<compile_context>
chip_gen: v7x
topology: tpu7x:2x2x1
jax: 0.10.0
libtpu: 0.0.40
codegen_flags: <defaults>
</compile_context>

<pallas_src>
import functools

import jax
import jax.numpy as jnp
from jax import lax
from jax.experimental import pallas as pl
from jax.experimental.pallas import tpu as pltpu

_MIB = 1024 * 1024


@functools.lru_cache(maxsize=None)
def _vmem_limit_bytes():
    """Generation-aware scoped-VMEM limit (v7x only has 64 MiB per TensorCore)."""
    try:
        cap = int(pltpu.get_tpu_info().vmem_capacity_bytes)
    except Exception:
        return 48 * _MIB
    return max(48 * _MIB, min(96 * _MIB, cap - 16 * _MIB))


# ---------------------------------------------------------------------------
# Kernels
# ---------------------------------------------------------------------------
def _resblock_kernel(xf_ref, scale_ref, shift_ref, w3_ref, b3_ref, w1_ref, b1_ref,
                     out_ref, *rest, H, W, apply_affine, compute_stats):
    """Fused ResBlock (+ optionally folded input BatchNorm affine) on one image.

    Layout: padded-flat NHWC, ((H+2)*(W+2), C) row-major, channels on the lane axis.
    y = x' + conv1x1(relu(conv3x3(relu(x'))))  with  x' = scale*x + shift.
    The 3x3 conv is one long-K im2col matmul: (L, 9C) x (9C, C).
    """
    if compute_stats:
        stats_ref, a_ref, patch_ref = rest
    else:
        (a_ref, patch_ref), stats_ref = rest, None

    Hp, Wp = H + 2, W + 2
    C = a_ref.shape[-1]
    L = (H - 1) * Wp + W                       # flat span covering all H output rows

    # ---- input transform: (folded BN affine) -> ReLU -> zero halo -> bf16 once
    x = xf_ref[...].astype(jnp.float32)
    if apply_affine:
        x = x * scale_ref[...] + shift_ref[...]
    a = jnp.maximum(x, 0.0)
    flat = lax.broadcasted_iota(jnp.int32, (Hp * Wp, 1), 0)
    col = flat % Wp
    border = (col == 0) | (col == Wp - 1) | (flat < Wp) | (flat >= (Hp - 1) * Wp)
    a_ref[...] = jnp.where(border, 0.0, a).astype(jnp.bfloat16)

    # ---- 3x3 conv: im2col (tap-major K) + ONE (L, 9C) x (9C, C) bf16 MXU matmul
    for t in range(9):                         # static unroll
        dy, dx = divmod(t, 3)
        patch_ref[:, t * C:(t + 1) * C] = a_ref[pl.ds(dy * Wp + dx, L), :]
    h = jnp.dot(patch_ref[...], w3_ref[...], preferred_element_type=jnp.float32)
    h = jnp.maximum(h + b3_ref[...], 0.0)      # bias once, then ReLU

    # ---- 1x1 conv
    y = jnp.dot(h.astype(jnp.bfloat16), w1_ref[...],
                preferred_element_type=jnp.float32) + b1_ref[...]

    # ---- residual: (affine'd) input at interior positions (flat offset Wp+1)
    res = xf_ref[pl.ds(Wp + 1, L), :].astype(jnp.float32)
    if apply_affine:
        res = res * scale_ref[...] + shift_ref[...]
    y = y + res

    # ---- per-image BatchNorm partial statistics (only when consumed downstream)
    if compute_stats:
        colv = lax.broadcasted_iota(jnp.int32, (L, 1), 0) % Wp
        yv = jnp.where(colv < W, y, 0.0)
        stats_ref[0:1, :] = jnp.sum(yv, axis=0, keepdims=True)
        stats_ref[1:2, :] = jnp.sum(yv * yv, axis=0, keepdims=True)

    # ---- write interior span; zero top/bottom halo strips so HBM is never stale
    out_ref[pl.ds(Wp + 1, L), :] = y.astype(out_ref.dtype)
    out_ref[pl.ds(0, Wp + 1), :] = jnp.zeros((Wp + 1, C), out_ref.dtype)
    out_ref[pl.ds(Wp + 1 + L, W + 3), :] = jnp.zeros((W + 3, C), out_ref.dtype)


def _convt_dd_kernel(xf_ref, w_ref, b_ref, out_ref, stats_ref, a_ref, patch_ref,
                     *, Hi, Wi):
    """ConvTranspose2d(d->d, k=4, s=2, p=1), 4-phase decomposed, on one image.

    Per output phase (py,px):  out[2m+py, 2n+px] = sum_{a,b} xpad[m+py+a, n+px+b]
    * w[py+2a, px+2b].  Each phase is ONE (L, 4C) x (4C, C) im2col matmul.  The
    four phase slabs stay phase-major in HBM (consumed directly by the next layer).
    Per-image BN partial statistics of the output are emitted.
    """
    Hip, Wip = Hi + 2, Wi + 2
    C = a_ref.shape[-1]
    cout = stats_ref.shape[-1]
    L = (Hi - 1) * Wip + Wi

    # ---- zero the halo border, cast to bf16 once
    x = xf_ref[...]
    flat = lax.broadcasted_iota(jnp.int32, (Hip * Wip, 1), 0)
    col = flat % Wip
    border = (col == 0) | (col == Wip - 1) | (flat < Wip) | (flat >= (Hip - 1) * Wip)
    a_ref[...] = jnp.where(border, 0.0, x).astype(jnp.bfloat16)

    colv = lax.broadcasted_iota(jnp.int32, (L, 1), 0) % Wip
    valid = colv < Wi

    s = jnp.zeros((1, cout), jnp.float32)
    s2 = jnp.zeros((1, cout), jnp.float32)

    for py in range(2):                        # static unroll over the 4 phases
        for px in range(2):
            p = 2 * py + px
            for ta in range(2):
                for tb in range(2):
                    k = 2 * ta + tb
                    off = (py + ta) * Wip + (px + tb)
                    patch_ref[:, k * C:(k + 1) * C] = a_ref[pl.ds(off, L), :]
            y = jnp.dot(patch_ref[...], w_ref[p],
                        preferred_element_type=jnp.float32) + b_ref[...]
            out_ref[p, pl.ds(0, L), :] = y.astype(out_ref.dtype)
            out_ref[p, pl.ds(L, Wip - Wi), :] = jnp.zeros((Wip - Wi, cout),
                                                          out_ref.dtype)
            yv = jnp.where(valid, y, 0.0)
            s = s + jnp.sum(yv, axis=0, keepdims=True)
            s2 = s2 + jnp.sum(yv * yv, axis=0, keepdims=True)

    stats_ref[0:1, :] = s
    stats_ref[1:2, :] = s2


def _convt_out_kernel(x_ref, scale_ref, shift_ref, w_ref, out_ref, *, Hi, Wi):
    """Final ConvTranspose2d(d -> nc): folded BN affine + ReLU, then a single
    per-pixel (L, d) x (d, 16*nc) matmul producing every input pixel's 4x4 output
    patch.  Consumes one phase-major slab of the previous ConvT directly; the
    stride-2 overlap-add of the tiny nc-channel patches is done in the wrapper."""
    Wip = Wi + 2
    L = (Hi - 1) * Wip + Wi
    K = w_ref.shape[-1]
    x = x_ref[pl.ds(0, L), :].astype(jnp.float32)
    a = jnp.maximum(x * scale_ref[...] + shift_ref[...], 0.0).astype(jnp.bfloat16)
    patches = jnp.dot(a, w_ref[...], preferred_element_type=jnp.float32)
    out_ref[pl.ds(0, L), :] = patches
    out_ref[pl.ds(L, Wip - Wi), :] = jnp.zeros((Wip - Wi, K), jnp.float32)


# ---------------------------------------------------------------------------
# pallas_call wrappers
# ---------------------------------------------------------------------------
def _resblock_call(xf, scale, shift, w3s, b3, w1, b1, *, H, W, apply_affine,
                   compute_stats):
    B, hwp, C = xf.shape
    Hp, Wp = H + 2, W + 2
    assert hwp == Hp * Wp
    L = (H - 1) * Wp + W
    kern = functools.partial(_resblock_kernel, H=H, W=W,
                             apply_affine=apply_affine, compute_stats=compute_stats)
    y_shape = jax.ShapeDtypeStruct((B, Hp * Wp, C), jnp.bfloat16)
    y_spec = pl.BlockSpec((None, Hp * Wp, C), lambda b: (b, 0, 0))
    if compute_stats:
        out_shape = (y_shape, jax.ShapeDtypeStruct((B, 2, C), jnp.float32))
        out_specs = (y_spec, pl.BlockSpec((None, 2, C), lambda b: (b, 0, 0)))
    else:
        out_shape, out_specs = y_shape, y_spec
    return pl.pallas_call(
        kern,
        out_shape=out_shape,
        grid=(B,),
        in_specs=[
            pl.BlockSpec((None, Hp * Wp, C), lambda b: (b, 0, 0)),
            pl.BlockSpec((1, C), lambda b: (0, 0)),
            pl.BlockSpec((1, C), lambda b: (0, 0)),
            pl.BlockSpec((9 * C, C), lambda b: (0, 0)),
            pl.BlockSpec((1, C), lambda b: (0, 0)),
            pl.BlockSpec((C, C), lambda b: (0, 0)),
            pl.BlockSpec((1, C), lambda b: (0, 0)),
        ],
        out_specs=out_specs,
        scratch_shapes=[pltpu.VMEM((Hp * Wp, C), jnp.bfloat16),
                        pltpu.VMEM((L, 9 * C), jnp.bfloat16)],
        compiler_params=pltpu.CompilerParams(
            dimension_semantics=("parallel",),
            vmem_limit_bytes=_vmem_limit_bytes()),
    )(xf, scale, shift, w3s, b3, w1, b1)


def _convt_dd_call(xf, wstk, b, *, Hi, Wi):
    B, hwp, C = xf.shape
    Hip, Wip = Hi + 2, Wi + 2
    assert hwp == Hip * Wip
    Cout = wstk.shape[-1]
    L = (Hi - 1) * Wip + Wi
    kern = functools.partial(_convt_dd_kernel, Hi=Hi, Wi=Wi)
    return pl.pallas_call(
        kern,
        out_shape=(jax.ShapeDtypeStruct((B, 4, Hi * Wip, Cout), jnp.bfloat16),
                   jax.ShapeDtypeStruct((B, 2, Cout), jnp.float32)),
        grid=(B,),
        in_specs=[
            pl.BlockSpec((None, Hip * Wip, C), lambda b: (b, 0, 0)),
            pl.BlockSpec((4, 4 * C, Cout), lambda b: (0, 0, 0)),
            pl.BlockSpec((1, Cout), lambda b: (0, 0)),
        ],
        out_specs=(pl.BlockSpec((None, 4, Hi * Wip, Cout), lambda b: (b, 0, 0, 0)),
                   pl.BlockSpec((None, 2, Cout), lambda b: (b, 0, 0))),
        scratch_shapes=[pltpu.VMEM((Hip * Wip, C), jnp.bfloat16),
                        pltpu.VMEM((L, 4 * C), jnp.bfloat16)],
        compiler_params=pltpu.CompilerParams(
            dimension_semantics=("parallel",),
            vmem_limit_bytes=_vmem_limit_bytes()),
    )(xf, wstk, b)


def _convt_out_call(ph, scale, shift, wflat, *, Hi, Wi):
    B, nph, hw, C = ph.shape
    Wip = Wi + 2
    assert nph == 4 and hw == Hi * Wip
    K = wflat.shape[-1]
    kern = functools.partial(_convt_out_kernel, Hi=Hi, Wi=Wi)
    return pl.pallas_call(
        kern,
        out_shape=jax.ShapeDtypeStruct((B, 4, Hi * Wip, K), jnp.float32),
        grid=(B, 4),
        in_specs=[
            pl.BlockSpec((None, None, Hi * Wip, C), lambda b, p: (b, p, 0, 0)),
            pl.BlockSpec((1, C), lambda b, p: (0, 0)),
            pl.BlockSpec((1, C), lambda b, p: (0, 0)),
            pl.BlockSpec((C, K), lambda b, p: (0, 0)),
        ],
        out_specs=pl.BlockSpec((None, None, Hi * Wip, K), lambda b, p: (b, p, 0, 0)),
        compiler_params=pltpu.CompilerParams(
            dimension_semantics=("parallel", "parallel"),
            vmem_limit_bytes=_vmem_limit_bytes()),
    )(ph, scale, shift, wflat)


# ---------------------------------------------------------------------------
# JAX-side glue (cheap data movement on small tensors only)
# ---------------------------------------------------------------------------
def _pad_flatten(x, dtype):
    """(B, H, W, C) -> padded-flat (B, (H+2)*(W+2), C), zero halo of 1 pixel."""
    B, H, W, C = x.shape
    return jnp.pad(x, ((0, 0), (1, 1), (1, 1), (0, 0))).reshape(
        B, (H + 2) * (W + 2), C).astype(dtype)


def _bn_fold(stats, count, gamma, beta, eps=1e-5):
    """Per-image [sum; sumsq] stats -> folded BatchNorm (scale, shift), shape (1,C)."""
    s = jnp.sum(stats[:, 0, :], axis=0)
    s2 = jnp.sum(stats[:, 1, :], axis=0)
    mean = s / count
    var = s2 / count - mean * mean              # biased variance (BN training mode)
    scale = gamma * lax.rsqrt(var + eps)
    shift = beta - mean * scale
    return (scale.reshape(1, -1).astype(jnp.float32),
            shift.reshape(1, -1).astype(jnp.float32))


def _stack_convt_weight(w):
    """(4,4,Cin,Cout) direct-conv layout -> (4 phases, 4*Cin, Cout) stacked-K."""
    blocks = []
    for py in range(2):
        for px in range(2):
            taps = [w[py + 2 * ta, px + 2 * tb] for ta in range(2) for tb in range(2)]
            blocks.append(jnp.concatenate(taps, axis=0))
    return jnp.stack(blocks, axis=0)


def _overlap_add(ph2, bias, H, W, nc):
    """Phase-major per-pixel 4x4 patches -> stride-2 overlap-add -> (B, nc, 4H, 4W)."""
    B = ph2.shape[0]
    Wip = W + 2
    H2, W2 = 2 * H, 2 * W
    Ho, Wo = 4 * H, 4 * W
    # de-interleave ConvT1 phases (cheap: only 16*nc channels)
    t = ph2.reshape(B, 2, 2, H, Wip, 16 * nc)[:, :, :, :, :W, :]
    P = t.transpose(0, 3, 1, 4, 2, 5).reshape(B, H2, W2, 4, 4, nc)
    # patch (kr,kc) of input pixel (r,c) lands on output (2r+2-kr, 2c+2-kc)
    acc = jnp.zeros((B, Ho + 2, Wo + 2, nc), jnp.float32)
    for kr in range(4):
        for kc in range(4):
            acc = acc.at[:, 3 - kr:3 - kr + 2 * H2:2,
                         3 - kc:3 - kc + 2 * W2:2, :].add(P[:, :, :, kr, kc, :])
    out = acc[:, 1:Ho + 1, 1:Wo + 1, :] + bias.reshape(1, 1, 1, -1)
    return jnp.transpose(out, (0, 3, 1, 2))


# ---------------------------------------------------------------------------
# Full decoder forward
# ---------------------------------------------------------------------------
def vqvae_decoder(x_nchw, params, *, eps=1e-5):
    B, d, H, W = x_nchw.shape
    assert d % 128 == 0, "kernels assume d is a multiple of the 128-lane width"
    nc = params["ct2"][0].shape[-1]

    w3a, b3a, w1a, b1a = params["rb1"]
    w3b, b3b, w1b, b1b = params["rb2"]
    g1, be1 = params["bn1"]
    g2, be2 = params["bn2"]
    wt1, bt1 = params["ct1"]
    wt2, bt2 = params["ct2"]

    bf = jnp.bfloat16                                     # cast weights once for the MXU
    w3a_k = w3a.reshape(9 * d, d).astype(bf)              # im2col-stacked 3x3 weights
    w3b_k = w3b.reshape(9 * d, d).astype(bf)
    w1a_k, w1b_k = w1a.astype(bf), w1b.astype(bf)
    wt1_k = _stack_convt_weight(wt1).astype(bf)           # (4, 4*d, d)
    wt2_k = wt2.transpose(2, 0, 1, 3).reshape(d, 16 * nc).astype(bf)  # (d, 16*nc)

    x = jnp.transpose(x_nchw, (0, 2, 3, 1))               # NCHW -> NHWC
    xf = _pad_flatten(x, bf)                              # one-time halo pad (bf16)

    ones = jnp.ones((1, d), jnp.float32)
    zeros = jnp.zeros((1, d), jnp.float32)

    # ResBlock 1 (+ fused per-image BN1 partial stats)
    y1, st1 = _resblock_call(xf, ones, zeros, w3a_k, b3a, w1a_k, b1a,
                             H=H, W=W, apply_affine=False, compute_stats=True)
    sc1, sh1 = _bn_fold(st1, B * H * W, g1, be1, eps)

    # ResBlock 2 with the BN1 affine folded into its input path (no stats needed)
    y2 = _resblock_call(y1, sc1, sh1, w3b_k, b3b, w1b_k, b1b,
                        H=H, W=W, apply_affine=True, compute_stats=False)

    # ConvTranspose 1 (d->d, phase-decomposed) + fused BN2 partial stats.
    # Output stays phase-major in HBM; no de-interleave / re-pad round trip.
    ph1, st2 = _convt_dd_call(y2, wt1_k, bt1, Hi=H, Wi=W)
    sc2, sh2 = _bn_fold(st2, B * 4 * H * W, g2, be2, eps)

    # Final ConvTranspose (d -> nc): BN2 affine + ReLU folded in, one per-pixel
    # (L, d) x (d, 16*nc) matmul per phase slab, consumed straight from ph1.
    ph2 = _convt_out_call(ph1, sc2, sh2, wt2_k, Hi=H, Wi=W)

    # Stride-2 overlap-add of the tiny nc-channel patches + bias, to NCHW.
    return _overlap_add(ph2, bt2, H, W, nc)


# ---------------------------------------------------------------------------
# Parameter init (synthetic, canonical f32 layouts)
# ---------------------------------------------------------------------------
def init_params(key, d, num_channels):
    ks = jax.random.split(key, 16)

    def wn(k, shape, fan_in):
        return jax.random.normal(k, shape, jnp.float32) / jnp.sqrt(float(fan_in))

    p = {}
    p["rb1"] = (wn(ks[0], (3, 3, d, d), 9 * d), 0.1 * wn(ks[1], (1, d), 1),
                wn(ks[2], (d, d), d), 0.1 * wn(ks[3], (1, d), 1))
    p["bn1"] = (1.0 + 0.1 * jax.random.normal(ks[4], (d,), jnp.float32),
                0.1 * jax.random.normal(ks[5], (d,), jnp.float32))
    p["rb2"] = (wn(ks[6], (3, 3, d, d), 9 * d), 0.1 * wn(ks[7], (1, d), 1),
                wn(ks[8], (d, d), d), 0.1 * wn(ks[9], (1, d), 1))
    p["ct1"] = (wn(ks[10], (4, 4, d, d), 16 * d), 0.1 * wn(ks[11], (1, d), 1))
    p["bn2"] = (1.0 + 0.1 * jax.random.normal(ks[12], (d,), jnp.float32),
                0.1 * jax.random.normal(ks[13], (d,), jnp.float32))
    p["ct2"] = (wn(ks[14], (4, 4, d, num_channels), 16 * d),
                0.1 * wn(ks[15], (1, num_channels), 1))
    return p


# ---------------------------------------------------------------------------
# Pure-JAX f32 reference (same math via lax.conv_general_dilated) for validation
# ---------------------------------------------------------------------------
def _ref_conv(x, w, b, padding):
    y = lax.conv_general_dilated(x, w, window_strides=(1, 1), padding=padding,
                                 dimension_numbers=("NHWC", "HWIO", "NHWC"))
    return y + b.reshape(1, 1, 1, -1)


def _ref_resblock(x, w3, b3, w1, b1):
    h = jax.nn.relu(x)
    h = _ref_conv(h, w3, b3, ((1, 1), (1, 1)))
    h = jax.nn.relu(h)
    h = _ref_conv(h, w1.reshape(1, 1, *w1.shape), b1, ((0, 0), (0, 0)))
    return x + h


def _ref_bn(x, gamma, beta, relu, eps=1e-5):
    mean = jnp.mean(x, axis=(0, 1, 2))
    var = jnp.var(x, axis=(0, 1, 2))
    y = (x - mean) / jnp.sqrt(var + eps) * gamma + beta
    return jax.nn.relu(y) if relu else y


def _ref_convT(x, w, b, K=4, stride=2, pad=1):
    p = K - 1 - pad
    y = lax.conv_general_dilated(x, w, window_strides=(1, 1),
                                 padding=((p, p), (p, p)),
                                 lhs_dilation=(stride, stride),
                                 dimension_numbers=("NHWC", "HWIO", "NHWC"))
    return y + b.reshape(1, 1, 1, -1)


def ref_decoder(x_nchw, params):
    x = jnp.transpose(x_nchw, (0, 2, 3, 1))
    h = _ref_resblock(x, *params["rb1"])
    h = _ref_bn(h, *params["bn1"], relu=False)
    h = _ref_resblock(h, *params["rb2"])
    h = _ref_convT(h, *params["ct1"])
    h = _ref_bn(h, *params["bn2"], relu=True)
    h = _ref_convT(h, *params["ct2"])
    return jnp.transpose(h, (0, 3, 1, 2))


if __name__ == "__main__":
    d, num_channels = 128, 3        # small lane-aligned d for the test (default 256)
    B, H, W = 2, 8, 8

    key = jax.random.PRNGKey(0)
    kx, kp = jax.random.split(key)
    x = jax.random.normal(kx, (B, d, H, W), jnp.float32)    # NCHW, like PyTorch
    params = init_params(kp, d, num_channels)

    out = jax.block_until_ready(jax.jit(vqvae_decoder)(x, params))
    assert out.shape == (B, num_channels, 4 * H, 4 * W), out.shape

    ref = jax.block_until_ready(jax.jit(ref_decoder)(x, params))
    max_err = float(jnp.max(jnp.abs(out - ref)))
    # bf16 MXU operands AND bf16 inter-kernel activations (perf feedback) vs the
    # pure-f32 reference; tolerance covers the accumulated bf16 rounding.
    assert jnp.allclose(out, ref, rtol=1e-1, atol=1e-1), max_err

    print("KERNEL_OK")
</pallas_src>

<mosaic_0001>
module attributes {stable_mosaic.version = 11 : i64} {
  func.func @_resblock_kernel(%arg0: i32, %arg1: memref<1x100x128xbf16, #tpu.memory_space<vmem>>, %arg2: memref<1x128xf32, #tpu.memory_space<vmem>>, %arg3: memref<1x128xf32, #tpu.memory_space<vmem>>, %arg4: memref<1152x128xbf16, #tpu.memory_space<vmem>>, %arg5: memref<1x128xf32, #tpu.memory_space<vmem>>, %arg6: memref<128x128xbf16, #tpu.memory_space<vmem>>, %arg7: memref<1x128xf32, #tpu.memory_space<vmem>>, %arg8: memref<1x100x128xbf16, #tpu.memory_space<vmem>>, %arg9: memref<1x2x128xf32, #tpu.memory_space<vmem>>, %arg10: memref<100x128xbf16, #tpu.memory_space<vmem>>, %arg11: memref<78x1152xbf16, #tpu.memory_space<vmem>>) attributes {dimension_semantics = [#tpu.dimension_semantics<parallel>], iteration_bounds = array<i64: 2>, scalar_prefetch = 0 : i64, scratch_operands = 2 : i64, tpu.core_type = #tpu.core_type<tc>, window_params = [{transform_indices = @transform_0, window_bounds = array<i64: 1, 100, 128>}, {pipeline_mode = #tpu.pipeline_mode<synchronous>, transform_indices = @transform_1, window_bounds = array<i64: 1, 128>}, {pipeline_mode = #tpu.pipeline_mode<synchronous>, transform_indices = @transform_2, window_bounds = array<i64: 1, 128>}, {pipeline_mode = #tpu.pipeline_mode<synchronous>, transform_indices = @transform_3, window_bounds = array<i64: 1152, 128>}, {pipeline_mode = #tpu.pipeline_mode<synchronous>, transform_indices = @transform_4, window_bounds = array<i64: 1, 128>}, {pipeline_mode = #tpu.pipeline_mode<synchronous>, transform_indices = @transform_5, window_bounds = array<i64: 128, 128>}, {pipeline_mode = #tpu.pipeline_mode<synchronous>, transform_indices = @transform_6, window_bounds = array<i64: 1, 128>}, {transform_indices = @transform_7, window_bounds = array<i64: 1, 100, 128>}, {transform_indices = @transform_8, window_bounds = array<i64: 1, 2, 128>}]} {
    %c0 = arith.constant 0 : index
    %c0_0 = arith.constant 0 : index
    %c0_1 = arith.constant 0 : index
    %0 = vector.load %arg1[%c0, %c0_0, %c0_1] : memref<1x100x128xbf16, #tpu.memory_space<vmem>>, vector<1x100x128xbf16>
    %1 = vector.shape_cast %0 : vector<1x100x128xbf16> to vector<100x128xbf16>
    %2 = arith.extf %1 : vector<100x128xbf16> to vector<100x128xf32>
    %cst = arith.constant 0.000000e+00 : f32
    %3 = vector.broadcast %cst : f32 to vector<100x128xf32>
    %4 = arith.maximumf %2, %3 : vector<100x128xf32>
    %5 = tpu.iota {dimensions = array<i32: 0>} : vector<100x1xi32>
    %c10_i32 = arith.constant 10 : i32
    %c0_i32 = arith.constant 0 : i32
    %6 = arith.cmpi eq, %c10_i32, %c0_i32 : i32
    %c1_i32 = arith.constant 1 : i32
    %7 = arith.select %6, %c1_i32, %c10_i32 : i32
    %8 = vector.broadcast %7 : i32 to vector<100x1xi32>
    %9 = arith.remsi %5, %8 : vector<100x1xi32>
    %c0_i32_2 = arith.constant 0 : i32
    %10 = vector.broadcast %c0_i32_2 : i32 to vector<100x1xi32>
    %11 = arith.cmpi ne, %9, %10 : vector<100x1xi32>
    %c0_i32_3 = arith.constant 0 : i32
    %12 = vector.broadcast %c0_i32_3 : i32 to vector<100x1xi32>
    %13 = arith.cmpi slt, %9, %12 : vector<100x1xi32>
    %c0_i32_4 = arith.constant 0 : i32
    %14 = arith.cmpi slt, %7, %c0_i32_4 : i32
    %15 = vector.broadcast %14 : i1 to vector<100x1xi1>
    %16 = vector.broadcast %15 : vector<100x1xi1> to vector<100x1xi1>
    %17 = arith.xori %13, %16 : vector<100x1xi1>
    %18 = arith.andi %17, %11 : vector<100x1xi1>
    %19 = vector.broadcast %7 : i32 to vector<100x1xi32>
    %20 = arith.addi %9, %19 : vector<100x1xi32>
    %21 = arith.select %18, %20, %9 : vector<100x1xi1>, vector<100x1xi32>
    %c0_i32_5 = arith.constant 0 : i32
    %22 = vector.broadcast %c0_i32_5 : i32 to vector<100x1xi32>
    %23 = arith.cmpi eq, %21, %22 : vector<100x1xi32>
    %c9_i32 = arith.constant 9 : i32
    %24 = vector.broadcast %c9_i32 : i32 to vector<100x1xi32>
    %25 = arith.cmpi eq, %21, %24 : vector<100x1xi32>
    %26 = arith.ori %23, %25 : vector<100x1xi1>
    %c10_i32_6 = arith.constant 10 : i32
    %27 = vector.broadcast %c10_i32_6 : i32 to vector<100x1xi32>
    %28 = arith.cmpi slt, %5, %27 : vector<100x1xi32>
    %29 = arith.ori %26, %28 : vector<100x1xi1>
    %c90_i32 = arith.constant 90 : i32
    %30 = vector.broadcast %c90_i32 : i32 to vector<100x1xi32>
    %31 = arith.cmpi sge, %5, %30 : vector<100x1xi32>
    %32 = arith.ori %29, %31 : vector<100x1xi1>
    %cst_7 = arith.constant 0.000000e+00 : f32
    %33 = vector.shape_cast %32 : vector<100x1xi1> to vector<100x1xi1>
    %34 = vector.broadcast %33 : vector<100x1xi1> to vector<100x128xi1>
    %35 = vector.broadcast %cst_7 : f32 to vector<100x128xf32>
    %36 = arith.select %34, %35, %4 : vector<100x128xi1>, vector<100x128xf32>
    %37 = arith.truncf %36 : vector<100x128xf32> to vector<100x128xbf16>
    %c0_8 = arith.constant 0 : index
    %c0_9 = arith.constant 0 : index
    %38 = vector.load %arg10[%c0_8, %c0_9] : memref<100x128xbf16, #tpu.memory_space<vmem>>, vector<100x128xbf16>
    tpu.vector_store %arg10[%c0_8, %c0_9], %37 {strides = array<i32>} : memref<100x128xbf16, #tpu.memory_space<vmem>>, vector<100x128xbf16>,
    %c0_10 = arith.constant 0 : index
    %c0_11 = arith.constant 0 : index
    %39 = vector.load %arg10[%c0_10, %c0_11] : memref<100x128xbf16, #tpu.memory_space<vmem>>, vector<78x128xbf16>
    %c0_12 = arith.constant 0 : index
    %c0_13 = arith.constant 0 : index
    %40 = vector.load %arg11[%c0_12, %c0_13] : memref<78x1152xbf16, #tpu.memory_space<vmem>>, vector<78x128xbf16>
    tpu.vector_store %arg11[%c0_12, %c0_13], %39 {strides = array<i32>} : memref<78x1152xbf16, #tpu.memory_space<vmem>>, vector<78x128xbf16>,
    %c1 = arith.constant 1 : index
    %c0_14 = arith.constant 0 : index
    %41 = vector.load %arg10[%c1, %c0_14] : memref<100x128xbf16, #tpu.memory_space<vmem>>, vector<78x128xbf16>
    %c0_15 = arith.constant 0 : index
    %c128 = arith.constant 128 : index
    %42 = vector.load %arg11[%c0_15, %c128] : memref<78x1152xbf16, #tpu.memory_space<vmem>>, vector<78x128xbf16>
    tpu.vector_store %arg11[%c0_15, %c128], %41 {strides = array<i32>} : memref<78x1152xbf16, #tpu.memory_space<vmem>>, vector<78x128xbf16>,
    %c2 = arith.constant 2 : index
    %c0_16 = arith.constant 0 : index
    %43 = vector.load %arg10[%c2, %c0_16] : memref<100x128xbf16, #tpu.memory_space<vmem>>, vector<78x128xbf16>
    %c0_17 = arith.constant 0 : index
    %c256 = arith.constant 256 : index
    %44 = vector.load %arg11[%c0_17, %c256] : memref<78x1152xbf16, #tpu.memory_space<vmem>>, vector<78x128xbf16>
    tpu.vector_store %arg11[%c0_17, %c256], %43 {strides = array<i32>} : memref<78x1152xbf16, #tpu.memory_space<vmem>>, vector<78x128xbf16>,
    %c10 = arith.constant 10 : index
    %c0_18 = arith.constant 0 : index
    %45 = vector.load %arg10[%c10, %c0_18] : memref<100x128xbf16, #tpu.memory_space<vmem>>, vector<78x128xbf16>
    %c0_19 = arith.constant 0 : index
    %c384 = arith.constant 384 : index
    %46 = vector.load %arg11[%c0_19, %c384] : memref<78x1152xbf16, #tpu.memory_space<vmem>>, vector<78x128xbf16>
    tpu.vector_store %arg11[%c0_19, %c384], %45 {strides = array<i32>} : memref<78x1152xbf16, #tpu.memory_space<vmem>>, vector<78x128xbf16>,
    %c11 = arith.constant 11 : index
    %c0_20 = arith.constant 0 : index
    %47 = vector.load %arg10[%c11, %c0_20] : memref<100x128xbf16, #tpu.memory_space<vmem>>, vector<78x128xbf16>
    %c0_21 = arith.constant 0 : index
    %c512 = arith.constant 512 : index
    %48 = vector.load %arg11[%c0_21, %c512] : memref<78x1152xbf16, #tpu.memory_space<vmem>>, vector<78x128xbf16>
    tpu.vector_store %arg11[%c0_21, %c512], %47 {strides = array<i32>} : memref<78x1152xbf16, #tpu.memory_space<vmem>>, vector<78x128xbf16>,
    %c12 = arith.constant 12 : index
    %c0_22 = arith.constant 0 : index
    %49 = vector.load %arg10[%c12, %c0_22] : memref<100x128xbf16, #tpu.memory_space<vmem>>, vector<78x128xbf16>
    %c0_23 = arith.constant 0 : index
    %c640 = arith.constant 640 : index
    %50 = vector.load %arg11[%c0_23, %c640] : memref<78x1152xbf16, #tpu.memory_space<vmem>>, vector<78x128xbf16>
    tpu.vector_store %arg11[%c0_23, %c640], %49 {strides = array<i32>} : memref<78x1152xbf16, #tpu.memory_space<vmem>>, vector<78x128xbf16>,
    %c20 = arith.constant 20 : index
    %c0_24 = arith.constant 0 : index
    %51 = vector.load %arg10[%c20, %c0_24] : memref<100x128xbf16, #tpu.memory_space<vmem>>, vector<78x128xbf16>
    %c0_25 = arith.constant 0 : index
    %c768 = arith.constant 768 : index
    %52 = vector.load %arg11[%c0_25, %c768] : memref<78x1152xbf16, #tpu.memory_space<vmem>>, vector<78x128xbf16>
    tpu.vector_store %arg11[%c0_25, %c768], %51 {strides = array<i32>} : memref<78x1152xbf16, #tpu.memory_space<vmem>>, vector<78x128xbf16>,
    %c21 = arith.constant 21 : index
    %c0_26 = arith.constant 0 : index
    %53 = vector.load %arg10[%c21, %c0_26] : memref<100x128xbf16, #tpu.memory_space<vmem>>, vector<78x128xbf16>
    %c0_27 = arith.constant 0 : index
    %c896 = arith.constant 896 : index
    %54 = vector.load %arg11[%c0_27, %c896] : memref<78x1152xbf16, #tpu.memory_space<vmem>>, vector<78x128xbf16>
    tpu.vector_store %arg11[%c0_27, %c896], %53 {strides = array<i32>} : memref<78x1152xbf16, #tpu.memory_space<vmem>>, vector<78x128xbf16>,
    %c22 = arith.constant 22 : index
    %c0_28 = arith.constant 0 : index
    %55 = vector.load %arg10[%c22, %c0_28] : memref<100x128xbf16, #tpu.memory_space<vmem>>, vector<78x128xbf16>
    %c0_29 = arith.constant 0 : index
    %c1024 = arith.constant 1024 : index
    %56 = vector.load %arg11[%c0_29, %c1024] : memref<78x1152xbf16, #tpu.memory_space<vmem>>, vector<78x128xbf16>
    tpu.vector_store %arg11[%c0_29, %c1024], %55 {strides = array<i32>} : memref<78x1152xbf16, #tpu.memory_space<vmem>>, vector<78x128xbf16>,
    %c0_30 = arith.constant 0 : index
    %c0_31 = arith.constant 0 : index
    %57 = vector.load %arg11[%c0_30, %c0_31] : memref<78x1152xbf16, #tpu.memory_space<vmem>>, vector<78x1152xbf16>
    %c0_32 = arith.constant 0 : index
    %c0_33 = arith.constant 0 : index
    %58 = vector.load %arg4[%c0_32, %c0_33] : memref<1152x128xbf16, #tpu.memory_space<vmem>>, vector<1152x128xbf16>
    %cst_34 = arith.constant dense<0.000000e+00> : vector<78x128xf32>
    %59 = tpu.matmul %57, %58, %cst_34 {dimension_numbers = #tpu.dot_dimension_numbers<[1], [0], [0], [1], [0, 0, 1, 1], [], []>} : vector<78x1152xbf16>, vector<1152x128xbf16>, vector<78x128xf32> -> vector<78x128xf32>
    %c0_35 = arith.constant 0 : index
    %c0_36 = arith.constant 0 : index
    %60 = vector.load %arg5[%c0_35, %c0_36] : memref<1x128xf32, #tpu.memory_space<vmem>>, vector<1x128xf32>
    %61 = vector.broadcast %60 : vector<1x128xf32> to vector<78x128xf32>
    %62 = arith.addf %59, %61 : vector<78x128xf32>
    %cst_37 = arith.constant 0.000000e+00 : f32
    %63 = vector.broadcast %cst_37 : f32 to vector<78x128xf32>
    %64 = arith.maximumf %62, %63 : vector<78x128xf32>
    %65 = arith.truncf %64 : vector<78x128xf32> to vector<78x128xbf16>
    %c0_38 = arith.constant 0 : index
    %c0_39 = arith.constant 0 : index
    %66 = vector.load %arg6[%c0_38, %c0_39] : memref<128x128xbf16, #tpu.memory_space<vmem>>, vector<128x128xbf16>
    %cst_40 = arith.constant dense<0.000000e+00> : vector<78x128xf32>
    %67 = tpu.matmul %65, %66, %cst_40 {dimension_numbers = #tpu.dot_dimension_numbers<[1], [0], [0], [1], [0, 0, 1, 1], [], []>} : vector<78x128xbf16>, vector<128x128xbf16>, vector<78x128xf32> -> vector<78x128xf32>
    %c0_41 = arith.constant 0 : index
    %c0_42 = arith.constant 0 : index
    %68 = vector.load %arg7[%c0_41, %c0_42] : memref<1x128xf32, #tpu.memory_space<vmem>>, vector<1x128xf32>
    %69 = vector.broadcast %68 : vector<1x128xf32> to vector<78x128xf32>
    %70 = arith.addf %67, %69 : vector<78x128xf32>
    %c0_43 = arith.constant 0 : index
    %c11_44 = arith.constant 11 : index
    %c0_45 = arith.constant 0 : index
    %71 = vector.load %arg1[%c0_43, %c11_44, %c0_45] : memref<1x100x128xbf16, #tpu.memory_space<vmem>>, vector<1x78x128xbf16>
    %72 = vector.shape_cast %71 : vector<1x78x128xbf16> to vector<78x128xbf16>
    %73 = arith.extf %72 : vector<78x128xbf16> to vector<78x128xf32>
    %74 = arith.addf %70, %73 : vector<78x128xf32>
    %75 = tpu.iota {dimensions = array<i32: 0>} : vector<78x1xi32>
    %c10_i32_46 = arith.constant 10 : i32
    %c0_i32_47 = arith.constant 0 : i32
    %76 = arith.cmpi eq, %c10_i32_46, %c0_i32_47 : i32
    %c1_i32_48 = arith.constant 1 : i32
    %77 = arith.select %76, %c1_i32_48, %c10_i32_46 : i32
    %78 = vector.broadcast %77 : i32 to vector<78x1xi32>
    %79 = arith.remsi %75, %78 : vector<78x1xi32>
    %c0_i32_49 = arith.constant 0 : i32
    %80 = vector.broadcast %c0_i32_49 : i32 to vector<78x1xi32>
    %81 = arith.cmpi ne, %79, %80 : vector<78x1xi32>
    %c0_i32_50 = arith.constant 0 : i32
    %82 = vector.broadcast %c0_i32_50 : i32 to vector<78x1xi32>
    %83 = arith.cmpi slt, %79, %82 : vector<78x1xi32>
    %c0_i32_51 = arith.constant 0 : i32
    %84 = arith.cmpi slt, %77, %c0_i32_51 : i32
    %85 = vector.broadcast %84 : i1 to vector<78x1xi1>
    %86 = vector.broadcast %85 : vector<78x1xi1> to vector<78x1xi1>
    %87 = arith.xori %83, %86 : vector<78x1xi1>
    %88 = arith.andi %87, %81 : vector<78x1xi1>
    %89 = vector.broadcast %77 : i32 to vector<78x1xi32>
    %90 = arith.addi %79, %89 : vector<78x1xi32>
    %91 = arith.select %88, %90, %79 : vector<78x1xi1>, vector<78x1xi32>
    %c8_i32 = arith.constant 8 : i32
    %92 = vector.broadcast %c8_i32 : i32 to vector<78x1xi32>
    %93 = arith.cmpi slt, %91, %92 : vector<78x1xi32>
    %cst_52 = arith.constant 0.000000e+00 : f32
    %94 = vector.shape_cast %93 : vector<78x1xi1> to vector<78x1xi1>
    %95 = vector.broadcast %94 : vector<78x1xi1> to vector<78x128xi1>
    %96 = vector.broadcast %cst_52 : f32 to vector<78x128xf32>
    %97 = arith.select %95, %74, %96 : vector<78x128xi1>, vector<78x128xf32>
    %cst_53 = arith.constant dense<0.000000e+00> : vector<128xf32>
    %98 = vector.multi_reduction <add>, %97, %cst_53 [0] : vector<78x128xf32> to vector<128xf32>
    %99 = vector.shape_cast %98 : vector<128xf32> to vector<1x128xf32>
    %c0_54 = arith.constant 0 : index
    %c0_55 = arith.constant 0 : index
    %c0_56 = arith.constant 0 : index
    %100 = vector.load %arg9[%c0_54, %c0_55, %c0_56] : memref<1x2x128xf32, #tpu.memory_space<vmem>>, vector<1x1x128xf32>
    %101 = vector.shape_cast %100 : vector<1x1x128xf32> to vector<1x128xf32>
    %102 = vector.shape_cast %99 : vector<1x128xf32> to vector<1x1x128xf32>
    tpu.vector_store %arg9[%c0_54, %c0_55, %c0_56], %102 {strides = array<i32>} : memref<1x2x128xf32, #tpu.memory_space<vmem>>, vector<1x1x128xf32>,
    %103 = arith.mulf %97, %97 : vector<78x128xf32>
    %cst_57 = arith.constant dense<0.000000e+00> : vector<128xf32>
    %104 = vector.multi_reduction <add>, %103, %cst_57 [0] : vector<78x128xf32> to vector<128xf32>
    %105 = vector.shape_cast %104 : vector<128xf32> to vector<1x128xf32>
    %c0_58 = arith.constant 0 : index
    %c1_59 = arith.constant 1 : index
    %c0_60 = arith.constant 0 : index
    %106 = vector.load %arg9[%c0_58, %c1_59, %c0_60] : memref<1x2x128xf32, #tpu.memory_space<vmem>>, vector<1x1x128xf32>
    %107 = vector.shape_cast %106 : vector<1x1x128xf32> to vector<1x128xf32>
    %108 = vector.shape_cast %105 : vector<1x128xf32> to vector<1x1x128xf32>
    tpu.vector_store %arg9[%c0_58, %c1_59, %c0_60], %108 {strides = array<i32>} : memref<1x2x128xf32, #tpu.memory_space<vmem>>, vector<1x1x128xf32>,
    %109 = arith.truncf %74 : vector<78x128xf32> to vector<78x128xbf16>
    %c0_61 = arith.constant 0 : index
    %c11_62 = arith.constant 11 : index
    %c0_63 = arith.constant 0 : index
    %110 = vector.load %arg8[%c0_61, %c11_62, %c0_63] : memref<1x100x128xbf16, #tpu.memory_space<vmem>>, vector<1x78x128xbf16>
    %111 = vector.shape_cast %110 : vector<1x78x128xbf16> to vector<78x128xbf16>
    %112 = vector.shape_cast %109 : vector<78x128xbf16> to vector<1x78x128xbf16>
    tpu.vector_store %arg8[%c0_61, %c11_62, %c0_63], %112 {strides = array<i32>} : memref<1x100x128xbf16, #tpu.memory_space<vmem>>, vector<1x78x128xbf16>,
    %cst_64 = arith.constant 0.000000e+00 : bf16
    %113 = vector.broadcast %cst_64 : bf16 to vector<11x128xbf16>
    %c0_65 = arith.constant 0 : index
    %c0_66 = arith.constant 0 : index
    %c0_67 = arith.constant 0 : index
    %114 = vector.load %arg8[%c0_65, %c0_66, %c0_67] : memref<1x100x128xbf16, #tpu.memory_space<vmem>>, vector<1x11x128xbf16>
    %115 = vector.shape_cast %114 : vector<1x11x128xbf16> to vector<11x128xbf16>
    %116 = vector.shape_cast %113 : vector<11x128xbf16> to vector<1x11x128xbf16>
    tpu.vector_store %arg8[%c0_65, %c0_66, %c0_67], %116 {strides = array<i32>} : memref<1x100x128xbf16, #tpu.memory_space<vmem>>, vector<1x11x128xbf16>,
    %cst_68 = arith.constant 0.000000e+00 : bf16
    %117 = vector.broadcast %cst_68 : bf16 to vector<11x128xbf16>
    %c0_69 = arith.constant 0 : index
    %c89 = arith.constant 89 : index
    %c0_70 = arith.constant 0 : index
    %118 = vector.load %arg8[%c0_69, %c89, %c0_70] : memref<1x100x128xbf16, #tpu.memory_space<vmem>>, vector<1x11x128xbf16>
    %119 = vector.shape_cast %118 : vector<1x11x128xbf16> to vector<11x128xbf16>
    %120 = vector.shape_cast %117 : vector<11x128xbf16> to vector<1x11x128xbf16>
    tpu.vector_store %arg8[%c0_69, %c89, %c0_70], %120 {strides = array<i32>} : memref<1x100x128xbf16, #tpu.memory_space<vmem>>, vector<1x11x128xbf16>,
    return
  }
  func.func @transform_0(%arg0: i32) -> (i32, i32, i32) {
    %c0_i32 = arith.constant 0 : i32
    %c0_i32_0 = arith.constant 0 : i32
    %c0_i32_1 = arith.constant 0 : i32
    return %arg0, %c0_i32, %c0_i32_0 : i32, i32, i32
  }
  func.func @transform_1(%arg0: i32) -> (i32, i32) {
    %c0_i32 = arith.constant 0 : i32
    %c0_i32_0 = arith.constant 0 : i32
    %c0_i32_1 = arith.constant 0 : i32
    return %c0_i32, %c0_i32_0 : i32, i32
  }
  func.func @transform_2(%arg0: i32) -> (i32, i32) {
    %c0_i32 = arith.constant 0 : i32
    %c0_i32_0 = arith.constant 0 : i32
    %c0_i32_1 = arith.constant 0 : i32
    return %c0_i32, %c0_i32_0 : i32, i32
  }
  func.func @transform_3(%arg0: i32) -> (i32, i32) {
    %c0_i32 = arith.constant 0 : i32
    %c0_i32_0 = arith.constant 0 : i32
    %c0_i32_1 = arith.constant 0 : i32
    return %c0_i32, %c0_i32_0 : i32, i32
  }
  func.func @transform_4(%arg0: i32) -> (i32, i32) {
    %c0_i32 = arith.constant 0 : i32
    %c0_i32_0 = arith.constant 0 : i32
    %c0_i32_1 = arith.constant 0 : i32
    return %c0_i32, %c0_i32_0 : i32, i32
  }
  func.func @transform_5(%arg0: i32) -> (i32, i32) {
    %c0_i32 = arith.constant 0 : i32
    %c0_i32_0 = arith.constant 0 : i32
    %c0_i32_1 = arith.constant 0 : i32
    return %c0_i32, %c0_i32_0 : i32, i32
  }
  func.func @transform_6(%arg0: i32) -> (i32, i32) {
    %c0_i32 = arith.constant 0 : i32
    %c0_i32_0 = arith.constant 0 : i32
    %c0_i32_1 = arith.constant 0 : i32
    return %c0_i32, %c0_i32_0 : i32, i32
  }
  func.func @transform_7(%arg0: i32) -> (i32, i32, i32) {
    %c0_i32 = arith.constant 0 : i32
    %c0_i32_0 = arith.constant 0 : i32
    %c0_i32_1 = arith.constant 0 : i32
    return %arg0, %c0_i32, %c0_i32_0 : i32, i32, i32
  }
  func.func @transform_8(%arg0: i32) -> (i32, i32, i32) {
    %c0_i32 = arith.constant 0 : i32
    %c0_i32_0 = arith.constant 0 : i32
    %c0_i32_1 = arith.constant 0 : i32
    return %arg0, %c0_i32, %c0_i32_0 : i32, i32, i32
  }
}

module attributes {stable_mosaic.version = 11 : i64} {
  func.func @_resblock_kernel(%arg0: i32, %arg1: memref<1x100x128xbf16, #tpu.memory_space<vmem>>, %arg2: memref<1x128xf32, #tpu.memory_space<vmem>>, %arg3: memref<1x128xf32, #tpu.memory_space<vmem>>, %arg4: memref<1152x128xbf16, #tpu.memory_space<vmem>>, %arg5: memref<1x128xf32, #tpu.memory_space<vmem>>, %arg6: memref<128x128xbf16, #tpu.memory_space<vmem>>, %arg7: memref<1x128xf32, #tpu.memory_space<vmem>>, %arg8: memref<1x100x128xbf16, #tpu.memory_space<vmem>>, %arg9: memref<100x128xbf16, #tpu.memory_space<vmem>>, %arg10: memref<78x1152xbf16, #tpu.memory_space<vmem>>) attributes {dimension_semantics = [#tpu.dimension_semantics<parallel>], iteration_bounds = array<i64: 2>, scalar_prefetch = 0 : i64, scratch_operands = 2 : i64, tpu.core_type = #tpu.core_type<tc>, window_params = [{transform_indices = @transform_0, window_bounds = array<i64: 1, 100, 128>}, {pipeline_mode = #tpu.pipeline_mode<synchronous>, transform_indices = @transform_1, window_bounds = array<i64: 1, 128>}, {pipeline_mode = #tpu.pipeline_mode<synchronous>, transform_indices = @transform_2, window_bounds = array<i64: 1, 128>}, {pipeline_mode = #tpu.pipeline_mode<synchronous>, transform_indices = @transform_3, window_bounds = array<i64: 1152, 128>}, {pipeline_mode = #tpu.pipeline_mode<synchronous>, transform_indices = @transform_4, window_bounds = array<i64: 1, 128>}, {pipeline_mode = #tpu.pipeline_mode<synchronous>, transform_indices = @transform_5, window_bounds = array<i64: 128, 128>}, {pipeline_mode = #tpu.pipeline_mode<synchronous>, transform_indices = @transform_6, window_bounds = array<i64: 1, 128>}, {transform_indices = @transform_7, window_bounds = array<i64: 1, 100, 128>}]} {
    %c0 = arith.constant 0 : index
    %c0_0 = arith.constant 0 : index
    %c0_1 = arith.constant 0 : index
    %0 = vector.load %arg1[%c0, %c0_0, %c0_1] : memref<1x100x128xbf16, #tpu.memory_space<vmem>>, vector<1x100x128xbf16>
    %1 = vector.shape_cast %0 : vector<1x100x128xbf16> to vector<100x128xbf16>
    %2 = arith.extf %1 : vector<100x128xbf16> to vector<100x128xf32>
    %c0_2 = arith.constant 0 : index
    %c0_3 = arith.constant 0 : index
    %3 = vector.load %arg2[%c0_2, %c0_3] : memref<1x128xf32, #tpu.memory_space<vmem>>, vector<1x128xf32>
    %4 = vector.broadcast %3 : vector<1x128xf32> to vector<100x128xf32>
    %5 = arith.mulf %2, %4 : vector<100x128xf32>
    %c0_4 = arith.constant 0 : index
    %c0_5 = arith.constant 0 : index
    %6 = vector.load %arg3[%c0_4, %c0_5] : memref<1x128xf32, #tpu.memory_space<vmem>>, vector<1x128xf32>
    %7 = vector.broadcast %6 : vector<1x128xf32> to vector<100x128xf32>
    %8 = arith.addf %5, %7 : vector<100x128xf32>
    %cst = arith.constant 0.000000e+00 : f32
    %9 = vector.broadcast %cst : f32 to vector<100x128xf32>
    %10 = arith.maximumf %8, %9 : vector<100x128xf32>
    %11 = tpu.iota {dimensions = array<i32: 0>} : vector<100x1xi32>
    %c10_i32 = arith.constant 10 : i32
    %c0_i32 = arith.constant 0 : i32
    %12 = arith.cmpi eq, %c10_i32, %c0_i32 : i32
    %c1_i32 = arith.constant 1 : i32
    %13 = arith.select %12, %c1_i32, %c10_i32 : i32
    %14 = vector.broadcast %13 : i32 to vector<100x1xi32>
    %15 = arith.remsi %11, %14 : vector<100x1xi32>
    %c0_i32_6 = arith.constant 0 : i32
    %16 = vector.broadcast %c0_i32_6 : i32 to vector<100x1xi32>
    %17 = arith.cmpi ne, %15, %16 : vector<100x1xi32>
    %c0_i32_7 = arith.constant 0 : i32
    %18 = vector.broadcast %c0_i32_7 : i32 to vector<100x1xi32>
    %19 = arith.cmpi slt, %15, %18 : vector<100x1xi32>
    %c0_i32_8 = arith.constant 0 : i32
    %20 = arith.cmpi slt, %13, %c0_i32_8 : i32
    %21 = vector.broadcast %20 : i1 to vector<100x1xi1>
    %22 = vector.broadcast %21 : vector<100x1xi1> to vector<100x1xi1>
    %23 = arith.xori %19, %22 : vector<100x1xi1>
    %24 = arith.andi %23, %17 : vector<100x1xi1>
    %25 = vector.broadcast %13 : i32 to vector<100x1xi32>
    %26 = arith.addi %15, %25 : vector<100x1xi32>
    %27 = arith.select %24, %26, %15 : vector<100x1xi1>, vector<100x1xi32>
    %c0_i32_9 = arith.constant 0 : i32
    %28 = vector.broadcast %c0_i32_9 : i32 to vector<100x1xi32>
    %29 = arith.cmpi eq, %27, %28 : vector<100x1xi32>
    %c9_i32 = arith.constant 9 : i32
    %30 = vector.broadcast %c9_i32 : i32 to vector<100x1xi32>
    %31 = arith.cmpi eq, %27, %30 : vector<100x1xi32>
    %32 = arith.ori %29, %31 : vector<100x1xi1>
    %c10_i32_10 = arith.constant 10 : i32
    %33 = vector.broadcast %c10_i32_10 : i32 to vector<100x1xi32>
    %34 = arith.cmpi slt, %11, %33 : vector<100x1xi32>
    %35 = arith.ori %32, %34 : vector<100x1xi1>
    %c90_i32 = arith.constant 90 : i32
    %36 = vector.broadcast %c90_i32 : i32 to vector<100x1xi32>
    %37 = arith.cmpi sge, %11, %36 : vector<100x1xi32>
    %38 = arith.ori %35, %37 : vector<100x1xi1>
    %cst_11 = arith.constant 0.000000e+00 : f32
    %39 = vector.shape_cast %38 : vector<100x1xi1> to vector<100x1xi1>
    %40 = vector.broadcast %39 : vector<100x1xi1> to vector<100x128xi1>
    %41 = vector.broadcast %cst_11 : f32 to vector<100x128xf32>
    %42 = arith.select %40, %41, %10 : vector<100x128xi1>, vector<100x128xf32>
    %43 = arith.truncf %42 : vector<100x128xf32> to vector<100x128xbf16>
    %c0_12 = arith.constant 0 : index
    %c0_13 = arith.constant 0 : index
    %44 = vector.load %arg9[%c0_12, %c0_13] : memref<100x128xbf16, #tpu.memory_space<vmem>>, vector<100x128xbf16>
    tpu.vector_store %arg9[%c0_12, %c0_13], %43 {strides = array<i32>} : memref<100x128xbf16, #tpu.memory_space<vmem>>, vector<100x128xbf16>,
    %c0_14 = arith.constant 0 : index
    %c0_15 = arith.constant 0 : index
    %45 = vector.load %arg9[%c0_14, %c0_15] : memref<100x128xbf16, #tpu.memory_space<vmem>>, vector<78x128xbf16>
    %c0_16 = arith.constant 0 : index
    %c0_17 = arith.constant 0 : index
    %46 = vector.load %arg10[%c0_16, %c0_17] : memref<78x1152xbf16, #tpu.memory_space<vmem>>, vector<78x128xbf16>
    tpu.vector_store %arg10[%c0_16, %c0_17], %45 {strides = array<i32>} : memref<78x1152xbf16, #tpu.memory_space<vmem>>, vector<78x128xbf16>,
    %c1 = arith.constant 1 : index
    %c0_18 = arith.constant 0 : index
    %47 = vector.load %arg9[%c1, %c0_18] : memref<100x128xbf16, #tpu.memory_space<vmem>>, vector<78x128xbf16>
    %c0_19 = arith.constant 0 : index
    %c128 = arith.constant 128 : index
    %48 = vector.load %arg10[%c0_19, %c128] : memref<78x1152xbf16, #tpu.memory_space<vmem>>, vector<78x128xbf16>
    tpu.vector_store %arg10[%c0_19, %c128], %47 {strides = array<i32>} : memref<78x1152xbf16, #tpu.memory_space<vmem>>, vector<78x128xbf16>,
    %c2 = arith.constant 2 : index
    %c0_20 = arith.constant 0 : index
    %49 = vector.load %arg9[%c2, %c0_20] : memref<100x128xbf16, #tpu.memory_space<vmem>>, vector<78x128xbf16>
    %c0_21 = arith.constant 0 : index
    %c256 = arith.constant 256 : index
    %50 = vector.load %arg10[%c0_21, %c256] : memref<78x1152xbf16, #tpu.memory_space<vmem>>, vector<78x128xbf16>
    tpu.vector_store %arg10[%c0_21, %c256], %49 {strides = array<i32>} : memref<78x1152xbf16, #tpu.memory_space<vmem>>, vector<78x128xbf16>,
    %c10 = arith.constant 10 : index
    %c0_22 = arith.constant 0 : index
    %51 = vector.load %arg9[%c10, %c0_22] : memref<100x128xbf16, #tpu.memory_space<vmem>>, vector<78x128xbf16>
    %c0_23 = arith.constant 0 : index
    %c384 = arith.constant 384 : index
    %52 = vector.load %arg10[%c0_23, %c384] : memref<78x1152xbf16, #tpu.memory_space<vmem>>, vector<78x128xbf16>
    tpu.vector_store %arg10[%c0_23, %c384], %51 {strides = array<i32>} : memref<78x1152xbf16, #tpu.memory_space<vmem>>, vector<78x128xbf16>,
    %c11 = arith.constant 11 : index
    %c0_24 = arith.constant 0 : index
    %53 = vector.load %arg9[%c11, %c0_24] : memref<100x128xbf16, #tpu.memory_space<vmem>>, vector<78x128xbf16>
    %c0_25 = arith.constant 0 : index
    %c512 = arith.constant 512 : index
    %54 = vector.load %arg10[%c0_25, %c512] : memref<78x1152xbf16, #tpu.memory_space<vmem>>, vector<78x128xbf16>
    tpu.vector_store %arg10[%c0_25, %c512], %53 {strides = array<i32>} : memref<78x1152xbf16, #tpu.memory_space<vmem>>, vector<78x128xbf16>,
    %c12 = arith.constant 12 : index
    %c0_26 = arith.constant 0 : index
    %55 = vector.load %arg9[%c12, %c0_26] : memref<100x128xbf16, #tpu.memory_space<vmem>>, vector<78x128xbf16>
    %c0_27 = arith.constant 0 : index
    %c640 = arith.constant 640 : index
    %56 = vector.load %arg10[%c0_27, %c640] : memref<78x1152xbf16, #tpu.memory_space<vmem>>, vector<78x128xbf16>
    tpu.vector_store %arg10[%c0_27, %c640], %55 {strides = array<i32>} : memref<78x1152xbf16, #tpu.memory_space<vmem>>, vector<78x128xbf16>,
    %c20 = arith.constant 20 : index
    %c0_28 = arith.constant 0 : index
    %57 = vector.load %arg9[%c20, %c0_28] : memref<100x128xbf16, #tpu.memory_space<vmem>>, vector<78x128xbf16>
    %c0_29 = arith.constant 0 : index
    %c768 = arith.constant 768 : index
    %58 = vector.load %arg10[%c0_29, %c768] : memref<78x1152xbf16, #tpu.memory_space<vmem>>, vector<78x128xbf16>
    tpu.vector_store %arg10[%c0_29, %c768], %57 {strides = array<i32>} : memref<78x1152xbf16, #tpu.memory_space<vmem>>, vector<78x128xbf16>,
    %c21 = arith.constant 21 : index
    %c0_30 = arith.constant 0 : index
    %59 = vector.load %arg9[%c21, %c0_30] : memref<100x128xbf16, #tpu.memory_space<vmem>>, vector<78x128xbf16>
    %c0_31 = arith.constant 0 : index
    %c896 = arith.constant 896 : index
    %60 = vector.load %arg10[%c0_31, %c896] : memref<78x1152xbf16, #tpu.memory_space<vmem>>, vector<78x128xbf16>
    tpu.vector_store %arg10[%c0_31, %c896], %59 {strides = array<i32>} : memref<78x1152xbf16, #tpu.memory_space<vmem>>, vector<78x128xbf16>,
    %c22 = arith.constant 22 : index
    %c0_32 = arith.constant 0 : index
    %61 = vector.load %arg9[%c22, %c0_32] : memref<100x128xbf16, #tpu.memory_space<vmem>>, vector<78x128xbf16>
    %c0_33 = arith.constant 0 : index
    %c1024 = arith.constant 1024 : index
    %62 = vector.load %arg10[%c0_33, %c1024] : memref<78x1152xbf16, #tpu.memory_space<vmem>>, vector<78x128xbf16>
    tpu.vector_store %arg10[%c0_33, %c1024], %61 {strides = array<i32>} : memref<78x1152xbf16, #tpu.memory_space<vmem>>, vector<78x128xbf16>,
    %c0_34 = arith.constant 0 : index
    %c0_35 = arith.constant 0 : index
    %63 = vector.load %arg10[%c0_34, %c0_35] : memref<78x1152xbf16, #tpu.memory_space<vmem>>, vector<78x1152xbf16>
    %c0_36 = arith.constant 0 : index
    %c0_37 = arith.constant 0 : index
    %64 = vector.load %arg4[%c0_36, %c0_37] : memref<1152x128xbf16, #tpu.memory_space<vmem>>, vector<1152x128xbf16>
    %cst_38 = arith.constant dense<0.000000e+00> : vector<78x128xf32>
    %65 = tpu.matmul %63, %64, %cst_38 {dimension_numbers = #tpu.dot_dimension_numbers<[1], [0], [0], [1], [0, 0, 1, 1], [], []>} : vector<78x1152xbf16>, vector<1152x128xbf16>, vector<78x128xf32> -> vector<78x128xf32>
    %c0_39 = arith.constant 0 : index
    %c0_40 = arith.constant 0 : index
    %66 = vector.load %arg5[%c0_39, %c0_40] : memref<1x128xf32, #tpu.memory_space<vmem>>, vector<1x128xf32>
    %67 = vector.broadcast %66 : vector<1x128xf32> to vector<78x128xf32>
    %68 = arith.addf %65, %67 : vector<78x128xf32>
    %cst_41 = arith.constant 0.000000e+00 : f32
    %69 = vector.broadcast %cst_41 : f32 to vector<78x128xf32>
    %70 = arith.maximumf %68, %69 : vector<78x128xf32>
    %71 = arith.truncf %70 : vector<78x128xf32> to vector<78x128xbf16>
    %c0_42 = arith.constant 0 : index
    %c0_43 = arith.constant 0 : index
    %72 = vector.load %arg6[%c0_42, %c0_43] : memref<128x128xbf16, #tpu.memory_space<vmem>>, vector<128x128xbf16>
    %cst_44 = arith.constant dense<0.000000e+00> : vector<78x128xf32>
    %73 = tpu.matmul %71, %72, %cst_44 {dimension_numbers = #tpu.dot_dimension_numbers<[1], [0], [0], [1], [0, 0, 1, 1], [], []>} : vector<78x128xbf16>, vector<128x128xbf16>, vector<78x128xf32> -> vector<78x128xf32>
    %c0_45 = arith.constant 0 : index
    %c0_46 = arith.constant 0 : index
    %74 = vector.load %arg7[%c0_45, %c0_46] : memref<1x128xf32, #tpu.memory_space<vmem>>, vector<1x128xf32>
    %75 = vector.broadcast %74 : vector<1x128xf32> to vector<78x128xf32>
    %76 = arith.addf %73, %75 : vector<78x128xf32>
    %c0_47 = arith.constant 0 : index
    %c11_48 = arith.constant 11 : index
    %c0_49 = arith.constant 0 : index
    %77 = vector.load %arg1[%c0_47, %c11_48, %c0_49] : memref<1x100x128xbf16, #tpu.memory_space<vmem>>, vector<1x78x128xbf16>
    %78 = vector.shape_cast %77 : vector<1x78x128xbf16> to vector<78x128xbf16>
    %79 = arith.extf %78 : vector<78x128xbf16> to vector<78x128xf32>
    %c0_50 = arith.constant 0 : index
    %c0_51 = arith.constant 0 : index
    %80 = vector.load %arg2[%c0_50, %c0_51] : memref<1x128xf32, #tpu.memory_space<vmem>>, vector<1x128xf32>
    %81 = vector.broadcast %80 : vector<1x128xf32> to vector<78x128xf32>
    %82 = arith.mulf %79, %81 : vector<78x128xf32>
    %c0_52 = arith.constant 0 : index
    %c0_53 = arith.constant 0 : index
    %83 = vector.load %arg3[%c0_52, %c0_53] : memref<1x128xf32, #tpu.memory_space<vmem>>, vector<1x128xf32>
    %84 = vector.broadcast %83 : vector<1x128xf32> to vector<78x128xf32>
    %85 = arith.addf %82, %84 : vector<78x128xf32>
    %86 = arith.addf %76, %85 : vector<78x128xf32>
    %87 = arith.truncf %86 : vector<78x128xf32> to vector<78x128xbf16>
    %c0_54 = arith.constant 0 : index
    %c11_55 = arith.constant 11 : index
    %c0_56 = arith.constant 0 : index
    %88 = vector.load %arg8[%c0_54, %c11_55, %c0_56] : memref<1x100x128xbf16, #tpu.memory_space<vmem>>, vector<1x78x128xbf16>
    %89 = vector.shape_cast %88 : vector<1x78x128xbf16> to vector<78x128xbf16>
    %90 = vector.shape_cast %87 : vector<78x128xbf16> to vector<1x78x128xbf16>
    tpu.vector_store %arg8[%c0_54, %c11_55, %c0_56], %90 {strides = array<i32>} : memref<1x100x128xbf16, #tpu.memory_space<vmem>>, vector<1x78x128xbf16>,
    %cst_57 = arith.constant 0.000000e+00 : bf16
    %91 = vector.broadcast %cst_57 : bf16 to vector<11x128xbf16>
    %c0_58 = arith.constant 0 : index
    %c0_59 = arith.constant 0 : index
    %c0_60 = arith.constant 0 : index
    %92 = vector.load %arg8[%c0_58, %c0_59, %c0_60] : memref<1x100x128xbf16, #tpu.memory_space<vmem>>, vector<1x11x128xbf16>
    %93 = vector.shape_cast %92 : vector<1x11x128xbf16> to vector<11x128xbf16>
    %94 = vector.shape_cast %91 : vector<11x128xbf16> to vector<1x11x128xbf16>
    tpu.vector_store %arg8[%c0_58, %c0_59, %c0_60], %94 {strides = array<i32>} : memref<1x100x128xbf16, #tpu.memory_space<vmem>>, vector<1x11x128xbf16>,
    %cst_61 = arith.constant 0.000000e+00 : bf16
    %95 = vector.broadcast %cst_61 : bf16 to vector<11x128xbf16>
    %c0_62 = arith.constant 0 : index
    %c89 = arith.constant 89 : index
    %c0_63 = arith.constant 0 : index
    %96 = vector.load %arg8[%c0_62, %c89, %c0_63] : memref<1x100x128xbf16, #tpu.memory_space<vmem>>, vector<1x11x128xbf16>
    %97 = vector.shape_cast %96 : vector<1x11x128xbf16> to vector<11x128xbf16>
    %98 = vector.shape_cast %95 : vector<11x128xbf16> to vector<1x11x128xbf16>
    tpu.vector_store %arg8[%c0_62, %c89, %c0_63], %98 {strides = array<i32>} : memref<1x100x128xbf16, #tpu.memory_space<vmem>>, vector<1x11x128xbf16>,
    return
  }
  func.func @transform_0(%arg0: i32) -> (i32, i32, i32) {
    %c0_i32 = arith.constant 0 : i32
    %c0_i32_0 = arith.constant 0 : i32
    %c0_i32_1 = arith.constant 0 : i32
    return %arg0, %c0_i32, %c0_i32_0 : i32, i32, i32
  }
  func.func @transform_1(%arg0: i32) -> (i32, i32) {
    %c0_i32 = arith.constant 0 : i32
    %c0_i32_0 = arith.constant 0 : i32
    %c0_i32_1 = arith.constant 0 : i32
    return %c0_i32, %c0_i32_0 : i32, i32
  }
  func.func @transform_2(%arg0: i32) -> (i32, i32) {
    %c0_i32 = arith.constant 0 : i32
    %c0_i32_0 = arith.constant 0 : i32
    %c0_i32_1 = arith.constant 0 : i32
    return %c0_i32, %c0_i32_0 : i32, i32
  }
  func.func @transform_3(%arg0: i32) -> (i32, i32) {
    %c0_i32 = arith.constant 0 : i32
    %c0_i32_0 = arith.constant 0 : i32
    %c0_i32_1 = arith.constant 0 : i32
    return %c0_i32, %c0_i32_0 : i32, i32
  }
  func.func @transform_4(%arg0: i32) -> (i32, i32) {
    %c0_i32 = arith.constant 0 : i32
    %c0_i32_0 = arith.constant 0 : i32
    %c0_i32_1 = arith.constant 0 : i32
    return %c0_i32, %c0_i32_0 : i32, i32
  }
  func.func @transform_5(%arg0: i32) -> (i32, i32) {
    %c0_i32 = arith.constant 0 : i32
    %c0_i32_0 = arith.constant 0 : i32
    %c0_i32_1 = arith.constant 0 : i32
    return %c0_i32, %c0_i32_0 : i32, i32
  }
  func.func @transform_6(%arg0: i32) -> (i32, i32) {
    %c0_i32 = arith.constant 0 : i32
    %c0_i32_0 = arith.constant 0 : i32
    %c0_i32_1 = arith.constant 0 : i32
    return %c0_i32, %c0_i32_0 : i32, i32
  }
  func.func @transform_7(%arg0: i32) -> (i32, i32, i32) {
    %c0_i32 = arith.constant 0 : i32
    %c0_i32_0 = arith.constant 0 : i32
    %c0_i32_1 = arith.constant 0 : i32
    return %arg0, %c0_i32, %c0_i32_0 : i32, i32, i32
  }
}

module attributes {stable_mosaic.version = 11 : i64} {
  func.func @_convt_dd_kernel(%arg0: i32, %arg1: memref<1x100x128xbf16, #tpu.memory_space<vmem>>, %arg2: memref<4x512x128xbf16, #tpu.memory_space<vmem>>, %arg3: memref<1x128xf32, #tpu.memory_space<vmem>>, %arg4: memref<1x4x80x128xbf16, #tpu.memory_space<vmem>>, %arg5: memref<1x2x128xf32, #tpu.memory_space<vmem>>, %arg6: memref<100x128xbf16, #tpu.memory_space<vmem>>, %arg7: memref<78x512xbf16, #tpu.memory_space<vmem>>) attributes {dimension_semantics = [#tpu.dimension_semantics<parallel>], iteration_bounds = array<i64: 2>, scalar_prefetch = 0 : i64, scratch_operands = 2 : i64, tpu.core_type = #tpu.core_type<tc>, window_params = [{transform_indices = @transform_0, window_bounds = array<i64: 1, 100, 128>}, {pipeline_mode = #tpu.pipeline_mode<synchronous>, transform_indices = @transform_1, window_bounds = array<i64: 4, 512, 128>}, {pipeline_mode = #tpu.pipeline_mode<synchronous>, transform_indices = @transform_2, window_bounds = array<i64: 1, 128>}, {transform_indices = @transform_3, window_bounds = array<i64: 1, 4, 80, 128>}, {transform_indices = @transform_4, window_bounds = array<i64: 1, 2, 128>}]} {
    %c0 = arith.constant 0 : index
    %c0_0 = arith.constant 0 : index
    %c0_1 = arith.constant 0 : index
    %0 = vector.load %arg1[%c0, %c0_0, %c0_1] : memref<1x100x128xbf16, #tpu.memory_space<vmem>>, vector<1x100x128xbf16>
    %1 = vector.shape_cast %0 : vector<1x100x128xbf16> to vector<100x128xbf16>
    %2 = tpu.iota {dimensions = array<i32: 0>} : vector<100x1xi32>
    %c10_i32 = arith.constant 10 : i32
    %c0_i32 = arith.constant 0 : i32
    %3 = arith.cmpi eq, %c10_i32, %c0_i32 : i32
    %c1_i32 = arith.constant 1 : i32
    %4 = arith.select %3, %c1_i32, %c10_i32 : i32
    %5 = vector.broadcast %4 : i32 to vector<100x1xi32>
    %6 = arith.remsi %2, %5 : vector<100x1xi32>
    %c0_i32_2 = arith.constant 0 : i32
    %7 = vector.broadcast %c0_i32_2 : i32 to vector<100x1xi32>
    %8 = arith.cmpi ne, %6, %7 : vector<100x1xi32>
    %c0_i32_3 = arith.constant 0 : i32
    %9 = vector.broadcast %c0_i32_3 : i32 to vector<100x1xi32>
    %10 = arith.cmpi slt, %6, %9 : vector<100x1xi32>
    %c0_i32_4 = arith.constant 0 : i32
    %11 = arith.cmpi slt, %4, %c0_i32_4 : i32
    %12 = vector.broadcast %11 : i1 to vector<100x1xi1>
    %13 = vector.broadcast %12 : vector<100x1xi1> to vector<100x1xi1>
    %14 = arith.xori %10, %13 : vector<100x1xi1>
    %15 = arith.andi %14, %8 : vector<100x1xi1>
    %16 = vector.broadcast %4 : i32 to vector<100x1xi32>
    %17 = arith.addi %6, %16 : vector<100x1xi32>
    %18 = arith.select %15, %17, %6 : vector<100x1xi1>, vector<100x1xi32>
    %c0_i32_5 = arith.constant 0 : i32
    %19 = vector.broadcast %c0_i32_5 : i32 to vector<100x1xi32>
    %20 = arith.cmpi eq, %18, %19 : vector<100x1xi32>
    %c9_i32 = arith.constant 9 : i32
    %21 = vector.broadcast %c9_i32 : i32 to vector<100x1xi32>
    %22 = arith.cmpi eq, %18, %21 : vector<100x1xi32>
    %23 = arith.ori %20, %22 : vector<100x1xi1>
    %c10_i32_6 = arith.constant 10 : i32
    %24 = vector.broadcast %c10_i32_6 : i32 to vector<100x1xi32>
    %25 = arith.cmpi slt, %2, %24 : vector<100x1xi32>
    %26 = arith.ori %23, %25 : vector<100x1xi1>
    %c90_i32 = arith.constant 90 : i32
    %27 = vector.broadcast %c90_i32 : i32 to vector<100x1xi32>
    %28 = arith.cmpi sge, %2, %27 : vector<100x1xi32>
    %29 = arith.ori %26, %28 : vector<100x1xi1>
    %cst = arith.constant 0.000000e+00 : f32
    %30 = arith.truncf %cst : f32 to bf16
    %31 = vector.shape_cast %29 : vector<100x1xi1> to vector<100x1xi1>
    %32 = vector.broadcast %31 : vector<100x1xi1> to vector<100x128xi1>
    %33 = vector.broadcast %30 : bf16 to vector<100x128xbf16>
    %34 = arith.select %32, %33, %1 : vector<100x128xi1>, vector<100x128xbf16>
    %c0_7 = arith.constant 0 : index
    %c0_8 = arith.constant 0 : index
    %35 = vector.load %arg6[%c0_7, %c0_8] : memref<100x128xbf16, #tpu.memory_space<vmem>>, vector<100x128xbf16>
    tpu.vector_store %arg6[%c0_7, %c0_8], %34 {strides = array<i32>} : memref<100x128xbf16, #tpu.memory_space<vmem>>, vector<100x128xbf16>,
    %36 = tpu.iota {dimensions = array<i32: 0>} : vector<78x1xi32>
    %c10_i32_9 = arith.constant 10 : i32
    %c0_i32_10 = arith.constant 0 : i32
    %37 = arith.cmpi eq, %c10_i32_9, %c0_i32_10 : i32
    %c1_i32_11 = arith.constant 1 : i32
    %38 = arith.select %37, %c1_i32_11, %c10_i32_9 : i32
    %39 = vector.broadcast %38 : i32 to vector<78x1xi32>
    %40 = arith.remsi %36, %39 : vector<78x1xi32>
    %c0_i32_12 = arith.constant 0 : i32
    %41 = vector.broadcast %c0_i32_12 : i32 to vector<78x1xi32>
    %42 = arith.cmpi ne, %40, %41 : vector<78x1xi32>
    %c0_i32_13 = arith.constant 0 : i32
    %43 = vector.broadcast %c0_i32_13 : i32 to vector<78x1xi32>
    %44 = arith.cmpi slt, %40, %43 : vector<78x1xi32>
    %c0_i32_14 = arith.constant 0 : i32
    %45 = arith.cmpi slt, %38, %c0_i32_14 : i32
    %46 = vector.broadcast %45 : i1 to vector<78x1xi1>
    %47 = vector.broadcast %46 : vector<78x1xi1> to vector<78x1xi1>
    %48 = arith.xori %44, %47 : vector<78x1xi1>
    %49 = arith.andi %48, %42 : vector<78x1xi1>
    %50 = vector.broadcast %38 : i32 to vector<78x1xi32>
    %51 = arith.addi %40, %50 : vector<78x1xi32>
    %52 = arith.select %49, %51, %40 : vector<78x1xi1>, vector<78x1xi32>
    %c8_i32 = arith.constant 8 : i32
    %53 = vector.broadcast %c8_i32 : i32 to vector<78x1xi32>
    %54 = arith.cmpi slt, %52, %53 : vector<78x1xi32>
    %cst_15 = arith.constant 0.000000e+00 : f32
    %55 = vector.broadcast %cst_15 : f32 to vector<1x128xf32>
    %cst_16 = arith.constant 0.000000e+00 : f32
    %56 = vector.broadcast %cst_16 : f32 to vector<1x128xf32>
    %c0_17 = arith.constant 0 : index
    %c0_18 = arith.constant 0 : index
    %57 = vector.load %arg6[%c0_17, %c0_18] : memref<100x128xbf16, #tpu.memory_space<vmem>>, vector<78x128xbf16>
    %c0_19 = arith.constant 0 : index
    %c0_20 = arith.constant 0 : index
    %58 = vector.load %arg7[%c0_19, %c0_20] : memref<78x512xbf16, #tpu.memory_space<vmem>>, vector<78x128xbf16>
    tpu.vector_store %arg7[%c0_19, %c0_20], %57 {strides = array<i32>} : memref<78x512xbf16, #tpu.memory_space<vmem>>, vector<78x128xbf16>,
    %c1 = arith.constant 1 : index
    %c0_21 = arith.constant 0 : index
    %59 = vector.load %arg6[%c1, %c0_21] : memref<100x128xbf16, #tpu.memory_space<vmem>>, vector<78x128xbf16>
    %c0_22 = arith.constant 0 : index
    %c128 = arith.constant 128 : index
    %60 = vector.load %arg7[%c0_22, %c128] : memref<78x512xbf16, #tpu.memory_space<vmem>>, vector<78x128xbf16>
    tpu.vector_store %arg7[%c0_22, %c128], %59 {strides = array<i32>} : memref<78x512xbf16, #tpu.memory_space<vmem>>, vector<78x128xbf16>,
    %c10 = arith.constant 10 : index
    %c0_23 = arith.constant 0 : index
    %61 = vector.load %arg6[%c10, %c0_23] : memref<100x128xbf16, #tpu.memory_space<vmem>>, vector<78x128xbf16>
    %c0_24 = arith.constant 0 : index
    %c256 = arith.constant 256 : index
    %62 = vector.load %arg7[%c0_24, %c256] : memref<78x512xbf16, #tpu.memory_space<vmem>>, vector<78x128xbf16>
    tpu.vector_store %arg7[%c0_24, %c256], %61 {strides = array<i32>} : memref<78x512xbf16, #tpu.memory_space<vmem>>, vector<78x128xbf16>,
    %c11 = arith.constant 11 : index
    %c0_25 = arith.constant 0 : index
    %63 = vector.load %arg6[%c11, %c0_25] : memref<100x128xbf16, #tpu.memory_space<vmem>>, vector<78x128xbf16>
    %c0_26 = arith.constant 0 : index
    %c384 = arith.constant 384 : index
    %64 = vector.load %arg7[%c0_26, %c384] : memref<78x512xbf16, #tpu.memory_space<vmem>>, vector<78x128xbf16>
    tpu.vector_store %arg7[%c0_26, %c384], %63 {strides = array<i32>} : memref<78x512xbf16, #tpu.memory_space<vmem>>, vector<78x128xbf16>,
    %c0_27 = arith.constant 0 : index
    %c0_28 = arith.constant 0 : index
    %65 = vector.load %arg7[%c0_27, %c0_28] : memref<78x512xbf16, #tpu.memory_space<vmem>>, vector<78x512xbf16>
    %c0_29 = arith.constant 0 : index
    %c0_30 = arith.constant 0 : index
    %c0_31 = arith.constant 0 : index
    %66 = vector.load %arg2[%c0_29, %c0_30, %c0_31] : memref<4x512x128xbf16, #tpu.memory_space<vmem>>, vector<1x512x128xbf16>
    %67 = vector.shape_cast %66 : vector<1x512x128xbf16> to vector<512x128xbf16>
    %cst_32 = arith.constant dense<0.000000e+00> : vector<78x128xf32>
    %68 = tpu.matmul %65, %67, %cst_32 {dimension_numbers = #tpu.dot_dimension_numbers<[1], [0], [0], [1], [0, 0, 1, 1], [], []>} : vector<78x512xbf16>, vector<512x128xbf16>, vector<78x128xf32> -> vector<78x128xf32>
    %c0_33 = arith.constant 0 : index
    %c0_34 = arith.constant 0 : index
    %69 = vector.load %arg3[%c0_33, %c0_34] : memref<1x128xf32, #tpu.memory_space<vmem>>, vector<1x128xf32>
    %70 = vector.broadcast %69 : vector<1x128xf32> to vector<78x128xf32>
    %71 = arith.addf %68, %70 : vector<78x128xf32>
    %72 = arith.truncf %71 : vector<78x128xf32> to vector<78x128xbf16>
    %c0_35 = arith.constant 0 : index
    %c0_36 = arith.constant 0 : index
    %c0_37 = arith.constant 0 : index
    %c0_38 = arith.constant 0 : index
    %73 = vector.load %arg4[%c0_35, %c0_36, %c0_37, %c0_38] : memref<1x4x80x128xbf16, #tpu.memory_space<vmem>>, vector<1x1x78x128xbf16>
    %74 = vector.shape_cast %73 : vector<1x1x78x128xbf16> to vector<78x128xbf16>
    %75 = vector.shape_cast %72 : vector<78x128xbf16> to vector<1x1x78x128xbf16>
    tpu.vector_store %arg4[%c0_35, %c0_36, %c0_37, %c0_38], %75 {strides = array<i32>} : memref<1x4x80x128xbf16, #tpu.memory_space<vmem>>, vector<1x1x78x128xbf16>,
    %cst_39 = arith.constant 0.000000e+00 : bf16
    %76 = vector.broadcast %cst_39 : bf16 to vector<2x128xbf16>
    %c0_40 = arith.constant 0 : index
    %c0_41 = arith.constant 0 : index
    %c78 = arith.constant 78 : index
    %c0_42 = arith.constant 0 : index
    %77 = vector.load %arg4[%c0_40, %c0_41, %c78, %c0_42] : memref<1x4x80x128xbf16, #tpu.memory_space<vmem>>, vector<1x1x2x128xbf16>
    %78 = vector.shape_cast %77 : vector<1x1x2x128xbf16> to vector<2x128xbf16>
    %79 = vector.shape_cast %76 : vector<2x128xbf16> to vector<1x1x2x128xbf16>
    tpu.vector_store %arg4[%c0_40, %c0_41, %c78, %c0_42], %79 {strides = array<i32>} : memref<1x4x80x128xbf16, #tpu.memory_space<vmem>>, vector<1x1x2x128xbf16>,
    %cst_43 = arith.constant 0.000000e+00 : f32
    %80 = vector.shape_cast %54 : vector<78x1xi1> to vector<78x1xi1>
    %81 = vector.broadcast %80 : vector<78x1xi1> to vector<78x128xi1>
    %82 = vector.broadcast %cst_43 : f32 to vector<78x128xf32>
    %83 = arith.select %81, %71, %82 : vector<78x128xi1>, vector<78x128xf32>
    %cst_44 = arith.constant dense<0.000000e+00> : vector<128xf32>
    %84 = vector.multi_reduction <add>, %83, %cst_44 [0] : vector<78x128xf32> to vector<128xf32>
    %85 = vector.shape_cast %84 : vector<128xf32> to vector<1x128xf32>
    %86 = arith.addf %55, %85 : vector<1x128xf32>
    %87 = arith.mulf %83, %83 : vector<78x128xf32>
    %cst_45 = arith.constant dense<0.000000e+00> : vector<128xf32>
    %88 = vector.multi_reduction <add>, %87, %cst_45 [0] : vector<78x128xf32> to vector<128xf32>
    %89 = vector.shape_cast %88 : vector<128xf32> to vector<1x128xf32>
    %90 = arith.addf %56, %89 : vector<1x128xf32>
    %c1_46 = arith.constant 1 : index
    %c0_47 = arith.constant 0 : index
    %91 = vector.load %arg6[%c1_46, %c0_47] : memref<100x128xbf16, #tpu.memory_space<vmem>>, vector<78x128xbf16>
    %c0_48 = arith.constant 0 : index
    %c0_49 = arith.constant 0 : index
    %92 = vector.load %arg7[%c0_48, %c0_49] : memref<78x512xbf16, #tpu.memory_space<vmem>>, vector<78x128xbf16>
    tpu.vector_store %arg7[%c0_48, %c0_49], %91 {strides = array<i32>} : memref<78x512xbf16, #tpu.memory_space<vmem>>, vector<78x128xbf16>,
    %c2 = arith.constant 2 : index
    %c0_50 = arith.constant 0 : index
    %93 = vector.load %arg6[%c2, %c0_50] : memref<100x128xbf16, #tpu.memory_space<vmem>>, vector<78x128xbf16>
    %c0_51 = arith.constant 0 : index
    %c128_52 = arith.constant 128 : index
    %94 = vector.load %arg7[%c0_51, %c128_52] : memref<78x512xbf16, #tpu.memory_space<vmem>>, vector<78x128xbf16>
    tpu.vector_store %arg7[%c0_51, %c128_52], %93 {strides = array<i32>} : memref<78x512xbf16, #tpu.memory_space<vmem>>, vector<78x128xbf16>,
    %c11_53 = arith.constant 11 : index
    %c0_54 = arith.constant 0 : index
    %95 = vector.load %arg6[%c11_53, %c0_54] : memref<100x128xbf16, #tpu.memory_space<vmem>>, vector<78x128xbf16>
    %c0_55 = arith.constant 0 : index
    %c256_56 = arith.constant 256 : index
    %96 = vector.load %arg7[%c0_55, %c256_56] : memref<78x512xbf16, #tpu.memory_space<vmem>>, vector<78x128xbf16>
    tpu.vector_store %arg7[%c0_55, %c256_56], %95 {strides = array<i32>} : memref<78x512xbf16, #tpu.memory_space<vmem>>, vector<78x128xbf16>,
    %c12 = arith.constant 12 : index
    %c0_57 = arith.constant 0 : index
    %97 = vector.load %arg6[%c12, %c0_57] : memref<100x128xbf16, #tpu.memory_space<vmem>>, vector<78x128xbf16>
    %c0_58 = arith.constant 0 : index
    %c384_59 = arith.constant 384 : index
    %98 = vector.load %arg7[%c0_58, %c384_59] : memref<78x512xbf16, #tpu.memory_space<vmem>>, vector<78x128xbf16>
    tpu.vector_store %arg7[%c0_58, %c384_59], %97 {strides = array<i32>} : memref<78x512xbf16, #tpu.memory_space<vmem>>, vector<78x128xbf16>,
    %c0_60 = arith.constant 0 : index
    %c0_61 = arith.constant 0 : index
    %99 = vector.load %arg7[%c0_60, %c0_61] : memref<78x512xbf16, #tpu.memory_space<vmem>>, vector<78x512xbf16>
    %c1_62 = arith.constant 1 : index
    %c0_63 = arith.constant 0 : index
    %c0_64 = arith.constant 0 : index
    %100 = vector.load %arg2[%c1_62, %c0_63, %c0_64] : memref<4x512x128xbf16, #tpu.memory_space<vmem>>, vector<1x512x128xbf16>
    %101 = vector.shape_cast %100 : vector<1x512x128xbf16> to vector<512x128xbf16>
    %cst_65 = arith.constant dense<0.000000e+00> : vector<78x128xf32>
    %102 = tpu.matmul %99, %101, %cst_65 {dimension_numbers = #tpu.dot_dimension_numbers<[1], [0], [0], [1], [0, 0, 1, 1], [], []>} : vector<78x512xbf16>, vector<512x128xbf16>, vector<78x128xf32> -> vector<78x128xf32>
    %c0_66 = arith.constant 0 : index
    %c0_67 = arith.constant 0 : index
    %103 = vector.load %arg3[%c0_66, %c0_67] : memref<1x128xf32, #tpu.memory_space<vmem>>, vector<1x128xf32>
    %104 = vector.broadcast %103 : vector<1x128xf32> to vector<78x128xf32>
    %105 = arith.addf %102, %104 : vector<78x128xf32>
    %106 = arith.truncf %105 : vector<78x128xf32> to vector<78x128xbf16>
    %c0_68 = arith.constant 0 : index
    %c1_69 = arith.constant 1 : index
    %c0_70 = arith.constant 0 : index
    %c0_71 = arith.constant 0 : index
    %107 = vector.load %arg4[%c0_68, %c1_69, %c0_70, %c0_71] : memref<1x4x80x128xbf16, #tpu.memory_space<vmem>>, vector<1x1x78x128xbf16>
    %108 = vector.shape_cast %107 : vector<1x1x78x128xbf16> to vector<78x128xbf16>
    %109 = vector.shape_cast %106 : vector<78x128xbf16> to vector<1x1x78x128xbf16>
    tpu.vector_store %arg4[%c0_68, %c1_69, %c0_70, %c0_71], %109 {strides = array<i32>} : memref<1x4x80x128xbf16, #tpu.memory_space<vmem>>, vector<1x1x78x128xbf16>,
    %cst_72 = arith.constant 0.000000e+00 : bf16
    %110 = vector.broadcast %cst_72 : bf16 to vector<2x128xbf16>
    %c0_73 = arith.constant 0 : index
    %c1_74 = arith.constant 1 : index
    %c78_75 = arith.constant 78 : index
    %c0_76 = arith.constant 0 : index
    %111 = vector.load %arg4[%c0_73, %c1_74, %c78_75, %c0_76] : memref<1x4x80x128xbf16, #tpu.memory_space<vmem>>, vector<1x1x2x128xbf16>
    %112 = vector.shape_cast %111 : vector<1x1x2x128xbf16> to vector<2x128xbf16>
    %113 = vector.shape_cast %110 : vector<2x128xbf16> to vector<1x1x2x128xbf16>
    tpu.vector_store %arg4[%c0_73, %c1_74, %c78_75, %c0_76], %113 {strides = array<i32>} : memref<1x4x80x128xbf16, #tpu.memory_space<vmem>>, vector<1x1x2x128xbf16>,
    %cst_77 = arith.constant 0.000000e+00 : f32
    %114 = vector.shape_cast %54 : vector<78x1xi1> to vector<78x1xi1>
    %115 = vector.broadcast %114 : vector<78x1xi1> to vector<78x128xi1>
    %116 = vector.broadcast %cst_77 : f32 to vector<78x128xf32>
    %117 = arith.select %115, %105, %116 : vector<78x128xi1>, vector<78x128xf32>
    %cst_78 = arith.constant dense<0.000000e+00> : vector<128xf32>
    %118 = vector.multi_reduction <add>, %117, %cst_78 [0] : vector<78x128xf32> to vector<128xf32>
    %119 = vector.shape_cast %118 : vector<128xf32> to vector<1x128xf32>
    %120 = arith.addf %86, %119 : vector<1x128xf32>
    %121 = arith.mulf %117, %117 : vector<78x128xf32>
    %cst_79 = arith.constant dense<0.000000e+00> : vector<128xf32>
    %122 = vector.multi_reduction <add>, %121, %cst_79 [0] : vector<78x128xf32> to vector<128xf32>
    %123 = vector.shape_cast %122 : vector<128xf32> to vector<1x128xf32>
    %124 = arith.addf %90, %123 : vector<1x128xf32>
    %c10_80 = arith.constant 10 : index
    %c0_81 = arith.constant 0 : index
    %125 = vector.load %arg6[%c10_80, %c0_81] : memref<100x128xbf16, #tpu.memory_space<vmem>>, vector<78x128xbf16>
    %c0_82 = arith.constant 0 : index
    %c0_83 = arith.constant 0 : index
    %126 = vector.load %arg7[%c0_82, %c0_83] : memref<78x512xbf16, #tpu.memory_space<vmem>>, vector<78x128xbf16>
    tpu.vector_store %arg7[%c0_82, %c0_83], %125 {strides = array<i32>} : memref<78x512xbf16, #tpu.memory_space<vmem>>, vector<78x128xbf16>,
    %c11_84 = arith.constant 11 : index
    %c0_85 = arith.constant 0 : index
    %127 = vector.load %arg6[%c11_84, %c0_85] : memref<100x128xbf16, #tpu.memory_space<vmem>>, vector<78x128xbf16>
    %c0_86 = arith.constant 0 : index
    %c128_87 = arith.constant 128 : index
    %128 = vector.load %arg7[%c0_86, %c128_87] : memref<78x512xbf16, #tpu.memory_space<vmem>>, vector<78x128xbf16>
    tpu.vector_store %arg7[%c0_86, %c128_87], %127 {strides = array<i32>} : memref<78x512xbf16, #tpu.memory_space<vmem>>, vector<78x128xbf16>,
    %c20 = arith.constant 20 : index
    %c0_88 = arith.constant 0 : index
    %129 = vector.load %arg6[%c20, %c0_88] : memref<100x128xbf16, #tpu.memory_space<vmem>>, vector<78x128xbf16>
    %c0_89 = arith.constant 0 : index
    %c256_90 = arith.constant 256 : index
    %130 = vector.load %arg7[%c0_89, %c256_90] : memref<78x512xbf16, #tpu.memory_space<vmem>>, vector<78x128xbf16>
    tpu.vector_store %arg7[%c0_89, %c256_90], %129 {strides = array<i32>} : memref<78x512xbf16, #tpu.memory_space<vmem>>, vector<78x128xbf16>,
    %c21 = arith.constant 21 : index
    %c0_91 = arith.constant 0 : index
    %131 = vector.load %arg6[%c21, %c0_91] : memref<100x128xbf16, #tpu.memory_space<vmem>>, vector<78x128xbf16>
    %c0_92 = arith.constant 0 : index
    %c384_93 = arith.constant 384 : index
    %132 = vector.load %arg7[%c0_92, %c384_93] : memref<78x512xbf16, #tpu.memory_space<vmem>>, vector<78x128xbf16>
    tpu.vector_store %arg7[%c0_92, %c384_93], %131 {strides = array<i32>} : memref<78x512xbf16, #tpu.memory_space<vmem>>, vector<78x128xbf16>,
    %c0_94 = arith.constant 0 : index
    %c0_95 = arith.constant 0 : index
    %133 = vector.load %arg7[%c0_94, %c0_95] : memref<78x512xbf16, #tpu.memory_space<vmem>>, vector<78x512xbf16>
    %c2_96 = arith.constant 2 : index
    %c0_97 = arith.constant 0 : index
    %c0_98 = arith.constant 0 : index
    %134 = vector.load %arg2[%c2_96, %c0_97, %c0_98] : memref<4x512x128xbf16, #tpu.memory_space<vmem>>, vector<1x512x128xbf16>
    %135 = vector.shape_cast %134 : vector<1x512x128xbf16> to vector<512x128xbf16>
    %cst_99 = arith.constant dense<0.000000e+00> : vector<78x128xf32>
    %136 = tpu.matmul %133, %135, %cst_99 {dimension_numbers = #tpu.dot_dimension_numbers<[1], [0], [0], [1], [0, 0, 1, 1], [], []>} : vector<78x512xbf16>, vector<512x128xbf16>, vector<78x128xf32> -> vector<78x128xf32>
    %c0_100 = arith.constant 0 : index
    %c0_101 = arith.constant 0 : index
    %137 = vector.load %arg3[%c0_100, %c0_101] : memref<1x128xf32, #tpu.memory_space<vmem>>, vector<1x128xf32>
    %138 = vector.broadcast %137 : vector<1x128xf32> to vector<78x128xf32>
    %139 = arith.addf %136, %138 : vector<78x128xf32>
    %140 = arith.truncf %139 : vector<78x128xf32> to vector<78x128xbf16>
    %c0_102 = arith.constant 0 : index
    %c2_103 = arith.constant 2 : index
    %c0_104 = arith.constant 0 : index
    %c0_105 = arith.constant 0 : index
    %141 = vector.load %arg4[%c0_102, %c2_103, %c0_104, %c0_105] : memref<1x4x80x128xbf16, #tpu.memory_space<vmem>>, vector<1x1x78x128xbf16>
    %142 = vector.shape_cast %141 : vector<1x1x78x128xbf16> to vector<78x128xbf16>
    %143 = vector.shape_cast %140 : vector<78x128xbf16> to vector<1x1x78x128xbf16>
    tpu.vector_store %arg4[%c0_102, %c2_103, %c0_104, %c0_105], %143 {strides = array<i32>} : memref<1x4x80x128xbf16, #tpu.memory_space<vmem>>, vector<1x1x78x128xbf16>,
    %cst_106 = arith.constant 0.000000e+00 : bf16
    %144 = vector.broadcast %cst_106 : bf16 to vector<2x128xbf16>
    %c0_107 = arith.constant 0 : index
    %c2_108 = arith.constant 2 : index
    %c78_109 = arith.constant 78 : index
    %c0_110 = arith.constant 0 : index
    %145 = vector.load %arg4[%c0_107, %c2_108, %c78_109, %c0_110] : memref<1x4x80x128xbf16, #tpu.memory_space<vmem>>, vector<1x1x2x128xbf16>
    %146 = vector.shape_cast %145 : vector<1x1x2x128xbf16> to vector<2x128xbf16>
    %147 = vector.shape_cast %144 : vector<2x128xbf16> to vector<1x1x2x128xbf16>
    tpu.vector_store %arg4[%c0_107, %c2_108, %c78_109, %c0_110], %147 {strides = array<i32>} : memref<1x4x80x128xbf16, #tpu.memory_space<vmem>>, vector<1x1x2x128xbf16>,
    %cst_111 = arith.constant 0.000000e+00 : f32
    %148 = vector.shape_cast %54 : vector<78x1xi1> to vector<78x1xi1>
    %149 = vector.broadcast %148 : vector<78x1xi1> to vector<78x128xi1>
    %150 = vector.broadcast %cst_111 : f32 to vector<78x128xf32>
    %151 = arith.select %149, %139, %150 : vector<78x128xi1>, vector<78x128xf32>
    %cst_112 = arith.constant dense<0.000000e+00> : vector<128xf32>
    %152 = vector.multi_reduction <add>, %151, %cst_112 [0] : vector<78x128xf32> to vector<128xf32>
    %153 = vector.shape_cast %152 : vector<128xf32> to vector<1x128xf32>
    %154 = arith.addf %120, %153 : vector<1x128xf32>
    %155 = arith.mulf %151, %151 : vector<78x128xf32>
    %cst_113 = arith.constant dense<0.000000e+00> : vector<128xf32>
    %156 = vector.multi_reduction <add>, %155, %cst_113 [0] : vector<78x128xf32> to vector<128xf32>
    %157 = vector.shape_cast %156 : vector<128xf32> to vector<1x128xf32>
    %158 = arith.addf %124, %157 : vector<1x128xf32>
    %c11_114 = arith.constant 11 : index
    %c0_115 = arith.constant 0 : index
    %159 = vector.load %arg6[%c11_114, %c0_115] : memref<100x128xbf16, #tpu.memory_space<vmem>>, vector<78x128xbf16>
    %c0_116 = arith.constant 0 : index
    %c0_117 = arith.constant 0 : index
    %160 = vector.load %arg7[%c0_116, %c0_117] : memref<78x512xbf16, #tpu.memory_space<vmem>>, vector<78x128xbf16>
    tpu.vector_store %arg7[%c0_116, %c0_117], %159 {strides = array<i32>} : memref<78x512xbf16, #tpu.memory_space<vmem>>, vector<78x128xbf16>,
    %c12_118 = arith.constant 12 : index
    %c0_119 = arith.constant 0 : index
    %161 = vector.load %arg6[%c12_118, %c0_119] : memref<100x128xbf16, #tpu.memory_space<vmem>>, vector<78x128xbf16>
    %c0_120 = arith.constant 0 : index
    %c128_121 = arith.constant 128 : index
    %162 = vector.load %arg7[%c0_120, %c128_121] : memref<78x512xbf16, #tpu.memory_space<vmem>>, vector<78x128xbf16>
    tpu.vector_store %arg7[%c0_120, %c128_121], %161 {strides = array<i32>} : memref<78x512xbf16, #tpu.memory_space<vmem>>, vector<78x128xbf16>,
    %c21_122 = arith.constant 21 : index
    %c0_123 = arith.constant 0 : index
    %163 = vector.load %arg6[%c21_122, %c0_123] : memref<100x128xbf16, #tpu.memory_space<vmem>>, vector<78x128xbf16>
    %c0_124 = arith.constant 0 : index
    %c256_125 = arith.constant 256 : index
    %164 = vector.load %arg7[%c0_124, %c256_125] : memref<78x512xbf16, #tpu.memory_space<vmem>>, vector<78x128xbf16>
    tpu.vector_store %arg7[%c0_124, %c256_125], %163 {strides = array<i32>} : memref<78x512xbf16, #tpu.memory_space<vmem>>, vector<78x128xbf16>,
    %c22 = arith.constant 22 : index
    %c0_126 = arith.constant 0 : index
    %165 = vector.load %arg6[%c22, %c0_126] : memref<100x128xbf16, #tpu.memory_space<vmem>>, vector<78x128xbf16>
    %c0_127 = arith.constant 0 : index
    %c384_128 = arith.constant 384 : index
    %166 = vector.load %arg7[%c0_127, %c384_128] : memref<78x512xbf16, #tpu.memory_space<vmem>>, vector<78x128xbf16>
    tpu.vector_store %arg7[%c0_127, %c384_128], %165 {strides = array<i32>} : memref<78x512xbf16, #tpu.memory_space<vmem>>, vector<78x128xbf16>,
    %c0_129 = arith.constant 0 : index
    %c0_130 = arith.constant 0 : index
    %167 = vector.load %arg7[%c0_129, %c0_130] : memref<78x512xbf16, #tpu.memory_space<vmem>>, vector<78x512xbf16>
    %c3 = arith.constant 3 : index
    %c0_131 = arith.constant 0 : index
    %c0_132 = arith.constant 0 : index
    %168 = vector.load %arg2[%c3, %c0_131, %c0_132] : memref<4x512x128xbf16, #tpu.memory_space<vmem>>, vector<1x512x128xbf16>
    %169 = vector.shape_cast %168 : vector<1x512x128xbf16> to vector<512x128xbf16>
    %cst_133 = arith.constant dense<0.000000e+00> : vector<78x128xf32>
    %170 = tpu.matmul %167, %169, %cst_133 {dimension_numbers = #tpu.dot_dimension_numbers<[1], [0], [0], [1], [0, 0, 1, 1], [], []>} : vector<78x512xbf16>, vector<512x128xbf16>, vector<78x128xf32> -> vector<78x128xf32>
    %c0_134 = arith.constant 0 : index
    %c0_135 = arith.constant 0 : index
    %171 = vector.load %arg3[%c0_134, %c0_135] : memref<1x128xf32, #tpu.memory_space<vmem>>, vector<1x128xf32>
    %172 = vector.broadcast %171 : vector<1x128xf32> to vector<78x128xf32>
    %173 = arith.addf %170, %172 : vector<78x128xf32>
    %174 = arith.truncf %173 : vector<78x128xf32> to vector<78x128xbf16>
    %c0_136 = arith.constant 0 : index
    %c3_137 = arith.constant 3 : index
    %c0_138 = arith.constant 0 : index
    %c0_139 = arith.constant 0 : index
    %175 = vector.load %arg4[%c0_136, %c3_137, %c0_138, %c0_139] : memref<1x4x80x128xbf16, #tpu.memory_space<vmem>>, vector<1x1x78x128xbf16>
    %176 = vector.shape_cast %175 : vector<1x1x78x128xbf16> to vector<78x128xbf16>
    %177 = vector.shape_cast %174 : vector<78x128xbf16> to vector<1x1x78x128xbf16>
    tpu.vector_store %arg4[%c0_136, %c3_137, %c0_138, %c0_139], %177 {strides = array<i32>} : memref<1x4x80x128xbf16, #tpu.memory_space<vmem>>, vector<1x1x78x128xbf16>,
    %cst_140 = arith.constant 0.000000e+00 : bf16
    %178 = vector.broadcast %cst_140 : bf16 to vector<2x128xbf16>
    %c0_141 = arith.constant 0 : index
    %c3_142 = arith.constant 3 : index
    %c78_143 = arith.constant 78 : index
    %c0_144 = arith.constant 0 : index
    %179 = vector.load %arg4[%c0_141, %c3_142, %c78_143, %c0_144] : memref<1x4x80x128xbf16, #tpu.memory_space<vmem>>, vector<1x1x2x128xbf16>
    %180 = vector.shape_cast %179 : vector<1x1x2x128xbf16> to vector<2x128xbf16>
    %181 = vector.shape_cast %178 : vector<2x128xbf16> to vector<1x1x2x128xbf16>
    tpu.vector_store %arg4[%c0_141, %c3_142, %c78_143, %c0_144], %181 {strides = array<i32>} : memref<1x4x80x128xbf16, #tpu.memory_space<vmem>>, vector<1x1x2x128xbf16>,
    %cst_145 = arith.constant 0.000000e+00 : f32
    %182 = vector.shape_cast %54 : vector<78x1xi1> to vector<78x1xi1>
    %183 = vector.broadcast %182 : vector<78x1xi1> to vector<78x128xi1>
    %184 = vector.broadcast %cst_145 : f32 to vector<78x128xf32>
    %185 = arith.select %183, %173, %184 : vector<78x128xi1>, vector<78x128xf32>
    %cst_146 = arith.constant dense<0.000000e+00> : vector<128xf32>
    %186 = vector.multi_reduction <add>, %185, %cst_146 [0] : vector<78x128xf32> to vector<128xf32>
    %187 = vector.shape_cast %186 : vector<128xf32> to vector<1x128xf32>
    %188 = arith.addf %154, %187 : vector<1x128xf32>
    %189 = arith.mulf %185, %185 : vector<78x128xf32>
    %cst_147 = arith.constant dense<0.000000e+00> : vector<128xf32>
    %190 = vector.multi_reduction <add>, %189, %cst_147 [0] : vector<78x128xf32> to vector<128xf32>
    %191 = vector.shape_cast %190 : vector<128xf32> to vector<1x128xf32>
    %192 = arith.addf %158, %191 : vector<1x128xf32>
    %c0_148 = arith.constant 0 : index
    %c0_149 = arith.constant 0 : index
    %c0_150 = arith.constant 0 : index
    %193 = vector.load %arg5[%c0_148, %c0_149, %c0_150] : memref<1x2x128xf32, #tpu.memory_space<vmem>>, vector<1x1x128xf32>
    %194 = vector.shape_cast %193 : vector<1x1x128xf32> to vector<1x128xf32>
    %195 = vector.shape_cast %188 : vector<1x128xf32> to vector<1x1x128xf32>
    tpu.vector_store %arg5[%c0_148, %c0_149, %c0_150], %195 {strides = array<i32>} : memref<1x2x128xf32, #tpu.memory_space<vmem>>, vector<1x1x128xf32>,
    %c0_151 = arith.constant 0 : index
    %c1_152 = arith.constant 1 : index
    %c0_153 = arith.constant 0 : index
    %196 = vector.load %arg5[%c0_151, %c1_152, %c0_153] : memref<1x2x128xf32, #tpu.memory_space<vmem>>, vector<1x1x128xf32>
    %197 = vector.shape_cast %196 : vector<1x1x128xf32> to vector<1x128xf32>
    %198 = vector.shape_cast %192 : vector<1x128xf32> to vector<1x1x128xf32>
    tpu.vector_store %arg5[%c0_151, %c1_152, %c0_153], %198 {strides = array<i32>} : memref<1x2x128xf32, #tpu.memory_space<vmem>>, vector<1x1x128xf32>,
    return
  }
  func.func @transform_0(%arg0: i32) -> (i32, i32, i32) {
    %c0_i32 = arith.constant 0 : i32
    %c0_i32_0 = arith.constant 0 : i32
    %c0_i32_1 = arith.constant 0 : i32
    return %arg0, %c0_i32, %c0_i32_0 : i32, i32, i32
  }
  func.func @transform_1(%arg0: i32) -> (i32, i32, i32) {
    %c0_i32 = arith.constant 0 : i32
    %c0_i32_0 = arith.constant 0 : i32
    %c0_i32_1 = arith.constant 0 : i32
    %c0_i32_2 = arith.constant 0 : i32
    return %c0_i32, %c0_i32_0, %c0_i32_1 : i32, i32, i32
  }
  func.func @transform_2(%arg0: i32) -> (i32, i32) {
    %c0_i32 = arith.constant 0 : i32
    %c0_i32_0 = arith.constant 0 : i32
    %c0_i32_1 = arith.constant 0 : i32
    return %c0_i32, %c0_i32_0 : i32, i32
  }
  func.func @transform_3(%arg0: i32) -> (i32, i32, i32, i32) {
    %c0_i32 = arith.constant 0 : i32
    %c0_i32_0 = arith.constant 0 : i32
    %c0_i32_1 = arith.constant 0 : i32
    %c0_i32_2 = arith.constant 0 : i32
    return %arg0, %c0_i32, %c0_i32_0, %c0_i32_1 : i32, i32, i32, i32
  }
  func.func @transform_4(%arg0: i32) -> (i32, i32, i32) {
    %c0_i32 = arith.constant 0 : i32
    %c0_i32_0 = arith.constant 0 : i32
    %c0_i32_1 = arith.constant 0 : i32
    return %arg0, %c0_i32, %c0_i32_0 : i32, i32, i32
  }
}

module attributes {stable_mosaic.version = 11 : i64} {
  func.func @_convt_out_kernel(%arg0: i32, %arg1: i32, %arg2: memref<1x1x80x128xbf16, #tpu.memory_space<vmem>>, %arg3: memref<1x128xf32, #tpu.memory_space<vmem>>, %arg4: memref<1x128xf32, #tpu.memory_space<vmem>>, %arg5: memref<128x48xbf16, #tpu.memory_space<vmem>>, %arg6: memref<1x1x80x48xf32, #tpu.memory_space<vmem>>) attributes {dimension_semantics = [#tpu.dimension_semantics<parallel>, #tpu.dimension_semantics<parallel>], iteration_bounds = array<i64: 2, 4>, scalar_prefetch = 0 : i64, scratch_operands = 0 : i64, tpu.core_type = #tpu.core_type<tc>, window_params = [{transform_indices = @transform_0, window_bounds = array<i64: 1, 1, 80, 128>}, {pipeline_mode = #tpu.pipeline_mode<synchronous>, transform_indices = @transform_1, window_bounds = array<i64: 1, 128>}, {pipeline_mode = #tpu.pipeline_mode<synchronous>, transform_indices = @transform_2, window_bounds = array<i64: 1, 128>}, {pipeline_mode = #tpu.pipeline_mode<synchronous>, transform_indices = @transform_3, window_bounds = array<i64: 128, 48>}, {transform_indices = @transform_4, window_bounds = array<i64: 1, 1, 80, 48>}]} {
    %c0 = arith.constant 0 : index
    %c0_0 = arith.constant 0 : index
    %c0_1 = arith.constant 0 : index
    %c0_2 = arith.constant 0 : index
    %0 = vector.load %arg2[%c0, %c0_0, %c0_1, %c0_2] : memref<1x1x80x128xbf16, #tpu.memory_space<vmem>>, vector<1x1x78x128xbf16>
    %1 = vector.shape_cast %0 : vector<1x1x78x128xbf16> to vector<78x128xbf16>
    %2 = arith.extf %1 : vector<78x128xbf16> to vector<78x128xf32>
    %c0_3 = arith.constant 0 : index
    %c0_4 = arith.constant 0 : index
    %3 = vector.load %arg3[%c0_3, %c0_4] : memref<1x128xf32, #tpu.memory_space<vmem>>, vector<1x128xf32>
    %4 = vector.broadcast %3 : vector<1x128xf32> to vector<78x128xf32>
    %5 = arith.mulf %2, %4 : vector<78x128xf32>
    %c0_5 = arith.constant 0 : index
    %c0_6 = arith.constant 0 : index
    %6 = vector.load %arg4[%c0_5, %c0_6] : memref<1x128xf32, #tpu.memory_space<vmem>>, vector<1x128xf32>
    %7 = vector.broadcast %6 : vector<1x128xf32> to vector<78x128xf32>
    %8 = arith.addf %5, %7 : vector<78x128xf32>
    %cst = arith.constant 0.000000e+00 : f32
    %9 = vector.broadcast %cst : f32 to vector<78x128xf32>
    %10 = arith.maximumf %8, %9 : vector<78x128xf32>
    %11 = arith.truncf %10 : vector<78x128xf32> to vector<78x128xbf16>
    %c0_7 = arith.constant 0 : index
    %c0_8 = arith.constant 0 : index
    %12 = vector.load %arg5[%c0_7, %c0_8] : memref<128x48xbf16, #tpu.memory_space<vmem>>, vector<128x48xbf16>
    %cst_9 = arith.constant dense<0.000000e+00> : vector<78x48xf32>
    %13 = tpu.matmul %11, %12, %cst_9 {dimension_numbers = #tpu.dot_dimension_numbers<[1], [0], [0], [1], [0, 0, 1, 1], [], []>} : vector<78x128xbf16>, vector<128x48xbf16>, vector<78x48xf32> -> vector<78x48xf32>
    %c0_10 = arith.constant 0 : index
    %c0_11 = arith.constant 0 : index
    %c0_12 = arith.constant 0 : index
    %c0_13 = arith.constant 0 : index
    %14 = vector.load %arg6[%c0_10, %c0_11, %c0_12, %c0_13] : memref<1x1x80x48xf32, #tpu.memory_space<vmem>>, vector<1x1x78x48xf32>
    %15 = vector.shape_cast %14 : vector<1x1x78x48xf32> to vector<78x48xf32>
    %16 = vector.shape_cast %13 : vector<78x48xf32> to vector<1x1x78x48xf32>
    tpu.vector_store %arg6[%c0_10, %c0_11, %c0_12, %c0_13], %16 {strides = array<i32>} : memref<1x1x80x48xf32, #tpu.memory_space<vmem>>, vector<1x1x78x48xf32>,
    %cst_14 = arith.constant 0.000000e+00 : f32
    %17 = vector.broadcast %cst_14 : f32 to vector<2x48xf32>
    %c0_15 = arith.constant 0 : index
    %c0_16 = arith.constant 0 : index
    %c78 = arith.constant 78 : index
    %c0_17 = arith.constant 0 : index
    %18 = vector.load %arg6[%c0_15, %c0_16, %c78, %c0_17] : memref<1x1x80x48xf32, #tpu.memory_space<vmem>>, vector<1x1x2x48xf32>
    %19 = vector.shape_cast %18 : vector<1x1x2x48xf32> to vector<2x48xf32>
    %20 = vector.shape_cast %17 : vector<2x48xf32> to vector<1x1x2x48xf32>
    tpu.vector_store %arg6[%c0_15, %c0_16, %c78, %c0_17], %20 {strides = array<i32>} : memref<1x1x80x48xf32, #tpu.memory_space<vmem>>, vector<1x1x2x48xf32>,
    return
  }
  func.func @transform_0(%arg0: i32, %arg1: i32) -> (i32, i32, i32, i32) {
    %c0_i32 = arith.constant 0 : i32
    %c0_i32_0 = arith.constant 0 : i32
    %c0_i32_1 = arith.constant 0 : i32
    return %arg0, %arg1, %c0_i32, %c0_i32_0 : i32, i32, i32, i32
  }
  func.func @transform_1(%arg0: i32, %arg1: i32) -> (i32, i32) {
    %c0_i32 = arith.constant 0 : i32
    %c0_i32_0 = arith.constant 0 : i32
    %c0_i32_1 = arith.constant 0 : i32
    return %c0_i32, %c0_i32_0 : i32, i32
  }
  func.func @transform_2(%arg0: i32, %arg1: i32) -> (i32, i32) {
    %c0_i32 = arith.constant 0 : i32
    %c0_i32_0 = arith.constant 0 : i32
    %c0_i32_1 = arith.constant 0 : i32
    return %c0_i32, %c0_i32_0 : i32, i32
  }
  func.func @transform_3(%arg0: i32, %arg1: i32) -> (i32, i32) {
    %c0_i32 = arith.constant 0 : i32
    %c0_i32_0 = arith.constant 0 : i32
    %c0_i32_1 = arith.constant 0 : i32
    return %c0_i32, %c0_i32_0 : i32, i32
  }
  func.func @transform_4(%arg0: i32, %arg1: i32) -> (i32, i32, i32, i32) {
    %c0_i32 = arith.constant 0 : i32
    %c0_i32_0 = arith.constant 0 : i32
    %c0_i32_1 = arith.constant 0 : i32
    return %arg0, %arg1, %c0_i32, %c0_i32_0 : i32, i32, i32, i32
  }
}

</mosaic_0001>

<bundles_post_ra>
// kernel: vqvae_decoder.7
= control target key start
LH: loop header
LB: loop body
LE: loop exit
PB: predicated region body
PF: predicated region fallthrough
CT: control target
= control target key end

     0   :  { %s772_s15 = smov 0   ;;  %s774_s16 = smov 0   ;;  %s914_s0 = inlined_call_operand.vmem [shape: bf16[2,4,80,128], index: 0, kind: input, shape index: {}]   ;;  %s915_s1 = inlined_call_operand.vmem [shape: f32[1,128], index: 1, kind: input, shape index: {}]   ;;  %s916_s2 = inlined_call_operand.vmem [shape: f32[1,128], index: 2, kind: input, shape index: {}]   ;;  %s917_s3 = inlined_call_operand.vmem [shape: bf16[128,48], index: 3, kind: input, shape index: {}]   ;;  %s918_s4 = inlined_call_operand.vmem [shape: f32[2,4,80,48], index: 4, kind: output, shape index: {}]  }
   0x1   :  { %s776_s17 = smov 0   ;;  %s778_s18 = smov 0  }
   0x2   :  { %s780_s19 = smov 0  }
   0x3 LB: > { %s23_s20 = sadd.s32 1, %s735_s17  ;;  %s26_s21 = sadd.s32 1, %s739_s18  ;;  %s743_s19 = sphi %s780_s19, %s14_s19   ;;  %s739_s18 = sphi %s778_s18, %s922_s18   ;;  %s735_s17 = sphi %s776_s17, %s921_s17   ;;  %s731_s16 = sphi %s774_s16, %s920_s16   ;;  %s727_s15 = sphi %s772_s15, %s919_s15  }
   0x4   : > { %p24_p0 = scmp.ge.s32.totalorder %s23_s20, 4  ;;  %p554_p1 = scmp.ge.s32.totalorder %s743_s19, 1 }
   0x5   : > { %p182_p2 = scmp.lt.s32.totalorder %s743_s19, 9 }
   0x6   : > { %s924_s20 = smov (%p24_p0, %s23_s20), 0  ;;  %s926_s21 = smov (!%p24_p0, %s26_s21), %s739_s18 }
   0x7   : > { %p183_p3 = pnand %p554_p1, %p182_p2  ;;  %p28_p4 = scmp.ge.s32.totalorder %s926_s21, 2 }
   0x8   : > { %v697_v0 = vld [vmem:[%s917_s3] sm:$0xff] (!%p183_p3)   ;;  %v745_v1 = vmov (!%p183_p3), 0.0   ;;  %v698_v2 = vld [vmem:[%s917_s3 + $0x8] sm:$0xff] (!%p183_p3)   ;;  %p216_p5 = scmp.lt.s32.totalorder (!%p183_p3), %s731_s16, 1  ;;  %p218_p6 = scmp.lt.s32.totalorder (!%p183_p3), %s727_s15, 3  ;;  %vm746_vm0 = vmmov (!%p183_p3), 0  }
   0x9   : > { %s928_s21 = smov (%p28_p4, %s926_s21), 0  ;;  %186 = sbr.rel (%p183_p3) target bundleno = 273 (0x111), region = 36 }
   0xa   : > { %601 = vmatprep.subr.bf16.mxu0 (!%p183_p3), %v745_v1  ;;  %637 = vmatprep.subr.bf16.mxu1 (!%p183_p3), %v745_v1  ;;  %v699_v3 = vld [vmem:[%s917_s3 + $0x10] sm:$0xff] (!%p183_p3)   ;;  %vm453_vm1 = vcmask (!%p183_p3), 386048   ;;  %v700_v4 = vld [vmem:[%s917_s3 + $0x18] sm:$0xff] (!%p183_p3)   ;;  %v701_v11 = vld [vmem:[%s917_s3 + $0x20] sm:$0xff] (!%p183_p3)   ;;  %vm441_vm2 = vcmask (!%p183_p3), 392192   ;;  %vm451_vm3 = vcmask (!%p183_p3), 390144  }
   0xb   : > { %602 = vmatpush3.bf16.msra.mxu0 (!%p183_p3), %v697_v0  ;;  %645 = vmatpush3.bf16.msra.mxu1 (!%p183_p3), %v697_v0  ;;  %v557_v12 = vld [vmem:[%s915_s1] ss:$0 sm:$0xff] (!%p183_p3)  ;;  %v702_v20 = vld [vmem:[%s917_s3 + $0x28] sm:$0xff] (!%p183_p3)   ;;  %v703_v30 = vld [vmem:[%s917_s3 + $0x30] sm:$0xff] (!%p183_p3)  }
   0xc   : > { %603 = vmatprep.subr.bf16.mxu0 (!%p183_p3), %v745_v1  ;;  %638 = vmatprep.subr.bf16.mxu1 (!%p183_p3), %v745_v1  ;;  %v558_v21 = vld [vmem:[%s916_s2] ss:$0 sm:$0xff] (!%p183_p3)  ;;  %v704_v40 = vld [vmem:[%s917_s3 + $0x38] sm:$0xff] (!%p183_p3)  }
   0xd   : > { %617 = vmatprep.mubr.msk.bf16.mxu0 (!%p183_p3), %vm746_vm0, %v745_v1  ;;  %629 = vmatprep.mubr.msk.bf16.mxu1 (!%p183_p3), %vm746_vm0, %v745_v1 }
   0xf   : > { %604 = vmatpush3.bf16.msra.mxu0 (!%p183_p3), %v698_v2  ;;  %646 = vmatpush3.bf16.msra.mxu1 (!%p183_p3), %v698_v2 }
  0x10   : > { %s930_s16 = smov (!%p216_p5, %s731_s16), 1  ;;  %s932_s15 = smov (!%p218_p6, %s727_s15), 3  ;;  %605 = vmatprep.subr.bf16.mxu0 %v745_v1  ;;  %639 = vmatprep.subr.bf16.mxu1 %v745_v1 }
  0x11   : > { %s654_s28 = smul.u32 40, %s930_s16 }
  0x12   : > { %s653_s29 = smul.u32 10, %s932_s15 }
  0x13   : > { %606 = vmatpush3.bf16.msra.mxu0 %v699_v3  ;;  %647 = vmatpush3.bf16.msra.mxu1 %v699_v3 }
  0x14   : > { %s222_s30 = sadd.s32 %s654_s28, %s653_s29  ;;  %607 = vmatprep.subr.bf16.mxu0 %v745_v1  ;;  %640 = vmatprep.subr.bf16.mxu1 %v745_v1 }
  0x15   : > { %s555_s7 = sshll.u32 %s222_s30, 2  ;;  %s556_s8 = sshll.u32 %s222_s30, 3 }
  0x16   : > { %s833_s11 = scalar_lea.vmem %s914_s0, %s555_s7  ;;  %s838_s14 = scalar_lea.vmem %s918_s4, %s556_s8 }
  0x17   : > { %v570_v5 = vld [vmem:[%s833_s11] sm:$0xff]   ;;  %454 = vst.msk [vmem:[%s838_s14 + $0x4e] sm:$0x3] %vm453_vm1, %v745_v1  ;;  %v587_v6 = vld [vmem:[%s833_s11 + $0x18] sm:$0xff]   ;;  %608 = vmatpush3.bf16.msra.mxu0 %v700_v4  ;;  %648 = vmatpush3.bf16.msra.mxu1 %v700_v4  ;;  %v585_v17 = vld [vmem:[%s833_s11 + $0x8] sm:$0xff]  }
  0x18   : > { %v571_v7 = vunpack.c.l.bf16 %v570_v5  ;;  %v572_v8 = vunpack.c.h.bf16 %v570_v5  ;;  %v583_v9 = vunpack.c.l.bf16 %v587_v6  ;;  %v584_v10 = vunpack.c.h.bf16 %v587_v6  ;;  %609 = vmatprep.subr.bf16.mxu0 %v745_v1  ;;  %641 = vmatprep.subr.bf16.mxu1 %v745_v1  ;;  %v243_v18 = vld [vmem:[%s833_s11 + $0x20] sm:$0xf]  ;;  %v244_v19 = vld [vmem:[%s833_s11 + $0x24] sm:$0x7]  ;;  %v586_v39 = vld [vmem:[%s833_s11 + $0x10] sm:$0xff]  }
  0x19   : > { %v575_v22 = vunpack.c.l.bf16 %v585_v17  ;;  %v576_v23 = vunpack.c.h.bf16 %v585_v17  ;;  %v253_v24 = vunpack.c.l.bf16 %v243_v18  ;;  %v254_v25 = vunpack.c.l.bf16 %v244_v19 }
  0x1a   : > { %v262_v13 = vmul.f32 %v571_v7, %v557_v12  ;;  %v263_v14 = vmul.f32 %v572_v8, %v557_v12  ;;  %v268_v15 = vmul.f32 %v583_v9, %v557_v12  ;;  %v269_v16 = vmul.f32 %v584_v10, %v557_v12 }
  0x1b   : > { %610 = vmatpush3.bf16.msra.mxu0 %v701_v11  ;;  %649 = vmatpush3.bf16.msra.mxu1 %v701_v11  ;;  %v264_v31 = vmul.f32 %v575_v22, %v557_v12  ;;  %v265_v32 = vmul.f32 %v576_v23, %v557_v12  ;;  %v270_v33 = vmul.f32 %v557_v12, %v253_v24  ;;  %v579_v43 = vunpack.c.l.bf16 %v586_v39 }
  0x1c   : > { %611 = vmatprep.subr.bf16.mxu0 %v745_v1  ;;  %642 = vmatprep.subr.bf16.mxu1 %v745_v1  ;;  %v279_v26 = vadd.f32 %v558_v21, %v262_v13  ;;  %v280_v27 = vadd.f32 %v558_v21, %v263_v14  ;;  %v285_v28 = vadd.f32 %v558_v21, %v268_v15  ;;  %v580_v44 = vunpack.c.h.bf16 %v586_v39 }
  0x1d   : > { %v286_v29 = vadd.f32 %v558_v21, %v269_v16  ;;  %v271_v34 = vmul.f32 %v557_v12, %v254_v25  ;;  %v281_v41 = vadd.f32 %v558_v21, %v264_v31  ;;  %v282_v42 = vadd.f32 %v558_v21, %v265_v32 }
  0x1e   : > { %v289_v35 = vmax.f32 %v279_v26, 0.0  ;;  %v290_v36 = vmax.f32 %v280_v27, 0.0  ;;  %v295_v37 = vmax.f32 %v285_v28, 0.0  ;;  %v287_v47 = vadd.f32 %v558_v21, %v270_v33 }
  0x1f   : > { %612 = vmatpush3.bf16.msra.mxu0 %v702_v20  ;;  %650 = vmatpush3.bf16.msra.mxu1 %v702_v20  ;;  %v296_v38 = vmax.f32 %v286_v29, 0.0  ;;  %v288_v48 = vadd.f32 %v558_v21, %v271_v34  ;;  %v291_v49 = vmax.f32 %v281_v41, 0.0  ;;  %v292_v50 = vmax.f32 %v282_v42, 0.0 }
  0x20   : > { %613 = vmatprep.subr.bf16.mxu0 %v745_v1  ;;  %643 = vmatprep.subr.bf16.mxu1 %v745_v1  ;;  %v299_v45 = vpack.c.bf16 %v290_v36, %v289_v35  ;;  %v297_v51 = vmax.f32 %v287_v47, 0.0  ;;  %v266_v53 = vmul.f32 %v579_v43, %v557_v12  ;;  %v267_v54 = vmul.f32 %v580_v44, %v557_v12 }
  0x21   : > { %v302_v46 = vpack.c.bf16 %v296_v38, %v295_v37  ;;  %v298_v52 = vmax.f32 %v288_v48, 0.0  ;;  %v300_v55 = vpack.c.bf16 %v292_v50, %v291_v49 }
  0x22   : > { %v283_v57 = vadd.f32 %v558_v21, %v266_v53  ;;  %v284_v58 = vadd.f32 %v558_v21, %v267_v54 }
  0x23   : > { %614 = vmatpush3.bf16.msra.mxu0 %v703_v30  ;;  %651 = vmatpush3.bf16.msra.mxu1 %v703_v30  ;;  %v303_v56 = vpack.c.bf16 %v298_v52, %v297_v51 }
  0x24   : > { %615 = vmatprep.subr.bf16.mxu0 %v745_v1  ;;  %644 = vmatprep.subr.bf16.mxu1 %v745_v1  ;;  %v293_v59 = vmax.f32 %v283_v57, 0.0  ;;  %v294_v60 = vmax.f32 %v284_v58, 0.0 }
  0x26   : > { %v301_v61 = vpack.c.bf16 %v294_v60, %v293_v59 }
  0x27   : > { %616 = vmatpush3.bf16.msra.mxu0 %v704_v40  ;;  %652 = vmatpush3.bf16.msra.mxu1 %v704_v40 }
  0x2a   : > { %618 = vmatmul.mubr.bf16.vlgmr.msra.gmra.mrb[0].mxu0 %v299_v45  ;;  %630 = vmatmul.mubr.bf16.vlgmr.msra.gmra.mrb[0].mxu1 %v302_v46 }
  0x2b   : > { %621 = vmatprep.mubr.msk.bf16.mxu0 %vm746_vm0, %v745_v1  ;;  %633 = vmatprep.mubr.msk.bf16.mxu1 %vm746_vm0, %v745_v1 }
  0x32   : > { %622 = vmatmul.mubr.bf16.gmra.mrb[4].mxu0 %v300_v55  ;;  %634 = vmatmul.mubr.bf16.gmra.mrb[4].mxu1 %v303_v56 }
  0x33   : > { %625 = vmatprep.mubr.msk.bf16.mxu0 %vm746_vm0, %v745_v1 }
  0x3a   : > { %626 = vmatmul.mubr.bf16.gmra.mrb[8].mxu0 %v301_v61 }
  0xfd   : > { %v402_v62 = vpop.f32.mrb[0].mxu0  ;;  %v426_v63 = vpop.f32.mrb[0].mxu1 }
  0xfe   : > { %442 = vst.msk [vmem:[%s838_s14] sm:$0xff] %vm441_vm2, %v402_v62  ;;  %v619_v0 = vpop.f32.mrb[1].mxu0  ;;  %448 = vst.msk [vmem:[%s838_s14 + $0x30] sm:$0xff] %vm441_vm2, %v426_v63  ;;  %v631_v2 = vpop.f32.mrb[1].mxu1 }
  0xff   : > { %v405_v3 = vpop.f32.mrb[2].mxu0  ;;  %v429_v4 = vpop.f32.mrb[2].mxu1 }
 0x100   : > { %443 = vst.msk [vmem:[%s838_s14 + $0x8] sm:$0xff] %vm441_vm2, %v405_v3  ;;  %v620_v1 = vpop.f32.mrb[3].mxu0  ;;  %449 = vst.msk [vmem:[%s838_s14 + $0x38] sm:$0xff] %vm441_vm2, %v429_v4  ;;  %v632_v5 = vpop.f32.mrb[3].mxu1 }
 0x105   : > { %v410_v6 = vpop.f32.mrb[4].mxu0  ;;  %v434_v7 = vpop.f32.mrb[4].mxu1 }
 0x106   : > { %444 = vst.msk [vmem:[%s838_s14 + $0x10] sm:$0xff] %vm441_vm2, %v410_v6  ;;  %v623_v8 = vpop.f32.mrb[5].mxu0  ;;  %450 = vst.msk [vmem:[%s838_s14 + $0x40] sm:$0xff] %vm441_vm2, %v434_v7  ;;  %v635_v9 = vpop.f32.mrb[5].mxu1 }
 0x107   : > { %v413_v10 = vpop.f32.mrb[6].mxu0  ;;  %v437_v11 = vpop.f32.mrb[6].mxu1 }
 0x108   : > { %445 = vst.msk [vmem:[%s838_s14 + $0x18] sm:$0xff] %vm441_vm2, %v413_v10  ;;  %v624_v12 = vpop.f32.mrb[7].mxu0  ;;  %v636_v13 = vpop.f32.mrb[7].mxu1 }
 0x109   : > { %452 = vst.msk [vmem:[%s838_s14 + $0x48] sm:$0x3f] %vm451_vm3, %v437_v11 }
 0x10d   : > { %v418_v14 = vpop.f32.mrb[8].mxu0 }
 0x10e   : > { %446 = vst.msk [vmem:[%s838_s14 + $0x20] sm:$0xff] %vm441_vm2, %v418_v14  ;;  %v627_v15 = vpop.f32.mrb[9].mxu0 }
 0x10f   : > { %v421_v16 = vpop.f32.mrb[10].mxu0 }
 0x110   : > { %447 = vst.msk [vmem:[%s838_s14 + $0x28] sm:$0xff] %vm441_vm2, %v421_v16  ;;  %v628_v17 = vpop.f32.mrb[11].mxu0 }
 0x111 PF: > { %s14_s19 = sadd.s32 1, %s743_s19   ;;  %s919_s15 = smov %s735_s17 }
 0x112   : > { %p11_p7 = scmp.ge.s32.totalorder %s14_s19, 10   ;;  %s920_s16 = smov %s739_s18 }
 0x113   : > { %s921_s17 = smov %s924_s20  ;;  %s922_s18 = smov %s928_s21 }
 0x114   :  { %13 = sbr.rel (!%p11_p7) target bundleno = 3 (0x3), region = 66 }

// kernel: vqvae_decoder.4
= control target key start
LH: loop header
LB: loop body
LE: loop exit
PB: predicated region body
PF: predicated region fallthrough
CT: control target
= control target key end

     0   :  { %s4165_s26 = smov 0   ;;  %s5181_s0 = inlined_call_operand.vmem [shape: bf16[2,100,128], index: 0, kind: input, shape index: {}]   ;;  %s5182_s1 = inlined_call_operand.vmem [shape: f32[1,128], index: 1, kind: input, shape index: {}]   ;;  %s5183_s2 = inlined_call_operand.vmem [shape: f32[1,128], index: 2, kind: input, shape index: {}]   ;;  %s5184_s3 = inlined_call_operand.vmem [shape: bf16[1152,128], index: 3, kind: input, shape index: {}]   ;;  %s5185_s4 = inlined_call_operand.vmem [shape: f32[1,128], index: 4, kind: input, shape index: {}]   ;;  %s5186_s5 = inlined_call_operand.vmem [shape: bf16[128,128], index: 5, kind: input, shape index: {}]   ;;  %s5187_s6 = inlined_call_operand.vmem [shape: f32[1,128], index: 6, kind: input, shape index: {}]   ;;  %s5188_s7 = inlined_call_operand.vmem [shape: bf16[2,100,128], index: 7, kind: output, shape index: {0}]   ;;  %s5189_s8 = inlined_call_operand.vmem [shape: f32[2,2,128], index: 8, kind: output, shape index: {1}]  }
   0x1 LB: > { %s3378_s2 = sadd.s32 4294967295, %s4114_s26   ;;  %p3382_p0 = scmp.ge.s32.totalorder %s4114_s26, 1  ;;  %s4114_s26 = sphi %s4165_s26, %s19_s26  }
   0x2   : > { %p265_p1 = scmp.lt.s32.totalorder %s4114_s26, 3 }
   0x4   : > { %p266_p2 = pnand %p3382_p0, %p265_p1 }
   0x5   : > { %v3963_v0 = vld [vmem:[%s5184_s3 + $0x40] sm:$0xff] (!%p266_p2)   ;;  %v3966_v3 = vld [vmem:[%s5184_s3 + $0x48] sm:$0xff] (!%p266_p2)   ;;  %v3970_v7 = vld [vmem:[%s5184_s3 + $0x50] sm:$0xff] (!%p266_p2)   ;;  %p303_p3 = scmp.lt.s32.totalorder (!%p266_p2), %s3378_s2, 1  ;;  %v357_v20 = vlaneseq (!%p266_p2)  ;;  %v4116_v50 = vmov (!%p266_p2), 0.0|0.0  }
   0x6   : > { %269 = sbr.rel (%p266_p2) target bundleno = 675 (0x2a3), region = 48  ;;  %v3964_v1 = vld [vmem:[%s5184_s3] sm:$0xff] (!%p266_p2)   ;;  %3644 = vmatprep.subr.bf16.mxu0 (!%p266_p2), %v3963_v0  ;;  %v3968_v5 = vld [vmem:[%s5184_s3 + $0x8] sm:$0xff] (!%p266_p2)   ;;  %v3972_v9 = vld [vmem:[%s5184_s3 + $0x10] sm:$0xff] (!%p266_p2)   ;;  %v3398_v51 = vcombine.low (!%p266_p2), %v4116_v50, %v4116_v50 }
   0x7   : > { %v3965_v2 = vld [vmem:[%s5184_s3 + $0xc0] sm:$0xff] (!%p266_p2)   ;;  %3645 = vmatpush3.bf16.msra.mxu0 (!%p266_p2), %v3964_v1  ;;  %v3969_v6 = vld [vmem:[%s5184_s3 + $0xc8] sm:$0xff] (!%p266_p2)   ;;  %v3973_v10 = vld [vmem:[%s5184_s3 + $0xd0] sm:$0xff] (!%p266_p2)   ;;  %v4251_v25 = vshrl.u32 (!%p266_p2), %v357_v20, 7 }
   0x8   : > { %3690 = vmatprep.subr.bf16.mxu1 (!%p266_p2), %v3965_v2  ;;  %v3967_v4 = vld [vmem:[%s5184_s3 + $0x80] sm:$0xff] (!%p266_p2)   ;;  %3646 = vmatprep.subr.bf16.mxu0 (!%p266_p2), %v3966_v3  ;;  %v3971_v8 = vld [vmem:[%s5184_s3 + $0x88] sm:$0xff] (!%p266_p2)   ;;  %v3974_v11 = vld [vmem:[%s5184_s3 + $0x58] sm:$0xff] (!%p266_p2)   ;;  %774 = vst [vmem:[#allocation2 + $0x30] sm:$0x3] (!%p266_p2), %v3398_v51 }
   0x9   : > { %3691 = vmatpush3.bf16.msra.mxu1 (!%p266_p2), %v3967_v4  ;;  %v3975_v12 = vld [vmem:[%s5184_s3 + $0x90] sm:$0xff] (!%p266_p2)   ;;  %v3976_v13 = vld [vmem:[%s5184_s3 + $0x18] sm:$0xff] (!%p266_p2)   ;;  %v3978_v15 = vld [vmem:[%s5184_s3 + $0x60] sm:$0xff] (!%p266_p2)   ;;  %v4267_v30 = vadd.s32 (!%p266_p2), 8, %v4251_v25  ;;  %v360_v32 = vadd.s32 (!%p266_p2), 16, %v4251_v25  ;;  %v361_v34 = vadd.s32 (!%p266_p2), 24, %v4251_v25 }
   0xa   : > { %3692 = vmatprep.subr.bf16.mxu1 (!%p266_p2), %v3969_v6  ;;  %v3977_v14 = vld [vmem:[%s5184_s3 + $0xd8] sm:$0xff] (!%p266_p2)   ;;  %v3980_v17 = vld [vmem:[%s5184_s3 + $0x20] sm:$0xff] (!%p266_p2)   ;;  %v3982_v19 = vld [vmem:[%s5184_s3 + $0x68] sm:$0xff] (!%p266_p2)   ;;  %v362_v48 = vadd.s32 (!%p266_p2), 32, %v4251_v25  ;;  %v4309_v49 = vadd.s32 (!%p266_p2), 40, %v4251_v25  ;;  %v4314_v55 = vadd.s32 (!%p266_p2), 48, %v4251_v25 }
   0xb   : > { %3647 = vmatpush3.bf16.msra.mxu0 (!%p266_p2), %v3968_v5  ;;  %v3979_v16 = vld [vmem:[%s5184_s3 + $0x98] sm:$0xff] (!%p266_p2)   ;;  %v3981_v18 = vld [vmem:[%s5184_s3 + $0xe0] sm:$0xff] (!%p266_p2)   ;;  %v3984_v22 = vld [vmem:[%s5184_s3 + $0x28] sm:$0xff] (!%p266_p2)   ;;  %v4288_v36 = vmul.u32.u64.low (!%p266_p2), 3435973837, %v4267_v30  ;;  %v4289_v37 = vmul.u32.u64.high 3435973837, %v4267_v30, %v4288_v36  ;;  %vm619_vm0 = vcmp.lt.s32.totalorder (!%p266_p2), %v4267_v30, 10 }
   0xc   : > { %3648 = vmatprep.subr.bf16.mxu0 (!%p266_p2), %v3970_v7  ;;  %v3983_v21 = vld [vmem:[%s5184_s3 + $0xa0] sm:$0xff] (!%p266_p2)   ;;  %v3985_v23 = vld [vmem:[%s5184_s3 + $0xe8] sm:$0xff] (!%p266_p2)   ;;  %v3986_v24 = vld [vmem:[%s5184_s3 + $0x70] sm:$0xff] (!%p266_p2)   ;;  %v4295_v40 = vmul.u32.u64.low (!%p266_p2), 3435973837, %v360_v32  ;;  %v4296_v41 = vmul.u32.u64.high 3435973837, %v360_v32, %v4295_v40  ;;  %v4317_v58 = vadd.s32 (!%p266_p2), 56, %v4251_v25 }
   0xd   : > { %3693 = vmatpush3.bf16.msra.mxu1 %v3971_v8  ;;  %s5229_s2 = smov (!%p303_p3, %s3378_s2), 1  ;;  %v3987_v26 = vld [vmem:[%s5184_s3 + $0xa8] sm:$0xff]   ;;  %v3988_v27 = vld [vmem:[%s5184_s3 + $0x30] sm:$0xff]   ;;  %v3990_v29 = vld [vmem:[%s5184_s3 + $0x78] sm:$0xff]   ;;  %v4298_v42 = vmul.u32.u64.low 3435973837, %v361_v34  ;;  %v4299_v43 = vmul.u32.u64.high 3435973837, %v361_v34, %v4298_v42 }
   0xe   : > { %3694 = vmatprep.subr.bf16.mxu1 %v3973_v10  ;;  %s3926_s13 = smul.u32 52, %s5229_s2  ;;  %v3989_v28 = vld [vmem:[%s5184_s3 + $0xf0] sm:$0xff]   ;;  %v3992_v33 = vld [vmem:[%s5184_s3 + $0x38] sm:$0xff]   ;;  %v3998_v45 = vld [vmem:[%s5184_s3 + $0x140] sm:$0xff]   ;;  %v388_v47 = vshrl.u32 %v4289_v37, 3  ;;  %v399_v53 = vshrl.u32 %v4296_v41, 3 }
   0xf   : > { %3649 = vmatpush3.bf16.msra.mxu0 %v3972_v9  ;;  %v3991_v31 = vld [vmem:[%s5184_s3 + $0xb0] sm:$0xff]   ;;  %v3993_v35 = vld [vmem:[%s5184_s3 + $0xf8] sm:$0xff]   ;;  %v410_v54 = vshrl.u32 %v4299_v43, 3  ;;  %v4320_v59 = vadd.s32 64, %v4251_v25  ;;  %v4323_v0 = vmul.u32.u64.low 3435973837, %v362_v48  ;;  %v4324_v1 = vmul.u32.u64.high 3435973837, %v362_v48, %v4323_v0 }
  0x10   : > { %3650 = vmatprep.subr.bf16.mxu0 %v3974_v11  ;;  %s4281_s24 = scalar_lea.vmem %s5181_s0, %s3926_s13  ;;  %v3997_v38 = vld [vmem:[%s5184_s3 + $0xb8] sm:$0xff]   ;;  %v389_v52 = vmul.u32 10, %v388_v47  ;;  %v400_v62 = vmul.u32 10, %v399_v53  ;;  %v4013_v4 = vld [vmem:[%s5184_s3 + $0x1c0] sm:$0xff]   ;;  %v4368_v36 = vadd.s32 80, %v4251_v25  ;;  %s5035_s29 = scalar_lea.vmem %s5188_s7, %s3926_s13 }
  0x11   : > { %3695 = vmatpush3.bf16.msra.mxu1 %v3975_v12  ;;  %v319_v39 = vld [vmem:[%s4281_s24 + $0x4] sm:$0xf]  ;;  %v3630_v44 = vld [vmem:[%s4281_s24 + $0x8] sm:$0xff]   ;;  %v411_v63 = vmul.u32 10, %v410_v54  ;;  %v3631_v8 = vld [vmem:[%s4281_s24 + $0x10] sm:$0xff]   ;;  %v421_v12 = vshrl.u32 %v4324_v1, 3 }
  0x12   : > { %3696 = vmatprep.subr.bf16.mxu1 %v3977_v14  ;;  %v332_v46 = vunpack.c.l.bf16 %v319_v39  ;;  %v3567_v56 = vunpack.c.l.bf16 %v3630_v44  ;;  %v3568_v57 = vunpack.c.h.bf16 %v3630_v44  ;;  %v390_v61 = vsub.s32 %v4267_v30, %v389_v52  ;;  %v4362_v30 = vld [vmem:[%s4281_s24 + $0x18] sm:$0xff]  }
  0x13   : > { %3651 = vmatpush3.bf16.msra.mxu0 %v3976_v13  ;;  %v401_v2 = vsub.s32 %v360_v32, %v400_v62  ;;  %v412_v3 = vsub.s32 %v361_v34, %v411_v63  ;;  %v4336_v13 = vmul.u32.u64.low 3435973837, %v4309_v49  ;;  %v4337_v14 = vmul.u32.u64.high 3435973837, %v4309_v49, %v4336_v13 }
  0x14   : > { %3652 = vmatprep.subr.bf16.mxu0 %v3978_v15  ;;  %v345_v60 = vmax.f32 %v332_v46, 0.0  ;;  %vm515_vm1 = vcmp.ne.s32.totalorder %v390_v61, 0  ;;  %vm528_vm2 = vcmp.lt.s32.totalorder %v390_v61, 0  ;;  %v346_v5 = vmax.f32 %v3567_v56, 0.0 }
  0x15   : > { %3697 = vmatpush3.bf16.msra.mxu1 %v3979_v16  ;;  %v347_v6 = vmax.f32 %v3568_v57, 0.0  ;;  %vm541_vm3 = vmand %vm528_vm2, %vm515_vm1  ;;  %v554_v7 = vadd.s32 10, %v390_v61  ;;  %vm516_vm4 = vcmp.ne.s32.totalorder %v401_v2, 0  ;;  %vm517_vm5 = vcmp.ne.s32.totalorder %v412_v3, 0 }
  0x16   : > { %3698 = vmatprep.subr.bf16.mxu1 %v3981_v18  ;;  %vm529_vm6 = vcmp.lt.s32.totalorder %v401_v2, 0  ;;  %vm530_vm7 = vcmp.lt.s32.totalorder %v412_v3, 0  ;;  %v555_v9 = vadd.s32 10, %v401_v2  ;;  %v556_v10 = vadd.s32 10, %v412_v3 }
  0x17   : > { %3653 = vmatpush3.bf16.msra.mxu0 %v3980_v17  ;;  %vm542_vm8 = vmand %vm529_vm6, %vm516_vm4  ;;  %v4330_v11 = vsel %vm541_vm3, %v554_v7, %v390_v61  ;;  %v3571_v17 = vunpack.c.l.bf16 %v3631_v8  ;;  %v422_v18 = vmul.u32 10, %v421_v12  ;;  %v3575_v39 = vunpack.c.l.bf16 %v4362_v30 }
  0x18   : > { %3654 = vmatprep.subr.bf16.mxu0 %v3982_v19  ;;  %vm543_vm9 = vmand %vm530_vm7, %vm517_vm5  ;;  %vm580_vm10 = vcmp.eq.s32.totalorder %v4330_v11, 0  ;;  %vm593_vm11 = vcmp.eq.s32.totalorder %v4330_v11, 9  ;;  %v4339_v15 = vsel %vm542_vm8, %v555_v9, %v401_v2  ;;  %vm948_vm5 = vcmask 1046532  }
  0x19   : > { %3699 = vmatpush3.bf16.msra.mxu1 %v3983_v21  ;;  %v4341_v16 = vsel %vm543_vm9, %v556_v10, %v412_v3  ;;  %vm606_vm12 = vmor %vm580_vm10, %vm593_vm11  ;;  %vm581_vm13 = vcmp.eq.s32.totalorder %v4339_v15, 0  ;;  %vm594_vm15 = vcmp.eq.s32.totalorder %v4339_v15, 9  ;;  %v423_v21 = vsub.s32 %v362_v48, %v422_v18 }
  0x1a   : > { %3700 = vmatprep.subr.bf16.mxu1 %v3985_v23  ;;  %vm582_vm14 = vcmp.eq.s32.totalorder %v4341_v16, 0  ;;  %vm595_vm1 = vcmp.eq.s32.totalorder %v4341_v16, 9  ;;  %vm632_vm2 = vmor %vm606_vm12, %vm619_vm0  ;;  %vm947_vm0 = vcmask 1042432   ;;  %v4370_v37 = vmax.f32 %v3571_v17, 0.0 }
  0x1b   : > { %3655 = vmatpush3.bf16.msra.mxu0 %v3984_v22  ;;  %vm4349_vm3 = vmor %vm581_vm13, %vm594_vm15  ;;  %v697_v20 = vsel %vm632_vm2, 0.0, %v345_v60  ;;  %v4354_v22 = vmul.u32.u64.low 3435973837, %v4314_v55  ;;  %v4355_v23 = vmul.u32.u64.high 3435973837, %v4314_v55, %v4354_v22  ;;  %vm518_vm6 = vcmp.ne.s32.totalorder %v423_v21, 0 }
  0x1c   : > { %3656 = vmatprep.subr.bf16.mxu0 %v3986_v24  ;;  %vm608_vm4 = vmor %vm582_vm14, %vm595_vm1  ;;  %v698_v24 = vsel %vm4349_vm3, 0.0, %v346_v5  ;;  %vm531_vm7 = vcmp.lt.s32.totalorder %v423_v21, 0  ;;  %v557_v32 = vadd.s32 10, %v423_v21  ;;  %vm805_vm9 = vsmask.f32 3328 }
  0x1d   : > { %3701 = vmatpush3.bf16.msra.mxu1 %v3987_v26  ;;  %v4117_v26 = vmov 0.0   ;;  %vm544_vm8 = vmand %vm531_vm7, %vm518_vm6  ;;  %v443_v40 = vshrl.u32 %v4355_v23, 3  ;;  %vm806_vm10 = vsmask.f32 7440  ;;  %v4386_v44 = vadd.s32 88, %v4251_v25 }
  0x1e   : > { %3702 = vmatprep.subr.bf16.mxu1 %v3989_v28  ;;  %v3572_v28 = vunpack.c.h.bf16 %v3631_v8  ;;  %v4402_v52 = vmul.u32.u64.low 3435973837, %v4320_v59  ;;  %v4403_v53 = vmul.u32.u64.high 3435973837, %v4320_v59, %v4402_v52  ;;  %v3576_v0 = vunpack.c.h.bf16 %v4362_v30  ;;  %vm4416_vm2 = vmor %vm947_vm0, %vm948_vm5 }
  0x1f   : > { %3657 = vmatpush3.bf16.msra.mxu0 %v3988_v27  ;;  %v3587_v27 = vpack.c.bf16 %v697_v20, %v4117_v26  ;;  %v444_v50 = vmul.u32 10, %v443_v40  ;;  %vm4422_vm3 = vmor %vm805_vm9, %vm806_vm10 }
  0x20   : > { %3658 = vmatprep.subr.bf16.mxu0 %v3990_v29  ;;  %v432_v29 = vshrl.u32 %v4337_v14, 3  ;;  %v4379_v42 = vmax.f32 %v3572_v28, 0.0 }
  0x21   : > { %3703 = vmatpush3.bf16.msra.mxu1 %v3991_v31  ;;  %v699_v31 = vsel %vm608_vm4, 0.0, %v347_v6  ;;  %3588 = vst [vmem:[#allocation2] sm:$0xff] %v3587_v27   ;;  %v4412_v6 = vsub.s32 %v4314_v55, %v444_v50 }
  0x22   : > { %3704 = vmatprep.subr.bf16.mxu1 %v3993_v35  ;;  %v433_v34 = vmul.u32 10, %v432_v29  ;;  %v4365_v35 = vadd.s32 72, %v4251_v25 }
  0x23   : > { %3659 = vmatpush3.bf16.msra.mxu0 %v3992_v33  ;;  %v3592_v33 = vpack.c.bf16 %v699_v31, %v698_v24  ;;  %vm520_vm6 = vcmp.ne.s32.totalorder %v4412_v6, 0  ;;  %vm533_vm7 = vcmp.lt.s32.totalorder %v4412_v6, 0 }
  0x24   : > { %3736 = vmatprep.subr.bf16.mxu0 %v3998_v45  ;;  %v434_v41 = vsub.s32 %v4309_v49, %v433_v34  ;;  %v4389_v45 = vmul.u32.u64.low 3435973837, %v4317_v58  ;;  %v4390_v46 = vmul.u32.u64.high 3435973837, %v4317_v58, %v4389_v45  ;;  %v4395_v49 = vmax.f32 %v3575_v39, 0.0 }
  0x25   : > { %3705 = vmatpush3.bf16.msra.mxu1 %v3997_v38  ;;  %v4372_v38 = vsel %vm544_vm8, %v557_v32, %v423_v21  ;;  %3635 = vst [vmem:[#allocation2 + $0x8] sm:$0xff] %v3592_v33   ;;  %vm4455_vm8 = vmand %vm533_vm7, %vm520_vm6 }
  0x26   : > { %3782 = vmatprep.subr.bf16.mxu1 %v4013_v4  ;;  %vm583_vm11 = vcmp.eq.s32.totalorder %v4372_v38, 0  ;;  %vm596_vm12 = vcmp.eq.s32.totalorder %v4372_v38, 9  ;;  %vm519_vm14 = vcmp.ne.s32.totalorder %v434_v41, 0  ;;  %vm532_vm15 = vcmp.lt.s32.totalorder %v434_v41, 0 }
  0x27   : > { %vm4381_vm13 = vmor %vm583_vm11, %vm596_vm12  ;;  %v558_v47 = vadd.s32 10, %v434_v41 }
  0x28   : > { %v700_v48 = vsel %vm4381_vm13, 0.0, %v4370_v37  ;;  %vm4397_vm1 = vmand %vm532_vm15, %vm519_vm14  ;;  %v775_v54 = vld [vmem:[#allocation2] sm:$0xf]  ;;  %v776_v56 = vld [vmem:[#allocation2 + $0x4] sm:$0xf]  ;;  %v559_v37 = vadd.s32 10, %v4412_v6 }
  0x29   : > { %v795_v57 = vld [vmem:[#allocation2] sm:$0xf]  ;;  %785 = vst [vmem:[#allocation3] sm:$0xf] %v775_v54  ;;  %786 = vst [vmem:[#allocation3 + $0x24] sm:$0xf] %v776_v56  ;;  %v4409_v5 = vsel %vm4397_vm1, %v558_v47, %v434_v41 }
  0x2a   : > { %v796_v60 = vld [vmem:[#allocation2 + $0x4] sm:$0xf]  ;;  %v809_v61 = vshrl.u32 %v795_v57, 16  ;;  %v812_v62 = vshll.u32 %v795_v57, 16  ;;  %v927_v63 = vld [vmem:[#allocation2] sm:$0xe] }
  0x2b   : > { %v818_v2 = vshll.u32 %v796_v60, 16  ;;  %v822_v3 = vshrl.u32 %v796_v60, 16  ;;  %v928_v4 = vld [vmem:[#allocation2 + $0x4] sm:$0xf]  ;;  %v3399_v18 = vrot.slane %v927_v63, 9  ;;  %v454_v47 = vshrl.u32 %v4390_v46, 3 }
  0x2c   : > { %v797_v1 = vld [vmem:[#allocation2 + $0x8] sm:$0xf]  ;;  %v811_v7 = vrot.slane %v809_v61, 4  ;;  %v814_v8 = vrot.slane %v812_v62, 5  ;;  %v952_v19 = vrot.slane %v928_v4, 5  ;;  %vm584_vm4 = vcmp.eq.s32.totalorder %v4409_v5, 0 }
  0x2d   : > { %v828_v9 = vshll.u32 %v797_v1, 16  ;;  %v832_v10 = vshrl.u32 %v797_v1, 16  ;;  %v929_v12 = vld [vmem:[#allocation2 + $0x8] sm:$0xf]  ;;  %v820_v14 = vrot.slane %v818_v2, 5  ;;  %v824_v17 = vrot.slane %v822_v3, 4 }
  0x2e   : > { %v999_v20 = vld [vmem:[#allocation2 + $0x4] sm:$0xe]  ;;  %v815_v21 = vor.u32 %v814_v8, %v811_v7  ;;  %v955_v23 = vrot.slane %v929_v12, 5  ;;  %v1000_v24 = vld [vmem:[#allocation2 + $0x8] sm:$0xf]  ;;  %v953_v29 = vsel %vm4416_vm2, %v3399_v18, %v952_v19  ;;  %v954_v31 = vrot.slane %v952_v19, 4 }
  0x2f   : > { %v830_v22 = vrot.slane %v828_v9, 5  ;;  %v834_v55 = vrot.slane %v832_v10, 4  ;;  %v825_v28 = vor.u32 %v824_v17, %v820_v14  ;;  %v1001_v32 = vld [vmem:[#allocation2 + $0xc] sm:$0xf]  ;;  %v3400_v33 = vrot.slane %v999_v20, 9  ;;  %v3633_v8 = vld [vmem:[%s4281_s24 + $0x20] sm:$0xff]  }
  0x30   : > { %v777_v34 = vld [vmem:[#allocation2 + $0x8] sm:$0xf]  ;;  %v816_v39 = vrot.slane %v815_v21, 4  ;;  %989 = vst [vmem:[#allocation3 + $0x8] sm:$0xf] %v953_v29  ;;  %v1021_v41 = vrot.slane %v1000_v24, 5  ;;  %v956_v51 = vsel %vm4416_vm2, %v954_v31, %v955_v23 }
  0x31   : > { %v835_v40 = vor.u32 %v834_v55, %v830_v22  ;;  %v778_v45 = vld [vmem:[#allocation2 + $0xc] sm:$0xf]  ;;  %787 = vst [vmem:[#allocation3 + $0x48] sm:$0xf] %v777_v34  ;;  %v826_v50 = vrot.slane %v825_v28, 4  ;;  %v1024_v52 = vrot.slane %v1001_v32, 5 }
  0x32   : > { %788 = vst [vmem:[#allocation3 + $0x6c] sm:$0xf] %v778_v45  ;;  %v798_v54 = vld [vmem:[#allocation2 + $0xc] sm:$0xf]  ;;  %v821_v56 = vsel %vm4422_vm3, %v816_v39, %v820_v14  ;;  %v957_v57 = vrot.slane %v955_v23, 4  ;;  %v1022_v60 = vsel %vm4416_vm2, %v3400_v33, %v1021_v41  ;;  %v1023_v61 = vrot.slane %v1021_v41, 4 }
  0x33   : > { %990 = vst [vmem:[#allocation3 + $0x2c] sm:$0xf] %v956_v51  ;;  %v930_v46 = vld [vmem:[#allocation2 + $0xc] sm:$0xf]  ;;  %v831_v62 = vsel %vm4422_vm3, %v826_v50, %v830_v22  ;;  %v836_v63 = vrot.slane %v835_v40, 4  ;;  %vm597_vm0 = vcmp.eq.s32.totalorder %v4409_v5, 9 }
  0x34   : > { %917 = vst [vmem:[#allocation3 + $0x4] sm:$0xf] %v821_v56  ;;  %1058 = vst [vmem:[#allocation3 + $0xc] sm:$0xf] %v1022_v60  ;;  %v838_v1 = vshll.u32 %v798_v54, 16  ;;  %v1025_v2 = vsel %vm4416_vm2, %v1023_v61, %v1024_v52  ;;  %v842_v3 = vshrl.u32 %v798_v54, 16 }
  0x35   : > { %918 = vst [vmem:[#allocation3 + $0x28] sm:$0xf] %v831_v62  ;;  %vm610_vm5 = vmor %vm584_vm4, %vm597_vm0  ;;  %v958_v4 = vrot.slane %v930_v46, 5  ;;  %v455_v7 = vmul.u32 10, %v454_v47  ;;  %v351_v18 = vmax.f32 %v3576_v0, 0.0  ;;  %v4463_v20 = vrot.slane %v1024_v52, 4 }
  0x36   : > { %1059 = vst [vmem:[#allocation3 + $0x30] sm:$0xf] %v1025_v2  ;;  %v701_v9 = vsel %vm610_vm5, 0.0, %v4379_v42  ;;  %v840_v10 = vrot.slane %v838_v1, 5  ;;  %v844_v14 = vrot.slane %v842_v3, 4  ;;  %v3580_v0 = vunpack.c.h.bf16 %v3633_v8  ;;  %v3999_v22 = vld [vmem:[%s5184_s3 + $0x100] sm:$0xff]  }
  0x37   : > { %v3597_v12 = vpack.c.bf16 %v701_v9, %v700_v48  ;;  %v959_v17 = vsel %vm4416_vm2, %v957_v57, %v958_v4  ;;  %v456_v43 = vsub.s32 %v4317_v58, %v455_v7  ;;  %v3579_v48 = vunpack.c.l.bf16 %v3633_v8  ;;  %v4003_v23 = vld [vmem:[%s5184_s3 + $0x148] sm:$0xff]   ;;  %v4014_v28 = vld [vmem:[%s5184_s3 + $0x180] sm:$0xff]   ;;  %v3994_v31 = vld [vmem:[#allocation3] ss:$36 sps:$4 sm:$0xff]  }
  0x38   : > { %v841_v42 = vsel %vm4422_vm3, %v836_v63, %v840_v10  ;;  %991 = vst [vmem:[#allocation3 + $0x50] sm:$0xf] %v959_v17  ;;  %v845_v21 = vor.u32 %v844_v14, %v840_v10  ;;  %v960_v30 = vrot.slane %v958_v4, 4  ;;  %v4471_v58 = vsel %vm4455_vm8, %v559_v37, %v4412_v6  ;;  %v4016_v32 = vld [vmem:[%s5184_s3 + $0x1c8] sm:$0xff]   ;;  %v4010_v51 = vld [vmem:[%s5184_s3 + $0x150] sm:$0xff]  }
  0x39   : > { %3636 = vst [vmem:[#allocation2 + $0x10] sm:$0xff] %v3597_v12   ;;  %919 = vst [vmem:[#allocation3 + $0x4c] sm:$0xf] %v841_v42  ;;  %vm521_vm9 = vcmp.ne.s32.totalorder %v456_v43, 0  ;;  %vm534_vm10 = vcmp.lt.s32.totalorder %v456_v43, 0  ;;  %v560_v55 = vadd.s32 10, %v456_v43 }
  0x3a   : > { %v4476_v24 = vrot.slane %v845_v21, 4  ;;  %vm547_vm11 = vmand %vm534_vm10, %vm521_vm9  ;;  %vm585_vm12 = vcmp.eq.s32.totalorder %v4471_v58, 0  ;;  %vm598_vm13 = vcmp.eq.s32.totalorder %v4471_v58, 9  ;;  %v465_v29 = vshrl.u32 %v4403_v53, 3  ;;  %v4000_v39 = vld [vmem:[#allocation3 + $0x8] ss:$36 sps:$4 sm:$0xff]  }
  0x3b   : > { %v4487_v33 = vsel %vm547_vm11, %v560_v55, %v456_v43  ;;  %v4489_v34 = vmax.f32 %v3579_v48, 0.0  ;;  %v4004_v41 = vld [vmem:[%s5184_s3 + $0x108] sm:$0xff]   ;;  %vm4496_vm1 = vmor %vm585_vm12, %vm598_vm13  ;;  %v4500_v45 = vmax.f32 %v3580_v0, 0.0  ;;  %v4012_v8 = vld [vmem:[%s5184_s3 + $0x110] sm:$0xff]  }
  0x3c   : > { %v3996_v6 = vld [vmem:[#allocation3 + $0x4] ss:$36 sps:$4 sm:$0xff]   ;;  %vm586_vm14 = vcmp.eq.s32.totalorder %v4487_v33, 0  ;;  %vm599_vm15 = vcmp.eq.s32.totalorder %v4487_v33, 9  ;;  %v4503_v47 = vmul.u32.u64.low 3435973837, %v4365_v35  ;;  %v4504_v50 = vmul.u32.u64.high 3435973837, %v4365_v35, %v4503_v47 }
  0x3d   : > { %v4002_v40 = vld [vmem:[#allocation3 + $0xc] ss:$36 sps:$4 sm:$0xff]   ;;  %2468 = vmatprep.mubr.bf16.mxu0 %v3996_v6  ;;  %vm4509_vm4 = vmor %vm586_vm14, %vm599_vm15  ;;  %v702_v54 = vsel %vm4496_vm1, 0.0, %v4395_v49  ;;  %v4020_v56 = vld [vmem:[%s5184_s3 + $0x188] sm:$0xff]   ;;  %v466_v57 = vmul.u32 10, %v465_v29 }
  0x3e   : > { %2469 = vmatmul.mubr.bf16.vlgmr.msra.gmra.mrb[0].mxu0 %v3994_v31  ;;  %2541 = vmatprep.mubr.bf16.mxu1 %v4002_v40  ;;  %v703_v46 = vsel %vm4509_vm4, 0.0, %v351_v18  ;;  %v4025_v49 = vld [vmem:[%s5184_s3 + $0x1d0] sm:$0xff]   ;;  %v476_v10 = vshrl.u32 %v4504_v50, 3  ;;  %v4015_v18 = vld [vmem:[%s5184_s3 + $0x158] sm:$0xff]   ;;  %v4026_v53 = vld [vmem:[%s5184_s3 + $0x160] sm:$0xff]  }
  0x3f   : > { %3737 = vmatpush3.bf16.msra.mxu0 %v3999_v22  ;;  %2542 = vmatmul.mubr.bf16.vlgmr.msra.gmra.mrb[0].mxu1 %v4000_v39  ;;  %v3602_v3 = vpack.c.bf16 %v703_v46, %v702_v54  ;;  %v467_v43 = vsub.s32 %v4320_v59, %v466_v57  ;;  %v4027_v22 = vld [vmem:[%s5184_s3 + $0x190] sm:$0xff]   ;;  %v4032_v50 = vld [vmem:[%s5184_s3 + $0x198] sm:$0xff]   ;;  %v4039_v54 = vld [vmem:[%s5184_s3 + $0x1e0] sm:$0xff]  }
  0x40   : > { %v799_v60 = vld [vmem:[#allocation2 + $0x10] sm:$0xf]  ;;  %3738 = vmatprep.subr.bf16.mxu0 %v4003_v23  ;;  %3783 = vmatpush3.bf16.msra.mxu1 %v4014_v28  ;;  %v1003_v4 = vld [vmem:[#allocation2 + $0x14] sm:$0xf]  ;;  %v477_v47 = vmul.u32 10, %v476_v10 }
  0x41   : > { %v931_v61 = vld [vmem:[#allocation2 + $0x10] sm:$0xf]  ;;  %v848_v62 = vshll.u32 %v799_v60, 16  ;;  %v852_v63 = vshrl.u32 %v799_v60, 16  ;;  %3784 = vmatprep.subr.bf16.mxu1 %v4016_v32  ;;  %v1030_v17 = vrot.slane %v1003_v4, 5  ;;  %3637 = vst [vmem:[#allocation2 + $0x18] sm:$0xff] %v3602_v3  }
  0x42   : > { %v961_v1 = vrot.slane %v931_v61, 5  ;;  %v1002_v2 = vld [vmem:[#allocation2 + $0x10] sm:$0xf]  ;;  %v780_v19 = vld [vmem:[#allocation2 + $0x14] sm:$0xf]  ;;  %vm522_vm0 = vcmp.ne.s32.totalorder %v467_v43, 0  ;;  %v478_v57 = vsub.s32 %v4365_v35, %v477_v47 }
  0x43   : > { %v1027_v7 = vrot.slane %v1002_v2, 5  ;;  %v779_v9 = vld [vmem:[#allocation2 + $0x10] sm:$0xf]  ;;  %v850_v12 = vrot.slane %v848_v62, 5  ;;  %v800_v42 = vld [vmem:[#allocation2 + $0x14] sm:$0xf]  ;;  %3739 = vmatpush3.bf16.msra.mxu0 %v4004_v41 }
  0x44   : > { %v962_v14 = vsel %vm4416_vm2, %v960_v30, %v961_v1  ;;  %789 = vst [vmem:[#allocation3 + $0x90] sm:$0xf] %v779_v9  ;;  %790 = vst [vmem:[#allocation3 + $0xb4] sm:$0xf] %v780_v19  ;;  %v854_v21 = vrot.slane %v852_v63, 4  ;;  %v858_v30 = vshll.u32 %v800_v42, 16  ;;  %3740 = vmatprep.subr.bf16.mxu0 %v4010_v51  ;;  %3785 = vmatpush3.bf16.msra.mxu1 %v4020_v56 }
  0x45   : > { %992 = vst [vmem:[#allocation3 + $0x74] sm:$0xf] %v962_v14  ;;  %v1028_v37 = vsel %vm4416_vm2, %v4463_v20, %v1027_v7  ;;  %v1029_v48 = vrot.slane %v1027_v7, 4  ;;  %v932_v0 = vld [vmem:[#allocation2 + $0x14] sm:$0xf]  ;;  %v851_v55 = vsel %vm4422_vm3, %v4476_v24, %v850_v12  ;;  %v862_v59 = vshrl.u32 %v800_v42, 16  ;;  %3786 = vmatprep.subr.bf16.mxu1 %v4025_v49 }
  0x46   : > { %1060 = vst [vmem:[#allocation3 + $0x54] sm:$0xf] %v1028_v37  ;;  %v963_v23 = vrot.slane %v961_v1, 4  ;;  %v964_v28 = vrot.slane %v932_v0, 5  ;;  %v4029_v20 = vld [vmem:[%s5184_s3 + $0x1d8] sm:$0xff]   ;;  %v855_v31 = vor.u32 %v854_v21, %v850_v12  ;;  %v860_v6 = vrot.slane %v858_v30, 5 }
  0x47   : > { %920 = vst [vmem:[#allocation3 + $0x70] sm:$0xf] %v851_v55  ;;  %v1031_v29 = vsel %vm4416_vm2, %v1029_v48, %v1030_v17  ;;  %v4019_v24 = vld [vmem:[%s5184_s3 + $0x118] sm:$0xff]   ;;  %v1032_v32 = vrot.slane %v1030_v17, 4  ;;  %v864_v39 = vrot.slane %v862_v59, 4  ;;  %3741 = vmatpush3.bf16.msra.mxu0 %v4012_v8  ;;  %vm535_vm5 = vcmp.lt.s32.totalorder %v467_v43, 0 }
  0x48   : > { %1061 = vst [vmem:[#allocation3 + $0x78] sm:$0xf] %v1031_v29  ;;  %v965_v40 = vsel %vm4416_vm2, %v963_v23, %v964_v28  ;;  %v966_v41 = vrot.slane %v964_v28, 4  ;;  %v856_v51 = vrot.slane %v855_v31, 4  ;;  %v561_v52 = vadd.s32 10, %v467_v43  ;;  %3742 = vmatprep.subr.bf16.mxu0 %v4015_v18  ;;  %3787 = vmatpush3.bf16.msra.mxu1 %v4027_v22  ;;  %vm548_vm6 = vmand %vm535_vm5, %vm522_vm0  ;;  %v4028_v8 = vld [vmem:[%s5184_s3 + $0x120] sm:$0xff]  }
  0x49   : > { %993 = vst [vmem:[#allocation3 + $0x98] sm:$0xf] %v965_v40  ;;  %v865_v56 = vor.u32 %v864_v39, %v860_v6  ;;  %v4564_v60 = vmul.u32.u64.low 3435973837, %v4368_v36  ;;  %v4565_v61 = vmul.u32.u64.high 3435973837, %v4368_v36, %v4564_v60  ;;  %v801_v46 = vld [vmem:[#allocation2 + $0x18] sm:$0xf]  ;;  %3788 = vmatprep.subr.bf16.mxu1 %v4029_v20 }
  0x4a   : > { %v861_v62 = vsel %vm4422_vm3, %v856_v51, %v860_v6  ;;  %v933_v63 = vld [vmem:[#allocation2 + $0x18] sm:$0xf]  ;;  %v4570_v2 = vsel %vm548_vm6, %v561_v52, %v467_v43  ;;  %v868_v49 = vshll.u32 %v801_v46, 16  ;;  %v872_v4 = vshrl.u32 %v801_v46, 16  ;;  %v4572_v7 = vld [vmem:[#allocation2 + $0x1c] sm:$0xf] }
  0x4b   : > { %v1004_v1 = vld [vmem:[#allocation2 + $0x18] sm:$0xf]  ;;  %v866_v3 = vrot.slane %v865_v56, 4  ;;  %921 = vst [vmem:[#allocation3 + $0x94] sm:$0xf] %v861_v62  ;;  %v967_v35 = vrot.slane %v933_v63, 5  ;;  %3743 = vmatpush3.bf16.msra.mxu0 %v4019_v24 }
  0x4c   : > { %v1033_v9 = vrot.slane %v1004_v1, 5  ;;  %v1036_v10 = vrot.slane %v4572_v7, 5  ;;  %vm523_vm7 = vcmp.ne.s32.totalorder %v478_v57, 0  ;;  %vm536_vm8 = vcmp.lt.s32.totalorder %v478_v57, 0  ;;  %v4034_v12 = vld [vmem:[%s5184_s3 + $0x168] sm:$0xff]   ;;  %v4040_v14 = vld [vmem:[%s5184_s3 + $0x1a0] sm:$0xff]   ;;  %3744 = vmatprep.subr.bf16.mxu0 %v4026_v53  ;;  %3789 = vmatpush3.bf16.msra.mxu1 %v4032_v50 }
  0x4d   : > { %v4007_v18 = vld [vmem:[#allocation3 + $0x48] ss:$36 sps:$4 sm:$0xff]   ;;  %v870_v19 = vrot.slane %v868_v49, 5  ;;  %v968_v42 = vsel %vm4416_vm2, %v966_v41, %v967_v35  ;;  %v4011_v37 = vld [vmem:[#allocation3 + $0x50] ss:$36 sps:$4 sm:$0xff]   ;;  %3790 = vmatprep.subr.bf16.mxu1 %v4039_v54  ;;  %vm4592_vm9 = vmand %vm536_vm8, %vm523_vm7  ;;  %v562_v22 = vadd.s32 10, %v478_v57 }
  0x4e   : > { %v4005_v17 = vld [vmem:[#allocation3 + $0x4c] ss:$36 sps:$4 sm:$0xff]   ;;  %994 = vst [vmem:[#allocation3 + $0xbc] sm:$0xf] %v968_v42  ;;  %v1034_v48 = vsel %vm4416_vm2, %v1032_v32, %v1033_v9  ;;  %v1035_v21 = vrot.slane %v1033_v9, 4  ;;  %vm587_vm10 = vcmp.eq.s32.totalorder %v4570_v2, 0 }
  0x4f   : > { %v4008_v43 = vld [vmem:[#allocation3 + $0x54] ss:$36 sps:$4 sm:$0xff]   ;;  %2476 = vmatprep.mubr.bf16.mxu0 %v4005_v17  ;;  %v871_v30 = vsel %vm4422_vm3, %v866_v3, %v870_v19  ;;  %1062 = vst [vmem:[#allocation3 + $0x9c] sm:$0xf] %v1034_v48  ;;  %vm600_vm11 = vcmp.eq.s32.totalorder %v4570_v2, 9  ;;  %v874_v6 = vrot.slane %v872_v4, 4  ;;  %3745 = vmatpush3.bf16.msra.mxu0 %v4028_v8  ;;  %v4617_v39 = vsel %vm4592_vm9, %v562_v22, %v478_v57 }
  0x50   : > { %v781_v55 = vld [vmem:[#allocation2 + $0x18] sm:$0xf]  ;;  %v4037_v59 = vld [vmem:[%s5184_s3 + $0x128] sm:$0xff]   ;;  %2477 = vmatmul.mubr.bf16.gmra.mrb[4].mxu0 %v4007_v18  ;;  %2549 = vmatprep.mubr.bf16.mxu1 %v4008_v43  ;;  %922 = vst [vmem:[#allocation3 + $0xb8] sm:$0xf] %v871_v30  ;;  %v1037_v28 = vsel %vm4416_vm2, %v1035_v21, %v1036_v10  ;;  %vm4608_vm12 = vmor %vm587_vm10, %vm600_vm11  ;;  %v969_v24 = vrot.slane %v967_v35, 4 }
  0x51   : > { %v4043_v23 = vld [vmem:[%s5184_s3 + $0x1e8] sm:$0xff]   ;;  %v782_v29 = vld [vmem:[#allocation2 + $0x1c] sm:$0xf]  ;;  %791 = vst [vmem:[#allocation3 + $0xd8] sm:$0xf] %v781_v55  ;;  %v4041_v32 = vld [vmem:[%s5184_s3 + $0x170] sm:$0xff]   ;;  %2550 = vmatmul.mubr.bf16.gmra.mrb[4].mxu1 %v4011_v37  ;;  %v875_v51 = vor.u32 %v874_v6, %v870_v19  ;;  %3746 = vmatprep.subr.bf16.mxu0 %v4034_v12 }
  0x52   : > { %v802_v31 = vld [vmem:[#allocation2 + $0x1c] sm:$0xf]  ;;  %1063 = vst [vmem:[#allocation3 + $0xc0] sm:$0xf] %v1037_v28  ;;  %v704_v40 = vsel %vm4608_vm12, 0.0, %v4489_v34  ;;  %v4046_v50 = vld [vmem:[%s5184_s3 + $0x1a8] sm:$0xff]   ;;  %3791 = vmatpush3.bf16.msra.mxu1 %v4040_v14 }
  0x53   : > { %792 = vst [vmem:[#allocation3 + $0xfc] sm:$0xf] %v782_v29  ;;  %v878_v41 = vshll.u32 %v802_v31, 16  ;;  %v882_v53 = vshrl.u32 %v802_v31, 16  ;;  %v934_v47 = vld [vmem:[#allocation2 + $0x1c] sm:$0xf]  ;;  %3792 = vmatprep.subr.bf16.mxu1 %v4043_v23  ;;  %3747 = vmatpush3.bf16.msra.mxu0 %v4037_v59 }
  0x54   : > { %vm588_vm13 = vcmp.eq.s32.totalorder %v4617_v39, 0  ;;  %vm601_vm14 = vcmp.eq.s32.totalorder %v4617_v39, 9  ;;  %v970_v52 = vrot.slane %v934_v47, 5  ;;  %v4042_v34 = vld [vmem:[%s5184_s3 + $0x130] sm:$0xff]   ;;  %v876_v57 = vrot.slane %v875_v51, 4  ;;  %v3634_v62 = vld [vmem:[%s4281_s24 + $0x28] sm:$0xff]   ;;  %3748 = vmatprep.subr.bf16.mxu0 %v4041_v32 }
  0x55   : > { %vm614_vm15 = vmor %vm588_vm13, %vm601_vm14  ;;  %v4052_v54 = vld [vmem:[%s5184_s3 + $0x1f0] sm:$0xff]   ;;  %v880_v60 = vrot.slane %v878_v41, 5  ;;  %v884_v1 = vrot.slane %v882_v53, 4  ;;  %v487_v3 = vshrl.u32 %v4565_v61, 3  ;;  %v4051_v49 = vld [vmem:[%s5184_s3 + $0x178] sm:$0xff]   ;;  %v3583_v61 = vunpack.c.l.bf16 %v3634_v62 }
  0x56   : > { %v705_v56 = vsel %vm614_vm15, 0.0, %v4500_v45  ;;  %v971_v46 = vsel %vm4416_vm2, %v969_v24, %v970_v52  ;;  %3793 = vmatpush3.bf16.msra.mxu1 %v4046_v50  ;;  %v4644_v45 = vmul.u32.u64.low 3435973837, %v4386_v44  ;;  %v4645_v35 = vmul.u32.u64.high 3435973837, %v4386_v44, %v4644_v45  ;;  %v4054_v8 = vld [vmem:[%s5184_s3 + $0x1b0] sm:$0xff]   ;;  %v4021_v12 = vld [vmem:[#allocation3 + $0x90] ss:$36 sps:$4 sm:$0xff]  }
  0x57   : > { %v3607_v63 = vpack.c.bf16 %v705_v56, %v704_v40  ;;  %995 = vst [vmem:[#allocation3 + $0xe0] sm:$0xf] %v971_v46  ;;  %v881_v4 = vsel %vm4422_vm3, %v876_v57, %v880_v60  ;;  %v4017_v9 = vld [vmem:[#allocation3 + $0x94] ss:$36 sps:$4 sm:$0xff]   ;;  %v3584_v14 = vunpack.c.h.bf16 %v3634_v62  ;;  %3794 = vmatprep.subr.bf16.mxu1 %v4052_v54  ;;  %v4053_v17 = vld [vmem:[%s5184_s3 + $0x138] sm:$0xff]   ;;  %v488_v42 = vmul.u32 10, %v487_v3  ;;  %3749 = vmatpush3.bf16.msra.mxu0 %v4042_v34 }
  0x58   : > { %923 = vst [vmem:[#allocation3 + $0xdc] sm:$0xf] %v881_v4  ;;  %v4024_v19 = vld [vmem:[#allocation3 + $0x98] ss:$36 sps:$4 sm:$0xff]   ;;  %2484 = vmatprep.mubr.bf16.mxu0 %v4017_v9  ;;  %v885_v43 = vor.u32 %v884_v1, %v880_v60  ;;  %v498_v48 = vshrl.u32 %v4645_v35, 3  ;;  %v4055_v21 = vld [vmem:[%s5184_s3 + $0x1f8] sm:$0xff]   ;;  %3750 = vmatprep.subr.bf16.mxu0 %v4051_v49 }
  0x59   : > { %3638 = vst [vmem:[#allocation2 + $0x20] sm:$0xff] %v3607_v63   ;;  %v4022_v18 = vld [vmem:[#allocation3 + $0x9c] ss:$36 sps:$4 sm:$0xff]   ;;  %2485 = vmatmul.mubr.bf16.gmra.mrb[8].mxu0 %v4021_v12  ;;  %v489_v37 = vsub.s32 %v4368_v36, %v488_v42  ;;  %v4658_v30 = vld [vmem:[#allocation2 + $0x4] sm:$0xe]  ;;  %v972_v0 = vrot.slane %v970_v52, 4 }
  0x5a   : > { %2557 = vmatprep.mubr.bf16.mxu1 %v4022_v18  ;;  %v1038_v22 = vrot.slane %v1036_v10, 4  ;;  %v4662_v55 = vmax.f32 %v3583_v61, 0.0  ;;  %v4664_v59 = vmax.f32 %v3584_v14, 0.0  ;;  %v4666_v23 = vld [vmem:[#allocation2 + $0x8] sm:$0xf]  ;;  %v499_v36 = vmul.u32 10, %v498_v48  ;;  %3795 = vmatpush3.bf16.msra.mxu1 %v4054_v8 }
  0x5b   : > { %2558 = vmatmul.mubr.bf16.gmra.mrb[8].mxu1 %v4024_v19  ;;  %vm524_vm1 = vcmp.ne.s32.totalorder %v489_v37, 0  ;;  %vm537_vm4 = vcmp.lt.s32.totalorder %v489_v37, 0  ;;  %v563_v28 = vadd.s32 10, %v489_v37  ;;  %v886_v20 = vrot.slane %v885_v43, 4  ;;  %3751 = vmatpush3.bf16.msra.mxu0 %v4053_v17  ;;  %v4059_v31 = vld [vmem:[%s5184_s3 + $0x1b8] sm:$0xff]  }
  0x5c   : > { %vm550_vm0 = vmand %vm537_vm4, %vm524_vm1  ;;  %vm655_vm5 = vcmp.ge.s32.totalorder %v4386_v44, 90  ;;  %3796 = vmatprep.subr.bf16.mxu1 %v4055_v21  ;;  %v1083_v7 = vshrl.u32 %v4658_v30, 16  ;;  %v1086_v10 = vshll.u32 %v4658_v30, 16  ;;  %v1092_v29 = vshrl.u32 %v4666_v23, 16  ;;  %3854 = vmatprep.subr.bf16.mxu0 %v4117_v26  ;;  %v1070_v14 = vld [vmem:[#allocation2 + $0xc] sm:$0xf] }
  0x5d   : > { %v500_v32 = vsub.s32 %v4386_v44, %v499_v36  ;;  %v576_v40 = vsel %vm550_vm0, %v563_v28, %v489_v37  ;;  %v1095_v41 = vshll.u32 %v4666_v23, 16  ;;  %vm1228_vm6 = vcmask 1041408   ;;  %v1206_v28 = vld [vmem:[#allocation2 + $0x4] sm:$0xc] }
  0x5e   : > { %vm1229_vm7 = vcmask 1045508   ;;  %vm589_vm8 = vcmp.eq.s32.totalorder %v576_v40, 0  ;;  %vm1079_vm9 = vsmask.f32 2304  ;;  %vm1080_vm10 = vsmask.f32 6416  ;;  %3797 = vmatpush3.bf16.msra.mxu1 %v4059_v31 }
  0x5f   : > { %vm525_vm11 = vcmp.ne.s32.totalorder %v500_v32, 0  ;;  %3890 = vmatprep.subr.bf16.mxu1 %v4117_v26  ;;  %vm538_vm12 = vcmp.lt.s32.totalorder %v500_v32, 0  ;;  %v564_v8 = vadd.s32 10, %v500_v32  ;;  %vm602_vm14 = vcmp.eq.s32.totalorder %v576_v40, 9  ;;  %v4714_v40 = vld [vmem:[#allocation2 + $0xc] sm:$0xf] }
  0x60   : > { %v803_v6 = vld [vmem:[#allocation2 + $0x20] sm:$0xf]  ;;  %v1007_v52 = vld [vmem:[#allocation2 + $0x24] sm:$0xf]  ;;  %vm551_vm13 = vmand %vm538_vm12, %vm525_vm11  ;;  %v3401_v23 = vrot.slane %v1206_v28, 10  ;;  %vm1520_vm11 = vcmask 1044484  }
  0x61   : > { %v935_v24 = vld [vmem:[#allocation2 + $0x20] sm:$0xf]  ;;  %v888_v53 = vshll.u32 %v803_v6, 16  ;;  %v892_v47 = vshrl.u32 %v803_v6, 16  ;;  %v1042_v60 = vrot.slane %v1007_v52, 5  ;;  %v577_v18 = vsel %vm551_vm13, %v564_v8, %v500_v32  ;;  %vm4689_vm15 = vmor %vm589_vm8, %vm602_vm14 }
  0x62   : > { %v973_v50 = vrot.slane %v935_v24, 5  ;;  %v1006_v51 = vld [vmem:[#allocation2 + $0x20] sm:$0xf]  ;;  %v784_v46 = vld [vmem:[#allocation2 + $0x24] sm:$0x7]  ;;  %vm590_vm1 = vcmp.eq.s32.totalorder %v577_v18, 0 }
  0x63   : > { %v1039_v34 = vrot.slane %v1006_v51, 5  ;;  %v783_v54 = vld [vmem:[#allocation2 + $0x20] sm:$0xf]  ;;  %v890_v56 = vrot.slane %v888_v53, 5  ;;  %v804_v62 = vld [vmem:[#allocation2 + $0x24] sm:$0xf] }
  0x64   : > { %v974_v57 = vsel %vm4416_vm2, %v972_v0, %v973_v50  ;;  %793 = vst [vmem:[#allocation3 + $0x120] sm:$0xf] %v783_v54  ;;  %794 = vst [vmem:[#allocation3 + $0x144] sm:$0x7] %v784_v46  ;;  %v894_v3 = vrot.slane %v892_v47, 4  ;;  %v898_v49 = vshll.u32 %v804_v62, 16 }
  0x65   : > { %996 = vst [vmem:[#allocation3 + $0x104] sm:$0xf] %v974_v57  ;;  %v1040_v63 = vsel %vm4416_vm2, %v1038_v22, %v1039_v34  ;;  %v1041_v1 = vrot.slane %v1039_v34, 4  ;;  %v936_v4 = vld [vmem:[#allocation2 + $0x24] sm:$0xf]  ;;  %v891_v45 = vsel %vm4422_vm3, %v886_v20, %v890_v56  ;;  %v902_v35 = vshrl.u32 %v804_v62, 16 }
  0x66   : > { %1064 = vst [vmem:[#allocation3 + $0xe4] sm:$0xf] %v1040_v63  ;;  %924 = vst [vmem:[#allocation3 + $0x100] sm:$0xf] %v891_v45  ;;  %v895_v12 = vor.u32 %v894_v3, %v890_v56  ;;  %v900_v61 = vrot.slane %v898_v49, 5  ;;  %v975_v42 = vrot.slane %v973_v50, 4 }
  0x67   : > { %v1043_v9 = vsel %vm4416_vm2, %v1041_v1, %v1042_v60  ;;  %v904_v17 = vrot.slane %v902_v35, 4  ;;  %v976_v43 = vrot.slane %v936_v4, 5  ;;  %vm603_vm4 = vcmp.eq.s32.totalorder %v577_v18, 9  ;;  %v1207_v32 = vld [vmem:[#allocation2 + $0x8] sm:$0xf] }
  0x68   : > { %1065 = vst [vmem:[#allocation3 + $0x108] sm:$0xf] %v1043_v9  ;;  %v896_v37 = vrot.slane %v895_v12, 4  ;;  %v706_v48 = vsel %vm4689_vm15, 0.0, %v4662_v55  ;;  %vm616_vm0 = vmor %vm590_vm1, %vm603_vm4  ;;  %v4698_v36 = vrot.slane %v1042_v60, 4  ;;  %v1085_v55 = vrot.slane %v1083_v7, 5 }
  0x69   : > { %v905_v21 = vor.u32 %v904_v17, %v900_v61  ;;  %v977_v0 = vsel %vm4416_vm2, %v975_v42, %v976_v43  ;;  %v978_v22 = vrot.slane %v976_v43, 4  ;;  %vm4704_vm8 = vmor %vm616_vm0, %vm655_vm5  ;;  %v1088_v6 = vrot.slane %v1086_v10, 6  ;;  %v1282_v10 = vld [vmem:[#allocation2 + $0x8] sm:$0xc]  ;;  %v4033_v34 = vld [vmem:[#allocation3 + $0xd8] ss:$36 sps:$4 sm:$0xff]  }
  0x6a   : > { %v901_v20 = vsel %vm4422_vm3, %v896_v37, %v900_v61  ;;  %997 = vst [vmem:[#allocation3 + $0x128] sm:$0xf] %v977_v0  ;;  %v1094_v24 = vrot.slane %v1092_v29, 5  ;;  %v707_v44 = vsel %vm4704_vm8, 0.0, %v4664_v59  ;;  %v1097_v53 = vrot.slane %v1095_v41, 6  ;;  %vm4723_vm3 = vmor %vm1228_vm6, %vm1229_vm7 }
  0x6b   : > { %v906_v27 = vrot.slane %v905_v21, 4  ;;  %925 = vst [vmem:[#allocation3 + $0x124] sm:$0xf] %v901_v20  ;;  %998 = vst [vmem:[#allocation3 + $0x14c] sm:$0x7] %v978_v22  ;;  %v1102_v7 = vshrl.u32 %v1070_v14, 16  ;;  %v3612_v47 = vpack.c.bf16 %v707_v44, %v706_v48  ;;  %v1089_v59 = vor.u32 %v1088_v6, %v1085_v55 }
  0x6c   : > { %v1283_v29 = vld [vmem:[#allocation2 + $0xc] sm:$0xf]  ;;  %vm4729_vm5 = vmor %vm1079_vm9, %vm1080_vm10  ;;  %v1105_v51 = vshll.u32 %v1070_v14, 16  ;;  %v4733_v41 = vld [vmem:[#allocation2 + $0x10] sm:$0xf]  ;;  %v1098_v54 = vor.u32 %v1097_v53, %v1094_v24  ;;  %v1233_v1 = vrot.slane %v1207_v32, 6 }
  0x6d   : > { %v4030_v52 = vld [vmem:[#allocation3 + $0xdc] ss:$36 sps:$4 sm:$0xff]   ;;  %926 = vst [vmem:[#allocation3 + $0x148] sm:$0x7] %v906_v27  ;;  %v1104_v56 = vrot.slane %v1102_v7, 5  ;;  %3639 = vst [vmem:[#allocation2 + $0x28] sm:$0xff] %v3612_v47  }
  0x6e   : > { %v4038_v60 = vld [vmem:[#allocation3 + $0xe0] ss:$36 sps:$4 sm:$0xff]   ;;  %v1090_v46 = vrot.slane %v1089_v59, 4  ;;  %2492 = vmatprep.mubr.bf16.mxu0 %v4030_v52  ;;  %v1100_v62 = vrot.slane %v1098_v54, 4  ;;  %v1107_v63 = vrot.slane %v1105_v51, 6  ;;  %v1236_v3 = vrot.slane %v4714_v40, 6 }
  0x6f   : > { %v4035_v57 = vld [vmem:[#allocation3 + $0xe4] ss:$36 sps:$4 sm:$0xff]   ;;  %v1355_v49 = vld [vmem:[#allocation2 + $0x8] sm:$0xc]  ;;  %2493 = vmatmul.mubr.bf16.gmra.mrb[12].mxu0 %v4033_v34  ;;  %v3402_v45 = vrot.slane %v1282_v10, 10  ;;  %v1306_v35 = vrot.slane %v1283_v29, 6  ;;  %v1234_v61 = vsel %vm4723_vm3, %v3401_v23, %v1233_v1 }
  0x70   : > { %2565 = vmatprep.mubr.bf16.mxu1 %v4035_v57  ;;  %v1099_v4 = vsel %vm4729_vm5, %v1090_v46, %v1098_v54  ;;  %v1309_v8 = vrot.slane %v4733_v41, 6  ;;  %v1356_v9 = vld [vmem:[#allocation2 + $0xc] sm:$0xf]  ;;  %v4739_v12 = vor.u32 %v1107_v63, %v1104_v56  ;;  %v1235_v14 = vrot.slane %v1233_v1, 4  ;;  %v1357_v17 = vld [vmem:[#allocation2 + $0x10] sm:$0xf] }
  0x71   : > { %2566 = vmatmul.mubr.bf16.gmra.mrb[12].mxu1 %v4038_v60  ;;  %1196 = vst [vmem:[#allocation3 + $0x10] sm:$0xf] %v1099_v4  ;;  %vm1366_vm7 = vsmask.f32 1280  ;;  %1272 = vst [vmem:[#allocation3 + $0x14] sm:$0xf] %v1234_v61  ;;  %v1307_v18 = vsel %vm4723_vm3, %v3402_v45, %v1306_v35 }
  0x72   : > { %v1308_v19 = vrot.slane %v1306_v35, 4  ;;  %vm1367_vm9 = vsmask.f32 5392  ;;  %v1370_v42 = vshrl.u32 %v1355_v49, 16  ;;  %v1109_v43 = vsel %vm4729_vm5, %v1100_v62, %v4739_v12  ;;  %1345 = vst [vmem:[#allocation3 + $0x18] sm:$0xf] %v1307_v18 }
  0x73   : > { %v1237_v37 = vsel %vm4723_vm3, %v1235_v14, %v1236_v3  ;;  %v1373_v48 = vshll.u32 %v1355_v49, 16  ;;  %v1379_v21 = vshrl.u32 %v1356_v9, 16  ;;  %v1071_v0 = vld [vmem:[#allocation2 + $0x10] sm:$0xf]  ;;  %1197 = vst [vmem:[#allocation3 + $0x34] sm:$0xf] %v1109_v43  ;;  %vm4762_vm10 = vmor %vm1366_vm7, %vm1367_vm9 }
  0x74   : > { %v4044_v22 = vld [vmem:[#allocation3 + $0x124] ss:$36 sps:$4 sm:$0x7f]   ;;  %1273 = vst [vmem:[#allocation3 + $0x38] sm:$0xf] %v1237_v37  ;;  %v1310_v28 = vsel %vm4723_vm3, %v1308_v19, %v1309_v8  ;;  %v1372_v20 = vrot.slane %v1370_v42, 6 }
  0x75   : > { %v4047_v31 = vld [vmem:[#allocation3 + $0x120] ss:$36 sps:$4 sm:$0x7f]   ;;  %v1008_v55 = vld [vmem:[#allocation2 + $0x28] sm:$0xf]  ;;  %v1375_v6 = vrot.slane %v1373_v48, 7  ;;  %2500 = vmatprep.mubr.bf16.mxu0 %v4044_v22 }
  0x76   : > { %1346 = vst [vmem:[#allocation3 + $0x3c] sm:$0xf] %v1310_v28  ;;  %v1045_v24 = vrot.slane %v1008_v55, 5  ;;  %v1381_v32 = vrot.slane %v1379_v21, 6  ;;  %v1382_v40 = vshll.u32 %v1356_v9, 16  ;;  %v1389_v27 = vshrl.u32 %v1357_v17, 16 }
  0x77   : > { %v1376_v44 = vor.u32 %v1375_v6, %v1372_v20  ;;  %v1392_v53 = vshll.u32 %v1357_v17, 16  ;;  %v1072_v7 = vld [vmem:[#allocation2 + $0x14] sm:$0xf]  ;;  %v1110_v10 = vrot.slane %v4739_v12, 4  ;;  %v1112_v29 = vshrl.u32 %v1071_v0, 16  ;;  %2501 = vmatmul.mubr.bf16.gmra.mrb[16].mxu0 %v4047_v31  ;;  %v4060_v18 = vld [vmem:[%s5184_s3 + $0x200] sm:$0xff]  }
  0x78   : > { %v1046_v47 = vsel %vm4416_vm2, %v4698_v36, %v1045_v24  ;;  %v1047_v59 = vrot.slane %v1045_v24, 4  ;;  %v1384_v51 = vrot.slane %v1382_v40, 7  ;;  %v1391_v23 = vrot.slane %v1389_v27, 6  ;;  %v1209_v52 = vld [vmem:[#allocation2 + $0x10] sm:$0xf]  ;;  %v4064_v20 = vld [vmem:[%s5184_s3 + $0x208] sm:$0xff]  }
  0x79   : > { %v4758_v34 = vld [vmem:[#allocation2 + $0x14] sm:$0xf]  ;;  %1066 = vst [vmem:[#allocation3 + $0x12c] sm:$0xf] %v1046_v47  ;;  %v1377_v56 = vrot.slane %v1376_v44, 4  ;;  %v1394_v57 = vrot.slane %v1392_v53, 7 }
  0x7a   : > { %v1114_v60 = vrot.slane %v1112_v29, 5  ;;  %v1115_v46 = vshll.u32 %v1071_v0, 16  ;;  %1067 = vst [vmem:[#allocation3 + $0x150] sm:$0x7] %v1047_v59  ;;  %v1385_v13 = vor.u32 %v1384_v51, %v1381_v32  ;;  %v1122_v36 = vshrl.u32 %v1072_v7, 16 }
  0x7b   : > { %v1125_v62 = vshll.u32 %v1072_v7, 16  ;;  %v1238_v63 = vrot.slane %v1236_v3, 4  ;;  %v1285_v1 = vld [vmem:[#allocation2 + $0x14] sm:$0xf]  ;;  %v4056_v49 = vld [vmem:[#allocation3 + $0x10] ss:$36 sps:$4 sm:$0xff]   ;;  %v4766_v45 = vor.u32 %v1394_v57, %v1391_v23 }
  0x7c   : > { %v4058_v4 = vld [vmem:[#allocation3 + $0x14] ss:$36 sps:$4 sm:$0xff]   ;;  %v1117_v35 = vrot.slane %v1115_v46, 6  ;;  %v1386_v9 = vsel %vm4762_vm10, %v1377_v56, %v1385_v13  ;;  %v1387_v12 = vrot.slane %v1385_v13, 4  ;;  %v1124_v61 = vrot.slane %v1122_v36, 5 }
  0x7d   : > { %v1127_v14 = vrot.slane %v1125_v62, 6  ;;  %v4770_v17 = vld [vmem:[#allocation2 + $0x18] sm:$0xf]  ;;  %2614 = vmatprep.mubr.bf16.mxu0 %v4058_v4  ;;  %1487 = vst [vmem:[#allocation3 + $0x1c] sm:$0xf] %v1386_v9  ;;  %v1239_v19 = vrot.slane %v1209_v52, 6 }
  0x7e   : > { %v1118_v3 = vor.u32 %v1117_v35, %v1114_v60  ;;  %v1242_v42 = vrot.slane %v4758_v34, 6  ;;  %v1311_v43 = vrot.slane %v1309_v8, 4  ;;  %v1358_v37 = vld [vmem:[#allocation2 + $0x14] sm:$0xf]  ;;  %v1396_v48 = vsel %vm4762_vm10, %v1387_v12, %v4766_v45  ;;  %v1359_v28 = vld [vmem:[#allocation2 + $0x18] sm:$0xf] }
  0x7f   : > { %v4781_v21 = vor.u32 %v1127_v14, %v1124_v61  ;;  %v1312_v0 = vrot.slane %v1285_v1, 6  ;;  %v1315_v22 = vrot.slane %v4770_v17, 6  ;;  %1488 = vst [vmem:[#allocation3 + $0x40] sm:$0xf] %v1396_v48  ;;  %v1240_v31 = vsel %vm4723_vm3, %v1238_v63, %v1239_v19  ;;  %v1073_v6 = vld [vmem:[#allocation2 + $0x18] sm:$0xf]  ;;  %2615 = vmatmul.mubr.bf16.vlgmr.msra.gmra.mrb[20].mxu0 %v4056_v49 }
  0x80   : > { %v1119_v41 = vsel %vm4729_vm5, %v1110_v10, %v1118_v3  ;;  %v1120_v8 = vrot.slane %v1118_v3, 4  ;;  %v1241_v55 = vrot.slane %v1239_v19, 4  ;;  %1274 = vst [vmem:[#allocation3 + $0x5c] sm:$0xf] %v1240_v31  ;;  %v1397_v40 = vrot.slane %v4766_v45, 4  ;;  %3855 = vmatpush3.bf16.msra.mxu0 %v4060_v18  ;;  %v4071_v49 = vld [vmem:[%s5184_s3 + $0x210] sm:$0xff]  }
  0x81   : > { %1198 = vst [vmem:[#allocation3 + $0x58] sm:$0xf] %v1119_v41  ;;  %v1313_v24 = vsel %vm4723_vm3, %v1311_v43, %v1312_v0  ;;  %v1314_v32 = vrot.slane %v1312_v0, 4  ;;  %v1399_v27 = vshrl.u32 %v1358_v37, 16  ;;  %v1074_v44 = vld [vmem:[#allocation2 + $0x1c] sm:$0xf]  ;;  %3856 = vmatprep.subr.bf16.mxu0 %v4117_v26 }
  0x82   : > { %v4048_v53 = vld [vmem:[#allocation3 + $0x12c] ss:$36 sps:$4 sm:$0x7f]   ;;  %v1129_v7 = vsel %vm4729_vm5, %v1120_v8, %v4781_v21  ;;  %v1243_v10 = vsel %vm4723_vm3, %v1241_v55, %v1242_v42  ;;  %1347 = vst [vmem:[#allocation3 + $0x60] sm:$0xf] %v1313_v24  ;;  %v1402_v29 = vshll.u32 %v1358_v37, 16 }
  0x83   : > { %v4050_v47 = vld [vmem:[#allocation3 + $0x128] ss:$36 sps:$4 sm:$0x7f]   ;;  %1199 = vst [vmem:[#allocation3 + $0x7c] sm:$0xf] %v1129_v7  ;;  %v1316_v59 = vsel %vm4723_vm3, %v1314_v32, %v1315_v22  ;;  %v1401_v51 = vrot.slane %v1399_v27, 6  ;;  %2573 = vmatprep.mubr.bf16.mxu1 %v4048_v53 }
  0x84   : > { %1275 = vst [vmem:[#allocation3 + $0x80] sm:$0xf] %v1243_v10  ;;  %v1409_v23 = vshrl.u32 %v1359_v28, 16  ;;  %v1412_v52 = vshll.u32 %v1359_v28, 16  ;;  %1348 = vst [vmem:[#allocation3 + $0x84] sm:$0xf] %v1316_v59  ;;  %2574 = vmatmul.mubr.bf16.gmra.mrb[16].mxu1 %v4050_v47  ;;  %3857 = vmatpush3.bf16.msra.mxu0 %v4064_v20 }
  0x85   : > { %v1404_v34 = vrot.slane %v1402_v29, 7  ;;  %v1130_v56 = vrot.slane %v4781_v21, 4  ;;  %v1132_v57 = vshrl.u32 %v1073_v6, 16  ;;  %v1135_v60 = vshll.u32 %v1073_v6, 16  ;;  %v1211_v46 = vld [vmem:[#allocation2 + $0x18] sm:$0xf]  ;;  %3858 = vmatprep.subr.bf16.mxu0 %v4117_v26 }
  0x86   : > { %v1411_v13 = vrot.slane %v1409_v23, 6  ;;  %v1414_v36 = vrot.slane %v1412_v52, 7  ;;  %v1142_v62 = vshrl.u32 %v1074_v44, 16  ;;  %v1145_v63 = vshll.u32 %v1074_v44, 16  ;;  %v4808_v35 = vld [vmem:[#allocation2 + $0x1c] sm:$0xf] }
  0x87   : > { %v1405_v1 = vor.u32 %v1404_v34, %v1401_v51  ;;  %v1134_v4 = vrot.slane %v1132_v57, 5  ;;  %v1137_v45 = vrot.slane %v1135_v60, 6  ;;  %v1244_v9 = vrot.slane %v1242_v42, 4  ;;  %v4061_v12 = vld [vmem:[#allocation3 + $0x18] ss:$36 sps:$4 sm:$0xff]   ;;  %v4074_v48 = vld [vmem:[%s5184_s3 + $0x218] sm:$0xff]  }
  0x88   : > { %v4063_v61 = vld [vmem:[#allocation3 + $0x1c] ss:$36 sps:$4 sm:$0xff]   ;;  %v4810_v14 = vor.u32 %v1414_v36, %v1411_v13  ;;  %v1144_v18 = vrot.slane %v1142_v62, 5  ;;  %v1147_v37 = vrot.slane %v1145_v63, 6  ;;  %v1245_v42 = vrot.slane %v1211_v46, 6  ;;  %3859 = vmatpush3.bf16.msra.mxu0 %v4071_v49  ;;  %v4079_v47 = vld [vmem:[%s5184_s3 + $0x220] sm:$0xff]  }
  0x89   : > { %v1406_v3 = vsel %vm4762_vm10, %v1397_v40, %v1405_v1  ;;  %v1407_v19 = vrot.slane %v1405_v1, 4  ;;  %v1138_v43 = vor.u32 %v1137_v45, %v1134_v4  ;;  %2687 = vmatprep.mubr.bf16.mxu1 %v4063_v61  ;;  %v1248_v21 = vrot.slane %v4808_v35, 6  ;;  %v1287_v0 = vld [vmem:[#allocation2 + $0x1c] sm:$0xf]  ;;  %3860 = vmatprep.subr.bf16.mxu0 %v4117_v26  ;;  %v1288_v32 = vld [vmem:[#allocation2 + $0x20] sm:$0xf] }
  0x8a   : > { %1489 = vst [vmem:[#allocation3 + $0x64] sm:$0xf] %v1406_v3  ;;  %v4067_v20 = vld [vmem:[#allocation3 + $0x58] ss:$36 sps:$4 sm:$0xff]   ;;  %v4824_v55 = vor.u32 %v1147_v37, %v1144_v18  ;;  %v1246_v6 = vsel %vm4723_vm3, %v1244_v9, %v1245_v42  ;;  %v1247_v24 = vrot.slane %v1245_v42, 4  ;;  %v1317_v40 = vrot.slane %v1315_v22, 4 }
  0x8b   : > { %v4065_v28 = vld [vmem:[#allocation3 + $0x5c] ss:$36 sps:$4 sm:$0xff]   ;;  %v1416_v41 = vsel %vm4762_vm10, %v1407_v19, %v4810_v14  ;;  %v1139_v8 = vsel %vm4729_vm5, %v1130_v56, %v1138_v43  ;;  %v1140_v31 = vrot.slane %v1138_v43, 4  ;;  %v1318_v27 = vrot.slane %v1287_v0, 6  ;;  %1276 = vst [vmem:[#allocation3 + $0xa4] sm:$0xf] %v1246_v6 }
  0x8c   : > { %1490 = vst [vmem:[#allocation3 + $0x88] sm:$0xf] %v1416_v41  ;;  %1200 = vst [vmem:[#allocation3 + $0xa0] sm:$0xf] %v1139_v8  ;;  %2622 = vmatprep.mubr.bf16.mxu0 %v4065_v28  ;;  %v1321_v53 = vrot.slane %v1288_v32, 6  ;;  %v1417_v29 = vrot.slane %v4810_v14, 4  ;;  %2688 = vmatmul.mubr.bf16.vlgmr.msra.gmra.mrb[20].mxu1 %v4061_v12  ;;  %v1249_v17 = vsel %vm4723_vm3, %v1247_v24, %v1248_v21 }
  0x8d   : > { %v1149_v44 = vsel %vm4729_vm5, %v1140_v31, %v4824_v55  ;;  %v1360_v7 = vld [vmem:[#allocation2 + $0x1c] sm:$0xf]  ;;  %v1361_v10 = vld [vmem:[#allocation2 + $0x20] sm:$0xf]  ;;  %2623 = vmatmul.mubr.bf16.gmra.mrb[24].mxu0 %v4067_v20  ;;  %v1319_v22 = vsel %vm4723_vm3, %v1317_v40, %v1318_v27  ;;  %v1320_v59 = vrot.slane %v1318_v27, 4  ;;  %v1150_v57 = vrot.slane %v4824_v55, 4 }
  0x8e   : > { %1201 = vst [vmem:[#allocation3 + $0xc4] sm:$0xf] %v1149_v44  ;;  %v1419_v51 = vshrl.u32 %v1360_v7, 16  ;;  %1277 = vst [vmem:[#allocation3 + $0xc8] sm:$0xf] %v1249_v17  ;;  %3861 = vmatpush3.bf16.msra.mxu0 %v4074_v48  ;;  %v1422_v23 = vshll.u32 %v1360_v7, 16 }
  0x8f   : > { %1349 = vst [vmem:[#allocation3 + $0xa8] sm:$0xf] %v1319_v22  ;;  %v1429_v52 = vshrl.u32 %v1361_v10, 16  ;;  %v1432_v34 = vshll.u32 %v1361_v10, 16  ;;  %v1075_v56 = vld [vmem:[#allocation2 + $0x20] sm:$0xf]  ;;  %v1322_v60 = vsel %vm4723_vm3, %v1320_v59, %v1321_v53  ;;  %3862 = vmatprep.subr.bf16.mxu0 %v4117_v26 }
  0x90   : > { %v1421_v46 = vrot.slane %v1419_v51, 6  ;;  %v1076_v13 = vld [vmem:[#allocation2 + $0x24] sm:$0xf]  ;;  %v1152_v36 = vshrl.u32 %v1075_v56, 16  ;;  %v1155_v62 = vshll.u32 %v1075_v56, 16  ;;  %v1424_v63 = vrot.slane %v1422_v23, 7 }
  0x91   : > { %1350 = vst [vmem:[#allocation3 + $0xcc] sm:$0xf] %v1322_v60  ;;  %v1431_v1 = vrot.slane %v1429_v52, 6  ;;  %v1434_v49 = vrot.slane %v1432_v34, 7  ;;  %v1162_v4 = vshrl.u32 %v1076_v13, 16  ;;  %v4085_v45 = vld [vmem:[%s5184_s3 + $0x228] sm:$0xff]  }
  0x92   : > { %v1154_v35 = vrot.slane %v1152_v36, 5  ;;  %v1157_v9 = vrot.slane %v1155_v62, 6  ;;  %v1165_v12 = vshll.u32 %v1076_v13, 16  ;;  %v1213_v61 = vld [vmem:[#allocation2 + $0x20] sm:$0xf]  ;;  %v1250_v14 = vrot.slane %v1248_v21, 4  ;;  %3863 = vmatpush3.bf16.msra.mxu0 %v4079_v47 }
  0x93   : > { %v4068_v18 = vld [vmem:[#allocation3 + $0x64] ss:$36 sps:$4 sm:$0xff]   ;;  %v1425_v19 = vor.u32 %v1424_v63, %v1421_v46  ;;  %v4849_v43 = vor.u32 %v1434_v49, %v1431_v1  ;;  %v1164_v37 = vrot.slane %v1162_v4, 5  ;;  %v1214_v0 = vld [vmem:[#allocation2 + $0x24] sm:$0xf]  ;;  %v1251_v28 = vrot.slane %v1213_v61, 6  ;;  %3864 = vmatprep.subr.bf16.mxu0 %v4117_v26 }
  0x94   : > { %v4070_v3 = vld [vmem:[#allocation3 + $0x60] ss:$36 sps:$4 sm:$0xff]   ;;  %v1158_v48 = vor.u32 %v1157_v9, %v1154_v35  ;;  %v1167_v42 = vrot.slane %v1165_v12, 6  ;;  %v1323_v20 = vrot.slane %v1321_v53, 4  ;;  %2695 = vmatprep.mubr.bf16.mxu1 %v4068_v18  ;;  %v1254_v21 = vrot.slane %v1214_v0, 6 }
  0x95   : > { %v1426_v41 = vsel %vm4762_vm10, %v1417_v29, %v1425_v19  ;;  %v1427_v8 = vrot.slane %v1425_v19, 4  ;;  %v1289_v31 = vld [vmem:[#allocation2 + $0x24] sm:$0xf]  ;;  %v4854_v55 = vld [vmem:[#allocation2 + $0x28] sm:$0xf]  ;;  %2696 = vmatmul.mubr.bf16.gmra.mrb[24].mxu1 %v4070_v3  ;;  %v1252_v44 = vsel %vm4723_vm3, %v1250_v14, %v1251_v28  ;;  %v1253_v7 = vrot.slane %v1251_v28, 4 }
  0x96   : > { %v4072_v6 = vld [vmem:[#allocation3 + $0xa4] ss:$36 sps:$4 sm:$0xff]   ;;  %1491 = vst [vmem:[#allocation3 + $0xac] sm:$0xf] %v1426_v41  ;;  %v1159_v32 = vsel %vm4729_vm5, %v1150_v57, %v1158_v48  ;;  %v1160_v40 = vrot.slane %v1158_v48, 4  ;;  %v4858_v27 = vor.u32 %v1167_v42, %v1164_v37  ;;  %v1324_v10 = vrot.slane %v1289_v31, 6  ;;  %3865 = vmatpush3.bf16.msra.mxu0 %v4085_v45 }
  0x97   : > { %v4075_v24 = vld [vmem:[#allocation3 + $0xa0] ss:$36 sps:$4 sm:$0xff]   ;;  %v1436_v53 = vsel %vm4762_vm10, %v1427_v8, %v4849_v43  ;;  %1202 = vst [vmem:[#allocation3 + $0xe8] sm:$0xf] %v1159_v32  ;;  %1278 = vst [vmem:[#allocation3 + $0xec] sm:$0xf] %v1252_v44  ;;  %2630 = vmatprep.mubr.bf16.mxu0 %v4072_v6  ;;  %3866 = vmatprep.subr.bf16.mxu0 %v4117_v26  ;;  %v1255_v34 = vsel %vm4723_vm3, %v1253_v7, %v1254_v21 }
  0x98   : > { %v1327_v29 = vrot.slane %v4854_v55, 6  ;;  %v1362_v47 = vld [vmem:[#allocation2 + $0x24] sm:$0xf]  ;;  %v4087_v17 = vld [vmem:[%s5184_s3 + $0x230] sm:$0xff]   ;;  %1492 = vst [vmem:[#allocation3 + $0xd0] sm:$0xf] %v1436_v53  ;;  %v1169_v22 = vsel %vm4729_vm5, %v1160_v40, %v4858_v27  ;;  %2631 = vmatmul.mubr.bf16.gmra.mrb[28].mxu0 %v4075_v24  ;;  %v1325_v56 = vsel %vm4723_vm3, %v1323_v20, %v1324_v10 }
  0x99   : > { %v1363_v59 = vld [vmem:[#allocation2 + $0x28] sm:$0xf]  ;;  %v1437_v51 = vrot.slane %v4849_v43, 4  ;;  %v1439_v23 = vshrl.u32 %v1362_v47, 16  ;;  %v1442_v52 = vshll.u32 %v1362_v47, 16  ;;  %v1326_v57 = vrot.slane %v1324_v10, 4 }
  0x9a   : > { %1203 = vst [vmem:[#allocation3 + $0x10c] sm:$0xf] %v1169_v22  ;;  %v1449_v60 = vshrl.u32 %v1363_v59, 16  ;;  %v4094_v46 = vld [vmem:[%s5184_s3 + $0x238] sm:$0xff]   ;;  %1279 = vst [vmem:[#allocation3 + $0x110] sm:$0xf] %v1255_v34  ;;  %3867 = vmatpush3.bf16.msra.mxu0 %v4087_v17 }
  0x9b   : > { %1351 = vst [vmem:[#allocation3 + $0xf0] sm:$0xf] %v1325_v56  ;;  %v1441_v13 = vrot.slane %v1439_v23, 6  ;;  %v1444_v36 = vrot.slane %v1442_v52, 7  ;;  %v1452_v62 = vshll.u32 %v1363_v59, 16  ;;  %v1170_v63 = vrot.slane %v4858_v27, 4  ;;  %3868 = vmatprep.subr.bf16.mxu0 %v4117_v26 }
  0x9c   : > { %v1328_v1 = vsel %vm4723_vm3, %v1326_v57, %v1327_v29  ;;  %v1451_v49 = vrot.slane %v1449_v60, 6  ;;  %v1077_v4 = vld [vmem:[#allocation2 + $0x28] sm:$0xf]  ;;  %v1256_v45 = vrot.slane %v1254_v21, 4  ;;  %v1078_v12 = vld [vmem:[#allocation2 + $0x2c] sm:$0x1] }
  0x9d   : > { %1352 = vst [vmem:[#allocation3 + $0x114] sm:$0xf] %v1328_v1  ;;  %v1445_v35 = vor.u32 %v1444_v36, %v1441_v13  ;;  %v1454_v9 = vrot.slane %v1452_v62, 7  ;;  %v1172_v61 = vshrl.u32 %v1077_v4, 16  ;;  %v1175_v14 = vshll.u32 %v1077_v4, 16 }
  0x9e   : > { %v1182_v18 = vshll.u32 %v1078_v12, 16  ;;  %v1215_v3 = vld [vmem:[#allocation2 + $0x28] sm:$0xf]  ;;  %v1216_v19 = vld [vmem:[#allocation2 + $0x2c] sm:$0x1]  ;;  %3869 = vmatpush3.bf16.msra.mxu0 %v4094_v46  ;;  %v1329_v27 = vrot.slane %v1327_v29, 4 }
  0x9f   : > { %v1446_v43 = vsel %vm4762_vm10, %v1437_v51, %v1445_v35  ;;  %v1447_v37 = vrot.slane %v1445_v35, 4  ;;  %v4887_v48 = vor.u32 %v1454_v9, %v1451_v49  ;;  %v1174_v42 = vrot.slane %v1172_v61, 5  ;;  %v1291_v0 = vld [vmem:[#allocation2 + $0x2c] sm:$0xf]  ;;  %v4076_v28 = vld [vmem:[#allocation3 + $0xac] ss:$36 sps:$4 sm:$0xff]  }
  0xa0   : > { %v4078_v20 = vld [vmem:[#allocation3 + $0xa8] ss:$36 sps:$4 sm:$0xff]   ;;  %1493 = vst [vmem:[#allocation3 + $0xf4] sm:$0xf] %v1446_v43  ;;  %v1177_v41 = vrot.slane %v1175_v14, 6  ;;  %v1184_v21 = vrot.slane %v1182_v18, 6  ;;  %2703 = vmatprep.mubr.bf16.mxu1 %v4076_v28 }
  0xa1   : > { %v1456_v8 = vsel %vm4762_vm10, %v1447_v37, %v4887_v48  ;;  %v1257_v31 = vrot.slane %v1215_v3, 6  ;;  %v1260_v55 = vrot.slane %v1216_v19, 6  ;;  %v1292_v6 = vld [vmem:[#allocation2 + $0x30] sm:$0x1]  ;;  %v4080_v24 = vld [vmem:[#allocation3 + $0xec] ss:$36 sps:$4 sm:$0xff]   ;;  %2704 = vmatmul.mubr.bf16.gmra.mrb[28].mxu1 %v4078_v20 }
  0xa2   : > { %v4082_v32 = vld [vmem:[#allocation3 + $0xe8] ss:$36 sps:$4 sm:$0xff]   ;;  %1494 = vst [vmem:[#allocation3 + $0x118] sm:$0xf] %v1456_v8  ;;  %v1178_v40 = vor.u32 %v1177_v41, %v1174_v42  ;;  %v1330_v7 = vrot.slane %v1291_v0, 6  ;;  %v1333_v10 = vrot.slane %v1292_v6, 6  ;;  %2638 = vmatprep.mubr.bf16.mxu0 %v4080_v24 }
  0xa3   : > { %v1258_v44 = vsel %vm4723_vm3, %v1256_v45, %v1257_v31  ;;  %v1259_v53 = vrot.slane %v1257_v31, 4  ;;  %v1364_v47 = vld [vmem:[#allocation2 + $0x2c] sm:$0xf]  ;;  %v1365_v59 = vld [vmem:[#allocation2 + $0x30] sm:$0x3]  ;;  %v1457_v51 = vrot.slane %v4887_v48, 4  ;;  %2639 = vmatmul.mubr.bf16.gmra.mrb[32].mxu0 %v4082_v32 }
  0xa4   : > { %v1179_v17 = vsel %vm4729_vm5, %v1170_v63, %v1178_v40  ;;  %v1180_v22 = vrot.slane %v1178_v40, 4  ;;  %1280 = vst [vmem:[#allocation3 + $0x134] sm:$0xf] %v1258_v44  ;;  %v1459_v23 = vshrl.u32 %v1364_v47, 16  ;;  %v1331_v52 = vsel %vm4723_vm3, %v1329_v27, %v1330_v7  ;;  %v1497_v36 = vld [vmem:[#allocation2 + $0x8] sm:$0x8] }
  0xa5   : > { %1204 = vst [vmem:[#allocation3 + $0x130] sm:$0xf] %v1179_v17  ;;  %v1261_v29 = vsel %vm4723_vm3, %v1259_v53, %v1260_v55  ;;  %v1332_v34 = vrot.slane %v1330_v7, 4  ;;  %v1462_v56 = vshll.u32 %v1364_v47, 16  ;;  %1353 = vst [vmem:[#allocation3 + $0x138] sm:$0xf] %v1331_v52 }
  0xa6   : > { %v1185_v57 = vsel %vm4729_vm5, %v1180_v22, %v1184_v21  ;;  %1281 = vst [vmem:[#allocation3 + $0x158] sm:$0x7] %v1261_v29  ;;  %v1461_v60 = vrot.slane %v1459_v23, 6  ;;  %v1469_v46 = vshrl.u32 %v1365_v59, 16  ;;  %v1472_v13 = vshll.u32 %v1365_v59, 16  ;;  %v4103_v18 = vld [vmem:[%s5186_s5 + $0x18] sm:$0xff]  }
  0xa7   : > { %1205 = vst [vmem:[#allocation3 + $0x154] sm:$0x7] %v1185_v57  ;;  %v1334_v62 = vsel %vm4723_vm3, %v1332_v34, %v1333_v10  ;;  %v1464_v63 = vrot.slane %v1462_v56, 7  ;;  %v1498_v1 = vld [vmem:[#allocation2 + $0xc] sm:$0xf]  ;;  %vm1519_vm2 = vcmask 1040384  }
  0xa8   : > { %v1499_v49 = vld [vmem:[#allocation2 + $0x10] sm:$0xf]  ;;  %1354 = vst [vmem:[#allocation3 + $0x15c] sm:$0x7] %v1334_v62  ;;  %v1471_v4 = vrot.slane %v1469_v46, 6  ;;  %v1474_v45 = vrot.slane %v1472_v13, 7  ;;  %vm4906_vm12 = vmor %vm1519_vm2, %vm1520_vm11 }
  0xa9   : > { %v1500_v50 = vld [vmem:[#allocation2 + $0x14] sm:$0xf]  ;;  %v4083_v35 = vld [vmem:[#allocation3 + $0xf4] ss:$36 sps:$4 sm:$0xff]   ;;  %v1465_v12 = vor.u32 %v1464_v63, %v1461_v60  ;;  %v3403_v61 = vrot.slane %v1497_v36, 11  ;;  %v1524_v30 = vrot.slane %v1498_v1, 7 }
  0xaa   : > { %v4086_v9 = vld [vmem:[#allocation3 + $0xf0] ss:$36 sps:$4 sm:$0xff]   ;;  %v1475_v14 = vor.u32 %v1474_v45, %v1471_v4  ;;  %v1527_v3 = vrot.slane %v1499_v49, 7  ;;  %v1501_v19 = vld [vmem:[#allocation2 + $0x18] sm:$0xf]  ;;  %v1530_v43 = vrot.slane %v1500_v50, 7  ;;  %2711 = vmatprep.mubr.bf16.mxu1 %v4083_v35 }
  0xab   : > { %v1466_v37 = vsel %vm4762_vm10, %v1457_v51, %v1465_v12  ;;  %v1467_v48 = vrot.slane %v1465_v12, 4  ;;  %v1533_v42 = vrot.slane %v1501_v19, 7  ;;  %v1502_v0 = vld [vmem:[#allocation2 + $0x1c] sm:$0xf]  ;;  %v1503_v28 = vld [vmem:[#allocation2 + $0x20] sm:$0xf]  ;;  %2712 = vmatmul.mubr.bf16.gmra.mrb[32].mxu1 %v4086_v9  ;;  %v1525_v20 = vsel %vm4906_vm12, %v3403_v61, %v1524_v30 }
  0xac   : > { %1495 = vst [vmem:[#allocation3 + $0x13c] sm:$0xf] %v1466_v37  ;;  %v1526_v41 = vrot.slane %v1524_v30, 4  ;;  %v1529_v8 = vrot.slane %v1527_v3, 4  ;;  %v1532_v21 = vrot.slane %v1530_v43, 4  ;;  %v1536_v24 = vrot.slane %v1502_v0, 7 }
  0xad   : > { %v1504_v31 = vld [vmem:[#allocation2 + $0x24] sm:$0xf]  ;;  %v1476_v55 = vsel %vm4762_vm10, %v1467_v48, %v1475_v14  ;;  %1563 = vst [vmem:[#allocation3 + $0x20] sm:$0xf] %v1525_v20  ;;  %v1535_v6 = vrot.slane %v1533_v42, 4  ;;  %v1539_v32 = vrot.slane %v1503_v28, 7 }
  0xae   : > { %v1505_v40 = vld [vmem:[#allocation2 + $0x28] sm:$0xf]  ;;  %1496 = vst [vmem:[#allocation3 + $0x160] sm:$0x7] %v1476_v55  ;;  %v1528_v44 = vsel %vm4906_vm12, %v1526_v41, %v1527_v3  ;;  %v1531_v53 = vsel %vm4906_vm12, %v1529_v8, %v1530_v43  ;;  %v1534_v7 = vsel %vm4906_vm12, %v1532_v21, %v1533_v42  ;;  %v1542_v10 = vrot.slane %v1504_v31, 7  ;;  %v4100_v12 = vld [vmem:[%s5186_s5] sm:$0xff]  }
  0xaf   : > { %v4088_v27 = vld [vmem:[#allocation3 + $0x134] ss:$36 sps:$4 sm:$0x7f]   ;;  %1564 = vst [vmem:[#allocation3 + $0x44] sm:$0xf] %v1528_v44  ;;  %v1537_v17 = vsel %vm4906_vm12, %v1535_v6, %v1536_v24  ;;  %v1538_v22 = vrot.slane %v1536_v24, 4  ;;  %3891 = vmatpush3.bf16.msra.mxu1 %v4100_v12 }
  0xb0   : > { %v4090_v47 = vld [vmem:[#allocation3 + $0x130] ss:$36 sps:$4 sm:$0x7f]   ;;  %1565 = vst [vmem:[#allocation3 + $0x68] sm:$0xf] %v1531_v53  ;;  %v1541_v59 = vrot.slane %v1539_v32, 4  ;;  %2646 = vmatprep.mubr.bf16.mxu0 %v4088_v27  ;;  %3892 = vmatprep.subr.bf16.mxu1 %v4117_v26 }
  0xb1   : > { %1566 = vst [vmem:[#allocation3 + $0x8c] sm:$0xf] %v1534_v7  ;;  %v1545_v51 = vrot.slane %v1505_v40, 7  ;;  %1567 = vst [vmem:[#allocation3 + $0xb0] sm:$0xf] %v1537_v17  ;;  %v1544_v23 = vrot.slane %v1542_v10, 4  ;;  %2647 = vmatmul.mubr.bf16.gmra.mrb[36].mxu0 %v4090_v47  ;;  %v1540_v34 = vsel %vm4906_vm12, %v1538_v22, %v1539_v32 }
  0xb2   : > { %v1506_v29 = vld [vmem:[#allocation2 + $0x2c] sm:$0xf]  ;;  %v1507_v52 = vld [vmem:[#allocation2 + $0x30] sm:$0x3]  ;;  %v1543_v56 = vsel %vm4906_vm12, %v1541_v59, %v1542_v10  ;;  %vm4118_vm13 = vmmov 0   ;;  %v4104_v30 = vld [vmem:[%s5186_s5 + $0x20] sm:$0xff]  }
  0xb3   : > { %v1547_v57 = vrot.slane %v1545_v51, 4  ;;  %v1548_v60 = vrot.slane %v1506_v29, 7  ;;  %3870 = vmatprep.mubr.msk.bf16.mxu0 %vm4118_vm13, %v4117_v26  ;;  %1568 = vst [vmem:[#allocation3 + $0xd4] sm:$0xf] %v1540_v34  ;;  %v1546_v46 = vsel %vm4906_vm12, %v1544_v23, %v1545_v51  ;;  %1569 = vst [vmem:[#allocation3 + $0xf8] sm:$0xf] %v1543_v56 }
  0xb4   : > { %v1551_v13 = vrot.slane %v1507_v52, 7  ;;  %1570 = vst [vmem:[#allocation3 + $0x11c] sm:$0xf] %v1546_v46  ;;  %v4093_v49 = vld [vmem:[#allocation3 + $0x138] ss:$36 sps:$4 sm:$0x7f]  }
  0xb5   : > { %v1549_v36 = vsel %vm4906_vm12, %v1547_v57, %v1548_v60  ;;  %v1550_v62 = vrot.slane %v1548_v60, 4  ;;  %v4091_v63 = vld [vmem:[#allocation3 + $0x13c] ss:$36 sps:$4 sm:$0x7f]   ;;  %v4101_v61 = vld [vmem:[%s5186_s5 + $0x8] sm:$0xff]   ;;  %v4107_v43 = vld [vmem:[%s5186_s5 + $0x38] sm:$0xff]  }
  0xb6   : > { %1571 = vst [vmem:[#allocation3 + $0x140] sm:$0xf] %v1549_v36  ;;  %2719 = vmatprep.mubr.bf16.mxu1 %v4091_v63  ;;  %v4095_v4 = vld [vmem:[#allocation3 + $0x20] ss:$36 sps:$4 sm:$0xff]   ;;  %3893 = vmatpush3.bf16.msra.mxu1 %v4101_v61  ;;  %v4105_v3 = vld [vmem:[%s5186_s5 + $0x28] sm:$0xff]   ;;  %vm2993_vm4 = vcmask 1044480  }
  0xb7   : > { %v1552_v1 = vsel %vm4906_vm12, %v1550_v62, %v1551_v13  ;;  %2720 = vmatmul.mubr.bf16.gmra.mrb[36].mxu1 %v4093_v49  ;;  %3894 = vmatprep.subr.bf16.mxu1 %v4117_v26  ;;  %v4102_v14 = vld [vmem:[%s5186_s5 + $0x10] sm:$0xff]   ;;  %v4980_v48 = vld [vmem:[%s5185_s4] ss:$0 sm:$0xff]  ;;  %vm3260_vm8 = vcmask 1043457   ;;  %vm3036_vm3 = vcmp.lt.s32.totalorder %v4330_v11, 8  ;;  %vm3037_vm9 = vcmp.lt.s32.totalorder %v4339_v15, 8 }
  0xb8   : > { %1572 = vst [vmem:[#allocation3 + $0x164] sm:$0x7] %v1552_v1  ;;  %3906 = vmatprep.mubr.msk.bf16.mxu1 %vm4118_vm13, %v4117_v26  ;;  %v4096_v45 = vld [vmem:[#allocation3 + $0x68] ss:$36 sps:$4 sm:$0xff]   ;;  %v4106_v19 = vld [vmem:[%s5186_s5 + $0x30] sm:$0xff]   ;;  %vm3038_vm11 = vcmp.lt.s32.totalorder %v4341_v16, 8 }
  0xb9   : > { %3871 = vmatmul.mubr.bf16.vlgmr.msra.gmra.mrb[40].mxu0 %v4095_v4  ;;  %vm3261_vm5 = vsmask.f32 7942 }
  0xba   : > { %3874 = vmatprep.mubr.msk.bf16.mxu0 %vm4118_vm13, %v4117_v26  ;;  %v4097_v50 = vld [vmem:[#allocation3 + $0xb0] ss:$36 sps:$4 sm:$0xff]   ;;  %3895 = vmatpush3.bf16.msra.mxu1 %v4102_v14  ;;  %vm5074_vm12 = vmand %vm3260_vm8, %vm3261_vm5  ;;  %vm3275_vm8 = vsmask.f32 256  ;;  %vm3286_vm5 = vsmask.f32 7938 }
  0xbb   : > { %v4098_v35 = vld [vmem:[#allocation3 + $0xf8] ss:$36 sps:$4 sm:$0xff]   ;;  %3896 = vmatprep.subr.bf16.mxu1 %v4117_v26 }
  0xbe   : > { %3897 = vmatpush3.bf16.msra.mxu1 %v4103_v18 }
  0xbf   : > { %v4099_v9 = vld [vmem:[#allocation3 + $0x140] ss:$36 sps:$4 sm:$0x7f]   ;;  %3898 = vmatprep.subr.bf16.mxu1 %v4117_v26 }
  0xc1   : > { %3875 = vmatmul.mubr.bf16.gmra.mrb[44].mxu0 %v4096_v45 }
  0xc2   : > { %3878 = vmatprep.mubr.msk.bf16.mxu0 %vm4118_vm13, %v4117_v26  ;;  %3899 = vmatpush3.bf16.msra.mxu1 %v4104_v30 }
  0xc3   : > { %3900 = vmatprep.subr.bf16.mxu1 %v4117_v26 }
  0xc6   : > { %3901 = vmatpush3.bf16.msra.mxu1 %v4105_v3 }
  0xc7   : > { %3902 = vmatprep.subr.bf16.mxu1 %v4117_v26 }
  0xc9   : > { %3879 = vmatmul.mubr.bf16.gmra.mrb[48].mxu0 %v4097_v50 }
  0xca   : > { %3882 = vmatprep.mubr.msk.bf16.mxu0 %vm4118_vm13, %v4117_v26  ;;  %3903 = vmatpush3.bf16.msra.mxu1 %v4106_v19 }
  0xcb   : > { %3904 = vmatprep.subr.bf16.mxu1 %v4117_v26 }
  0xce   : > { %3905 = vmatpush3.bf16.msra.mxu1 %v4107_v43 }
  0xd1   : > { %3883 = vmatmul.mubr.bf16.gmra.mrb[52].mxu0 %v4098_v35 }
  0xd2   : > { %3886 = vmatprep.mubr.msk.bf16.mxu0 %vm4118_vm13, %v4117_v26 }
  0xd9   : > { %3887 = vmatmul.mubr.bf16.gmra.mrb[56].mxu0 %v4099_v9 }
 0x111   : > { %v3660_v37 = vpop.f32.mrb[0].mxu0 }
 0x112   : > { %v3661_v42 = vpop.f32.mrb[1].mxu0  ;;  %v3706_v0 = vpop.f32.mrb[0].mxu1 }
 0x113   : > { %v3662_v28 = vadd.f32 %v3661_v42, %v3660_v37  ;;  %v3663_v20 = vpop.f32.mrb[2].mxu0  ;;  %v3707_v41 = vpop.f32.mrb[1].mxu1 }
 0x114   : > { %v3664_v8 = vpop.f32.mrb[3].mxu0  ;;  %v3708_v21 = vadd.f32 %v3707_v41, %v3706_v0  ;;  %v3709_v31 = vpop.f32.mrb[2].mxu1 }
 0x115   : > { %v2471_v55 = vadd.f32 %v3662_v28, %v4980_v48  ;;  %v3665_v6 = vadd.f32 %v3664_v8, %v3663_v20  ;;  %v3710_v24 = vpop.f32.mrb[3].mxu1 }
 0x116   : > { %v3711_v32 = vadd.f32 %v3710_v24, %v3709_v31 }
 0x117   : > { %v2474_v40 = vadd.f32 %v3665_v6, %v4980_v48  ;;  %v4984_v27 = vadd.f32 %v3708_v21, %v2471_v55 }
 0x119   : > { %v4986_v44 = vadd.f32 %v3711_v32, %v2474_v40 }
 0x123   : > { %v3666_v53 = vpop.f32.mrb[4].mxu0 }
 0x124   : > { %v3667_v7 = vpop.f32.mrb[5].mxu0  ;;  %v3712_v10 = vpop.f32.mrb[4].mxu1 }
 0x125   : > { %v3668_v47 = vadd.f32 %v3667_v7, %v3666_v53  ;;  %v3669_v17 = vpop.f32.mrb[6].mxu0  ;;  %v3713_v22 = vpop.f32.mrb[5].mxu1 }
 0x126   : > { %v3670_v59 = vpop.f32.mrb[7].mxu0  ;;  %v3714_v51 = vadd.f32 %v3713_v22, %v3712_v10  ;;  %v3715_v23 = vpop.f32.mrb[6].mxu1 }
 0x127   : > { %v2479_v29 = vadd.f32 %v3668_v47, %v4980_v48  ;;  %v3671_v52 = vadd.f32 %v3670_v59, %v3669_v17  ;;  %v3716_v34 = vpop.f32.mrb[7].mxu1 }
 0x128   : > { %v3717_v56 = vadd.f32 %v3716_v34, %v3715_v23 }
 0x129   : > { %v2482_v57 = vadd.f32 %v3671_v52, %v4980_v48  ;;  %v4990_v60 = vadd.f32 %v3714_v51, %v2479_v29 }
 0x12b   : > { %v4992_v46 = vadd.f32 %v3717_v56, %v2482_v57 }
 0x12c   : > { %v3672_v13 = vpop.f32.mrb[8].mxu0 }
 0x12d   : > { %v3673_v36 = vpop.f32.mrb[9].mxu0 }
 0x12e   : > { %v3718_v62 = vpop.f32.mrb[8].mxu1  ;;  %v3674_v63 = vadd.f32 %v3673_v36, %v3672_v13  ;;  %v3675_v1 = vpop.f32.mrb[10].mxu0 }
 0x12f   : > { %v3719_v49 = vpop.f32.mrb[9].mxu1  ;;  %v3676_v4 = vpop.f32.mrb[11].mxu0 }
 0x130   : > { %v3720_v45 = vadd.f32 %v3719_v49, %v3718_v62  ;;  %v3721_v50 = vpop.f32.mrb[10].mxu1  ;;  %v2487_v35 = vadd.f32 %v3674_v63, %v4980_v48  ;;  %v3677_v9 = vadd.f32 %v3676_v4, %v3675_v1 }
 0x131   : > { %v3722_v12 = vpop.f32.mrb[11].mxu1 }
 0x132   : > { %v3723_v61 = vadd.f32 %v3722_v12, %v3721_v50  ;;  %v2490_v14 = vadd.f32 %v3677_v9, %v4980_v48  ;;  %v4996_v18 = vadd.f32 %v3720_v45, %v2487_v35 }
 0x134   : > { %v4998_v30 = vadd.f32 %v3723_v61, %v2490_v14 }
 0x142   : > { %v3678_v3 = vpop.f32.mrb[12].mxu0 }
 0x143   : > { %v3679_v19 = vpop.f32.mrb[13].mxu0 }
 0x144   : > { %v3724_v43 = vpop.f32.mrb[12].mxu1  ;;  %v3680_v37 = vadd.f32 %v3679_v19, %v3678_v3  ;;  %v3681_v42 = vpop.f32.mrb[14].mxu0 }
 0x145   : > { %v3725_v0 = vpop.f32.mrb[13].mxu1  ;;  %v3682_v28 = vpop.f32.mrb[15].mxu0 }
 0x146   : > { %v3726_v20 = vadd.f32 %v3725_v0, %v3724_v43  ;;  %v3727_v41 = vpop.f32.mrb[14].mxu1  ;;  %v2495_v8 = vadd.f32 %v3680_v37, %v4980_v48  ;;  %v3683_v21 = vadd.f32 %v3682_v28, %v3681_v42 }
 0x147   : > { %v3728_v31 = vpop.f32.mrb[15].mxu1 }
 0x148   : > { %v3729_v55 = vadd.f32 %v3728_v31, %v3727_v41  ;;  %v2498_v6 = vadd.f32 %v3683_v21, %v4980_v48  ;;  %v5002_v24 = vadd.f32 %v3726_v20, %v2495_v8 }
 0x14a   : > { %v5004_v32 = vadd.f32 %v3729_v55, %v2498_v6  ;;  %v3684_v40 = vpop.f32.mrb[16].mxu0 }
 0x14b   : > { %v3685_v53 = vpop.f32.mrb[17].mxu0 }
 0x14c   : > { %v3686_v7 = vadd.f32 %v3685_v53, %v3684_v40  ;;  %v3687_v10 = vpop.f32.mrb[18].mxu0 }
 0x14d   : > { %v3688_v47 = vpop.f32.mrb[19].mxu0 }
 0x14e   : > { %v3689_v17 = vadd.f32 %v3688_v47, %v3687_v10  ;;  %v2503_v52 = vadd.f32 %v3686_v7, %v4980_v48 }
 0x150   : > { %v2506_v36 = vadd.f32 %v3689_v17, %v4980_v48 }
 0x152   : > { %v3752_v22 = vpop.f32.mrb[20].mxu0 }
 0x153   : > { %v3753_v59 = vpop.f32.mrb[21].mxu0 }
 0x154   : > { %v3754_v51 = vadd.f32 %v3753_v59, %v3752_v22  ;;  %v3755_v23 = vpop.f32.mrb[22].mxu0 }
 0x155   : > { %v3756_v29 = vpop.f32.mrb[23].mxu0 }
 0x156   : > { %v2617_v56 = vadd.f32 %v3754_v51, %v4984_v27  ;;  %v3757_v57 = vadd.f32 %v3756_v29, %v3755_v23 }
 0x157   : > { %v3730_v34 = vpop.f32.mrb[16].mxu1 }
 0x158   : > { %v3731_v13 = vpop.f32.mrb[17].mxu1  ;;  %v2620_v1 = vadd.f32 %v3757_v57, %v4986_v44 }
 0x159   : > { %v3732_v62 = vadd.f32 %v3731_v13, %v3730_v34  ;;  %v3733_v63 = vpop.f32.mrb[18].mxu1 }
 0x15a   : > { %v3734_v49 = vpop.f32.mrb[19].mxu1 }
 0x15b   : > { %v5010_v4 = vadd.f32 %v3732_v62, %v2503_v52  ;;  %v3735_v45 = vadd.f32 %v3734_v49, %v3733_v63 }
 0x15d   : > { %v5012_v50 = vadd.f32 %v3735_v45, %v2506_v36 }
 0x15f   : > { %v3798_v35 = vpop.f32.mrb[20].mxu1 }
 0x160   : > { %v3758_v9 = vpop.f32.mrb[24].mxu0  ;;  %v3799_v12 = vpop.f32.mrb[21].mxu1 }
 0x161   : > { %v3759_v61 = vpop.f32.mrb[25].mxu0  ;;  %v3800_v14 = vadd.f32 %v3799_v12, %v3798_v35  ;;  %v3801_v27 = vpop.f32.mrb[22].mxu1 }
 0x162   : > { %v3760_v3 = vadd.f32 %v3759_v61, %v3758_v9  ;;  %v3761_v19 = vpop.f32.mrb[26].mxu0  ;;  %v3802_v43 = vpop.f32.mrb[23].mxu1 }
 0x163   : > { %v3762_v48 = vpop.f32.mrb[27].mxu0  ;;  %v3803_v37 = vadd.f32 %v3802_v43, %v3801_v27  ;;  %v2690_v0 = vadd.f32 %v3800_v14, %v2617_v56 }
 0x164   : > { %v2625_v42 = vadd.f32 %v3760_v3, %v4990_v60  ;;  %v3763_v44 = vadd.f32 %v3762_v48, %v3761_v19 }
 0x165   : > { %v2693_v20 = vadd.f32 %v3803_v37, %v2620_v1 }
 0x166   : > { %v2628_v28 = vadd.f32 %v3763_v44, %v4992_v46 }
 0x168   : > { %v3804_v41 = vpop.f32.mrb[24].mxu1 }
 0x169   : > { %v3805_v8 = vpop.f32.mrb[25].mxu1 }
 0x16a   : > { %v3806_v21 = vadd.f32 %v3805_v8, %v3804_v41  ;;  %v3807_v31 = vpop.f32.mrb[26].mxu1 }
 0x16b   : > { %v3808_v55 = vpop.f32.mrb[27].mxu1  ;;  %v3764_v6 = vpop.f32.mrb[28].mxu0 }
 0x16c   : > { %v3809_v40 = vadd.f32 %v3808_v55, %v3807_v31  ;;  %v3765_v53 = vpop.f32.mrb[29].mxu0  ;;  %v2698_v7 = vadd.f32 %v3806_v21, %v2625_v42 }
 0x16d   : > { %v3766_v10 = vadd.f32 %v3765_v53, %v3764_v6  ;;  %v3767_v47 = vpop.f32.mrb[30].mxu0 }
 0x16e   : > { %v3768_v17 = vpop.f32.mrb[31].mxu0  ;;  %v2701_v22 = vadd.f32 %v3809_v40, %v2628_v28 }
 0x16f   : > { %v2633_v60 = vadd.f32 %v3766_v10, %v4996_v18  ;;  %v3769_v59 = vadd.f32 %v3768_v17, %v3767_v47 }
 0x171   : > { %v2636_v51 = vadd.f32 %v3769_v59, %v4998_v30 }
 0x174   : > { %v3810_v46 = vpop.f32.mrb[28].mxu1 }
 0x175   : > { %v3811_v23 = vpop.f32.mrb[29].mxu1 }
 0x176   : > { %v3812_v29 = vadd.f32 %v3811_v23, %v3810_v46  ;;  %v3813_v52 = vpop.f32.mrb[30].mxu1  ;;  %v3770_v34 = vpop.f32.mrb[32].mxu0 }
 0x177   : > { %v3814_v56 = vpop.f32.mrb[31].mxu1  ;;  %v3771_v57 = vpop.f32.mrb[33].mxu0 }
 0x178   : > { %v3815_v13 = vadd.f32 %v3814_v56, %v3813_v52  ;;  %v3772_v36 = vadd.f32 %v3771_v57, %v3770_v34  ;;  %v3773_v62 = vpop.f32.mrb[34].mxu0  ;;  %v2706_v63 = vadd.f32 %v3812_v29, %v2633_v60 }
 0x179   : > { %v3774_v1 = vpop.f32.mrb[35].mxu0 }
 0x17a   : > { %v2641_v49 = vadd.f32 %v3772_v36, %v5002_v24  ;;  %v3775_v45 = vadd.f32 %v3774_v1, %v3773_v62  ;;  %v2709_v35 = vadd.f32 %v3815_v13, %v2636_v51 }
 0x17c   : > { %v2644_v18 = vadd.f32 %v3775_v45, %v5004_v32 }
 0x17e   : > { %v3816_v9 = vpop.f32.mrb[32].mxu1 }
 0x17f   : > { %v3817_v30 = vpop.f32.mrb[33].mxu1 }
 0x180   : > { %v3818_v12 = vadd.f32 %v3817_v30, %v3816_v9  ;;  %v3819_v61 = vpop.f32.mrb[34].mxu1 }
 0x181   : > { %v3820_v14 = vpop.f32.mrb[35].mxu1 }
 0x182   : > { %v3821_v27 = vadd.f32 %v3820_v14, %v3819_v61  ;;  %v2714_v3 = vadd.f32 %v3818_v12, %v2641_v49 }
 0x184   : > { %v3776_v19 = vpop.f32.mrb[36].mxu0  ;;  %v2717_v48 = vadd.f32 %v3821_v27, %v2644_v18 }
 0x185   : > { %v3777_v43 = vpop.f32.mrb[37].mxu0 }
 0x186   : > { %v3778_v37 = vadd.f32 %v3777_v43, %v3776_v19  ;;  %v3779_v42 = vpop.f32.mrb[38].mxu0 }
 0x187   : > { %v3780_v44 = vpop.f32.mrb[39].mxu0 }
 0x188   : > { %v2649_v28 = vadd.f32 %v3778_v37, %v5010_v4  ;;  %v3781_v24 = vadd.f32 %v3780_v44, %v3779_v42 }
 0x18a   : > { %v2652_v41 = vadd.f32 %v3781_v24, %v5012_v50  ;;  %v3822_v8 = vpop.f32.mrb[36].mxu1 }
 0x18b   : > { %v3823_v32 = vpop.f32.mrb[37].mxu1 }
 0x18c   : > { %v2762_v21 = vpop.f32.mrb[40].mxu0  ;;  %v3824_v31 = vadd.f32 %v3823_v32, %v3822_v8  ;;  %v3825_v55 = vpop.f32.mrb[38].mxu1  ;;  %v4119_v32 = vmov 0  }
 0x18d   : > { %v2763_v6 = vadd.f32 %v2762_v21, %v2690_v0  ;;  %v3872_v40 = vpop.f32.mrb[41].mxu0  ;;  %v3826_v53 = vpop.f32.mrb[39].mxu1  ;;  %3280 = vst [vmem:[%s5035_s29] sm:$0xf] %v4119_v32  ;;  %3291 = vst [vmem:[%s5035_s29 + $0x30] sm:$0x3] %v4119_v32 }
 0x18e   : > { %v2765_v10 = vpop.f32.mrb[42].mxu0  ;;  %v3827_v47 = vadd.f32 %v3826_v53, %v3825_v55  ;;  %v2722_v59 = vadd.f32 %v3824_v31, %v2649_v28  ;;  %v2960_v40 = vld [vmem:[%s4281_s24 + $0x4] sm:$0xe]  ;;  %v3640_v53 = vld [vmem:[%s4281_s24 + $0x8] sm:$0xff]  }
 0x18f   : > { %v2766_v17 = vadd.f32 %v2765_v10, %v2693_v20  ;;  %v3873_v60 = vpop.f32.mrb[43].mxu0  ;;  %v2801_v51 = vmax.f32 %v2763_v6, 0.0  ;;  %v3616_v10 = vunpack.c.l.bf16 %v3640_v53 }
 0x190   : > { %v2725_v23 = vadd.f32 %v3827_v47, %v2652_v41  ;;  %v2971_v47 = vunpack.c.l.bf16 %v2960_v40  ;;  %v3617_v60 = vunpack.c.h.bf16 %v3640_v53 }
 0x191   : > { %v2802_v46 = vmax.f32 %v2766_v17, 0.0  ;;  %v3641_v17 = vld [vmem:[%s4281_s24 + $0x10] sm:$0xff]  }
 0x193   : > { %v2811_v4 = vpack.c.bf16 %v2802_v46, %v2801_v51  ;;  %v2994_v46 = vrot.slane %v2971_v47, 3 }
 0x194   : > { %v2770_v29 = vpop.f32.mrb[44].mxu0 }
 0x195   : > { %v2771_v52 = vadd.f32 %v2770_v29, %v2698_v7  ;;  %v3876_v50 = vpop.f32.mrb[45].mxu0  ;;  %3907 = vmatmul.mubr.bf16.vlgmr.msra.gmra.mrb[40].mxu1 %v2811_v4  ;;  %v3620_v4 = vunpack.c.l.bf16 %v3641_v17  ;;  %v3621_v29 = vunpack.c.h.bf16 %v3641_v17 }
 0x196   : > { %v2773_v34 = vpop.f32.mrb[46].mxu0  ;;  %3910 = vmatprep.mubr.msk.bf16.mxu1 %vm4118_vm13, %v4117_v26 }
 0x197   : > { %v2774_v0 = vadd.f32 %v2773_v34, %v2701_v22  ;;  %v3877_v56 = vpop.f32.mrb[47].mxu0  ;;  %v2803_v57 = vmax.f32 %v2771_v52, 0.0  ;;  %v2997_v52 = vrot.slane %v3617_v60, 3  ;;  %v3642_v34 = vld [vmem:[%s4281_s24 + $0x18] sm:$0xff]  }
 0x199   : > { %v2804_v13 = vmax.f32 %v2774_v0, 0.0 }
 0x19b   : > { %v2812_v36 = vpack.c.bf16 %v2804_v13, %v2803_v57  ;;  %v2999_v57 = vrot.slane %v3620_v4, 3 }
 0x19c   : > { %v2778_v20 = vpop.f32.mrb[48].mxu0 }
 0x19d   : > { %v2779_v62 = vadd.f32 %v2778_v20, %v2706_v63  ;;  %v3880_v1 = vpop.f32.mrb[49].mxu0  ;;  %3911 = vmatmul.mubr.bf16.gmra.mrb[44].mxu1 %v2812_v36  ;;  %v3001_v20 = vrot.slane %v3621_v29, 3 }
 0x19e   : > { %v2781_v49 = vpop.f32.mrb[50].mxu0  ;;  %3914 = vmatprep.mubr.msk.bf16.mxu1 %vm4118_vm13, %v4117_v26 }
 0x19f   : > { %v2782_v7 = vadd.f32 %v2781_v49, %v2709_v35  ;;  %v3881_v45 = vpop.f32.mrb[51].mxu0  ;;  %v2805_v18 = vmax.f32 %v2779_v62, 0.0  ;;  %v3624_v49 = vunpack.c.l.bf16 %v3642_v34 }
 0x1a1   : > { %v2806_v9 = vmax.f32 %v2782_v7, 0.0 }
 0x1a3   : > { %v2813_v30 = vpack.c.bf16 %v2806_v9, %v2805_v18  ;;  %v3643_v9 = vld [vmem:[%s4281_s24 + $0x20] sm:$0xff]  }
 0x1a4   : > { %v2786_v12 = vpop.f32.mrb[52].mxu0 }
 0x1a5   : > { %v2787_v61 = vadd.f32 %v2786_v12, %v2714_v3  ;;  %v3884_v22 = vpop.f32.mrb[53].mxu0  ;;  %3915 = vmatmul.mubr.bf16.gmra.mrb[48].mxu1 %v2813_v30  ;;  %v3000_v30 = vsel %vm2993_vm4, %v2997_v52, %v2999_v57  ;;  %v3625_v12 = vunpack.c.h.bf16 %v3642_v34 }
 0x1a6   : > { %v2789_v14 = vpop.f32.mrb[54].mxu0  ;;  %3918 = vmatprep.mubr.msk.bf16.mxu1 %vm4118_vm13, %v4117_v26 }
 0x1a7   : > { %v2790_v63 = vadd.f32 %v2789_v14, %v2717_v48  ;;  %v3885_v27 = vpop.f32.mrb[55].mxu0  ;;  %v2807_v19 = vmax.f32 %v2787_v61, 0.0 }
 0x1a8   : > { %v3003_v27 = vrot.slane %v3624_v49, 3 }
 0x1a9   : > { %v2808_v43 = vmax.f32 %v2790_v63, 0.0  ;;  %v3002_v63 = vsel %vm2993_vm4, %v2999_v57, %v3001_v20 }
 0x1aa   : > { %v3004_v4 = vsel %vm2993_vm4, %v3001_v20, %v3003_v27 }
 0x1ab   : > { %v2814_v37 = vpack.c.bf16 %v2808_v43, %v2807_v19  ;;  %v3628_v19 = vunpack.c.l.bf16 %v3643_v9  ;;  %v3629_v43 = vunpack.c.h.bf16 %v3643_v9  ;;  %v2969_v9 = vld [vmem:[%s4281_s24 + $0x28] sm:$0xf] }
 0x1ac   : > { %v2794_v42 = vpop.f32.mrb[56].mxu0 }
 0x1ad   : > { %v2795_v35 = vadd.f32 %v2794_v42, %v2722_v59  ;;  %v3888_v44 = vpop.f32.mrb[57].mxu0  ;;  %3919 = vmatmul.mubr.bf16.gmra.mrb[52].mxu1 %v2814_v37  ;;  %v5080_v47 = vrot.slane %v3629_v43, 3 }
 0x1ae   : > { %v2797_v28 = vpop.f32.mrb[58].mxu0  ;;  %3922 = vmatprep.mubr.msk.bf16.mxu1 %vm4118_vm13, %v4117_v26  ;;  %v5040_v26 = vmul.u32.u64.low 3435973837, %v4251_v25  ;;  %v5041_v21 = vmul.u32.u64.high 3435973837, %v4251_v25, %v5040_v26  ;;  %vm3039_vm13 = vcmp.lt.s32.totalorder %v4372_v38, 8 }
 0x1af   : > { %v2798_v3 = vadd.f32 %v2797_v28, %v2725_v23  ;;  %v3889_v24 = vpop.f32.mrb[59].mxu0  ;;  %v2809_v41 = vmax.f32 %v2795_v35, 0.0  ;;  %v2995_v23 = vrot.slane %v3616_v10, 3  ;;  %v3007_v10 = vrot.slane %v3628_v19, 3 }
 0x1b0   : > { %v377_v31 = vshrl.u32 %v5041_v21, 3 }
 0x1b1   : > { %v2810_v8 = vmax.f32 %v2798_v3, 0.0  ;;  %v2996_v56 = vsel %vm2993_vm4, %v2994_v46, %v2995_v23  ;;  %v2998_v1 = vsel %vm2993_vm4, %v2995_v23, %v2997_v52 }
 0x1b2   : > { %v378_v55 = vmul.u32 10, %v377_v31 }
 0x1b3   : > { %v2815_v48 = vpack.c.bf16 %v2810_v8, %v2809_v41  ;;  %v3005_v8 = vrot.slane %v3625_v12, 3 }
 0x1b4   : > { %v379_v6 = vsub.s32 %v4251_v25, %v378_v55  ;;  %v5055_v25 = vld [vmem:[%s5187_s6] ss:$0 sm:$0xff] }
 0x1b5   : > { %3923 = vmatmul.mubr.bf16.gmra.mrb[56].mxu1 %v2815_v48  ;;  %v3006_v29 = vsel %vm2993_vm4, %v3003_v27, %v3005_v8 }
 0x1b6   : > { %vm514_vm14 = vcmp.ne.s32.totalorder %v379_v6, 0  ;;  %vm527_vm15 = vcmp.lt.s32.totalorder %v379_v6, 0  ;;  %v553_v59 = vadd.s32 10, %v379_v6 }
 0x1b7   : > { %vm5048_vm1 = vmand %vm527_vm15, %vm514_vm14  ;;  %vm3040_vm14 = vcmp.lt.s32.totalorder %v4409_v5, 8 }
 0x1b8   : > { %v566_v50 = vsel %vm5048_vm1, %v553_v59, %v379_v6  ;;  %v3263_v6 = vld [vmem:[%s5035_s29 + $0x4] sm:$0xe]  ;;  %vm5109_vm15 = vmand %vm1228_vm6, %vm1366_vm7  ;;  %vm3041_vm1 = vcmp.lt.s32.totalorder %v4471_v58, 8  ;;  %vm3043_vm6 = vcmp.lt.s32.totalorder %v4570_v2, 8  ;;  %vm3044_vm7 = vcmp.lt.s32.totalorder %v4617_v39, 8 }
 0x1b9   : > { %vm3035_vm0 = vcmp.lt.s32.totalorder %v566_v50, 8 }
 0x268   : > { %v2921_v0 = vpop.f32.mrb[40].mxu1 }
 0x269   : > { %v2922_v13 = vadd.f32 %v5055_v25, %v2921_v0  ;;  %v3908_v36 = vpop.f32.mrb[41].mxu1 }
 0x26a   : > { %v2924_v62 = vpop.f32.mrb[42].mxu1 }
 0x26b   : > { %v3025_v7 = vadd.f32 %v2996_v56, %v2922_v13  ;;  %v2925_v45 = vadd.f32 %v5055_v25, %v2924_v62  ;;  %v3909_v18 = vpop.f32.mrb[43].mxu1  ;;  %v5093_v13 = vsel %vm2993_vm4, %v3005_v8, %v3007_v10 }
 0x26d   : > { %v3065_v61 = vsel %vm3035_vm0, %v3025_v7, 0.0  ;;  %v3555_v22 = vpack.c.bf16 %v3025_v7, %v3025_v7  ;;  %v3026_v14 = vadd.f32 %v2998_v1, %v2925_v45  ;;  %v5099_v1 = vsel %vm2993_vm4, %v3007_v10, %v5080_v47 }
 0x26e   : > { %v3093_v28 = vmul.f32 %v3065_v61, %v3065_v61  ;;  %vm3042_vm0 = vcmp.lt.s32.totalorder %v4487_v33, 8 }
 0x26f   : > { %v3151_v37 = vshrl.u32 %v3555_v22, 16  ;;  %v3154_v42 = vshll.u32 %v3555_v22, 16  ;;  %v3066_v35 = vsel %vm3036_vm3, %v3026_v14, 0.0  ;;  %v3556_v44 = vpack.c.bf16 %v3026_v14, %v3026_v14  ;;  %vm3276_vm3 = vmand %vm1519_vm2, %vm3275_vm8 }
 0x270   : > { %v3075_v3 = vadd.f32 %v3066_v35, %v3065_v61  ;;  %v3094_v24 = vmul.f32 %v3066_v35, %v3066_v35  ;;  %v2929_v41 = vpop.f32.mrb[44].mxu1  ;;  %vm3285_vm2 = vcmask 1043456  }
 0x271   : > { %v3153_v48 = vrot.slane %v3151_v37, 6  ;;  %v3156_v32 = vrot.slane %v3154_v42, 7  ;;  %v3160_v26 = vshrl.u32 %v3556_v44, 16  ;;  %v3163_v21 = vshll.u32 %v3556_v44, 16  ;;  %v3912_v31 = vpop.f32.mrb[45].mxu1 }
 0x272   : > { %v3103_v11 = vadd.f32 %v3094_v24, %v3093_v28  ;;  %v2930_v40 = vadd.f32 %v5055_v25, %v2929_v41  ;;  %v2932_v53 = vpop.f32.mrb[46].mxu1  ;;  %v2980_v24 = vunpack.c.l.bf16 %v2969_v9 }
 0x273   : > { %v3157_v17 = vor.u32 %v3156_v32, %v3153_v48  ;;  %v3162_v60 = vrot.slane %v3160_v26, 6  ;;  %v3165_v59 = vrot.slane %v3163_v21, 7  ;;  %v2933_v51 = vadd.f32 %v5055_v25, %v2932_v53  ;;  %v3913_v46 = vpop.f32.mrb[47].mxu1 }
 0x274   : > { %v3027_v23 = vadd.f32 %v3000_v30, %v2930_v40 }
 0x275   : > { %v3158_v52 = vrot.slane %v3157_v17, 4  ;;  %v3264_v50 = vsel %vm5074_vm12, %v3157_v17, %v3263_v6  ;;  %v3166_v34 = vor.u32 %v3165_v59, %v3162_v60  ;;  %v3028_v0 = vadd.f32 %v3002_v63, %v2933_v51  ;;  %v2970_v63 = vld [vmem:[%s4281_s24 + $0x2c] sm:$0x1]  ;;  %s3385_s24 = sshll.u32 %s5229_s2, 1 }
 0x276   : > { %3265 = vst [vmem:[%s5035_s29 + $0x4] sm:$0xe] %v3264_v50  ;;  %v3067_v56 = vsel %vm3037_vm9, %v3027_v23, 0.0  ;;  %v3557_v57 = vpack.c.bf16 %v3027_v23, %v3027_v23  ;;  %v2981_v6 = vunpack.c.l.bf16 %v2970_v63  ;;  %s316_s11 = scalar_lea.vmem %s5189_s8, %s3385_s24  ;;  %vm3287_vm9 = vmand %vm3285_vm2, %vm3286_vm5 }
 0x277   : > { %v3167_v36 = vsel %vm4762_vm10, %v3158_v52, %v3166_v34  ;;  %v3076_v20 = vadd.f32 %v3075_v3, %v3067_v56  ;;  %v3095_v62 = vmul.f32 %v3067_v56, %v3067_v56  ;;  %v3068_v7 = vsel %vm3038_vm11, %v3028_v0, 0.0 }
 0x278   : > { %3266 = vst [vmem:[%s5035_s29 + $0x8] sm:$0xf] %v3167_v36  ;;  %v3170_v49 = vshrl.u32 %v3557_v57, 16  ;;  %v3173_v15 = vshll.u32 %v3557_v57, 16  ;;  %v3558_v45 = vpack.c.bf16 %v3028_v0, %v3028_v0  ;;  %v2937_v18 = vpop.f32.mrb[48].mxu1  ;;  %v3096_v61 = vmul.f32 %v3068_v7, %v3068_v7 }
 0x279   : > { %v3104_v30 = vadd.f32 %v3103_v11, %v3095_v62  ;;  %v3077_v12 = vadd.f32 %v3076_v20, %v3068_v7  ;;  %v2938_v22 = vadd.f32 %v5055_v25, %v2937_v18  ;;  %v3916_v14 = vpop.f32.mrb[49].mxu1  ;;  %v3168_v41 = vrot.slane %v3166_v34, 4 }
 0x27a   : > { %v3172_v27 = vrot.slane %v3170_v49, 6  ;;  %v3175_v19 = vrot.slane %v3173_v15, 7  ;;  %v3180_v43 = vshrl.u32 %v3558_v45, 16  ;;  %v3183_v37 = vshll.u32 %v3558_v45, 16  ;;  %v2940_v42 = vpop.f32.mrb[50].mxu1 }
 0x27b   : > { %v3105_v35 = vadd.f32 %v3104_v30, %v3096_v61  ;;  %v3029_v44 = vadd.f32 %v3004_v4, %v2938_v22  ;;  %v2941_v28 = vadd.f32 %v5055_v25, %v2940_v42  ;;  %v3917_v3 = vpop.f32.mrb[51].mxu1  ;;  %v3013_v18 = vrot.slane %v2981_v6, 3 }
 0x27c   : > { %v3176_v8 = vor.u32 %v3175_v19, %v3172_v27  ;;  %v3182_v48 = vrot.slane %v3180_v43, 6  ;;  %v3185_v32 = vrot.slane %v3183_v37, 7 }
 0x27d   : > { %v3282_v26 = vld [vmem:[%s5035_s29 + $0x4] sm:$0x3]  ;;  %v3069_v21 = vsel %vm3039_vm13, %v3029_v44, 0.0  ;;  %v3559_v31 = vpack.c.bf16 %v3029_v44, %v3029_v44  ;;  %v3030_v55 = vadd.f32 %v3006_v29, %v2941_v28  ;;  %v3011_v29 = vrot.slane %v2980_v24, 3 }
 0x27e   : > { %v3283_v11 = vsel %vm5109_vm15, 0, %v3282_v26  ;;  %v3177_v40 = vsel %vm4762_vm10, %v3168_v41, %v3176_v8  ;;  %v3178_v53 = vrot.slane %v3176_v8, 4  ;;  %v3186_v10 = vor.u32 %v3185_v32, %v3182_v48 }
 0x27f   : > { %3284 = vst [vmem:[%s5035_s29 + $0x4] sm:$0x3] %v3283_v11  ;;  %3267 = vst [vmem:[%s5035_s29 + $0xc] sm:$0xf] %v3177_v40  ;;  %v3078_v17 = vadd.f32 %v3077_v12, %v3069_v21  ;;  %v3097_v60 = vmul.f32 %v3069_v21, %v3069_v21  ;;  %v3190_v59 = vshrl.u32 %v3559_v31, 16  ;;  %v3193_v51 = vshll.u32 %v3559_v31, 16 }
 0x280   : > { %v3187_v38 = vsel %vm4762_vm10, %v3178_v53, %v3186_v10  ;;  %v3070_v46 = vsel %vm3040_vm14, %v3030_v55, 0.0  ;;  %v3560_v23 = vpack.c.bf16 %v3030_v55, %v3030_v55  ;;  %v2945_v4 = vpop.f32.mrb[52].mxu1  ;;  %v3188_v15 = vrot.slane %v3186_v10, 4 }
 0x281   : > { %3268 = vst [vmem:[%s5035_s29 + $0x10] sm:$0xf] %v3187_v38  ;;  %v3106_v52 = vadd.f32 %v3105_v35, %v3097_v60  ;;  %v3192_v50 = vrot.slane %v3190_v59, 6  ;;  %v3195_v34 = vrot.slane %v3193_v51, 7  ;;  %v3079_v0 = vadd.f32 %v3078_v17, %v3070_v46  ;;  %v3920_v56 = vpop.f32.mrb[53].mxu1 }
 0x282   : > { %v3098_v57 = vmul.f32 %v3070_v46, %v3070_v46  ;;  %v3200_v36 = vshrl.u32 %v3560_v23, 16  ;;  %v3203_v20 = vshll.u32 %v3560_v23, 16  ;;  %v2946_v62 = vadd.f32 %v5055_v25, %v2945_v4  ;;  %v2948_v49 = vpop.f32.mrb[54].mxu1 }
 0x283   : > { %v3196_v7 = vor.u32 %v3195_v34, %v3192_v50  ;;  %v2949_v5 = vadd.f32 %v5055_v25, %v2948_v49  ;;  %v3921_v45 = vpop.f32.mrb[55].mxu1  ;;  %v3012_v27 = vsel %vm2993_vm4, %v5080_v47, %v3011_v29  ;;  %v3014_v3 = vsel %vm2993_vm4, %v3011_v29, %v3013_v18 }
 0x284   : > { %v3107_v9 = vadd.f32 %v3106_v52, %v3098_v57  ;;  %v3202_v30 = vrot.slane %v3200_v36, 6  ;;  %v3205_v12 = vrot.slane %v3203_v20, 7  ;;  %v3031_v61 = vadd.f32 %v5093_v13, %v2946_v62 }
 0x285   : > { %v3197_v22 = vsel %vm4762_vm10, %v3188_v15, %v3196_v7  ;;  %v3198_v14 = vrot.slane %v3196_v7, 4  ;;  %v3032_v63 = vadd.f32 %v5099_v1, %v2949_v5  ;;  %vm3083_vm4 = vcmask 1045504  }
 0x286   : > { %3269 = vst [vmem:[%s5035_s29 + $0x14] sm:$0xf] %v3197_v22  ;;  %v3206_v19 = vor.u32 %v3205_v12, %v3202_v30  ;;  %v3071_v43 = vsel %vm3041_vm1, %v3031_v61, 0.0  ;;  %v3561_v37 = vpack.c.bf16 %v3031_v61, %v3031_v61 }
 0x287   : > { %v3080_v42 = vadd.f32 %v3079_v0, %v3071_v43  ;;  %v3099_v13 = vmul.f32 %v3071_v43, %v3071_v43  ;;  %v3072_v16 = vsel %vm3042_vm0, %v3032_v63, 0.0  ;;  %v3562_v35 = vpack.c.bf16 %v3032_v63, %v3032_v63  ;;  %v3277_v43 = vld [vmem:[%s5035_s29 + $0x2c] sm:$0x1] }
 0x288   : > { %v3207_v1 = vsel %vm4762_vm10, %v3198_v14, %v3206_v19  ;;  %v3210_v44 = vshrl.u32 %v3561_v37, 16  ;;  %v3213_v28 = vshll.u32 %v3561_v37, 16  ;;  %v2953_v47 = vpop.f32.mrb[56].mxu1  ;;  %v3100_v41 = vmul.f32 %v3072_v16, %v3072_v16 }
 0x289   : > { %3270 = vst [vmem:[%s5035_s29 + $0x18] sm:$0xf] %v3207_v1  ;;  %v3108_v58 = vadd.f32 %v3107_v9, %v3099_v13  ;;  %v3081_v24 = vadd.f32 %v3080_v42, %v3072_v16  ;;  %v3220_v8 = vshrl.u32 %v3562_v35, 16  ;;  %v3924_v48 = vpop.f32.mrb[57].mxu1  ;;  %v3223_v21 = vshll.u32 %v3562_v35, 16 }
 0x28a   : > { %v3212_v32 = vrot.slane %v3210_v44, 6  ;;  %v3215_v26 = vrot.slane %v3213_v28, 7  ;;  %v2954_v33 = vadd.f32 %v5055_v25, %v2953_v47  ;;  %v2956_v31 = vpop.f32.mrb[58].mxu1  ;;  %v3208_v53 = vrot.slane %v3206_v19, 4 }
 0x28b   : > { %v3109_v55 = vadd.f32 %v3108_v58, %v3100_v41  ;;  %v3222_v6 = vrot.slane %v3220_v8, 6  ;;  %v2957_v11 = vadd.f32 %v5055_v25, %v2956_v31  ;;  %v3925_v40 = vpop.f32.mrb[59].mxu1  ;;  %v3225_v17 = vrot.slane %v3223_v21, 7 }
 0x28c   : > { %v3216_v10 = vor.u32 %v3215_v26, %v3212_v32  ;;  %v3033_v60 = vadd.f32 %v3012_v27, %v2954_v33 }
 0x28d   : > { %v3034_v59 = vadd.f32 %v3014_v3, %v2957_v11  ;;  %v3226_v46 = vor.u32 %v3225_v17, %v3222_v6 }
 0x28e   : > { %v3217_v51 = vsel %vm4762_vm10, %v3208_v53, %v3216_v10  ;;  %v3218_v38 = vrot.slane %v3216_v10, 4  ;;  %v3073_v23 = vsel %vm3043_vm6, %v3033_v60, 0.0  ;;  %v3563_v29 = vpack.c.bf16 %v3033_v60, %v3033_v60 }
 0x28f   : > { %3271 = vst [vmem:[%s5035_s29 + $0x1c] sm:$0xf] %v3217_v51  ;;  %v3082_v25 = vadd.f32 %v3081_v24, %v3073_v23  ;;  %v3101_v4 = vmul.f32 %v3073_v23, %v3073_v23  ;;  %v3074_v52 = vsel %vm3044_vm7, %v3034_v59, 0.0  ;;  %v3564_v62 = vpack.c.bf16 %v3034_v59, %v3034_v59 }
 0x290   : > { %v3227_v50 = vsel %vm4762_vm10, %v3218_v38, %v3226_v46  ;;  %v3084_v34 = vsel %vm3083_vm4, %v3074_v52, 0.0  ;;  %v3102_v0 = vmul.f32 %v3074_v52, %v3074_v52  ;;  %v3230_v57 = vshrl.u32 %v3563_v29, 16 }
 0x291   : > { %3272 = vst [vmem:[%s5035_s29 + $0x20] sm:$0xf] %v3227_v50  ;;  %v3110_v56 = vadd.f32 %v3109_v55, %v3101_v4  ;;  %v3233_v36 = vshll.u32 %v3563_v29, 16  ;;  %v3085_v20 = vadd.f32 %v3084_v34, %v3082_v25  ;;  %v3240_v5 = vshrl.u32 %v3564_v62, 16 }
 0x292   : > { %v3111_v2 = vsel %vm3083_vm4, %v3102_v0, 0.0  ;;  %v3232_v49 = vrot.slane %v3230_v57, 6  ;;  %v3243_v45 = vshll.u32 %v3564_v62, 16  ;;  %v3228_v18 = vrot.slane %v3226_v46, 4 }
 0x293   : > { %v3235_v15 = vrot.slane %v3233_v36, 7  ;;  %v3086_v7 = vrot.slane %v3085_v20, 4  ;;  %v3112_v39 = vadd.f32 %v3111_v2, %v3110_v56  ;;  %v3242_v61 = vrot.slane %v3240_v5, 6 }
 0x294   : > { %v3245_v22 = vrot.slane %v3243_v45, 7 }
 0x295   : > { %v3236_v9 = vor.u32 %v3235_v15, %v3232_v49  ;;  %v3087_v30 = vadd.f32 %v3086_v7, %v3085_v20  ;;  %v3113_v12 = vrot.slane %v3112_v39, 4  ;;  %v3248_v42 = vrot.slane %v3242_v61, 4 }
 0x296   : > { %v3246_v37 = vor.u32 %v3245_v22, %v3242_v61 }
 0x297   : > { %v3237_v14 = vsel %vm4762_vm10, %v3228_v18, %v3236_v9  ;;  %v3238_v63 = vrot.slane %v3236_v9, 4  ;;  %v3088_v27 = vrot.slane %v3087_v30, 2  ;;  %v3114_v19 = vadd.f32 %v3113_v12, %v3112_v39 }
 0x298   : > { %3273 = vst [vmem:[%s5035_s29 + $0x24] sm:$0xf] %v3237_v14  ;;  %v3278_v1 = vsel %vm3276_vm3, %v3248_v42, %v3277_v43 }
 0x299   : > { %v3089_v13 = vadd.f32 %v3088_v27, %v3087_v30  ;;  %v3115_v16 = vrot.slane %v3114_v19, 2  ;;  %v3247_v35 = vsel %vm4762_vm10, %v3238_v63, %v3246_v37  ;;  %3279 = vst [vmem:[%s5035_s29 + $0x2c] sm:$0x1] %v3278_v1 }
 0x29a   : > { %3274 = vst [vmem:[%s5035_s29 + $0x28] sm:$0xf] %v3247_v35 }
 0x29b   : > { %v3090_v44 = vrot.slane %v3089_v13, 1  ;;  %v3116_v28 = vadd.f32 %v3115_v16, %v3114_v19 }
 0x29d   : > { %v3091_v47 = vadd.f32 %v3090_v44, %v3089_v13  ;;  %v3117_v3 = vrot.slane %v3116_v28, 1 }
 0x29f   : > { %3092 = vst [vmem:[%s316_s11] sm:$0x1] %v3091_v47  ;;  %v3118_v58 = vadd.f32 %v3117_v3, %v3116_v28 }
 0x2a0   : > { %v3288_v54 = vld [vmem:[%s5035_s29 + $0x2c] sm:$0xf] }
 0x2a1   : > { %3119 = vst [vmem:[%s316_s11 + $0x1] sm:$0x1] %v3118_v58  ;;  %v3289_v24 = vsel %vm3287_vm9, 0, %v3288_v54 }
 0x2a2   : > { %3290 = vst [vmem:[%s5035_s29 + $0x2c] sm:$0xf] %v3289_v24 }
 0x2a3 PF: > { %s19_s26 = sadd.s32 1, %s4114_s26  }
 0x2a4   : > { %p16_p4 = scmp.ge.s32.totalorder %s19_s26, 4  }
 0x2a6   :  { %18 = sbr.rel (!%p16_p4) target bundleno = 1 (0x1), region = 90 }

// kernel: vqvae_decoder.5
= control target key start
LH: loop header
LB: loop body
LE: loop exit
PB: predicated region body
PF: predicated region fallthrough
CT: control target
= control target key end

     0   :  { %s4083_s24 = smov 0   ;;  %s5098_s0 = inlined_call_operand.vmem [shape: bf16[2,100,128], index: 0, kind: input, shape index: {}]   ;;  %s5099_s1 = inlined_call_operand.vmem [shape: f32[1,128], index: 1, kind: input, shape index: {}]   ;;  %s5100_s2 = inlined_call_operand.vmem [shape: f32[1,128], index: 2, kind: input, shape index: {}]   ;;  %s5101_s3 = inlined_call_operand.vmem [shape: bf16[1152,128], index: 3, kind: input, shape index: {}]   ;;  %s5102_s4 = inlined_call_operand.vmem [shape: f32[1,128], index: 4, kind: input, shape index: {}]   ;;  %s5103_s5 = inlined_call_operand.vmem [shape: bf16[128,128], index: 5, kind: input, shape index: {}]   ;;  %s5104_s6 = inlined_call_operand.vmem [shape: f32[1,128], index: 6, kind: input, shape index: {}]   ;;  %s5105_s7 = inlined_call_operand.vmem [shape: bf16[2,100,128], index: 7, kind: output, shape index: {}]  }
   0x1 LB: > { %s3300_s25 = sadd.s32 4294967295, %s4037_s24   ;;  %p3304_p0 = scmp.ge.s32.totalorder %s4037_s24, 1  ;;  %s4037_s24 = sphi %s4083_s24, %s17_s24  }
   0x2   : > { %p237_p1 = scmp.lt.s32.totalorder %s4037_s24, 3 }
   0x4   : > { %p238_p2 = pnand %p3304_p0, %p237_p1 }
   0x5   : > { %v3886_v0 = vld [vmem:[%s5101_s3 + $0x40] sm:$0xff] (!%p238_p2)   ;;  %v3889_v3 = vld [vmem:[%s5101_s3 + $0x48] sm:$0xff] (!%p238_p2)   ;;  %v3893_v7 = vld [vmem:[%s5101_s3 + $0x50] sm:$0xff] (!%p238_p2)   ;;  %p269_p3 = scmp.lt.s32.totalorder (!%p238_p2), %s3300_s25, 1  ;;  %v359_v20 = vlaneseq (!%p238_p2) }
   0x6   : > { %241 = sbr.rel (%p238_p2) target bundleno = 678 (0x2a6), region = 48  ;;  %v3887_v1 = vld [vmem:[%s5101_s3] sm:$0xff] (!%p238_p2)   ;;  %3569 = vmatprep.subr.bf16.mxu0 (!%p238_p2), %v3886_v0  ;;  %v3891_v5 = vld [vmem:[%s5101_s3 + $0x8] sm:$0xff] (!%p238_p2)   ;;  %v3895_v9 = vld [vmem:[%s5101_s3 + $0x10] sm:$0xff] (!%p238_p2)  }
   0x7   : > { %v3888_v2 = vld [vmem:[%s5101_s3 + $0xc0] sm:$0xff] (!%p238_p2)   ;;  %3570 = vmatpush3.bf16.msra.mxu0 (!%p238_p2), %v3887_v1  ;;  %v3892_v6 = vld [vmem:[%s5101_s3 + $0xc8] sm:$0xff] (!%p238_p2)   ;;  %v3896_v10 = vld [vmem:[%s5101_s3 + $0xd0] sm:$0xff] (!%p238_p2)   ;;  %v4169_v25 = vshrl.u32 (!%p238_p2), %v359_v20, 7 }
   0x8   : > { %3615 = vmatprep.subr.bf16.mxu1 (!%p238_p2), %v3888_v2  ;;  %v3890_v4 = vld [vmem:[%s5101_s3 + $0x80] sm:$0xff] (!%p238_p2)   ;;  %3571 = vmatprep.subr.bf16.mxu0 (!%p238_p2), %v3889_v3  ;;  %v3894_v8 = vld [vmem:[%s5101_s3 + $0x88] sm:$0xff] (!%p238_p2)   ;;  %v3897_v11 = vld [vmem:[%s5101_s3 + $0x58] sm:$0xff] (!%p238_p2)  }
   0x9   : > { %3616 = vmatpush3.bf16.msra.mxu1 (!%p238_p2), %v3890_v4  ;;  %v3898_v12 = vld [vmem:[%s5101_s3 + $0x90] sm:$0xff] (!%p238_p2)   ;;  %v3899_v13 = vld [vmem:[%s5101_s3 + $0x18] sm:$0xff] (!%p238_p2)   ;;  %v3901_v15 = vld [vmem:[%s5101_s3 + $0x60] sm:$0xff] (!%p238_p2)   ;;  %v4195_v31 = vadd.s32 (!%p238_p2), 8, %v4169_v25  ;;  %v362_v33 = vadd.s32 (!%p238_p2), 16, %v4169_v25  ;;  %v363_v38 = vadd.s32 (!%p238_p2), 24, %v4169_v25 }
   0xa   : > { %3617 = vmatprep.subr.bf16.mxu1 (!%p238_p2), %v3892_v6  ;;  %v3900_v14 = vld [vmem:[%s5101_s3 + $0xd8] sm:$0xff] (!%p238_p2)   ;;  %v3903_v17 = vld [vmem:[%s5101_s3 + $0x20] sm:$0xff] (!%p238_p2)   ;;  %v3905_v19 = vld [vmem:[%s5101_s3 + $0x68] sm:$0xff] (!%p238_p2)   ;;  %v364_v55 = vadd.s32 (!%p238_p2), 32, %v4169_v25  ;;  %v4245_v60 = vadd.s32 (!%p238_p2), 40, %v4169_v25  ;;  %v4248_v61 = vadd.s32 (!%p238_p2), 48, %v4169_v25 }
   0xb   : > { %3572 = vmatpush3.bf16.msra.mxu0 (!%p238_p2), %v3891_v5  ;;  %v3902_v16 = vld [vmem:[%s5101_s3 + $0x98] sm:$0xff] (!%p238_p2)   ;;  %v3904_v18 = vld [vmem:[%s5101_s3 + $0xe0] sm:$0xff] (!%p238_p2)   ;;  %v3907_v22 = vld [vmem:[%s5101_s3 + $0x28] sm:$0xff] (!%p238_p2)   ;;  %v4218_v43 = vmul.u32.u64.low (!%p238_p2), 3435973837, %v4195_v31  ;;  %v4219_v44 = vmul.u32.u64.high 3435973837, %v4195_v31, %v4218_v43  ;;  %vm621_vm0 = vcmp.lt.s32.totalorder (!%p238_p2), %v4195_v31, 10 }
   0xc   : > { %3573 = vmatprep.subr.bf16.mxu0 (!%p238_p2), %v3893_v7  ;;  %v3906_v21 = vld [vmem:[%s5101_s3 + $0xa0] sm:$0xff] (!%p238_p2)   ;;  %v3908_v23 = vld [vmem:[%s5101_s3 + $0xe8] sm:$0xff] (!%p238_p2)   ;;  %v3909_v24 = vld [vmem:[%s5101_s3 + $0x70] sm:$0xff] (!%p238_p2)   ;;  %v4221_v45 = vmul.u32.u64.low (!%p238_p2), 3435973837, %v362_v33  ;;  %v4222_v46 = vmul.u32.u64.high 3435973837, %v362_v33, %v4221_v45 }
   0xd   : > { %3618 = vmatpush3.bf16.msra.mxu1 %v3894_v8  ;;  %s5135_s25 = smov (!%p269_p3, %s3300_s25), 1  ;;  %v3910_v26 = vld [vmem:[%s5101_s3 + $0xa8] sm:$0xff]   ;;  %v3911_v27 = vld [vmem:[%s5101_s3 + $0x30] sm:$0xff]   ;;  %v3913_v29 = vld [vmem:[%s5101_s3 + $0x78] sm:$0xff]   ;;  %v4232_v51 = vmul.u32.u64.low 3435973837, %v363_v38  ;;  %v4233_v52 = vmul.u32.u64.high 3435973837, %v363_v38, %v4232_v51 }
   0xe   : > { %3619 = vmatprep.subr.bf16.mxu1 %v3896_v10  ;;  %s3851_s11 = smul.u32 52, %s5135_s25  ;;  %v3912_v28 = vld [vmem:[%s5101_s3 + $0xf0] sm:$0xff]   ;;  %v3915_v32 = vld [vmem:[%s5101_s3 + $0x38] sm:$0xff]   ;;  %v4209_v37 = vld [vmem:[%s5099_s1] ss:$0 sm:$0xff]  ;;  %v390_v57 = vshrl.u32 %v4219_v44, 3 }
   0xf   : > { %3574 = vmatpush3.bf16.msra.mxu0 %v3895_v9  ;;  %v3914_v30 = vld [vmem:[%s5101_s3 + $0xb0] sm:$0xff]   ;;  %v3916_v34 = vld [vmem:[%s5101_s3 + $0xf8] sm:$0xff]   ;;  %v4215_v42 = vld [vmem:[%s5100_s2] ss:$0 sm:$0xff]  ;;  %v401_v58 = vshrl.u32 %v4222_v46, 3  ;;  %v412_v0 = vshrl.u32 %v4233_v52, 3 }
  0x10   : > { %3575 = vmatprep.subr.bf16.mxu0 %v3897_v11  ;;  %s4192_s22 = scalar_lea.vmem %s5098_s0, %s3851_s11  ;;  %v3920_v49 = vld [vmem:[%s5101_s3 + $0xb8] sm:$0xff]   ;;  %v3921_v50 = vld [vmem:[%s5101_s3 + $0x140] sm:$0xff]   ;;  %v391_v62 = vmul.u32 10, %v390_v57  ;;  %v4254_v3 = vmul.u32.u64.low 3435973837, %v364_v55  ;;  %v4255_v4 = vmul.u32.u64.high 3435973837, %v364_v55, %v4254_v3  ;;  %s4970_s18 = scalar_lea.vmem %s5105_s7, %s3851_s11 }
  0x11   : > { %3620 = vmatpush3.bf16.msra.mxu1 %v3898_v12  ;;  %v281_v35 = vld [vmem:[%s4192_s22 + $0x4] sm:$0xf]  ;;  %v3555_v36 = vld [vmem:[%s4192_s22 + $0x8] sm:$0xff]   ;;  %v402_v63 = vmul.u32 10, %v401_v58  ;;  %v3556_v1 = vld [vmem:[%s4192_s22 + $0x10] sm:$0xff]   ;;  %v413_v8 = vmul.u32 10, %v412_v0 }
  0x12   : > { %3621 = vmatprep.subr.bf16.mxu1 %v3900_v14  ;;  %v3492_v39 = vunpack.c.l.bf16 %v3555_v36  ;;  %v3493_v40 = vunpack.c.h.bf16 %v3555_v36  ;;  %v294_v41 = vunpack.c.l.bf16 %v281_v35  ;;  %v392_v6 = vsub.s32 %v4195_v31, %v391_v62 }
  0x13   : > { %3576 = vmatpush3.bf16.msra.mxu0 %v3899_v13  ;;  %v403_v7 = vsub.s32 %v362_v33, %v402_v63  ;;  %v3496_v9 = vunpack.c.l.bf16 %v3556_v1  ;;  %v4259_v10 = vmul.u32.u64.low 3435973837, %v4245_v60  ;;  %v4260_v11 = vmul.u32.u64.high 3435973837, %v4245_v60, %v4259_v10  ;;  %v3936_v13 = vld [vmem:[%s5101_s3 + $0x1c0] sm:$0xff]  }
  0x14   : > { %3577 = vmatprep.subr.bf16.mxu0 %v3901_v15  ;;  %v314_v47 = vmul.f32 %v4209_v37, %v294_v41  ;;  %v315_v48 = vmul.f32 %v3492_v39, %v4209_v37  ;;  %v316_v53 = vmul.f32 %v3493_v40, %v4209_v37  ;;  %v414_v12 = vsub.s32 %v363_v38, %v413_v8 }
  0x15   : > { %3622 = vmatpush3.bf16.msra.mxu1 %v3902_v16  ;;  %vm517_vm1 = vcmp.ne.s32.totalorder %v392_v6, 0  ;;  %vm518_vm2 = vcmp.ne.s32.totalorder %v403_v7, 0  ;;  %vm530_vm3 = vcmp.lt.s32.totalorder %v392_v6, 0  ;;  %vm531_vm4 = vcmp.lt.s32.totalorder %v403_v7, 0 }
  0x16   : > { %3623 = vmatprep.subr.bf16.mxu1 %v3904_v18  ;;  %v4237_v54 = vadd.f32 %v4215_v42, %v314_v47  ;;  %v335_v56 = vadd.f32 %v4215_v42, %v315_v48  ;;  %v336_v2 = vadd.f32 %v4215_v42, %v316_v53  ;;  %vm543_vm5 = vmand %vm530_vm3, %vm517_vm1  ;;  %v556_v14 = vadd.s32 10, %v392_v6 }
  0x17   : > { %3578 = vmatpush3.bf16.msra.mxu0 %v3903_v17  ;;  %v557_v15 = vadd.s32 10, %v403_v7  ;;  %v3497_v16 = vunpack.c.h.bf16 %v3556_v1  ;;  %vm519_vm6 = vcmp.ne.s32.totalorder %v414_v12, 0  ;;  %vm532_vm7 = vcmp.lt.s32.totalorder %v414_v12, 0  ;;  %vm544_vm8 = vmand %vm531_vm4, %vm518_vm2 }
  0x18   : > { %3579 = vmatprep.subr.bf16.mxu0 %v3905_v19  ;;  %v347_v59 = vmax.f32 %v4237_v54, 0.0  ;;  %v348_v5 = vmax.f32 %v335_v56, 0.0  ;;  %v349_v17 = vmax.f32 %v336_v2, 0.0  ;;  %v558_v18 = vadd.s32 10, %v414_v12  ;;  %vm545_vm9 = vmand %vm532_vm7, %vm519_vm6 }
  0x19   : > { %3624 = vmatpush3.bf16.msra.mxu1 %v3906_v21  ;;  %v569_v19 = vsel %vm543_vm5, %v556_v14, %v392_v6  ;;  %v570_v20 = vsel %vm544_vm8, %v557_v15, %v403_v7  ;;  %v317_v21 = vmul.f32 %v3496_v9, %v4209_v37  ;;  %v4039_v40 = vmov 0.0  }
  0x1a   : > { %3625 = vmatprep.subr.bf16.mxu1 %v3908_v23  ;;  %v571_v23 = vsel %vm545_vm9, %v558_v18, %v414_v12  ;;  %vm582_vm10 = vcmp.eq.s32.totalorder %v569_v19, 0  ;;  %vm583_vm11 = vcmp.eq.s32.totalorder %v570_v20, 0  ;;  %vm595_vm12 = vcmp.eq.s32.totalorder %v569_v19, 9 }
  0x1b   : > { %3580 = vmatpush3.bf16.msra.mxu0 %v3907_v22  ;;  %v423_v22 = vshrl.u32 %v4255_v4, 3  ;;  %vm584_vm13 = vcmp.eq.s32.totalorder %v571_v23, 0  ;;  %vm596_vm14 = vcmp.eq.s32.totalorder %v570_v20, 9  ;;  %vm597_vm15 = vcmp.eq.s32.totalorder %v571_v23, 9  ;;  %vm608_vm1 = vmor %vm582_vm10, %vm595_vm12 }
  0x1c   : > { %3581 = vmatprep.subr.bf16.mxu0 %v3909_v24  ;;  %v318_v24 = vmul.f32 %v3497_v16, %v4209_v37  ;;  %vm609_vm2 = vmor %vm583_vm11, %vm596_vm14  ;;  %v337_v33 = vadd.f32 %v4215_v42, %v317_v21  ;;  %vm949_vm7 = vcmask 1042432   ;;  %vm807_vm12 = vsmask.f32 3328 }
  0x1d   : > { %3626 = vmatpush3.bf16.msra.mxu1 %v3910_v26  ;;  %v424_v26 = vmul.u32 10, %v423_v22  ;;  %vm610_vm3 = vmor %vm584_vm13, %vm597_vm15  ;;  %v4289_v56 = vadd.s32 64, %v4169_v25 }
  0x1e   : > { %3627 = vmatprep.subr.bf16.mxu1 %v3912_v28  ;;  %v700_v28 = vsel %vm609_vm2, 0.0, %v348_v5  ;;  %vm634_vm4 = vmor %vm608_vm1, %vm621_vm0  ;;  %v338_v39 = vadd.f32 %v4215_v42, %v318_v24  ;;  %vm950_vm0 = vcmask 1046532   ;;  %v350_v45 = vmax.f32 %v337_v33, 0.0 }
  0x1f   : > { %3582 = vmatpush3.bf16.msra.mxu0 %v3911_v27  ;;  %v434_v27 = vshrl.u32 %v4260_v11, 3  ;;  %v699_v36 = vsel %vm634_vm4, 0.0, %v347_v59 }
  0x20   : > { %3583 = vmatprep.subr.bf16.mxu0 %v3913_v29  ;;  %v3512_v41 = vpack.c.bf16 %v699_v36, %v4039_v40  ;;  %v351_v47 = vmax.f32 %v338_v39, 0.0 }
  0x21   : > { %3628 = vmatpush3.bf16.msra.mxu1 %v3914_v30  ;;  %v4270_v29 = vmul.u32.u64.low 3435973837, %v4248_v61  ;;  %v4271_v30 = vmul.u32.u64.high 3435973837, %v4248_v61, %v4270_v29  ;;  %v435_v35 = vmul.u32 10, %v434_v27 }
  0x22   : > { %3629 = vmatprep.subr.bf16.mxu1 %v3916_v34  ;;  %v425_v34 = vsub.s32 %v364_v55, %v424_v26  ;;  %3513 = vst [vmem:[#allocation2] sm:$0xff] %v3512_v41  }
  0x23   : > { %3584 = vmatpush3.bf16.msra.mxu0 %v3915_v32  ;;  %v701_v32 = vsel %vm610_vm3, 0.0, %v349_v17  ;;  %v436_v43 = vsub.s32 %v4245_v60, %v435_v35  ;;  %v445_v44 = vshrl.u32 %v4271_v30, 3  ;;  %vm808_vm3 = vsmask.f32 7440 }
  0x24   : > { %3661 = vmatprep.subr.bf16.mxu0 %v3921_v50  ;;  %v3517_v38 = vpack.c.bf16 %v701_v32, %v700_v28  ;;  %vm520_vm5 = vcmp.ne.s32.totalorder %v425_v34, 0  ;;  %vm533_vm6 = vcmp.lt.s32.totalorder %v425_v34, 0  ;;  %v559_v31 = vadd.s32 10, %v425_v34 }
  0x25   : > { %3630 = vmatpush3.bf16.msra.mxu1 %v3920_v49  ;;  %vm546_vm8 = vmand %vm533_vm6, %vm520_vm5  ;;  %vm521_vm9 = vcmp.ne.s32.totalorder %v436_v43, 0  ;;  %vm534_vm10 = vcmp.lt.s32.totalorder %v436_v43, 0  ;;  %v560_v46 = vadd.s32 10, %v436_v43  ;;  %v4281_v49 = vld [vmem:[%s4192_s22 + $0x18] sm:$0xff]   ;;  %v4284_v50 = vadd.s32 56, %v4169_v25 }
  0x26   : > { %3707 = vmatprep.subr.bf16.mxu1 %v3936_v13  ;;  %3560 = vst [vmem:[#allocation2 + $0x8] sm:$0xff] %v3517_v38   ;;  %vm547_vm11 = vmand %vm534_vm10, %vm521_vm9  ;;  %v572_v48 = vsel %vm546_vm8, %v559_v31, %v425_v34  ;;  %v446_v51 = vmul.u32 10, %v445_v44  ;;  %v3500_v55 = vunpack.c.l.bf16 %v4281_v49  ;;  %v3501_v5 = vunpack.c.h.bf16 %v4281_v49 }
  0x27   : > { %v573_v52 = vsel %vm547_vm11, %v560_v46, %v436_v43  ;;  %vm585_vm13 = vcmp.eq.s32.totalorder %v572_v48, 0  ;;  %vm598_vm14 = vcmp.eq.s32.totalorder %v572_v48, 9  ;;  %vm4306_vm9 = vmor %vm949_vm7, %vm950_vm0 }
  0x28   : > { %vm586_vm15 = vcmp.eq.s32.totalorder %v573_v52, 0  ;;  %vm599_vm1 = vcmp.eq.s32.totalorder %v573_v52, 9  ;;  %vm611_vm2 = vmor %vm585_vm13, %vm598_vm14  ;;  %v447_v53 = vsub.s32 %v4248_v61, %v446_v51  ;;  %v4040_v61 = vmov 0.0|0.0  }
  0x29   : > { %vm612_vm4 = vmor %vm586_vm15, %vm599_vm1  ;;  %v702_v54 = vsel %vm611_vm2, 0.0, %v350_v45  ;;  %v4292_v62 = vmul.u32.u64.low 3435973837, %v4284_v50  ;;  %v4293_v63 = vmul.u32.u64.high 3435973837, %v4284_v50, %v4292_v62  ;;  %v3321_v0 = vcombine.low %v4040_v61, %v4040_v61  ;;  %v777_v1 = vld [vmem:[#allocation2] sm:$0xf] }
  0x2a   : > { %v703_v57 = vsel %vm612_vm4, 0.0, %v351_v47  ;;  %vm522_vm5 = vcmp.ne.s32.totalorder %v447_v53, 0  ;;  %vm535_vm6 = vcmp.lt.s32.totalorder %v447_v53, 0  ;;  %v561_v58 = vadd.s32 10, %v447_v53  ;;  %v778_v2 = vld [vmem:[#allocation2 + $0x4] sm:$0xf]  ;;  %vm4312_vm10 = vmor %vm807_vm12, %vm808_vm3 }
  0x2b   : > { %v3522_v60 = vpack.c.bf16 %v703_v57, %v702_v54  ;;  %v797_v3 = vld [vmem:[#allocation2] sm:$0xf]  ;;  %787 = vst [vmem:[#allocation3] sm:$0xf] %v777_v1  ;;  %788 = vst [vmem:[#allocation3 + $0x24] sm:$0xf] %v778_v2  ;;  %v4300_v16 = vmul.f32 %v3500_v55, %v4209_v37 }
  0x2c   : > { %v798_v6 = vld [vmem:[#allocation2 + $0x4] sm:$0xf]  ;;  %v811_v7 = vshrl.u32 %v797_v3, 16  ;;  %v814_v8 = vshll.u32 %v797_v3, 16  ;;  %vm548_vm8 = vmand %vm535_vm6, %vm522_vm5  ;;  %776 = vst [vmem:[#allocation2 + $0x30] sm:$0x3] %v3321_v0 }
  0x2d   : > { %v799_v59 = vld [vmem:[#allocation2 + $0x8] sm:$0xf]  ;;  %3561 = vst [vmem:[#allocation2 + $0x10] sm:$0xff] %v3522_v60   ;;  %v820_v12 = vshll.u32 %v798_v6, 16  ;;  %v824_v13 = vshrl.u32 %v798_v6, 16  ;;  %v4302_v17 = vsel %vm548_vm8, %v561_v58, %v447_v53 }
  0x2e   : > { %v931_v4 = vld [vmem:[#allocation2 + $0x8] sm:$0xf]  ;;  %v830_v9 = vshll.u32 %v799_v59, 16  ;;  %v834_v10 = vshrl.u32 %v799_v59, 16  ;;  %v929_v14 = vld [vmem:[#allocation2] sm:$0xe] }
  0x2f   : > { %v1002_v11 = vld [vmem:[#allocation2 + $0x8] sm:$0xf]  ;;  %v930_v15 = vld [vmem:[#allocation2 + $0x4] sm:$0xf]  ;;  %v813_v18 = vrot.slane %v811_v7, 4  ;;  %v816_v19 = vrot.slane %v814_v8, 5 }
  0x30   : > { %v832_v20 = vrot.slane %v830_v9, 5  ;;  %v836_v21 = vrot.slane %v834_v10, 4  ;;  %v1001_v23 = vld [vmem:[#allocation2 + $0x4] sm:$0xe]  ;;  %v822_v24 = vrot.slane %v820_v12, 5  ;;  %v826_v26 = vrot.slane %v824_v13, 4 }
  0x31   : > { %v3322_v27 = vrot.slane %v929_v14, 9  ;;  %v954_v28 = vrot.slane %v930_v15, 5  ;;  %v1003_v29 = vld [vmem:[#allocation2 + $0xc] sm:$0xf]  ;;  %v817_v30 = vor.u32 %v816_v19, %v813_v18  ;;  %v957_v33 = vrot.slane %v931_v4, 5 }
  0x32   : > { %v837_v32 = vor.u32 %v836_v21, %v832_v20  ;;  %v3323_v34 = vrot.slane %v1001_v23, 9  ;;  %v779_v35 = vld [vmem:[#allocation2 + $0x8] sm:$0xf]  ;;  %v780_v36 = vld [vmem:[#allocation2 + $0xc] sm:$0xf]  ;;  %v827_v39 = vor.u32 %v826_v26, %v822_v24  ;;  %v1023_v31 = vrot.slane %v1002_v11, 5 }
  0x33   : > { %v955_v41 = vsel %vm4306_vm9, %v3322_v27, %v954_v28  ;;  %v956_v43 = vrot.slane %v954_v28, 4  ;;  %789 = vst [vmem:[#allocation3 + $0x48] sm:$0xf] %v779_v35  ;;  %790 = vst [vmem:[#allocation3 + $0x6c] sm:$0xf] %v780_v36  ;;  %v818_v46 = vrot.slane %v817_v30, 4 }
  0x34   : > { %v800_v44 = vld [vmem:[#allocation2 + $0xc] sm:$0xf]  ;;  %v838_v47 = vrot.slane %v837_v32, 4  ;;  %v959_v48 = vrot.slane %v957_v33, 4  ;;  %991 = vst [vmem:[#allocation3 + $0x8] sm:$0xf] %v955_v41  ;;  %v1024_v54 = vsel %vm4306_vm9, %v3323_v34, %v1023_v31  ;;  %v4347_v32 = vadd.f32 %v4215_v42, %v4300_v16 }
  0x35   : > { %v932_v45 = vld [vmem:[#allocation2 + $0xc] sm:$0xf]  ;;  %v1026_v51 = vrot.slane %v1003_v29, 5  ;;  %v828_v52 = vrot.slane %v827_v39, 4  ;;  %v958_v53 = vsel %vm4306_vm9, %v956_v43, %v957_v33  ;;  %v1025_v55 = vrot.slane %v1023_v31, 4  ;;  %v3922_v34 = vld [vmem:[%s5101_s3 + $0x100] sm:$0xff]  }
  0x36   : > { %v801_v57 = vld [vmem:[#allocation2 + $0x10] sm:$0xf]  ;;  %v823_v59 = vsel %vm4312_vm10, %v818_v46, %v822_v24  ;;  %992 = vst [vmem:[#allocation3 + $0x2c] sm:$0xf] %v958_v53  ;;  %1060 = vst [vmem:[#allocation3 + $0xc] sm:$0xf] %v1024_v54 }
  0x37   : > { %v933_v58 = vld [vmem:[#allocation2 + $0x10] sm:$0xf]  ;;  %v1028_v60 = vrot.slane %v1026_v51, 4  ;;  %v840_v62 = vshll.u32 %v800_v44, 16  ;;  %v844_v61 = vshrl.u32 %v800_v44, 16  ;;  %v833_v1 = vsel %vm4312_vm10, %v828_v52, %v832_v20  ;;  %v3558_v16 = vld [vmem:[%s4192_s22 + $0x20] sm:$0xff]  }
  0x38   : > { %v1004_v0 = vld [vmem:[#allocation2 + $0x10] sm:$0xf]  ;;  %919 = vst [vmem:[#allocation3 + $0x4] sm:$0xf] %v823_v59  ;;  %v1027_v2 = vsel %vm4306_vm9, %v1025_v55, %v1026_v51  ;;  %v850_v3 = vshll.u32 %v801_v57, 16  ;;  %v854_v4 = vshrl.u32 %v801_v57, 16  ;;  %v3504_v51 = vunpack.c.l.bf16 %v3558_v16 }
  0x39   : > { %v4328_v6 = vld [vmem:[#allocation2 + $0x14] sm:$0xf]  ;;  %v781_v7 = vld [vmem:[#allocation2 + $0x10] sm:$0xf]  ;;  %920 = vst [vmem:[#allocation3 + $0x28] sm:$0xf] %v833_v1  ;;  %v3505_v59 = vunpack.c.h.bf16 %v3558_v16 }
  0x3a   : > { %1061 = vst [vmem:[#allocation3 + $0x30] sm:$0xf] %v1027_v2  ;;  %v842_v8 = vrot.slane %v840_v62, 5  ;;  %v846_v9 = vrot.slane %v844_v61, 4  ;;  %v960_v10 = vrot.slane %v932_v45, 5  ;;  %v963_v11 = vrot.slane %v933_v58, 5 }
  0x3b   : > { %v782_v12 = vld [vmem:[#allocation2 + $0x14] sm:$0xf]  ;;  %791 = vst [vmem:[#allocation3 + $0x90] sm:$0xf] %v781_v7  ;;  %v852_v13 = vrot.slane %v850_v3, 5  ;;  %v1029_v14 = vrot.slane %v1004_v0, 5 }
  0x3c   : > { %v1032_v15 = vrot.slane %v4328_v6, 5  ;;  %v456_v18 = vshrl.u32 %v4293_v63, 3  ;;  %792 = vst [vmem:[#allocation3 + $0xb4] sm:$0xf] %v782_v12  ;;  %v843_v19 = vsel %vm4312_vm10, %v838_v47, %v842_v8  ;;  %v847_v20 = vor.u32 %v846_v9, %v842_v8  ;;  %v4336_v24 = vld [vmem:[#allocation2 + $0x14] sm:$0xf] }
  0x3d   : > { %v961_v21 = vsel %vm4306_vm9, %v959_v48, %v960_v10  ;;  %v962_v23 = vrot.slane %v960_v10, 4  ;;  %921 = vst [vmem:[#allocation3 + $0x4c] sm:$0xf] %v843_v19  ;;  %v1030_v26 = vsel %vm4306_vm9, %v1028_v60, %v1029_v14  ;;  %v1031_v27 = vrot.slane %v1029_v14, 4  ;;  %v4359_v36 = vld [vmem:[#allocation2 + $0x14] sm:$0xf] }
  0x3e   : > { %993 = vst [vmem:[#allocation3 + $0x50] sm:$0xf] %v961_v21  ;;  %v320_v63 = vmul.f32 %v3501_v5, %v4209_v37  ;;  %v457_v28 = vmul.u32 10, %v456_v18  ;;  %v848_v29 = vrot.slane %v847_v20, 4  ;;  %1062 = vst [vmem:[#allocation3 + $0x54] sm:$0xf] %v1030_v26  ;;  %v321_v14 = vmul.f32 %v3504_v51, %v4209_v37 }
  0x3f   : > { %v964_v30 = vsel %vm4306_vm9, %v962_v23, %v963_v11  ;;  %v856_v33 = vrot.slane %v854_v4, 4  ;;  %v1033_v49 = vsel %vm4306_vm9, %v1031_v27, %v1032_v15  ;;  %vm587_vm7 = vcmp.eq.s32.totalorder %v4302_v17, 0  ;;  %v3926_v39 = vld [vmem:[%s5101_s3 + $0x148] sm:$0xff]   ;;  %v3937_v43 = vld [vmem:[%s5101_s3 + $0x180] sm:$0xff]   ;;  %v3917_v44 = vld [vmem:[#allocation3] ss:$36 sps:$4 sm:$0xff]  }
  0x40   : > { %994 = vst [vmem:[#allocation3 + $0x74] sm:$0xf] %v964_v30  ;;  %v458_v5 = vsub.s32 %v4284_v50, %v457_v28  ;;  %v860_v35 = vshll.u32 %v4336_v24, 16  ;;  %v853_v41 = vsel %vm4312_vm10, %v848_v29, %v852_v13  ;;  %1063 = vst [vmem:[#allocation3 + $0x78] sm:$0xf] %v1033_v49  ;;  %vm600_vm0 = vcmp.eq.s32.totalorder %v4302_v17, 9 }
  0x41   : > { %v857_v50 = vor.u32 %v856_v33, %v852_v13  ;;  %v965_v31 = vrot.slane %v963_v11, 4  ;;  %v3919_v45 = vld [vmem:[#allocation3 + $0x4] ss:$36 sps:$4 sm:$0xff]   ;;  %922 = vst [vmem:[#allocation3 + $0x70] sm:$0xf] %v853_v41  ;;  %v340_v46 = vadd.f32 %v4215_v42, %v320_v63  ;;  %v3927_v52 = vld [vmem:[%s5101_s3 + $0x108] sm:$0xff]   ;;  %vm4392_vm14 = vmor %vm587_vm7, %vm600_vm0  ;;  %v322_v18 = vmul.f32 %v3505_v59, %v4209_v37 }
  0x42   : > { %vm523_vm11 = vcmp.ne.s32.totalorder %v458_v5, 0  ;;  %v3923_v47 = vld [vmem:[#allocation3 + $0x8] ss:$36 sps:$4 sm:$0xff]   ;;  %vm536_vm12 = vcmp.lt.s32.totalorder %v458_v5, 0  ;;  %2470 = vmatprep.mubr.bf16.mxu0 %v3919_v45  ;;  %v3939_v53 = vld [vmem:[%s5101_s3 + $0x1c8] sm:$0xff]   ;;  %v562_v55 = vadd.s32 10, %v458_v5  ;;  %v4452_v49 = vadd.f32 %v4215_v42, %v321_v14 }
  0x43   : > { %v3925_v48 = vld [vmem:[#allocation3 + $0xc] ss:$36 sps:$4 sm:$0xff]   ;;  %vm4378_vm13 = vmand %vm536_vm12, %vm523_vm11  ;;  %v858_v57 = vrot.slane %v857_v50, 4  ;;  %v4382_v58 = vrot.slane %v860_v35, 5  ;;  %2471 = vmatmul.mubr.bf16.vlgmr.msra.gmra.mrb[0].mxu0 %v3917_v44  ;;  %v3933_v60 = vld [vmem:[%s5101_s3 + $0x150] sm:$0xff]   ;;  %v352_v62 = vmax.f32 %v4347_v32, 0.0 }
  0x44   : > { %2543 = vmatprep.mubr.bf16.mxu1 %v3925_v48  ;;  %v966_v0 = vrot.slane %v4359_v36, 5  ;;  %v4398_v1 = vadd.s32 72, %v4169_v25  ;;  %v4401_v2 = vadd.s32 80, %v4169_v25  ;;  %3662 = vmatpush3.bf16.msra.mxu0 %v3922_v34  ;;  %v353_v3 = vmax.f32 %v340_v46, 0.0  ;;  %v3943_v7 = vld [vmem:[%s5101_s3 + $0x188] sm:$0xff]   ;;  %v3948_v10 = vld [vmem:[%s5101_s3 + $0x1d0] sm:$0xff]  }
  0x45   : > { %2544 = vmatmul.mubr.bf16.vlgmr.msra.gmra.mrb[0].mxu1 %v3923_v47  ;;  %v575_v4 = vsel %vm4378_vm13, %v562_v55, %v458_v5  ;;  %v863_v17 = vsel %vm4312_vm10, %v858_v57, %v4382_v58  ;;  %3663 = vmatprep.subr.bf16.mxu0 %v3926_v39  ;;  %v864_v8 = vshrl.u32 %v4336_v24, 16  ;;  %v3935_v13 = vld [vmem:[%s5101_s3 + $0x110] sm:$0xff]   ;;  %v4425_v19 = vadd.s32 88, %v4169_v25  ;;  %v3930_v21 = vld [vmem:[#allocation3 + $0x48] ss:$36 sps:$4 sm:$0xff]   ;;  %v3559_v35 = vld [vmem:[%s4192_s22 + $0x28] sm:$0xff]  }
  0x46   : > { %3708 = vmatpush3.bf16.msra.mxu1 %v3937_v43  ;;  %vm588_vm15 = vcmp.eq.s32.totalorder %v575_v4, 0  ;;  %vm601_vm1 = vcmp.eq.s32.totalorder %v575_v4, 9  ;;  %923 = vst [vmem:[#allocation3 + $0x94] sm:$0xf] %v863_v17  ;;  %v967_v9 = vsel %vm4306_vm9, %v965_v31, %v966_v0  ;;  %v3938_v23 = vld [vmem:[%s5101_s3 + $0x158] sm:$0xff]   ;;  %v704_v24 = vsel %vm4392_vm14, 0.0, %v352_v62 }
  0x47   : > { %v3931_v11 = vld [vmem:[#allocation3 + $0x54] ss:$36 sps:$4 sm:$0xff]   ;;  %3709 = vmatprep.subr.bf16.mxu1 %v3939_v53  ;;  %995 = vst [vmem:[#allocation3 + $0x98] sm:$0xf] %v967_v9  ;;  %vm614_vm2 = vmor %vm588_vm15, %vm601_vm1  ;;  %v3950_v25 = vld [vmem:[%s5101_s3 + $0x190] sm:$0xff]   ;;  %v866_v30 = vrot.slane %v864_v8, 4  ;;  %v4455_v5 = vadd.f32 %v4215_v42, %v322_v18  ;;  %v3508_v39 = vunpack.c.l.bf16 %v3559_v35  ;;  %v3509_v41 = vunpack.c.h.bf16 %v3559_v35 }
  0x48   : > { %v3934_v12 = vld [vmem:[#allocation3 + $0x50] ss:$36 sps:$4 sm:$0xff]   ;;  %3664 = vmatpush3.bf16.msra.mxu0 %v3927_v52  ;;  %2551 = vmatprep.mubr.bf16.mxu1 %v3931_v11  ;;  %v4438_v26 = vmul.u32.u64.low 3435973837, %v4289_v56  ;;  %v4439_v27 = vmul.u32.u64.high 3435973837, %v4289_v56, %v4438_v26  ;;  %v4442_v63 = vmul.u32.u64.low 3435973837, %v4398_v1  ;;  %v4443_v28 = vmul.u32.u64.high 3435973837, %v4398_v1, %v4442_v63 }
  0x49   : > { %v3928_v20 = vld [vmem:[#allocation3 + $0x4c] ss:$36 sps:$4 sm:$0xff]   ;;  %3665 = vmatprep.subr.bf16.mxu0 %v3933_v60  ;;  %v705_v29 = vsel %vm614_vm2, 0.0, %v353_v3  ;;  %v3952_v32 = vld [vmem:[%s5101_s3 + $0x1d8] sm:$0xff]   ;;  %v4462_v43 = vmul.u32.u64.low 3435973837, %v4401_v2  ;;  %v4463_v50 = vmul.u32.u64.high 3435973837, %v4401_v2, %v4462_v43  ;;  %v867_v48 = vor.u32 %v866_v30, %v4382_v58 }
  0x4a   : > { %2478 = vmatprep.mubr.bf16.mxu0 %v3928_v20  ;;  %v3527_v33 = vpack.c.bf16 %v705_v29, %v704_v24  ;;  %v3942_v34 = vld [vmem:[%s5101_s3 + $0x118] sm:$0xff]   ;;  %3710 = vmatpush3.bf16.msra.mxu1 %v3943_v7  ;;  %v3949_v16 = vld [vmem:[%s5101_s3 + $0x160] sm:$0xff]   ;;  %v467_v31 = vshrl.u32 %v4439_v27, 3  ;;  %v478_v44 = vshrl.u32 %v4443_v28, 3  ;;  %v323_v52 = vmul.f32 %v3508_v39, %v4209_v37 }
  0x4b   : > { %2479 = vmatmul.mubr.bf16.gmra.mrb[4].mxu0 %v3930_v21  ;;  %3711 = vmatprep.subr.bf16.mxu1 %v3948_v10  ;;  %v3955_v45 = vld [vmem:[%s5101_s3 + $0x198] sm:$0xff]   ;;  %v4471_v46 = vmul.u32.u64.low 3435973837, %v4425_v19  ;;  %v4472_v47 = vmul.u32.u64.high 3435973837, %v4425_v19, %v4471_v46  ;;  %v3962_v51 = vld [vmem:[%s5101_s3 + $0x1e0] sm:$0xff]   ;;  %v324_v53 = vmul.f32 %v3509_v41, %v4209_v37  ;;  %v1034_v59 = vrot.slane %v1032_v15, 4  ;;  %v3964_v10 = vld [vmem:[%s5101_s3 + $0x170] sm:$0xff]  }
  0x4c   : > { %3666 = vmatpush3.bf16.msra.mxu0 %v3935_v13  ;;  %3562 = vst [vmem:[#allocation2 + $0x18] sm:$0xff] %v3527_v33   ;;  %v3951_v54 = vld [vmem:[%s5101_s3 + $0x120] sm:$0xff]   ;;  %v468_v55 = vmul.u32 10, %v467_v31  ;;  %v479_v57 = vmul.u32 10, %v478_v44  ;;  %v4486_v58 = vadd.f32 %v4215_v42, %v323_v52  ;;  %v489_v62 = vshrl.u32 %v4463_v50, 3  ;;  %v3975_v50 = vld [vmem:[%s5101_s3 + $0x1f0] sm:$0xff]  }
  0x4d   : > { %2552 = vmatmul.mubr.bf16.gmra.mrb[4].mxu1 %v3934_v12  ;;  %3667 = vmatprep.subr.bf16.mxu0 %v3938_v23  ;;  %v4489_v60 = vadd.f32 %v4215_v42, %v324_v53  ;;  %v354_v37 = vmax.f32 %v4452_v49, 0.0  ;;  %v355_v61 = vmax.f32 %v4455_v5, 0.0  ;;  %v868_v6 = vrot.slane %v867_v48, 4  ;;  %v3957_v42 = vld [vmem:[%s5101_s3 + $0x168] sm:$0xff]   ;;  %v3963_v36 = vld [vmem:[%s5101_s3 + $0x1a0] sm:$0xff]   ;;  %v3974_v48 = vld [vmem:[%s5101_s3 + $0x178] sm:$0xff]  }
  0x4e   : > { %3712 = vmatpush3.bf16.msra.mxu1 %v3950_v25  ;;  %v469_v3 = vsub.s32 %v4289_v56, %v468_v55  ;;  %v480_v4 = vsub.s32 %v4398_v1, %v479_v57  ;;  %v968_v15 = vrot.slane %v966_v0, 4  ;;  %v490_v17 = vmul.u32 10, %v489_v62  ;;  %v3960_v56 = vld [vmem:[%s5101_s3 + $0x128] sm:$0xff]   ;;  %v3976_v57 = vld [vmem:[%s5101_s3 + $0x138] sm:$0xff]   ;;  %v1070_v49 = vld [vmem:[#allocation2 + $0x4] sm:$0xe] }
  0x4f   : > { %3713 = vmatprep.subr.bf16.mxu1 %v3952_v32  ;;  %v500_v7 = vshrl.u32 %v4472_v47, 3  ;;  %v3966_v0 = vld [vmem:[%s5101_s3 + $0x1e8] sm:$0xff]   ;;  %vm1230_vm0 = vcmask 1041408   ;;  %vm1231_vm11 = vcmask 1045508   ;;  %v356_v47 = vmax.f32 %v4486_v58, 0.0 }
  0x50   : > { %3668 = vmatpush3.bf16.msra.mxu0 %v3942_v34  ;;  %vm524_vm3 = vcmp.ne.s32.totalorder %v469_v3, 0  ;;  %vm525_vm4 = vcmp.ne.s32.totalorder %v480_v4, 0  ;;  %vm537_vm5 = vcmp.lt.s32.totalorder %v469_v3, 0  ;;  %vm538_vm6 = vcmp.lt.s32.totalorder %v480_v4, 0  ;;  %v3969_v23 = vld [vmem:[%s5101_s3 + $0x1a8] sm:$0xff]  }
  0x51   : > { %3669 = vmatprep.subr.bf16.mxu0 %v3949_v16  ;;  %v4515_v11 = vsub.s32 %v4401_v2, %v490_v17  ;;  %vm4521_vm8 = vmand %vm537_vm5, %vm524_vm3  ;;  %v563_v25 = vadd.s32 10, %v469_v3  ;;  %v564_v26 = vadd.s32 10, %v480_v4  ;;  %v501_v63 = vmul.u32 10, %v500_v7  ;;  %v3944_v21 = vld [vmem:[#allocation3 + $0x90] ss:$36 sps:$4 sm:$0xff]  }
  0x52   : > { %3714 = vmatpush3.bf16.msra.mxu1 %v3955_v45  ;;  %vm4531_vm7 = vmand %vm538_vm6, %vm525_vm4  ;;  %v3965_v45 = vld [vmem:[%s5101_s3 + $0x130] sm:$0xff]   ;;  %vm657_vm2 = vcmp.ge.s32.totalorder %v4425_v19, 90 }
  0x53   : > { %v803_v1 = vld [vmem:[#allocation2 + $0x18] sm:$0xf]  ;;  %3715 = vmatprep.subr.bf16.mxu1 %v3962_v51  ;;  %v4517_v18 = vld [vmem:[#allocation2 + $0x1c] sm:$0xf]  ;;  %v576_v35 = vsel %vm4521_vm8, %v563_v25, %v469_v3  ;;  %v577_v16 = vsel %vm4531_vm7, %v564_v26, %v480_v4  ;;  %v3977_v51 = vld [vmem:[%s5101_s3 + $0x1b0] sm:$0xff]   ;;  %v502_v3 = vsub.s32 %v4425_v19, %v501_v63  ;;  %vm526_vm4 = vcmp.ne.s32.totalorder %v4515_v11, 0 }
  0x54   : > { %v935_v8 = vld [vmem:[#allocation2 + $0x18] sm:$0xf]  ;;  %v870_v12 = vshll.u32 %v803_v1, 16  ;;  %v874_v13 = vshrl.u32 %v803_v1, 16  ;;  %3670 = vmatpush3.bf16.msra.mxu0 %v3951_v54  ;;  %v1038_v2 = vrot.slane %v4517_v18, 5  ;;  %vm589_vm12 = vcmp.eq.s32.totalorder %v576_v35, 0 }
  0x55   : > { %v1006_v9 = vld [vmem:[#allocation2 + $0x18] sm:$0xf]  ;;  %v969_v14 = vrot.slane %v935_v8, 5  ;;  %3671 = vmatprep.subr.bf16.mxu0 %v3957_v42  ;;  %v784_v33 = vld [vmem:[#allocation2 + $0x1c] sm:$0xf]  ;;  %vm590_vm13 = vcmp.eq.s32.totalorder %v577_v16, 0 }
  0x56   : > { %v1035_v20 = vrot.slane %v1006_v9, 5  ;;  %v783_v27 = vld [vmem:[#allocation2 + $0x18] sm:$0xf]  ;;  %v872_v28 = vrot.slane %v870_v12, 5  ;;  %v804_v34 = vld [vmem:[#allocation2 + $0x1c] sm:$0xf]  ;;  %3716 = vmatpush3.bf16.msra.mxu1 %v3963_v36 }
  0x57   : > { %v970_v29 = vsel %vm4306_vm9, %v968_v15, %v969_v14  ;;  %793 = vst [vmem:[#allocation3 + $0xd8] sm:$0xf] %v783_v27  ;;  %794 = vst [vmem:[#allocation3 + $0xfc] sm:$0xf] %v784_v33  ;;  %v876_v39 = vrot.slane %v874_v13, 4  ;;  %v880_v41 = vshll.u32 %v804_v34, 16  ;;  %3717 = vmatprep.subr.bf16.mxu1 %v3966_v0 }
  0x58   : > { %v1036_v30 = vsel %vm4306_vm9, %v1034_v59, %v1035_v20  ;;  %v1037_v32 = vrot.slane %v1035_v20, 4  ;;  %996 = vst [vmem:[#allocation3 + $0xbc] sm:$0xf] %v970_v29  ;;  %v936_v43 = vld [vmem:[#allocation2 + $0x1c] sm:$0xf]  ;;  %v873_v31 = vsel %vm4312_vm10, %v868_v6, %v872_v28  ;;  %3672 = vmatpush3.bf16.msra.mxu0 %v3960_v56  ;;  %vm602_vm14 = vcmp.eq.s32.totalorder %v576_v35, 9 }
  0x59   : > { %1064 = vst [vmem:[#allocation3 + $0x9c] sm:$0xf] %v1036_v30  ;;  %924 = vst [vmem:[#allocation3 + $0xb8] sm:$0xf] %v873_v31  ;;  %vm603_vm15 = vcmp.eq.s32.totalorder %v577_v16, 9  ;;  %v877_v46 = vor.u32 %v876_v39, %v872_v28  ;;  %3673 = vmatprep.subr.bf16.mxu0 %v3964_v10  ;;  %v882_v52 = vrot.slane %v880_v41, 5 }
  0x5a   : > { %v1039_v44 = vsel %vm4306_vm9, %v1037_v32, %v1038_v2  ;;  %vm615_vm1 = vmor %vm589_vm12, %vm602_vm14  ;;  %v884_v53 = vshrl.u32 %v804_v34, 16  ;;  %v971_v54 = vrot.slane %v969_v14, 4  ;;  %v972_v55 = vrot.slane %v936_v43, 5  ;;  %3718 = vmatpush3.bf16.msra.mxu1 %v3969_v23  ;;  %v3978_v4 = vld [vmem:[%s5101_s3 + $0x1f8] sm:$0xff]   ;;  %v1071_v36 = vld [vmem:[#allocation2 + $0x8] sm:$0xf] }
  0x5b   : > { %1065 = vst [vmem:[#allocation3 + $0xc0] sm:$0xf] %v1039_v44  ;;  %vm616_vm3 = vmor %vm590_vm13, %vm603_vm15  ;;  %v706_v59 = vsel %vm615_vm1, 0.0, %v354_v37  ;;  %v878_v62 = vrot.slane %v877_v46, 4  ;;  %3719 = vmatprep.subr.bf16.mxu1 %v3975_v50  ;;  %vm527_vm5 = vcmp.ne.s32.totalorder %v502_v3, 0  ;;  %vm539_vm6 = vcmp.lt.s32.totalorder %v4515_v11, 0 }
  0x5c   : > { %v707_v6 = vsel %vm616_vm3, 0.0, %v355_v61  ;;  %v886_v15 = vrot.slane %v884_v53, 4  ;;  %v973_v42 = vsel %vm4306_vm9, %v971_v54, %v972_v55  ;;  %3674 = vmatpush3.bf16.msra.mxu0 %v3965_v45  ;;  %vm540_vm8 = vcmp.lt.s32.totalorder %v502_v3, 0  ;;  %vm4583_vm7 = vmand %vm539_vm6, %vm526_vm4  ;;  %v4588_v0 = vld [vmem:[#allocation2 + $0xc] sm:$0xf]  ;;  %v3982_v1 = vld [vmem:[%s5101_s3 + $0x1b8] sm:$0xff]  }
  0x5d   : > { %v3532_v37 = vpack.c.bf16 %v707_v6, %v706_v59  ;;  %v883_v17 = vsel %vm4312_vm10, %v878_v62, %v882_v52  ;;  %997 = vst [vmem:[#allocation3 + $0xe0] sm:$0xf] %v973_v42  ;;  %3675 = vmatprep.subr.bf16.mxu0 %v3974_v48  ;;  %v565_v61 = vadd.s32 10, %v4515_v11  ;;  %v566_v56 = vadd.s32 10, %v502_v3  ;;  %vm553_vm12 = vmand %vm540_vm8, %vm527_vm5  ;;  %v1208_v13 = vld [vmem:[#allocation2 + $0x4] sm:$0xc] }
  0x5e   : > { %v887_v7 = vor.u32 %v886_v15, %v882_v52  ;;  %925 = vst [vmem:[#allocation3 + $0xdc] sm:$0xf] %v883_v17  ;;  %3720 = vmatpush3.bf16.msra.mxu1 %v3977_v51  ;;  %v4593_v8 = vrot.slane %v972_v55, 4  ;;  %v4597_v9 = vrot.slane %v1038_v2, 4  ;;  %v357_v10 = vmax.f32 %v4489_v60, 0.0  ;;  %vm4609_vm5 = vmor %vm1230_vm0, %vm1231_vm11 }
  0x5f   : > { %3563 = vst [vmem:[#allocation2 + $0x20] sm:$0xff] %v3532_v37   ;;  %3721 = vmatprep.subr.bf16.mxu1 %v3978_v4  ;;  %v1085_v12 = vshrl.u32 %v1070_v49, 16  ;;  %v4601_v14 = vld [vmem:[#allocation2 + $0x8] sm:$0xf]  ;;  %v578_v23 = vsel %vm4583_vm7, %v565_v61, %v4515_v11  ;;  %v579_v24 = vsel %vm553_vm12, %v566_v56, %v502_v3  ;;  %v1088_v18 = vshll.u32 %v1070_v49, 16 }
  0x60   : > { %v3940_v20 = vld [vmem:[#allocation3 + $0x94] ss:$36 sps:$4 sm:$0xff]   ;;  %3676 = vmatpush3.bf16.msra.mxu0 %v3976_v57  ;;  %vm591_vm13 = vcmp.eq.s32.totalorder %v578_v23, 0  ;;  %vm1081_vm14 = vsmask.f32 2304  ;;  %v888_v60 = vrot.slane %v887_v7, 4 }
  0x61   : > { %v3947_v25 = vld [vmem:[#allocation3 + $0x98] ss:$36 sps:$4 sm:$0xff]   ;;  %vm1082_vm15 = vsmask.f32 6416  ;;  %3779 = vmatprep.subr.bf16.mxu0 %v4039_v40  ;;  %2486 = vmatprep.mubr.bf16.mxu0 %v3940_v20  ;;  %vm592_vm1 = vcmp.eq.s32.totalorder %v579_v24, 0  ;;  %vm604_vm3 = vcmp.eq.s32.totalorder %v578_v23, 9 }
  0x62   : > { %v3945_v2 = vld [vmem:[#allocation3 + $0x9c] ss:$36 sps:$4 sm:$0xff]   ;;  %vm605_vm4 = vcmp.eq.s32.totalorder %v579_v24, 9  ;;  %3722 = vmatpush3.bf16.msra.mxu1 %v3982_v1  ;;  %2487 = vmatmul.mubr.bf16.gmra.mrb[8].mxu0 %v3944_v21  ;;  %vm617_vm6 = vmor %vm591_vm13, %vm604_vm3  ;;  %v4613_v11 = vrot.slane %v1085_v12, 5  ;;  %v1094_v27 = vshrl.u32 %v1071_v36, 16  ;;  %v1097_v63 = vshll.u32 %v1071_v36, 16 }
  0x63   : > { %2559 = vmatprep.mubr.bf16.mxu1 %v3945_v2  ;;  %v1104_v28 = vshrl.u32 %v4588_v0, 16  ;;  %vm618_vm8 = vmor %vm592_vm1, %vm605_vm4  ;;  %v708_v29 = vsel %vm617_vm6, 0.0, %v356_v47  ;;  %v1090_v30 = vrot.slane %v1088_v18, 6  ;;  %v3324_v32 = vrot.slane %v1208_v13, 10  ;;  %3815 = vmatprep.subr.bf16.mxu1 %v4039_v40  ;;  %v4640_v17 = vld [vmem:[#allocation2 + $0xc] sm:$0xf] }
  0x64   : > { %2560 = vmatmul.mubr.bf16.gmra.mrb[8].mxu1 %v3947_v25  ;;  %v1235_v33 = vrot.slane %v4601_v14, 6  ;;  %vm4622_vm11 = vmor %vm618_vm8, %vm657_vm2  ;;  %v1096_v35 = vrot.slane %v1094_v27, 5  ;;  %v1099_v16 = vrot.slane %v1097_v63, 6  ;;  %v1107_v41 = vshll.u32 %v4588_v0, 16  ;;  %v1284_v36 = vld [vmem:[#allocation2 + $0x8] sm:$0xc] }
  0x65   : > { %v4626_v39 = vrot.slane %v1104_v28, 5  ;;  %v709_v53 = vsel %vm4622_vm11, 0.0, %v357_v10  ;;  %v1091_v54 = vor.u32 %v1090_v30, %v4613_v11  ;;  %vm4650_vm2 = vmor %vm1081_vm14, %vm1082_vm15  ;;  %v1285_v12 = vld [vmem:[#allocation2 + $0xc] sm:$0xf]  ;;  %v4656_v23 = vld [vmem:[#allocation2 + $0x10] sm:$0xf] }
  0x66   : > { %v805_v58 = vld [vmem:[#allocation2 + $0x20] sm:$0xf]  ;;  %v1236_v31 = vsel %vm4609_vm5, %v3324_v32, %v1235_v33  ;;  %v1009_v19 = vld [vmem:[#allocation2 + $0x24] sm:$0xf]  ;;  %v1100_v55 = vor.u32 %v1099_v16, %v1096_v35  ;;  %v3537_v37 = vpack.c.bf16 %v709_v53, %v708_v29  ;;  %v1109_v2 = vrot.slane %v1107_v41, 6 }
  0x67   : > { %v937_v43 = vld [vmem:[#allocation2 + $0x20] sm:$0xf]  ;;  %v890_v44 = vshll.u32 %v805_v58, 16  ;;  %v894_v45 = vshrl.u32 %v805_v58, 16  ;;  %1274 = vst [vmem:[#allocation3 + $0x14] sm:$0xf] %v1236_v31 }
  0x68   : > { %v1008_v50 = vld [vmem:[#allocation2 + $0x20] sm:$0xf]  ;;  %v975_v46 = vrot.slane %v937_v43, 5  ;;  %v1044_v48 = vrot.slane %v1009_v19, 5  ;;  %v786_v52 = vld [vmem:[#allocation2 + $0x24] sm:$0x7]  ;;  %v4664_v32 = vor.u32 %v1109_v2, %v4626_v39 }
  0x69   : > { %v1041_v47 = vrot.slane %v1008_v50, 5  ;;  %v785_v51 = vld [vmem:[#allocation2 + $0x20] sm:$0xf]  ;;  %v892_v57 = vrot.slane %v890_v44, 5  ;;  %796 = vst [vmem:[#allocation3 + $0x144] sm:$0x7] %v786_v52 }
  0x6a   : > { %v976_v59 = vsel %vm4306_vm9, %v4593_v8, %v975_v46  ;;  %795 = vst [vmem:[#allocation3 + $0x120] sm:$0xf] %v785_v51  ;;  %v806_v4 = vld [vmem:[#allocation2 + $0x24] sm:$0xf]  ;;  %v896_v15 = vrot.slane %v894_v45, 4  ;;  %v977_v61 = vrot.slane %v975_v46, 4 }
  0x6b   : > { %v1042_v62 = vsel %vm4306_vm9, %v4597_v9, %v1041_v47  ;;  %v1043_v3 = vrot.slane %v1041_v47, 4  ;;  %v938_v6 = vld [vmem:[#allocation2 + $0x24] sm:$0xf]  ;;  %998 = vst [vmem:[#allocation3 + $0x104] sm:$0xf] %v976_v59  ;;  %v900_v42 = vshll.u32 %v806_v4, 16  ;;  %v893_v7 = vsel %vm4312_vm10, %v888_v60, %v892_v57 }
  0x6c   : > { %1066 = vst [vmem:[#allocation3 + $0xe4] sm:$0xf] %v1042_v62  ;;  %v904_v49 = vshrl.u32 %v806_v4, 16  ;;  %v978_v56 = vrot.slane %v938_v6, 5  ;;  %926 = vst [vmem:[#allocation3 + $0x100] sm:$0xf] %v893_v7  ;;  %v897_v0 = vor.u32 %v896_v15, %v892_v57 }
  0x6d   : > { %v1045_v5 = vsel %vm4306_vm9, %v1043_v3, %v1044_v48  ;;  %v902_v1 = vrot.slane %v900_v42, 5  ;;  %3564 = vst [vmem:[#allocation2 + $0x28] sm:$0xff] %v3537_v37   ;;  %v4646_v9 = vrot.slane %v1044_v48, 4  ;;  %v1092_v20 = vrot.slane %v1091_v54, 4  ;;  %v1357_v28 = vld [vmem:[#allocation2 + $0x8] sm:$0xc] }
  0x6e   : > { %1067 = vst [vmem:[#allocation3 + $0x108] sm:$0xf] %v1045_v5  ;;  %v906_v8 = vrot.slane %v904_v49, 4  ;;  %v979_v13 = vsel %vm4306_vm9, %v977_v61, %v978_v56  ;;  %v980_v14 = vrot.slane %v978_v56, 4  ;;  %v1102_v21 = vrot.slane %v1100_v55, 4 }
  0x6f   : > { %v898_v24 = vrot.slane %v897_v0, 4  ;;  %999 = vst [vmem:[#allocation3 + $0x128] sm:$0xf] %v979_v13  ;;  %v1237_v25 = vrot.slane %v1235_v33, 4  ;;  %v1101_v60 = vsel %vm4650_vm2, %v1092_v20, %v1100_v55  ;;  %v1238_v11 = vrot.slane %v4640_v17, 6 }
  0x70   : > { %v907_v18 = vor.u32 %v906_v8, %v902_v1  ;;  %1000 = vst [vmem:[#allocation3 + $0x14c] sm:$0x7] %v980_v14  ;;  %v3325_v27 = vrot.slane %v1284_v36, 10  ;;  %v1308_v63 = vrot.slane %v1285_v12, 6  ;;  %1198 = vst [vmem:[#allocation3 + $0x10] sm:$0xf] %v1101_v60  ;;  %v1111_v39 = vsel %vm4650_vm2, %v1102_v21, %v4664_v32 }
  0x71   : > { %v903_v29 = vsel %vm4312_vm10, %v898_v24, %v902_v1  ;;  %v1311_v34 = vrot.slane %v4656_v23, 6  ;;  %v1358_v33 = vld [vmem:[#allocation2 + $0xc] sm:$0xf]  ;;  %v1359_v35 = vld [vmem:[#allocation2 + $0x10] sm:$0xf]  ;;  %v1239_v16 = vsel %vm4609_vm5, %v1237_v25, %v1238_v11  ;;  %v1372_v43 = vshrl.u32 %v1357_v28, 16 }
  0x72   : > { %v908_v30 = vrot.slane %v907_v18, 4  ;;  %927 = vst [vmem:[#allocation3 + $0x124] sm:$0xf] %v903_v29  ;;  %v1309_v41 = vsel %vm4609_vm5, %v3325_v27, %v1308_v63  ;;  %v1310_v38 = vrot.slane %v1308_v63, 4  ;;  %vm1368_vm10 = vsmask.f32 1280 }
  0x73   : > { %v1073_v58 = vld [vmem:[#allocation2 + $0x10] sm:$0xf]  ;;  %1275 = vst [vmem:[#allocation3 + $0x38] sm:$0xf] %v1239_v16  ;;  %1347 = vst [vmem:[#allocation3 + $0x18] sm:$0xf] %v1309_v41 }
  0x74   : > { %928 = vst [vmem:[#allocation3 + $0x148] sm:$0x7] %v908_v30  ;;  %vm1369_vm7 = vsmask.f32 5392  ;;  %v1375_v50 = vshll.u32 %v1357_v28, 16  ;;  %v1312_v45 = vsel %vm4609_vm5, %v1310_v38, %v1311_v34  ;;  %v1381_v46 = vshrl.u32 %v1358_v33, 16  ;;  %vm5044_vm6 = vmand %vm1230_vm0, %vm1368_vm10 }
  0x75   : > { %v3953_v31 = vld [vmem:[#allocation3 + $0xdc] ss:$36 sps:$4 sm:$0xff]   ;;  %1199 = vst [vmem:[#allocation3 + $0x34] sm:$0xf] %v1111_v39  ;;  %v3958_v19 = vld [vmem:[#allocation3 + $0xe4] ss:$36 sps:$4 sm:$0xff]   ;;  %vm4685_vm12 = vmor %vm1368_vm10, %vm1369_vm7 }
  0x76   : > { %v3956_v44 = vld [vmem:[#allocation3 + $0xd8] ss:$36 sps:$4 sm:$0xff]   ;;  %v3961_v47 = vld [vmem:[#allocation3 + $0xe0] ss:$36 sps:$4 sm:$0xff]   ;;  %1348 = vst [vmem:[#allocation3 + $0x3c] sm:$0xf] %v1312_v45  ;;  %2494 = vmatprep.mubr.bf16.mxu0 %v3953_v31  ;;  %2567 = vmatprep.mubr.bf16.mxu1 %v3958_v19 }
  0x77   : > { %v1374_v48 = vrot.slane %v1372_v43, 6  ;;  %v1010_v51 = vld [vmem:[#allocation2 + $0x28] sm:$0xf]  ;;  %v1377_v52 = vrot.slane %v1375_v50, 7  ;;  %v1383_v53 = vrot.slane %v1381_v46, 6  ;;  %v1384_v54 = vshll.u32 %v1358_v33, 16  ;;  %2495 = vmatmul.mubr.bf16.gmra.mrb[12].mxu0 %v3956_v44  ;;  %2568 = vmatmul.mubr.bf16.gmra.mrb[12].mxu1 %v3961_v47 }
  0x78   : > { %v1391_v55 = vshrl.u32 %v1359_v35, 16  ;;  %v1047_v57 = vrot.slane %v1010_v51, 5  ;;  %v1394_v59 = vshll.u32 %v1359_v35, 16  ;;  %v1074_v62 = vld [vmem:[#allocation2 + $0x14] sm:$0xf]  ;;  %v1114_v3 = vshrl.u32 %v1073_v58, 16 }
  0x79   : > { %v1378_v4 = vor.u32 %v1377_v52, %v1374_v48  ;;  %v1386_v6 = vrot.slane %v1384_v54, 7  ;;  %v1117_v42 = vshll.u32 %v1073_v58, 16  ;;  %v1211_v49 = vld [vmem:[#allocation2 + $0x10] sm:$0xf]  ;;  %v4689_v36 = vld [vmem:[#allocation2 + $0x14] sm:$0xf] }
  0x7a   : > { %v1393_v15 = vrot.slane %v1391_v55, 6  ;;  %v1048_v37 = vsel %vm4306_vm9, %v4646_v9, %v1047_v57  ;;  %v1049_v7 = vrot.slane %v1047_v57, 4  ;;  %v1396_v61 = vrot.slane %v1394_v59, 7  ;;  %v1287_v12 = vld [vmem:[#allocation2 + $0x14] sm:$0xf]  ;;  %v3983_v55 = vld [vmem:[%s5101_s3 + $0x200] sm:$0xff]  }
  0x7b   : > { %v1116_v56 = vrot.slane %v1114_v3, 5  ;;  %v3967_v0 = vld [vmem:[#allocation3 + $0x124] ss:$36 sps:$4 sm:$0x7f]   ;;  %1068 = vst [vmem:[#allocation3 + $0x12c] sm:$0xf] %v1048_v37  ;;  %v1387_v8 = vor.u32 %v1386_v6, %v1383_v53 }
  0x7c   : > { %v1379_v1 = vrot.slane %v1378_v4, 4  ;;  %v3970_v13 = vld [vmem:[#allocation3 + $0x120] ss:$36 sps:$4 sm:$0x7f]   ;;  %1069 = vst [vmem:[#allocation3 + $0x150] sm:$0x7] %v1049_v7  ;;  %v4691_v22 = vor.u32 %v1396_v61, %v1393_v15  ;;  %2502 = vmatprep.mubr.bf16.mxu0 %v3967_v0 }
  0x7d   : > { %v1112_v9 = vrot.slane %v4664_v32, 4  ;;  %v3981_v14 = vld [vmem:[#allocation3 + $0x14] ss:$36 sps:$4 sm:$0xff]   ;;  %v1389_v21 = vrot.slane %v1387_v8, 4  ;;  %v1119_v24 = vrot.slane %v1117_v42, 6  ;;  %v1124_v18 = vshrl.u32 %v1074_v62, 16 }
  0x7e   : > { %v1388_v20 = vsel %vm4685_vm12, %v1379_v1, %v1387_v8  ;;  %v1127_v2 = vshll.u32 %v1074_v62, 16  ;;  %v1240_v25 = vrot.slane %v1238_v11, 4  ;;  %v1241_v60 = vrot.slane %v1211_v49, 6  ;;  %v4699_v63 = vld [vmem:[#allocation2 + $0x18] sm:$0xf] }
  0x7f   : > { %1489 = vst [vmem:[#allocation3 + $0x1c] sm:$0xf] %v1388_v20  ;;  %v1244_v27 = vrot.slane %v4689_v36, 6  ;;  %v1398_v28 = vsel %vm4685_vm12, %v1389_v21, %v4691_v22  ;;  %v1120_v29 = vor.u32 %v1119_v24, %v1116_v56  ;;  %v1126_v30 = vrot.slane %v1124_v18, 5  ;;  %v1360_v33 = vld [vmem:[#allocation2 + $0x14] sm:$0xf]  ;;  %2503 = vmatmul.mubr.bf16.gmra.mrb[16].mxu0 %v3970_v13 }
  0x80   : > { %v1313_v32 = vrot.slane %v1311_v34, 4  ;;  %1490 = vst [vmem:[#allocation3 + $0x40] sm:$0xf] %v1398_v28  ;;  %v1129_v35 = vrot.slane %v1127_v2, 6  ;;  %v1242_v17 = vsel %vm4609_vm5, %v1240_v25, %v1241_v60  ;;  %v1243_v11 = vrot.slane %v1241_v60, 4  ;;  %2616 = vmatprep.mubr.bf16.mxu0 %v3981_v14  ;;  %v3987_v56 = vld [vmem:[%s5101_s3 + $0x208] sm:$0xff]  }
  0x81   : > { %v1314_v16 = vrot.slane %v1287_v12, 6  ;;  %v1121_v41 = vsel %vm4650_vm2, %v1112_v9, %v1120_v29  ;;  %v1122_v38 = vrot.slane %v1120_v29, 4  ;;  %1276 = vst [vmem:[#allocation3 + $0x5c] sm:$0xf] %v1242_v17  ;;  %v1317_v58 = vrot.slane %v4699_v63, 6 }
  0x82   : > { %v1361_v39 = vld [vmem:[#allocation2 + $0x18] sm:$0xf]  ;;  %v3979_v34 = vld [vmem:[#allocation3 + $0x10] ss:$36 sps:$4 sm:$0xff]   ;;  %v4711_v43 = vor.u32 %v1129_v35, %v1126_v30  ;;  %1200 = vst [vmem:[#allocation3 + $0x58] sm:$0xf] %v1121_v41  ;;  %v1245_v50 = vsel %vm4609_vm5, %v1243_v11, %v1244_v27 }
  0x83   : > { %v1075_v23 = vld [vmem:[#allocation2 + $0x18] sm:$0xf]  ;;  %v1315_v31 = vsel %vm4609_vm5, %v1313_v32, %v1314_v16  ;;  %v1316_v44 = vrot.slane %v1314_v16, 4  ;;  %v1076_v45 = vld [vmem:[#allocation2 + $0x1c] sm:$0xf]  ;;  %v1401_v19 = vshrl.u32 %v1360_v33, 16 }
  0x84   : > { %v3971_v46 = vld [vmem:[#allocation3 + $0x12c] ss:$36 sps:$4 sm:$0x7f]   ;;  %1277 = vst [vmem:[#allocation3 + $0x80] sm:$0xf] %v1245_v50  ;;  %v1131_v48 = vsel %vm4650_vm2, %v1122_v38, %v4711_v43  ;;  %v1404_v52 = vshll.u32 %v1360_v33, 16 }
  0x85   : > { %1349 = vst [vmem:[#allocation3 + $0x60] sm:$0xf] %v1315_v31  ;;  %v3973_v47 = vld [vmem:[#allocation3 + $0x128] ss:$36 sps:$4 sm:$0x7f]   ;;  %v1318_v51 = vsel %vm4609_vm5, %v1316_v44, %v1317_v58  ;;  %v1411_v53 = vshrl.u32 %v1361_v39, 16  ;;  %2575 = vmatprep.mubr.bf16.mxu1 %v3971_v46 }
  0x86   : > { %v1213_v54 = vld [vmem:[#allocation2 + $0x18] sm:$0xf]  ;;  %1201 = vst [vmem:[#allocation3 + $0x7c] sm:$0xf] %v1131_v48  ;;  %1350 = vst [vmem:[#allocation3 + $0x84] sm:$0xf] %v1318_v51  ;;  %2576 = vmatmul.mubr.bf16.gmra.mrb[16].mxu1 %v3973_v47 }
  0x87   : > { %v1399_v57 = vrot.slane %v4691_v22, 4  ;;  %v1403_v59 = vrot.slane %v1401_v19, 6  ;;  %v1414_v62 = vshll.u32 %v1361_v39, 16  ;;  %v1134_v3 = vshrl.u32 %v1075_v23, 16  ;;  %v4728_v49 = vld [vmem:[#allocation2 + $0x1c] sm:$0xf]  ;;  %2617 = vmatmul.mubr.bf16.vlgmr.msra.gmra.mrb[20].mxu0 %v3979_v34 }
  0x88   : > { %v1406_v4 = vrot.slane %v1404_v52, 7  ;;  %v1413_v6 = vrot.slane %v1411_v53, 6  ;;  %v1137_v15 = vshll.u32 %v1075_v23, 16  ;;  %v1144_v42 = vshrl.u32 %v1076_v45, 16  ;;  %v3986_v37 = vld [vmem:[#allocation3 + $0x1c] ss:$36 sps:$4 sm:$0xff]   ;;  %3780 = vmatpush3.bf16.msra.mxu0 %v3983_v55 }
  0x89   : > { %v1416_v7 = vrot.slane %v1414_v62, 7  ;;  %v1132_v61 = vrot.slane %v4711_v43, 4  ;;  %v1136_v1 = vrot.slane %v1134_v3, 5  ;;  %v1289_v13 = vld [vmem:[#allocation2 + $0x1c] sm:$0xf]  ;;  %2689 = vmatprep.mubr.bf16.mxu1 %v3986_v37  ;;  %v1147_v14 = vshll.u32 %v1076_v45, 16  ;;  %3781 = vmatprep.subr.bf16.mxu0 %v4039_v40 }
  0x8a   : > { %v1407_v0 = vor.u32 %v1406_v4, %v1403_v59  ;;  %v1139_v8 = vrot.slane %v1137_v15, 6  ;;  %v1146_v12 = vrot.slane %v1144_v42, 5  ;;  %v4734_v22 = vld [vmem:[#allocation2 + $0x20] sm:$0xf]  ;;  %v1246_v20 = vrot.slane %v1244_v27, 4  ;;  %v3994_v16 = vld [vmem:[%s5101_s3 + $0x210] sm:$0xff]  }
  0x8b   : > { %v4736_v9 = vor.u32 %v1416_v7, %v1413_v6  ;;  %v1247_v21 = vrot.slane %v1213_v54, 6  ;;  %v3984_v24 = vld [vmem:[#allocation3 + $0x18] ss:$36 sps:$4 sm:$0xff]   ;;  %v1250_v60 = vrot.slane %v4728_v49, 6  ;;  %v1362_v63 = vld [vmem:[#allocation2 + $0x1c] sm:$0xf] }
  0x8c   : > { %v1408_v18 = vsel %vm4685_vm12, %v1399_v57, %v1407_v0  ;;  %v1409_v2 = vrot.slane %v1407_v0, 4  ;;  %v1140_v25 = vor.u32 %v1139_v8, %v1136_v1  ;;  %v1149_v28 = vrot.slane %v1147_v14, 6  ;;  %v1363_v27 = vld [vmem:[#allocation2 + $0x20] sm:$0xf]  ;;  %v3988_v32 = vld [vmem:[#allocation3 + $0x5c] ss:$36 sps:$4 sm:$0xff]   ;;  %3782 = vmatpush3.bf16.msra.mxu0 %v3987_v56 }
  0x8d   : > { %1491 = vst [vmem:[#allocation3 + $0x64] sm:$0xf] %v1408_v18  ;;  %v1248_v29 = vsel %vm4609_vm5, %v1246_v20, %v1247_v21  ;;  %v1249_v30 = vrot.slane %v1247_v21, 4  ;;  %v1319_v36 = vrot.slane %v1317_v58, 4  ;;  %v3990_v33 = vld [vmem:[#allocation3 + $0x58] ss:$36 sps:$4 sm:$0xff]   ;;  %2624 = vmatprep.mubr.bf16.mxu0 %v3988_v32  ;;  %3783 = vmatprep.subr.bf16.mxu0 %v4039_v40 }
  0x8e   : > { %v1418_v35 = vsel %vm4685_vm12, %v1409_v2, %v4736_v9  ;;  %v1141_v17 = vsel %vm4650_vm2, %v1132_v61, %v1140_v25  ;;  %v1142_v11 = vrot.slane %v1140_v25, 4  ;;  %1278 = vst [vmem:[#allocation3 + $0xa4] sm:$0xf] %v1248_v29  ;;  %v4754_v41 = vor.u32 %v1149_v28, %v1146_v12  ;;  %2690 = vmatmul.mubr.bf16.vlgmr.msra.gmra.mrb[20].mxu1 %v3984_v24  ;;  %v1077_v31 = vld [vmem:[#allocation2 + $0x20] sm:$0xf]  ;;  %v3997_v55 = vld [vmem:[%s5101_s3 + $0x218] sm:$0xff]  }
  0x8f   : > { %1492 = vst [vmem:[#allocation3 + $0x88] sm:$0xf] %v1418_v35  ;;  %1202 = vst [vmem:[#allocation3 + $0xa0] sm:$0xf] %v1141_v17  ;;  %v1251_v38 = vsel %vm4609_vm5, %v1249_v30, %v1250_v60  ;;  %v1320_v58 = vrot.slane %v1289_v13, 6  ;;  %v1323_v39 = vrot.slane %v4734_v22, 6  ;;  %2625 = vmatmul.mubr.bf16.gmra.mrb[24].mxu0 %v3990_v33 }
  0x90   : > { %1279 = vst [vmem:[#allocation3 + $0xc8] sm:$0xf] %v1251_v38  ;;  %v1419_v23 = vrot.slane %v4736_v9, 4  ;;  %v1421_v34 = vshrl.u32 %v1362_v63, 16  ;;  %v1424_v43 = vshll.u32 %v1362_v63, 16  ;;  %v1431_v50 = vshrl.u32 %v1363_v27, 16  ;;  %3784 = vmatpush3.bf16.msra.mxu0 %v3994_v16 }
  0x91   : > { %v1151_v44 = vsel %vm4650_vm2, %v1142_v11, %v4754_v41  ;;  %v1321_v45 = vsel %vm4609_vm5, %v1319_v36, %v1320_v58  ;;  %v1322_v46 = vrot.slane %v1320_v58, 4  ;;  %v1434_v19 = vshll.u32 %v1363_v27, 16  ;;  %v1078_v47 = vld [vmem:[#allocation2 + $0x24] sm:$0xf]  ;;  %v1215_v48 = vld [vmem:[#allocation2 + $0x20] sm:$0xf]  ;;  %3785 = vmatprep.subr.bf16.mxu0 %v4039_v40 }
  0x92   : > { %1203 = vst [vmem:[#allocation3 + $0xc4] sm:$0xf] %v1151_v44  ;;  %1351 = vst [vmem:[#allocation3 + $0xa8] sm:$0xf] %v1321_v45  ;;  %v1423_v51 = vrot.slane %v1421_v34, 6  ;;  %v1426_v52 = vrot.slane %v1424_v43, 7 }
  0x93   : > { %v1433_v53 = vrot.slane %v1431_v50, 6  ;;  %v1152_v54 = vrot.slane %v4754_v41, 4  ;;  %v1324_v57 = vsel %vm4609_vm5, %v1322_v46, %v1323_v39  ;;  %v1436_v59 = vrot.slane %v1434_v19, 7  ;;  %v4772_v4 = vld [vmem:[#allocation2 + $0x24] sm:$0xf] }
  0x94   : > { %v1154_v62 = vshrl.u32 %v1077_v31, 16  ;;  %v1157_v3 = vshll.u32 %v1077_v31, 16  ;;  %1352 = vst [vmem:[#allocation3 + $0xcc] sm:$0xf] %v1324_v57  ;;  %v1427_v6 = vor.u32 %v1426_v52, %v1423_v51  ;;  %v1164_v15 = vshrl.u32 %v1078_v47, 16  ;;  %3786 = vmatpush3.bf16.msra.mxu0 %v3997_v55  ;;  %v4002_v9 = vld [vmem:[%s5101_s3 + $0x220] sm:$0xff]  }
  0x95   : > { %v1167_v42 = vshll.u32 %v1078_v47, 16  ;;  %v1252_v49 = vrot.slane %v1250_v60, 4  ;;  %v4775_v37 = vor.u32 %v1436_v59, %v1433_v53  ;;  %v1253_v56 = vrot.slane %v1215_v48, 6  ;;  %v1291_v0 = vld [vmem:[#allocation2 + $0x24] sm:$0xf]  ;;  %3787 = vmatprep.subr.bf16.mxu0 %v4039_v40 }
  0x96   : > { %v1156_v7 = vrot.slane %v1154_v62, 5  ;;  %v1159_v61 = vrot.slane %v1157_v3, 6  ;;  %v4777_v1 = vld [vmem:[#allocation2 + $0x28] sm:$0xf]  ;;  %v3991_v8 = vld [vmem:[#allocation3 + $0x64] ss:$36 sps:$4 sm:$0xff]   ;;  %v1428_v13 = vsel %vm4685_vm12, %v1419_v23, %v1427_v6 }
  0x97   : > { %v3993_v12 = vld [vmem:[#allocation3 + $0x60] ss:$36 sps:$4 sm:$0xff]   ;;  %v1429_v22 = vrot.slane %v1427_v6, 4  ;;  %1493 = vst [vmem:[#allocation3 + $0xac] sm:$0xf] %v1428_v13  ;;  %v1166_v20 = vrot.slane %v1164_v15, 5  ;;  %v1254_v24 = vsel %vm4609_vm5, %v1252_v49, %v1253_v56  ;;  %2697 = vmatprep.mubr.bf16.mxu1 %v3991_v8 }
  0x98   : > { %v1160_v14 = vor.u32 %v1159_v61, %v1156_v7  ;;  %v1169_v21 = vrot.slane %v1167_v42, 6  ;;  %v1364_v18 = vld [vmem:[#allocation2 + $0x24] sm:$0xf]  ;;  %v1255_v25 = vrot.slane %v1253_v56, 4  ;;  %v1256_v60 = vrot.slane %v4772_v4, 6  ;;  %2698 = vmatmul.mubr.bf16.gmra.mrb[24].mxu1 %v3993_v12  ;;  %3788 = vmatpush3.bf16.msra.mxu0 %v4002_v9  ;;  %v4008_v23 = vld [vmem:[%s5101_s3 + $0x228] sm:$0xff]  }
  0x99   : > { %v1438_v2 = vsel %vm4685_vm12, %v1429_v22, %v4775_v37  ;;  %1280 = vst [vmem:[#allocation3 + $0xec] sm:$0xf] %v1254_v24  ;;  %v1325_v63 = vrot.slane %v1323_v39, 4  ;;  %v1365_v28 = vld [vmem:[#allocation2 + $0x28] sm:$0xf]  ;;  %v1326_v35 = vrot.slane %v1291_v0, 6  ;;  %3789 = vmatprep.subr.bf16.mxu0 %v4039_v40 }
  0x9a   : > { %v3995_v29 = vld [vmem:[#allocation3 + $0xa4] ss:$36 sps:$4 sm:$0xff]   ;;  %1494 = vst [vmem:[#allocation3 + $0xd0] sm:$0xf] %v1438_v2  ;;  %v1161_v36 = vsel %vm4650_vm2, %v1152_v54, %v1160_v14  ;;  %v1162_v27 = vrot.slane %v1160_v14, 4  ;;  %v4793_v32 = vor.u32 %v1169_v21, %v1166_v20  ;;  %v1257_v33 = vsel %vm4609_vm5, %v1255_v25, %v1256_v60  ;;  %v4010_v62 = vld [vmem:[%s5101_s3 + $0x230] sm:$0xff]  }
  0x9b   : > { %v3998_v30 = vld [vmem:[#allocation3 + $0xa0] ss:$36 sps:$4 sm:$0xff]   ;;  %1204 = vst [vmem:[#allocation3 + $0xe8] sm:$0xf] %v1161_v36  ;;  %v1329_v17 = vrot.slane %v4777_v1, 6  ;;  %v1439_v11 = vrot.slane %v4775_v37, 4  ;;  %2632 = vmatprep.mubr.bf16.mxu0 %v3995_v29  ;;  %v1327_v43 = vsel %vm4609_vm5, %v1325_v63, %v1326_v35 }
  0x9c   : > { %v1079_v16 = vld [vmem:[#allocation2 + $0x28] sm:$0xf]  ;;  %v1171_v41 = vsel %vm4650_vm2, %v1162_v27, %v4793_v32  ;;  %1281 = vst [vmem:[#allocation3 + $0x110] sm:$0xf] %v1257_v33  ;;  %v1441_v38 = vshrl.u32 %v1364_v18, 16  ;;  %v1444_v58 = vshll.u32 %v1364_v18, 16  ;;  %2633 = vmatmul.mubr.bf16.gmra.mrb[28].mxu0 %v3998_v30 }
  0x9d   : > { %v1451_v39 = vshrl.u32 %v1365_v28, 16  ;;  %v1080_v34 = vld [vmem:[#allocation2 + $0x2c] sm:$0x1]  ;;  %vm1521_vm9 = vcmask 1040384   ;;  %vm1522_vm13 = vcmask 1044484   ;;  %v1328_v50 = vrot.slane %v1326_v35, 4  ;;  %3790 = vmatpush3.bf16.msra.mxu0 %v4008_v23 }
  0x9e   : > { %1205 = vst [vmem:[#allocation3 + $0x10c] sm:$0xf] %v1171_v41  ;;  %v1454_v31 = vshll.u32 %v1365_v28, 16  ;;  %v1172_v44 = vrot.slane %v4793_v32, 4  ;;  %v1217_v45 = vld [vmem:[#allocation2 + $0x28] sm:$0xf]  ;;  %3791 = vmatprep.subr.bf16.mxu0 %v4039_v40  ;;  %vm4839_vm14 = vmor %vm1521_vm9, %vm1522_vm13 }
  0x9f   : > { %1353 = vst [vmem:[#allocation3 + $0xf0] sm:$0xf] %v1327_v43  ;;  %v1443_v46 = vrot.slane %v1441_v38, 6  ;;  %v1446_v19 = vrot.slane %v1444_v58, 7  ;;  %v1453_v47 = vrot.slane %v1451_v39, 6  ;;  %v1174_v48 = vshrl.u32 %v1079_v16, 16 }
  0xa0   : > { %v1218_v51 = vld [vmem:[#allocation2 + $0x2c] sm:$0x1]  ;;  %v1330_v52 = vsel %vm4609_vm5, %v1328_v50, %v1329_v17  ;;  %v1456_v53 = vrot.slane %v1454_v31, 7  ;;  %v1177_v54 = vshll.u32 %v1079_v16, 16  ;;  %v1184_v55 = vshll.u32 %v1080_v34, 16  ;;  %v4017_v20 = vld [vmem:[%s5101_s3 + $0x238] sm:$0xff]  }
  0xa1   : > { %v1293_v57 = vld [vmem:[#allocation2 + $0x2c] sm:$0xf]  ;;  %1354 = vst [vmem:[#allocation3 + $0x114] sm:$0xf] %v1330_v52  ;;  %v1447_v59 = vor.u32 %v1446_v19, %v1443_v46  ;;  %v1176_v3 = vrot.slane %v1174_v48, 5  ;;  %v1258_v4 = vrot.slane %v1256_v60, 4  ;;  %3792 = vmatpush3.bf16.msra.mxu0 %v4010_v62 }
  0xa2   : > { %v1259_v6 = vrot.slane %v1217_v45, 6  ;;  %v1294_v15 = vld [vmem:[#allocation2 + $0x30] sm:$0x1]  ;;  %v3999_v42 = vld [vmem:[#allocation3 + $0xac] ss:$36 sps:$4 sm:$0xff]   ;;  %v4814_v37 = vor.u32 %v1456_v53, %v1453_v47  ;;  %v1179_v7 = vrot.slane %v1177_v54, 6  ;;  %3793 = vmatprep.subr.bf16.mxu0 %v4039_v40 }
  0xa3   : > { %v4001_v49 = vld [vmem:[#allocation3 + $0xa8] ss:$36 sps:$4 sm:$0xff]   ;;  %v1366_v61 = vld [vmem:[#allocation2 + $0x2c] sm:$0xf]  ;;  %v1448_v56 = vsel %vm4685_vm12, %v1439_v11, %v1447_v59  ;;  %v1449_v0 = vrot.slane %v1447_v59, 4  ;;  %v1186_v1 = vrot.slane %v1184_v55, 6  ;;  %2705 = vmatprep.mubr.bf16.mxu1 %v3999_v42 }
  0xa4   : > { %v1260_v8 = vsel %vm4609_vm5, %v1258_v4, %v1259_v6  ;;  %v1367_v12 = vld [vmem:[#allocation2 + $0x30] sm:$0x3]  ;;  %1495 = vst [vmem:[#allocation3 + $0xf4] sm:$0xf] %v1448_v56  ;;  %v1180_v13 = vor.u32 %v1179_v7, %v1176_v3  ;;  %v1261_v22 = vrot.slane %v1259_v6, 4  ;;  %v1262_v9 = vrot.slane %v1218_v51, 6  ;;  %2706 = vmatmul.mubr.bf16.gmra.mrb[28].mxu1 %v4001_v49 }
  0xa5   : > { %1282 = vst [vmem:[#allocation3 + $0x134] sm:$0xf] %v1260_v8  ;;  %v1331_v14 = vrot.slane %v1329_v17, 4  ;;  %v4003_v21 = vld [vmem:[#allocation3 + $0xec] ss:$36 sps:$4 sm:$0xff]   ;;  %v1458_v18 = vsel %vm4685_vm12, %v1449_v0, %v4814_v37  ;;  %v1332_v2 = vrot.slane %v1293_v57, 6  ;;  %3794 = vmatpush3.bf16.msra.mxu0 %v4017_v20 }
  0xa6   : > { %v4005_v24 = vld [vmem:[#allocation3 + $0xe8] ss:$36 sps:$4 sm:$0xff]   ;;  %1496 = vst [vmem:[#allocation3 + $0x118] sm:$0xf] %v1458_v18  ;;  %v1181_v25 = vsel %vm4650_vm2, %v1172_v44, %v1180_v13  ;;  %v1182_v60 = vrot.slane %v1180_v13, 4  ;;  %v1263_v63 = vsel %vm4609_vm5, %v1261_v22, %v1262_v9  ;;  %v1335_v28 = vrot.slane %v1294_v15, 6  ;;  %2640 = vmatprep.mubr.bf16.mxu0 %v4003_v21 }
  0xa7   : > { %v1499_v29 = vld [vmem:[#allocation2 + $0x8] sm:$0x8]  ;;  %v1500_v30 = vld [vmem:[#allocation2 + $0xc] sm:$0xf]  ;;  %1206 = vst [vmem:[#allocation3 + $0x130] sm:$0xf] %v1181_v25  ;;  %v1333_v36 = vsel %vm4609_vm5, %v1331_v14, %v1332_v2  ;;  %2641 = vmatmul.mubr.bf16.gmra.mrb[32].mxu0 %v4005_v24 }
  0xa8   : > { %1283 = vst [vmem:[#allocation3 + $0x158] sm:$0x7] %v1263_v63  ;;  %v1334_v27 = vrot.slane %v1332_v2, 4  ;;  %v1459_v32 = vrot.slane %v4814_v37, 4  ;;  %v1461_v33 = vshrl.u32 %v1366_v61, 16  ;;  %v1187_v17 = vsel %vm4650_vm2, %v1182_v60, %v1186_v1  ;;  %v4025_v38 = vld [vmem:[%s5103_s5 + $0x10] sm:$0xff]  }
  0xa9   : > { %v1501_v35 = vld [vmem:[#allocation2 + $0x10] sm:$0xf]  ;;  %1355 = vst [vmem:[#allocation3 + $0x138] sm:$0xf] %v1333_v36  ;;  %v1464_v11 = vshll.u32 %v1366_v61, 16  ;;  %v1471_v16 = vshrl.u32 %v1367_v12, 16 }
  0xaa   : > { %v1474_v41 = vshll.u32 %v1367_v12, 16  ;;  %v1502_v58 = vld [vmem:[#allocation2 + $0x14] sm:$0xf]  ;;  %1207 = vst [vmem:[#allocation3 + $0x154] sm:$0x7] %v1187_v17  ;;  %v1336_v39 = vsel %vm4609_vm5, %v1334_v27, %v1335_v28  ;;  %v1463_v23 = vrot.slane %v1461_v33, 6 }
  0xab   : > { %v3326_v34 = vrot.slane %v1499_v29, 11  ;;  %v1526_v10 = vrot.slane %v1500_v30, 7  ;;  %v1503_v43 = vld [vmem:[#allocation2 + $0x18] sm:$0xf]  ;;  %1356 = vst [vmem:[#allocation3 + $0x15c] sm:$0x7] %v1336_v39 }
  0xac   : > { %v1466_v50 = vrot.slane %v1464_v11, 7  ;;  %v1473_v31 = vrot.slane %v1471_v16, 6  ;;  %v1476_v44 = vrot.slane %v1474_v41, 7  ;;  %v1529_v45 = vrot.slane %v1501_v35, 7  ;;  %v1504_v46 = vld [vmem:[#allocation2 + $0x1c] sm:$0xf] }
  0xad   : > { %v1527_v19 = vsel %vm4839_vm14, %v3326_v34, %v1526_v10  ;;  %v1528_v47 = vrot.slane %v1526_v10, 4  ;;  %v1532_v48 = vrot.slane %v1502_v58, 7  ;;  %v1535_v51 = vrot.slane %v1503_v43, 7  ;;  %v1505_v52 = vld [vmem:[#allocation2 + $0x20] sm:$0xf]  ;;  %v4024_v41 = vld [vmem:[%s5103_s5 + $0x8] sm:$0xff]  }
  0xae   : > { %v1467_v26 = vor.u32 %v1466_v50, %v1463_v23  ;;  %v1477_v53 = vor.u32 %v1476_v44, %v1473_v31  ;;  %1565 = vst [vmem:[#allocation3 + $0x20] sm:$0xf] %v1527_v19  ;;  %v1531_v54 = vrot.slane %v1529_v45, 4  ;;  %v1538_v55 = vrot.slane %v1504_v46, 7  ;;  %v1506_v57 = vld [vmem:[#allocation2 + $0x24] sm:$0xf] }
  0xaf   : > { %v1507_v59 = vld [vmem:[#allocation2 + $0x28] sm:$0xf]  ;;  %v1530_v4 = vsel %vm4839_vm14, %v1528_v47, %v1529_v45  ;;  %v1534_v6 = vrot.slane %v1532_v48, 4  ;;  %v1537_v37 = vrot.slane %v1535_v51, 4  ;;  %v1508_v7 = vld [vmem:[#allocation2 + $0x2c] sm:$0xf] }
  0xb0   : > { %v4006_v62 = vld [vmem:[#allocation3 + $0xf4] ss:$36 sps:$4 sm:$0xff]   ;;  %v1468_v15 = vsel %vm4685_vm12, %v1459_v32, %v1467_v26  ;;  %v1469_v42 = vrot.slane %v1467_v26, 4  ;;  %1566 = vst [vmem:[#allocation3 + $0x44] sm:$0xf] %v1530_v4  ;;  %v1533_v49 = vsel %vm4839_vm14, %v1531_v54, %v1532_v48  ;;  %v1540_v56 = vrot.slane %v1538_v55, 4 }
  0xb1   : > { %v4009_v3 = vld [vmem:[#allocation3 + $0xf0] ss:$36 sps:$4 sm:$0xff]   ;;  %2713 = vmatprep.mubr.bf16.mxu1 %v4006_v62  ;;  %1497 = vst [vmem:[#allocation3 + $0x13c] sm:$0xf] %v1468_v15  ;;  %v1536_v61 = vsel %vm4839_vm14, %v1534_v6, %v1535_v51  ;;  %1567 = vst [vmem:[#allocation3 + $0x68] sm:$0xf] %v1533_v49  ;;  %v1539_v22 = vsel %vm4839_vm14, %v1537_v37, %v1538_v55 }
  0xb2   : > { %v1541_v0 = vrot.slane %v1505_v52, 7  ;;  %v1544_v1 = vrot.slane %v1506_v57, 7  ;;  %v1509_v8 = vld [vmem:[#allocation2 + $0x30] sm:$0x3]  ;;  %2714 = vmatmul.mubr.bf16.gmra.mrb[32].mxu1 %v4009_v3  ;;  %v1478_v13 = vsel %vm4685_vm12, %v1469_v42, %v1477_v53  ;;  %1568 = vst [vmem:[#allocation3 + $0x8c] sm:$0xf] %v1536_v61 }
  0xb3   : > { %v4011_v12 = vld [vmem:[#allocation3 + $0x134] ss:$36 sps:$4 sm:$0x7f]   ;;  %v1547_v9 = vrot.slane %v1507_v59, 7  ;;  %1498 = vst [vmem:[#allocation3 + $0x160] sm:$0x7] %v1478_v13 }
  0xb4   : > { %v4013_v14 = vld [vmem:[#allocation3 + $0x130] ss:$36 sps:$4 sm:$0x7f]   ;;  %v1542_v20 = vsel %vm4839_vm14, %v1540_v56, %v1541_v0  ;;  %1569 = vst [vmem:[#allocation3 + $0xb0] sm:$0xf] %v1539_v22  ;;  %v1543_v21 = vrot.slane %v1541_v0, 4  ;;  %2648 = vmatprep.mubr.bf16.mxu0 %v4011_v12 }
  0xb5   : > { %v1546_v24 = vrot.slane %v1544_v1, 4  ;;  %v1550_v18 = vrot.slane %v1508_v7, 7  ;;  %1570 = vst [vmem:[#allocation3 + $0xd4] sm:$0xf] %v1542_v20  ;;  %v1549_v2 = vrot.slane %v1547_v9, 4  ;;  %v1553_v25 = vrot.slane %v1509_v8, 7  ;;  %2649 = vmatmul.mubr.bf16.gmra.mrb[36].mxu0 %v4013_v14 }
  0xb6   : > { %v1545_v60 = vsel %vm4839_vm14, %v1543_v21, %v1544_v1  ;;  %vm4041_vm15 = vmmov 0   ;;  %v4016_v32 = vld [vmem:[#allocation3 + $0x138] ss:$36 sps:$4 sm:$0x7f]   ;;  %v4023_v16 = vld [vmem:[%s5103_s5] sm:$0xff]   ;;  %v4026_v58 = vld [vmem:[%s5103_s5 + $0x18] sm:$0xff]  }
  0xb7   : > { %v1548_v63 = vsel %vm4839_vm14, %v1546_v24, %v1547_v9  ;;  %v1552_v28 = vrot.slane %v1550_v18, 4  ;;  %3795 = vmatprep.mubr.msk.bf16.mxu0 %vm4041_vm15, %v4039_v40  ;;  %1571 = vst [vmem:[#allocation3 + $0xf8] sm:$0xf] %v1545_v60  ;;  %v1551_v29 = vsel %vm4839_vm14, %v1549_v2, %v1550_v18  ;;  %v4018_v36 = vld [vmem:[#allocation3 + $0x20] ss:$36 sps:$4 sm:$0xff]   ;;  %3816 = vmatpush3.bf16.msra.mxu1 %v4023_v16  ;;  %v4027_v39 = vld [vmem:[%s5103_s5 + $0x20] sm:$0xff]  }
  0xb8   : > { %1572 = vst [vmem:[#allocation3 + $0x11c] sm:$0xf] %v1548_v63  ;;  %1573 = vst [vmem:[#allocation3 + $0x140] sm:$0xf] %v1551_v29  ;;  %3817 = vmatprep.subr.bf16.mxu1 %v4039_v40  ;;  %v4028_v23 = vld [vmem:[%s5103_s5 + $0x28] sm:$0xff]   ;;  %v4029_v34 = vld [vmem:[%s5103_s5 + $0x30] sm:$0xff]  }
  0xb9   : > { %v1554_v30 = vsel %vm4839_vm14, %v1552_v28, %v1553_v25  ;;  %v4019_v33 = vld [vmem:[#allocation3 + $0x68] ss:$36 sps:$4 sm:$0xff]   ;;  %vm3031_vm1 = vcmask 1044480   ;;  %vm3213_vm3 = vcmask 1043457   ;;  %vm3214_vm4 = vsmask.f32 7942 }
  0xba   : > { %1574 = vst [vmem:[#allocation3 + $0x164] sm:$0x7] %v1554_v30  ;;  %v4014_v27 = vld [vmem:[#allocation3 + $0x13c] ss:$36 sps:$4 sm:$0x7f]   ;;  %v4030_v10 = vld [vmem:[%s5103_s5 + $0x38] sm:$0xff]   ;;  %vm5013_vm5 = vmand %vm3213_vm3, %vm3214_vm4 }
  0xbb   : > { %2721 = vmatprep.mubr.bf16.mxu1 %v4014_v27  ;;  %3818 = vmatpush3.bf16.msra.mxu1 %v4024_v41  ;;  %v4915_v50 = vld [vmem:[%s5102_s4] ss:$0 sm:$0xff]  ;;  %vm3228_vm0 = vsmask.f32 256  ;;  %vm3238_vm11 = vcmask 1043456  }
  0xbc   : > { %2722 = vmatmul.mubr.bf16.gmra.mrb[36].mxu1 %v4016_v32  ;;  %v4020_v35 = vld [vmem:[#allocation3 + $0xb0] ss:$36 sps:$4 sm:$0xff]   ;;  %3819 = vmatprep.subr.bf16.mxu1 %v4039_v40  ;;  %vm3229_vm8 = vmand %vm1521_vm9, %vm3228_vm0  ;;  %vm3239_vm2 = vsmask.f32 7938 }
  0xbd   : > { %3796 = vmatmul.mubr.bf16.vlgmr.msra.gmra.mrb[40].mxu0 %v4018_v36  ;;  %3831 = vmatprep.mubr.msk.bf16.mxu1 %vm4041_vm15, %v4039_v40  ;;  %vm3240_vm10 = vmand %vm3238_vm11, %vm3239_vm2 }
  0xbe   : > { %3799 = vmatprep.mubr.msk.bf16.mxu0 %vm4041_vm15, %v4039_v40 }
  0xbf   : > { %v4021_v17 = vld [vmem:[#allocation3 + $0xf8] ss:$36 sps:$4 sm:$0xff]   ;;  %3820 = vmatpush3.bf16.msra.mxu1 %v4025_v38 }
  0xc0   : > { %3821 = vmatprep.subr.bf16.mxu1 %v4039_v40 }
  0xc1   : > { %v4022_v11 = vld [vmem:[#allocation3 + $0x140] ss:$36 sps:$4 sm:$0x7f]  }
  0xc3   : > { %3822 = vmatpush3.bf16.msra.mxu1 %v4026_v58 }
  0xc4   : > { %3823 = vmatprep.subr.bf16.mxu1 %v4039_v40 }
  0xc5   : > { %3800 = vmatmul.mubr.bf16.gmra.mrb[44].mxu0 %v4019_v33 }
  0xc6   : > { %3803 = vmatprep.mubr.msk.bf16.mxu0 %vm4041_vm15, %v4039_v40 }
  0xc7   : > { %3824 = vmatpush3.bf16.msra.mxu1 %v4027_v39 }
  0xc8   : > { %3825 = vmatprep.subr.bf16.mxu1 %v4039_v40 }
  0xcb   : > { %3826 = vmatpush3.bf16.msra.mxu1 %v4028_v23 }
  0xcc   : > { %3827 = vmatprep.subr.bf16.mxu1 %v4039_v40 }
  0xcd   : > { %3804 = vmatmul.mubr.bf16.gmra.mrb[48].mxu0 %v4020_v35 }
  0xce   : > { %3807 = vmatprep.mubr.msk.bf16.mxu0 %vm4041_vm15, %v4039_v40 }
  0xcf   : > { %3828 = vmatpush3.bf16.msra.mxu1 %v4029_v34 }
  0xd0   : > { %3829 = vmatprep.subr.bf16.mxu1 %v4039_v40 }
  0xd3   : > { %3830 = vmatpush3.bf16.msra.mxu1 %v4030_v10 }
  0xd5   : > { %3808 = vmatmul.mubr.bf16.gmra.mrb[52].mxu0 %v4021_v17 }
  0xd6   : > { %3811 = vmatprep.mubr.msk.bf16.mxu0 %vm4041_vm15, %v4039_v40 }
  0xdd   : > { %3812 = vmatmul.mubr.bf16.gmra.mrb[56].mxu0 %v4022_v11 }
 0x116   : > { %v3585_v43 = vpop.f32.mrb[0].mxu0 }
 0x117   : > { %v3586_v31 = vpop.f32.mrb[1].mxu0 }
 0x118   : > { %v3631_v44 = vpop.f32.mrb[0].mxu1  ;;  %v3587_v45 = vadd.f32 %v3586_v31, %v3585_v43  ;;  %v3588_v46 = vpop.f32.mrb[2].mxu0 }
 0x119   : > { %v3632_v19 = vpop.f32.mrb[1].mxu1  ;;  %v3589_v47 = vpop.f32.mrb[3].mxu0 }
 0x11a   : > { %v3633_v48 = vadd.f32 %v3632_v19, %v3631_v44  ;;  %v3634_v51 = vpop.f32.mrb[2].mxu1  ;;  %v2473_v52 = vadd.f32 %v3587_v45, %v4915_v50  ;;  %v3590_v26 = vadd.f32 %v3589_v47, %v3588_v46 }
 0x11b   : > { %v3635_v53 = vpop.f32.mrb[3].mxu1 }
 0x11c   : > { %v3636_v54 = vadd.f32 %v3635_v53, %v3634_v51  ;;  %v2476_v55 = vadd.f32 %v3590_v26, %v4915_v50  ;;  %v4919_v57 = vadd.f32 %v3633_v48, %v2473_v52 }
 0x11e   : > { %v4921_v59 = vadd.f32 %v3636_v54, %v2476_v55  ;;  %v3591_v62 = vpop.f32.mrb[4].mxu0 }
 0x11f   : > { %v3592_v3 = vpop.f32.mrb[5].mxu0 }
 0x120   : > { %v3637_v4 = vpop.f32.mrb[4].mxu1  ;;  %v3593_v6 = vadd.f32 %v3592_v3, %v3591_v62  ;;  %v3594_v15 = vpop.f32.mrb[6].mxu0 }
 0x121   : > { %v3638_v42 = vpop.f32.mrb[5].mxu1  ;;  %v3595_v49 = vpop.f32.mrb[7].mxu0 }
 0x122   : > { %v3639_v37 = vadd.f32 %v3638_v42, %v3637_v4  ;;  %v3640_v7 = vpop.f32.mrb[6].mxu1  ;;  %v2481_v61 = vadd.f32 %v3593_v6, %v4915_v50  ;;  %v3596_v56 = vadd.f32 %v3595_v49, %v3594_v15 }
 0x123   : > { %v3641_v0 = vpop.f32.mrb[7].mxu1 }
 0x124   : > { %v3642_v1 = vadd.f32 %v3641_v0, %v3640_v7  ;;  %v2484_v8 = vadd.f32 %v3596_v56, %v4915_v50  ;;  %v4925_v12 = vadd.f32 %v3639_v37, %v2481_v61 }
 0x126   : > { %v4927_v13 = vadd.f32 %v3642_v1, %v2484_v8 }
 0x135   : > { %v3597_v22 = vpop.f32.mrb[8].mxu0 }
 0x136   : > { %v3598_v9 = vpop.f32.mrb[9].mxu0 }
 0x137   : > { %v3643_v14 = vpop.f32.mrb[8].mxu1  ;;  %v3599_v20 = vadd.f32 %v3598_v9, %v3597_v22  ;;  %v3600_v21 = vpop.f32.mrb[10].mxu0 }
 0x138   : > { %v3644_v24 = vpop.f32.mrb[9].mxu1  ;;  %v3601_v18 = vpop.f32.mrb[11].mxu0 }
 0x139   : > { %v3645_v2 = vadd.f32 %v3644_v24, %v3643_v14  ;;  %v3646_v25 = vpop.f32.mrb[10].mxu1  ;;  %v2489_v60 = vadd.f32 %v3599_v20, %v4915_v50  ;;  %v3602_v63 = vadd.f32 %v3601_v18, %v3600_v21 }
 0x13a   : > { %v3647_v28 = vpop.f32.mrb[11].mxu1 }
 0x13b   : > { %v3648_v29 = vadd.f32 %v3647_v28, %v3646_v25  ;;  %v2492_v30 = vadd.f32 %v3602_v63, %v4915_v50  ;;  %v4931_v36 = vadd.f32 %v3645_v2, %v2489_v60 }
 0x13d   : > { %v4933_v27 = vadd.f32 %v3648_v29, %v2492_v30 }
 0x14a   : > { %v3603_v32 = vpop.f32.mrb[12].mxu0  ;;  %v3649_v35 = vpop.f32.mrb[12].mxu1 }
 0x14b   : > { %v3604_v33 = vpop.f32.mrb[13].mxu0  ;;  %v3650_v16 = vpop.f32.mrb[13].mxu1 }
 0x14c   : > { %v3605_v17 = vadd.f32 %v3604_v33, %v3603_v32  ;;  %v3606_v11 = vpop.f32.mrb[14].mxu0  ;;  %v3651_v38 = vadd.f32 %v3650_v16, %v3649_v35  ;;  %v3652_v58 = vpop.f32.mrb[14].mxu1 }
 0x14d   : > { %v3607_v41 = vpop.f32.mrb[15].mxu0  ;;  %v3653_v34 = vpop.f32.mrb[15].mxu1 }
 0x14e   : > { %v2497_v39 = vadd.f32 %v3605_v17, %v4915_v50  ;;  %v3608_v23 = vadd.f32 %v3607_v41, %v3606_v11  ;;  %v3654_v10 = vadd.f32 %v3653_v34, %v3652_v58 }
 0x150   : > { %v2500_v43 = vadd.f32 %v3608_v23, %v4915_v50  ;;  %v4937_v31 = vadd.f32 %v3651_v38, %v2497_v39 }
 0x152   : > { %v4939_v44 = vadd.f32 %v3654_v10, %v2500_v43  ;;  %v3609_v45 = vpop.f32.mrb[16].mxu0 }
 0x153   : > { %v3610_v46 = vpop.f32.mrb[17].mxu0 }
 0x154   : > { %v3611_v19 = vadd.f32 %v3610_v46, %v3609_v45  ;;  %v3612_v47 = vpop.f32.mrb[18].mxu0 }
 0x155   : > { %v3613_v48 = vpop.f32.mrb[19].mxu0 }
 0x156   : > { %v3614_v51 = vadd.f32 %v3613_v48, %v3612_v47  ;;  %v2505_v52 = vadd.f32 %v3611_v19, %v4915_v50 }
 0x158   : > { %v2508_v54 = vadd.f32 %v3614_v51, %v4915_v50 }
 0x159   : > { %v3655_v26 = vpop.f32.mrb[16].mxu1 }
 0x15a   : > { %v3656_v53 = vpop.f32.mrb[17].mxu1  ;;  %v3677_v3 = vpop.f32.mrb[20].mxu0 }
 0x15b   : > { %v3657_v55 = vadd.f32 %v3656_v53, %v3655_v26  ;;  %v3658_v62 = vpop.f32.mrb[18].mxu1  ;;  %v3678_v6 = vpop.f32.mrb[21].mxu0 }
 0x15c   : > { %v3659_v4 = vpop.f32.mrb[19].mxu1  ;;  %v3679_v49 = vadd.f32 %v3678_v6, %v3677_v3  ;;  %v3680_v37 = vpop.f32.mrb[22].mxu0 }
 0x15d   : > { %v4943_v15 = vadd.f32 %v3657_v55, %v2505_v52  ;;  %v3660_v42 = vadd.f32 %v3659_v4, %v3658_v62  ;;  %v3681_v7 = vpop.f32.mrb[23].mxu0 }
 0x15e   : > { %v2619_v56 = vadd.f32 %v3679_v49, %v4919_v57  ;;  %v3682_v0 = vadd.f32 %v3681_v7, %v3680_v37 }
 0x15f   : > { %v4945_v61 = vadd.f32 %v3660_v42, %v2508_v54 }
 0x160   : > { %v2622_v8 = vadd.f32 %v3682_v0, %v4921_v59 }
 0x161   : > { %v3723_v1 = vpop.f32.mrb[20].mxu1 }
 0x162   : > { %v3724_v50 = vpop.f32.mrb[21].mxu1  ;;  %v3683_v14 = vpop.f32.mrb[24].mxu0 }
 0x163   : > { %v3725_v22 = vadd.f32 %v3724_v50, %v3723_v1  ;;  %v3726_v9 = vpop.f32.mrb[22].mxu1  ;;  %v3684_v21 = vpop.f32.mrb[25].mxu0 }
 0x164   : > { %v3727_v20 = vpop.f32.mrb[23].mxu1  ;;  %v3685_v18 = vadd.f32 %v3684_v21, %v3683_v14  ;;  %v3686_v2 = vpop.f32.mrb[26].mxu0 }
 0x165   : > { %v3728_v24 = vadd.f32 %v3727_v20, %v3726_v9  ;;  %v2692_v25 = vadd.f32 %v3725_v22, %v2619_v56  ;;  %v3687_v60 = vpop.f32.mrb[27].mxu0 }
 0x166   : > { %v2627_v63 = vadd.f32 %v3685_v18, %v4925_v12  ;;  %v3688_v28 = vadd.f32 %v3687_v60, %v3686_v2 }
 0x167   : > { %v2695_v29 = vadd.f32 %v3728_v24, %v2622_v8 }
 0x168   : > { %v2630_v57 = vadd.f32 %v3688_v28, %v4927_v13 }
 0x16b   : > { %v3729_v30 = vpop.f32.mrb[24].mxu1 }
 0x16c   : > { %v3730_v32 = vpop.f32.mrb[25].mxu1 }
 0x16d   : > { %v3731_v59 = vadd.f32 %v3730_v32, %v3729_v30  ;;  %v3732_v33 = vpop.f32.mrb[26].mxu1 }
 0x16e   : > { %v3733_v35 = vpop.f32.mrb[27].mxu1 }
 0x16f   : > { %v3689_v17 = vpop.f32.mrb[28].mxu0  ;;  %v3734_v11 = vadd.f32 %v3733_v35, %v3732_v33  ;;  %v2700_v41 = vadd.f32 %v3731_v59, %v2627_v63 }
 0x170   : > { %v3690_v16 = vpop.f32.mrb[29].mxu0 }
 0x171   : > { %v3691_v38 = vadd.f32 %v3690_v16, %v3689_v17  ;;  %v3692_v58 = vpop.f32.mrb[30].mxu0  ;;  %v2703_v23 = vadd.f32 %v3734_v11, %v2630_v57 }
 0x172   : > { %v3693_v39 = vpop.f32.mrb[31].mxu0 }
 0x173   : > { %v2635_v34 = vadd.f32 %v3691_v38, %v4931_v36  ;;  %v3694_v12 = vadd.f32 %v3693_v39, %v3692_v58 }
 0x175   : > { %v2638_v10 = vadd.f32 %v3694_v12, %v4933_v27 }
 0x177   : > { %v3735_v43 = vpop.f32.mrb[28].mxu1 }
 0x178   : > { %v3736_v13 = vpop.f32.mrb[29].mxu1 }
 0x179   : > { %v3737_v45 = vadd.f32 %v3736_v13, %v3735_v43  ;;  %v3738_v46 = vpop.f32.mrb[30].mxu1 }
 0x17a   : > { %v3739_v19 = vpop.f32.mrb[31].mxu1  ;;  %v3695_v47 = vpop.f32.mrb[32].mxu0 }
 0x17b   : > { %v3740_v48 = vadd.f32 %v3739_v19, %v3738_v46  ;;  %v3696_v51 = vpop.f32.mrb[33].mxu0  ;;  %v2708_v52 = vadd.f32 %v3737_v45, %v2635_v34 }
 0x17c   : > { %v3697_v26 = vadd.f32 %v3696_v51, %v3695_v47  ;;  %v3698_v53 = vpop.f32.mrb[34].mxu0 }
 0x17d   : > { %v3699_v54 = vpop.f32.mrb[35].mxu0  ;;  %v2711_v55 = vadd.f32 %v3740_v48, %v2638_v10 }
 0x17e   : > { %v2643_v62 = vadd.f32 %v3697_v26, %v4937_v31  ;;  %v3700_v3 = vadd.f32 %v3699_v54, %v3698_v53 }
 0x180   : > { %v2646_v36 = vadd.f32 %v3700_v3, %v4939_v44 }
 0x185   : > { %v3741_v4 = vpop.f32.mrb[32].mxu1 }
 0x186   : > { %v3742_v27 = vpop.f32.mrb[33].mxu1 }
 0x187   : > { %v3743_v6 = vadd.f32 %v3742_v27, %v3741_v4  ;;  %v3744_v42 = vpop.f32.mrb[34].mxu1 }
 0x188   : > { %v3745_v49 = vpop.f32.mrb[35].mxu1  ;;  %v3701_v37 = vpop.f32.mrb[36].mxu0 }
 0x189   : > { %v3746_v7 = vadd.f32 %v3745_v49, %v3744_v42  ;;  %v3702_v56 = vpop.f32.mrb[37].mxu0  ;;  %v2716_v0 = vadd.f32 %v3743_v6, %v2643_v62 }
 0x18a   : > { %v3703_v1 = vadd.f32 %v3702_v56, %v3701_v37  ;;  %v3704_v8 = vpop.f32.mrb[38].mxu0  ;;  %v4042_v56 = vmov 0  }
 0x18b   : > { %v3705_v50 = vpop.f32.mrb[39].mxu0  ;;  %v2719_v22 = vadd.f32 %v3746_v7, %v2646_v36  ;;  %3233 = vst [vmem:[%s4970_s18] sm:$0xf] %v4042_v56  ;;  %3244 = vst [vmem:[%s4970_s18 + $0x30] sm:$0x3] %v4042_v56 }
 0x18c   : > { %v2651_v9 = vadd.f32 %v3703_v1, %v4943_v15  ;;  %v3706_v14 = vadd.f32 %v3705_v50, %v3704_v8  ;;  %v4979_v50 = vld [vmem:[%s5099_s1] ss:$0 sm:$0xff] }
 0x18e   : > { %v2654_v31 = vadd.f32 %v3706_v14, %v4945_v61 }
 0x18f   : > { %v3747_v20 = vpop.f32.mrb[36].mxu1 }
 0x190   : > { %v2764_v44 = vpop.f32.mrb[40].mxu0  ;;  %v3748_v21 = vpop.f32.mrb[37].mxu1 }
 0x191   : > { %v2765_v24 = vadd.f32 %v2764_v44, %v2692_v25  ;;  %v3797_v18 = vpop.f32.mrb[41].mxu0  ;;  %v3749_v2 = vadd.f32 %v3748_v21, %v3747_v20  ;;  %v3750_v60 = vpop.f32.mrb[38].mxu1  ;;  %v3566_v20 = vld [vmem:[%s4192_s22 + $0x10] sm:$0xff]  }
 0x192   : > { %v2767_v63 = vpop.f32.mrb[42].mxu0  ;;  %v3751_v28 = vpop.f32.mrb[39].mxu1  ;;  %v3545_v18 = vunpack.c.l.bf16 %v3566_v20 }
 0x193   : > { %v2768_v57 = vadd.f32 %v2767_v63, %v2695_v29  ;;  %v3798_v30 = vpop.f32.mrb[43].mxu0  ;;  %v3752_v32 = vadd.f32 %v3751_v28, %v3750_v60  ;;  %v2724_v59 = vadd.f32 %v3749_v2, %v2651_v9  ;;  %v2803_v33 = vmax.f32 %v2765_v24, 0.0  ;;  %v3567_v63 = vld [vmem:[%s4192_s22 + $0x18] sm:$0xff]  }
 0x194   : > { %v3546_v60 = vunpack.c.h.bf16 %v3566_v20  ;;  %v2994_v30 = vmul.f32 %v3545_v18, %v4979_v50 }
 0x195   : > { %v2804_v35 = vmax.f32 %v2768_v57, 0.0  ;;  %v2727_v17 = vadd.f32 %v3752_v32, %v2654_v31  ;;  %v4986_v31 = vld [vmem:[%s5100_s2] ss:$0 sm:$0xff] }
 0x196   : > { %v4998_v32 = vld [vmem:[%s5104_s6] ss:$0 sm:$0xff] }
 0x197   : > { %v2813_v15 = vpack.c.bf16 %v2804_v35, %v2803_v33  ;;  %v2995_v33 = vmul.f32 %v3546_v60, %v4979_v50  ;;  %v3549_v35 = vunpack.c.l.bf16 %v3567_v63 }
 0x198   : > { %v2772_v11 = vpop.f32.mrb[44].mxu0 }
 0x199   : > { %v2773_v16 = vadd.f32 %v2772_v11, %v2700_v41  ;;  %v3801_v61 = vpop.f32.mrb[45].mxu0  ;;  %3832 = vmatmul.mubr.bf16.vlgmr.msra.gmra.mrb[40].mxu1 %v2813_v15  ;;  %v3012_v11 = vadd.f32 %v4986_v31, %v2994_v30 }
 0x19a   : > { %v2775_v38 = vpop.f32.mrb[46].mxu0  ;;  %3835 = vmatprep.mubr.msk.bf16.mxu1 %vm4041_vm15, %v4039_v40 }
 0x19b   : > { %v2776_v25 = vadd.f32 %v2775_v38, %v2703_v23  ;;  %v3802_v58 = vpop.f32.mrb[47].mxu0  ;;  %v2805_v39 = vmax.f32 %v2773_v16, 0.0 }
 0x19c   : > { %v3013_v58 = vadd.f32 %v4986_v31, %v2995_v33 }
 0x19d   : > { %v2806_v34 = vmax.f32 %v2776_v25, 0.0 }
 0x19f   : > { %v2814_v29 = vpack.c.bf16 %v2806_v34, %v2805_v39  ;;  %v2996_v39 = vmul.f32 %v3549_v35, %v4979_v50  ;;  %v3550_v34 = vunpack.c.h.bf16 %v3567_v63 }
 0x1a0   : > { %v2780_v12 = vpop.f32.mrb[48].mxu0 }
 0x1a1   : > { %v2781_v10 = vadd.f32 %v2780_v12, %v2708_v52  ;;  %v3805_v43 = vpop.f32.mrb[49].mxu0  ;;  %3836 = vmatmul.mubr.bf16.gmra.mrb[44].mxu1 %v2814_v29 }
 0x1a2   : > { %v2783_v13 = vpop.f32.mrb[50].mxu0  ;;  %3839 = vmatprep.mubr.msk.bf16.mxu1 %vm4041_vm15, %v4039_v40  ;;  %v3037_v43 = vrot.slane %v3012_v11, 3 }
 0x1a3   : > { %v2784_v41 = vadd.f32 %v2783_v13, %v2711_v55  ;;  %v3806_v45 = vpop.f32.mrb[51].mxu0  ;;  %v2807_v46 = vmax.f32 %v2781_v10, 0.0 }
 0x1a4   : > { %v3568_v45 = vld [vmem:[%s4192_s22 + $0x20] sm:$0xff]  }
 0x1a5   : > { %v2808_v19 = vmax.f32 %v2784_v41, 0.0 }
 0x1a7   : > { %v2815_v47 = vpack.c.bf16 %v2808_v19, %v2807_v46  ;;  %v3039_v46 = vrot.slane %v3013_v58, 3  ;;  %v3014_v19 = vadd.f32 %v4986_v31, %v2996_v39 }
 0x1a8   : > { %v2788_v48 = vpop.f32.mrb[52].mxu0 }
 0x1a9   : > { %v2789_v51 = vadd.f32 %v2788_v48, %v2716_v0  ;;  %v3809_v23 = vpop.f32.mrb[53].mxu0  ;;  %3840 = vmatmul.mubr.bf16.gmra.mrb[48].mxu1 %v2815_v47  ;;  %v2962_v0 = vld [vmem:[%s4192_s22 + $0x4] sm:$0xe]  ;;  %v2997_v47 = vmul.f32 %v3550_v34, %v4979_v50 }
 0x1aa   : > { %v2791_v26 = vpop.f32.mrb[54].mxu0  ;;  %3843 = vmatprep.mubr.msk.bf16.mxu1 %vm4041_vm15, %v4039_v40  ;;  %v2973_v8 = vunpack.c.l.bf16 %v2962_v0 }
 0x1ab   : > { %v2792_v52 = vadd.f32 %v2791_v26, %v2719_v22  ;;  %v3810_v53 = vpop.f32.mrb[55].mxu0  ;;  %v2809_v54 = vmax.f32 %v2789_v51, 0.0  ;;  %v5021_v56 = vadd.f32 %v4986_v31, %v2997_v47 }
 0x1ac   : > { %v2991_v9 = vmul.f32 %v4979_v50, %v2973_v8  ;;  %v3553_v53 = vunpack.c.l.bf16 %v3568_v45 }
 0x1ad   : > { %v2810_v62 = vmax.f32 %v2792_v52, 0.0  ;;  %v3043_v63 = vrot.slane %v5021_v56, 3 }
 0x1ae   : > { %v3009_v21 = vadd.f32 %v4986_v31, %v2991_v9 }
 0x1af   : > { %v2816_v3 = vpack.c.bf16 %v2810_v62, %v2809_v54  ;;  %v3554_v54 = vunpack.c.h.bf16 %v3568_v45 }
 0x1b0   : > { %v2796_v36 = vpop.f32.mrb[56].mxu0  ;;  %v3032_v28 = vrot.slane %v3009_v21, 3 }
 0x1b1   : > { %v2797_v55 = vadd.f32 %v2796_v36, %v2724_v59  ;;  %v3813_v4 = vpop.f32.mrb[57].mxu0  ;;  %3844 = vmatmul.mubr.bf16.gmra.mrb[52].mxu1 %v2816_v3  ;;  %v2999_v20 = vmul.f32 %v3554_v54, %v4979_v50 }
 0x1b2   : > { %v2799_v27 = vpop.f32.mrb[58].mxu0  ;;  %3847 = vmatprep.mubr.msk.bf16.mxu1 %vm4041_vm15, %v4039_v40  ;;  %v3565_v40 = vld [vmem:[%s4192_s22 + $0x8] sm:$0xff]  }
 0x1b3   : > { %v2800_v6 = vadd.f32 %v2799_v27, %v2727_v17  ;;  %v3814_v42 = vpop.f32.mrb[59].mxu0  ;;  %v2811_v49 = vmax.f32 %v2797_v55, 0.0  ;;  %v3541_v1 = vunpack.c.l.bf16 %v3565_v40  ;;  %v3542_v22 = vunpack.c.h.bf16 %v3565_v40 }
 0x1b4   : > { %v5039_v58 = vadd.f32 %v4986_v31, %v2999_v20 }
 0x1b5   : > { %v2812_v37 = vmax.f32 %v2800_v6, 0.0  ;;  %v2992_v14 = vmul.f32 %v3541_v1, %v4979_v50  ;;  %v2993_v44 = vmul.f32 %v3542_v22, %v4979_v50  ;;  %v3216_v6 = vld [vmem:[%s4970_s18 + $0x4] sm:$0xe] }
 0x1b7   : > { %v2817_v7 = vpack.c.bf16 %v2812_v37, %v2811_v49  ;;  %v3010_v24 = vadd.f32 %v4986_v31, %v2992_v14  ;;  %v3011_v2 = vadd.f32 %v4986_v31, %v2993_v44  ;;  %v3040_v37 = vsel %vm3031_vm1, %v3037_v43, %v3039_v46 }
 0x1b8   : > { %v2998_v14 = vmul.f32 %v3553_v53, %v4979_v50 }
 0x1b9   : > { %3848 = vmatmul.mubr.bf16.gmra.mrb[56].mxu1 %v2817_v7  ;;  %v3033_v57 = vrot.slane %v3010_v24, 3  ;;  %v3035_v59 = vrot.slane %v3011_v2, 3  ;;  %v3041_v7 = vrot.slane %v3014_v19, 3  ;;  %v2971_v2 = vld [vmem:[%s4192_s22 + $0x28] sm:$0xf] }
 0x1ba   : > { %v2982_v11 = vunpack.c.l.bf16 %v2971_v2 }
 0x1bb   : > { %v3034_v15 = vsel %vm3031_vm1, %v3032_v28, %v3033_v57  ;;  %v3036_v25 = vsel %vm3031_vm1, %v3033_v57, %v3035_v59  ;;  %v3038_v52 = vsel %vm3031_vm1, %v3035_v59, %v3037_v43  ;;  %v3042_v30 = vsel %vm3031_vm1, %v3039_v46, %v3041_v7  ;;  %v2972_v59 = vld [vmem:[%s4192_s22 + $0x2c] sm:$0x1] }
 0x26c   : > { %v2923_v17 = vpop.f32.mrb[40].mxu1 }
 0x26d   : > { %v2924_v16 = vadd.f32 %v4998_v32, %v2923_v17  ;;  %v3833_v61 = vpop.f32.mrb[41].mxu1 }
 0x26e   : > { %v2926_v38 = vpop.f32.mrb[42].mxu1 }
 0x26f   : > { %v3063_v29 = vadd.f32 %v3034_v15, %v2924_v16  ;;  %v2927_v12 = vadd.f32 %v4998_v32, %v2926_v38  ;;  %v3834_v10 = vpop.f32.mrb[43].mxu1  ;;  %v3016_v15 = vadd.f32 %v4986_v31, %v2998_v14 }
 0x270   : > { %v2983_v10 = vunpack.c.l.bf16 %v2972_v59 }
 0x271   : > { %v3480_v13 = vpack.c.bf16 %v3063_v29, %v3063_v29  ;;  %v3064_v41 = vadd.f32 %v3036_v25, %v2927_v12  ;;  %v3044_v12 = vsel %vm3031_vm1, %v3041_v7, %v3043_v63 }
 0x273   : > { %v3104_v48 = vshrl.u32 %v3480_v13, 16  ;;  %v3107_v51 = vshll.u32 %v3480_v13, 16  ;;  %v3481_v23 = vpack.c.bf16 %v3064_v41, %v3064_v41 }
 0x274   : > { %v2931_v26 = vpop.f32.mrb[44].mxu1 }
 0x275   : > { %v3106_v62 = vrot.slane %v3104_v48, 6  ;;  %v3109_v3 = vrot.slane %v3107_v51, 7  ;;  %v3113_v36 = vshrl.u32 %v3481_v23, 16  ;;  %v3116_v55 = vshll.u32 %v3481_v23, 16  ;;  %v3837_v4 = vpop.f32.mrb[45].mxu1 }
 0x276   : > { %v2932_v42 = vadd.f32 %v4998_v32, %v2931_v26  ;;  %v2934_v49 = vpop.f32.mrb[46].mxu1  ;;  %v3045_v51 = vrot.slane %v3016_v15, 3  ;;  %v3000_v23 = vmul.f32 %v4979_v50, %v2982_v11  ;;  %v3001_v4 = vmul.f32 %v4979_v50, %v2983_v10 }
 0x277   : > { %v3110_v0 = vor.u32 %v3109_v3, %v3106_v62  ;;  %v3115_v40 = vrot.slane %v3113_v36, 6  ;;  %v3118_v1 = vrot.slane %v3116_v55, 7  ;;  %v2935_v8 = vadd.f32 %v4998_v32, %v2934_v49  ;;  %v3838_v22 = vpop.f32.mrb[47].mxu1 }
 0x278   : > { %v3065_v9 = vadd.f32 %v3038_v52, %v2932_v42  ;;  %v3047_v62 = vrot.slane %v5039_v58, 3  ;;  %v3046_v7 = vsel %vm3031_vm1, %v3043_v63, %v3045_v51  ;;  %v3018_v56 = vadd.f32 %v4986_v31, %v3000_v23 }
 0x279   : > { %v3111_v44 = vrot.slane %v3110_v0, 4  ;;  %v3217_v21 = vsel %vm5013_vm5, %v3110_v0, %v3216_v6  ;;  %v3119_v24 = vor.u32 %v3118_v1, %v3115_v40  ;;  %v3066_v18 = vadd.f32 %v3040_v37, %v2935_v8 }
 0x27a   : > { %3218 = vst [vmem:[%s4970_s18 + $0x4] sm:$0xe] %v3217_v21  ;;  %v3482_v60 = vpack.c.bf16 %v3065_v9, %v3065_v9  ;;  %v3048_v20 = vsel %vm3031_vm1, %v3045_v51, %v3047_v62 }
 0x27b   : > { %v3120_v28 = vsel %vm4685_vm12, %v3111_v44, %v3119_v24  ;;  %v3483_v57 = vpack.c.bf16 %v3066_v18, %v3066_v18  ;;  %v3121_v47 = vrot.slane %v3119_v24, 4  ;;  %v3019_v44 = vadd.f32 %v4986_v31, %v3001_v4 }
 0x27c   : > { %3219 = vst [vmem:[%s4970_s18 + $0x8] sm:$0xf] %v3120_v28  ;;  %v3123_v33 = vshrl.u32 %v3482_v60, 16  ;;  %v3126_v35 = vshll.u32 %v3482_v60, 16  ;;  %v2939_v17 = vpop.f32.mrb[48].mxu1  ;;  %v3049_v28 = vrot.slane %v3018_v56, 3 }
 0x27d   : > { %v3133_v16 = vshrl.u32 %v3483_v57, 16  ;;  %v3136_v61 = vshll.u32 %v3483_v57, 16  ;;  %v2940_v38 = vadd.f32 %v4998_v32, %v2939_v17  ;;  %v3841_v25 = vpop.f32.mrb[49].mxu1  ;;  %v3051_v17 = vrot.slane %v3019_v44, 3 }
 0x27e   : > { %v3125_v39 = vrot.slane %v3123_v33, 6  ;;  %v3128_v34 = vrot.slane %v3126_v35, 7  ;;  %v2942_v29 = vpop.f32.mrb[50].mxu1 }
 0x27f   : > { %v3135_v13 = vrot.slane %v3133_v16, 6  ;;  %v3138_v41 = vrot.slane %v3136_v61, 7  ;;  %v3067_v45 = vadd.f32 %v3042_v30, %v2940_v38  ;;  %v2943_v46 = vadd.f32 %v4998_v32, %v2942_v29  ;;  %v3842_v19 = vpop.f32.mrb[51].mxu1 }
 0x280   : > { %v3129_v48 = vor.u32 %v3128_v34, %v3125_v39  ;;  %v3050_v38 = vsel %vm3031_vm1, %v3047_v62, %v3049_v28  ;;  %v3052_v43 = vsel %vm3031_vm1, %v3049_v28, %v3051_v17 }
 0x281   : > { %v3235_v26 = vld [vmem:[%s4970_s18 + $0x4] sm:$0x3]  ;;  %v3139_v52 = vor.u32 %v3138_v41, %v3135_v13  ;;  %v3484_v53 = vpack.c.bf16 %v3067_v45, %v3067_v45  ;;  %v3068_v54 = vadd.f32 %v3044_v12, %v2943_v46 }
 0x282   : > { %v3236_v3 = vsel %vm5044_vm6, 0, %v3235_v26  ;;  %v3130_v36 = vsel %vm4685_vm12, %v3121_v47, %v3129_v48  ;;  %v3131_v55 = vrot.slane %v3129_v48, 4 }
 0x283   : > { %3237 = vst [vmem:[%s4970_s18 + $0x4] sm:$0x3] %v3236_v3  ;;  %3220 = vst [vmem:[%s4970_s18 + $0xc] sm:$0xf] %v3130_v36  ;;  %v3143_v27 = vshrl.u32 %v3484_v53, 16  ;;  %v3146_v6 = vshll.u32 %v3484_v53, 16  ;;  %v3485_v42 = vpack.c.bf16 %v3068_v54, %v3068_v54 }
 0x284   : > { %v3140_v49 = vsel %vm4685_vm12, %v3131_v55, %v3139_v52  ;;  %v2947_v37 = vpop.f32.mrb[52].mxu1  ;;  %v3141_v50 = vrot.slane %v3139_v52, 4 }
 0x285   : > { %3221 = vst [vmem:[%s4970_s18 + $0x10] sm:$0xf] %v3140_v49  ;;  %v3145_v0 = vrot.slane %v3143_v27, 6  ;;  %v3148_v40 = vrot.slane %v3146_v6, 7  ;;  %v3153_v1 = vshrl.u32 %v3485_v42, 16  ;;  %v3156_v8 = vshll.u32 %v3485_v42, 16 }
 0x286   : > { %v3845_v22 = vpop.f32.mrb[53].mxu1  ;;  %v2948_v9 = vadd.f32 %v4998_v32, %v2947_v37 }
 0x287   : > { %v2950_v14 = vpop.f32.mrb[54].mxu1  ;;  %v3149_v21 = vor.u32 %v3148_v40, %v3145_v0  ;;  %v3155_v24 = vrot.slane %v3153_v1, 6  ;;  %v3158_v18 = vrot.slane %v3156_v8, 7 }
 0x288   : > { %v2951_v2 = vadd.f32 %v4998_v32, %v2950_v14  ;;  %v3846_v60 = vpop.f32.mrb[55].mxu1  ;;  %v3069_v63 = vadd.f32 %v3046_v7, %v2948_v9  ;;  %v3230_v7 = vld [vmem:[%s4970_s18 + $0x2c] sm:$0x1] }
 0x289   : > { %v3150_v57 = vsel %vm4685_vm12, %v3141_v50, %v3149_v21  ;;  %v3151_v30 = vrot.slane %v3149_v21, 4  ;;  %v3159_v59 = vor.u32 %v3158_v18, %v3155_v24 }
 0x28a   : > { %v3070_v33 = vadd.f32 %v3048_v20, %v2951_v2  ;;  %3222 = vst [vmem:[%s4970_s18 + $0x14] sm:$0xf] %v3150_v57  ;;  %v3486_v35 = vpack.c.bf16 %v3069_v63, %v3069_v63 }
 0x28b   : > { %v3160_v31 = vsel %vm4685_vm12, %v3151_v30, %v3159_v59  ;;  %v3161_v47 = vrot.slane %v3159_v59, 4 }
 0x28c   : > { %v3487_v15 = vpack.c.bf16 %v3070_v33, %v3070_v33  ;;  %3223 = vst [vmem:[%s4970_s18 + $0x18] sm:$0xf] %v3160_v31  ;;  %v3163_v11 = vshrl.u32 %v3486_v35, 16  ;;  %v3166_v16 = vshll.u32 %v3486_v35, 16  ;;  %v2955_v61 = vpop.f32.mrb[56].mxu1 }
 0x28d   : > { %v2956_v39 = vadd.f32 %v4998_v32, %v2955_v61  ;;  %v3849_v34 = vpop.f32.mrb[57].mxu1 }
 0x28e   : > { %v3173_v25 = vshrl.u32 %v3487_v15, 16  ;;  %v3176_v58 = vshll.u32 %v3487_v15, 16  ;;  %v3165_v29 = vrot.slane %v3163_v11, 6  ;;  %v3168_v12 = vrot.slane %v3166_v16, 7  ;;  %v2958_v10 = vpop.f32.mrb[58].mxu1 }
 0x28f   : > { %v3071_v45 = vadd.f32 %v3050_v38, %v2956_v39  ;;  %v2959_v46 = vadd.f32 %v4998_v32, %v2958_v10  ;;  %v3850_v19 = vpop.f32.mrb[59].mxu1 }
 0x290   : > { %v3175_v13 = vrot.slane %v3173_v25, 6  ;;  %v3178_v41 = vrot.slane %v3176_v58, 7  ;;  %v3169_v48 = vor.u32 %v3168_v12, %v3165_v29 }
 0x291   : > { %v3488_v23 = vpack.c.bf16 %v3071_v45, %v3071_v45  ;;  %v3072_v26 = vadd.f32 %v3052_v43, %v2959_v46 }
 0x292   : > { %v3179_v51 = vor.u32 %v3178_v41, %v3175_v13  ;;  %v3170_v52 = vsel %vm4685_vm12, %v3161_v47, %v3169_v48  ;;  %v3171_v53 = vrot.slane %v3169_v48, 4 }
 0x293   : > { %3224 = vst [vmem:[%s4970_s18 + $0x1c] sm:$0xf] %v3170_v52  ;;  %v3183_v54 = vshrl.u32 %v3488_v23, 16  ;;  %v3186_v62 = vshll.u32 %v3488_v23, 16  ;;  %v3489_v3 = vpack.c.bf16 %v3072_v26, %v3072_v26 }
 0x294   : > { %v3180_v36 = vsel %vm4685_vm12, %v3171_v53, %v3179_v51  ;;  %v3181_v6 = vrot.slane %v3179_v51, 4 }
 0x295   : > { %3225 = vst [vmem:[%s4970_s18 + $0x20] sm:$0xf] %v3180_v36  ;;  %v3185_v32 = vrot.slane %v3183_v54, 6  ;;  %v3188_v55 = vrot.slane %v3186_v62, 7  ;;  %v3193_v4 = vshrl.u32 %v3489_v3, 16  ;;  %v3196_v27 = vshll.u32 %v3489_v3, 16 }
 0x297   : > { %v3189_v42 = vor.u32 %v3188_v55, %v3185_v32  ;;  %v3195_v49 = vrot.slane %v3193_v4, 6  ;;  %v3198_v37 = vrot.slane %v3196_v27, 7 }
 0x299   : > { %v3190_v56 = vsel %vm4685_vm12, %v3181_v6, %v3189_v42  ;;  %v3191_v0 = vrot.slane %v3189_v42, 4  ;;  %v3199_v40 = vor.u32 %v3198_v37, %v3195_v49  ;;  %v3201_v1 = vrot.slane %v3195_v49, 4 }
 0x29a   : > { %3226 = vst [vmem:[%s4970_s18 + $0x24] sm:$0xf] %v3190_v56 }
 0x29b   : > { %v3200_v8 = vsel %vm4685_vm12, %v3191_v0, %v3199_v40  ;;  %v3231_v22 = vsel %vm3229_vm8, %v3201_v1, %v3230_v7 }
 0x29c   : > { %3227 = vst [vmem:[%s4970_s18 + $0x28] sm:$0xf] %v3200_v8  ;;  %3232 = vst [vmem:[%s4970_s18 + $0x2c] sm:$0x1] %v3231_v22 }
 0x2a3   : > { %v3241_v50 = vld [vmem:[%s4970_s18 + $0x2c] sm:$0xf] }
 0x2a4   : > { %v3242_v9 = vsel %vm3240_vm10, 0, %v3241_v50 }
 0x2a5   : > { %3243 = vst [vmem:[%s4970_s18 + $0x2c] sm:$0xf] %v3242_v9 }
 0x2a6 PF: > { %s17_s24 = sadd.s32 1, %s4037_s24  }
 0x2a7   : > { %p14_p4 = scmp.ge.s32.totalorder %s17_s24, 4  }
 0x2a9   :  { %16 = sbr.rel (!%p14_p4) target bundleno = 1 (0x1), region = 78 }

// kernel: vqvae_decoder.6
= control target key start
LH: loop header
LB: loop body
LE: loop exit
PB: predicated region body
PF: predicated region fallthrough
CT: control target
= control target key end

     0   :  { %s6172_s15 = smov 0   ;;  %s7882_s0 = inlined_call_operand.vmem [shape: bf16[2,100,128], index: 0, kind: input, shape index: {}]   ;;  %s7883_s1 = inlined_call_operand.vmem [shape: bf16[4,512,128], index: 1, kind: input, shape index: {}]   ;;  %s7884_s2 = inlined_call_operand.vmem [shape: f32[1,128], index: 2, kind: input, shape index: {}]   ;;  %s7885_s3 = inlined_call_operand.vmem [shape: bf16[2,4,80,128], index: 3, kind: output, shape index: {0}]   ;;  %s7886_s4 = inlined_call_operand.vmem [shape: f32[2,2,128], index: 4, kind: output, shape index: {1}]  }
   0x1 LB: > { %s4875_s16 = sadd.s32 4294967295, %s6143_s15   ;;  %p4879_p0 = scmp.ge.s32.totalorder %s6143_s15, 1  ;;  %s6143_s15 = sphi %s6172_s15, %s15_s15  }
   0x2   : > { %p165_p1 = scmp.lt.s32.totalorder %s6143_s15, 3 }
   0x4   : > { %p166_p2 = pnand %p4879_p0, %p165_p1 }
   0x5   : > { %v5908_v0 = vld [vmem:[%s7883_s1 + $0x40] sm:$0xff] (!%p166_p2)   ;;  %p195_p3 = scmp.lt.s32.totalorder (!%p166_p2), %s4875_s16, 1  ;;  %v5912_v4 = vld [vmem:[%s7883_s1 + $0x48] sm:$0xff] (!%p166_p2)   ;;  %v5916_v8 = vld [vmem:[%s7883_s1 + $0x50] sm:$0xff] (!%p166_p2)   ;;  %v6145_v13 = vmov (!%p166_p2), 0   ;;  %v223_v22 = vlaneseq (!%p166_p2)  ;;  %vm6146_vm0 = vmmov (!%p166_p2), 1  }
   0x6   : > { %169 = sbr.rel (%p166_p2) target bundleno = 602 (0x25a), region = 32  ;;  %v5909_v1 = vld [vmem:[%s7883_s1] sm:$0xff] (!%p166_p2)   ;;  %5504 = vmatprep.subr.bf16.mxu0 (!%p166_p2), %v5908_v0  ;;  %v5913_v5 = vld [vmem:[%s7883_s1 + $0x8] sm:$0xff] (!%p166_p2)   ;;  %v5917_v9 = vld [vmem:[%s7883_s1 + $0x10] sm:$0xff] (!%p166_p2)  }
   0x7   : > { %v5910_v2 = vld [vmem:[%s7883_s1 + $0xc0] sm:$0xff] (!%p166_p2)   ;;  %5505 = vmatpush3.bf16.msra.mxu0 (!%p166_p2), %v5909_v1  ;;  %v5914_v6 = vld [vmem:[%s7883_s1 + $0xc8] sm:$0xff] (!%p166_p2)   ;;  %v5918_v10 = vld [vmem:[%s7883_s1 + $0xd0] sm:$0xff] (!%p166_p2)   ;;  %v6267_v27 = vshrl.u32 (!%p166_p2), %v223_v22, 7 }
   0x8   : > { %v5911_v3 = vld [vmem:[%s7883_s1 + $0x80] sm:$0xff] (!%p166_p2)   ;;  %5550 = vmatprep.subr.bf16.mxu1 (!%p166_p2), %v5910_v2  ;;  %5506 = vmatprep.subr.bf16.mxu0 (!%p166_p2), %v5912_v4  ;;  %v5915_v7 = vld [vmem:[%s7883_s1 + $0x88] sm:$0xff] (!%p166_p2)   ;;  %v5919_v11 = vld [vmem:[%s7883_s1 + $0x90] sm:$0xff] (!%p166_p2)  }
   0x9   : > { %5551 = vmatpush3.bf16.msra.mxu1 (!%p166_p2), %v5911_v3  ;;  %v5920_v12 = vld [vmem:[%s7883_s1 + $0x58] sm:$0xff] (!%p166_p2)   ;;  %v5924_v17 = vld [vmem:[%s7883_s1 + $0x60] sm:$0xff] (!%p166_p2)   ;;  %v5928_v21 = vld [vmem:[%s7883_s1 + $0x68] sm:$0xff] (!%p166_p2)   ;;  %v6283_v32 = vadd.s32 (!%p166_p2), 8, %v6267_v27  ;;  %v226_v34 = vadd.s32 (!%p166_p2), 16, %v6267_v27  ;;  %v227_v37 = vadd.s32 (!%p166_p2), 24, %v6267_v27 }
   0xa   : > { %5552 = vmatprep.subr.bf16.mxu1 (!%p166_p2), %v5914_v6  ;;  %v5921_v14 = vld [vmem:[%s7883_s1 + $0x18] sm:$0xff] (!%p166_p2)   ;;  %v5925_v18 = vld [vmem:[%s7883_s1 + $0x20] sm:$0xff] (!%p166_p2)   ;;  %v5929_v23 = vld [vmem:[%s7883_s1 + $0x28] sm:$0xff] (!%p166_p2)   ;;  %v6303_v39 = vadd.s32 (!%p166_p2), 32, %v6267_v27 }
   0xb   : > { %5507 = vmatpush3.bf16.msra.mxu0 (!%p166_p2), %v5913_v5  ;;  %v5922_v15 = vld [vmem:[%s7883_s1 + $0xd8] sm:$0xff] (!%p166_p2)   ;;  %v5926_v19 = vld [vmem:[%s7883_s1 + $0xe0] sm:$0xff] (!%p166_p2)   ;;  %v5930_v24 = vld [vmem:[%s7883_s1 + $0xe8] sm:$0xff] (!%p166_p2)   ;;  %v6306_v40 = vmul.u32.u64.low (!%p166_p2), 3435973837, %v6283_v32  ;;  %v6307_v41 = vmul.u32.u64.high 3435973837, %v6283_v32, %v6306_v40  ;;  %vm485_vm2 = vcmp.lt.s32.totalorder (!%p166_p2), %v6283_v32, 10 }
   0xc   : > { %5508 = vmatprep.subr.bf16.mxu0 (!%p166_p2), %v5916_v8  ;;  %v5923_v16 = vld [vmem:[%s7883_s1 + $0x98] sm:$0xff] (!%p166_p2)   ;;  %v5927_v20 = vld [vmem:[%s7883_s1 + $0xa0] sm:$0xff] (!%p166_p2)   ;;  %v5931_v25 = vld [vmem:[%s7883_s1 + $0xa8] sm:$0xff] (!%p166_p2)   ;;  %v6309_v42 = vmul.u32.u64.low (!%p166_p2), 3435973837, %v226_v34  ;;  %v6310_v43 = vmul.u32.u64.high 3435973837, %v226_v34, %v6309_v42 }
   0xd   : > { %s7918_s16 = smov (!%p195_p3, %s4875_s16), 1  ;;  %5553 = vmatpush3.bf16.msra.mxu1 %v5915_v7  ;;  %v5932_v26 = vld [vmem:[%s7883_s1 + $0x70] sm:$0xff]   ;;  %v5936_v31 = vld [vmem:[%s7883_s1 + $0x78] sm:$0xff]   ;;  %vm6312_vm1 = vmpackc.low %vm6146_vm0, %vm6146_vm0  ;;  %v6321_v47 = vmul.u32.u64.low 3435973837, %v227_v37  ;;  %v6322_v48 = vmul.u32.u64.high 3435973837, %v227_v37, %v6321_v47  ;;  %v254_v51 = vshrl.u32 %v6307_v41, 3 }
   0xe   : > { %s5873_s7 = smul.u32 160, %s7918_s16  ;;  %5554 = vmatprep.subr.bf16.mxu1 %v5918_v10  ;;  %v5933_v28 = vld [vmem:[%s7883_s1 + $0x30] sm:$0xff]   ;;  %v5937_v33 = vld [vmem:[%s7883_s1 + $0x38] sm:$0xff]   ;;  %v5944_v46 = vld [vmem:[%s7883_s1 + $0x140] sm:$0xff]   ;;  %v6325_v49 = vmul.u32.u64.low 3435973837, %v6303_v39  ;;  %v6326_v50 = vmul.u32.u64.high 3435973837, %v6303_v39, %v6325_v49 }
   0xf   : > { %5509 = vmatpush3.bf16.msra.mxu0 %v5917_v9  ;;  %s5872_s26 = smul.u32 52, %s7918_s16  ;;  %v5934_v29 = vld [vmem:[%s7883_s1 + $0xf0] sm:$0xff]   ;;  %v5938_v35 = vld [vmem:[%s7883_s1 + $0xf8] sm:$0xff]   ;;  %v265_v52 = vshrl.u32 %v6310_v43, 3  ;;  %v255_v53 = vmul.u32 10, %v254_v51  ;;  %v276_v55 = vshrl.u32 %v6322_v48, 3 }
  0x10   : > { %s6222_s20 = scalar_lea.vmem %s7885_s3, %s5873_s7  ;;  %5510 = vmatprep.subr.bf16.mxu0 %v5920_v12  ;;  %v5935_v30 = vld [vmem:[%s7883_s1 + $0xb0] sm:$0xff]   ;;  %v5939_v36 = vld [vmem:[%s7883_s1 + $0xb8] sm:$0xff]   ;;  %v5946_v56 = vld [vmem:[%s7883_s1 + $0x1c0] sm:$0xff]   ;;  %v287_v6 = vshrl.u32 %v6326_v50, 3  ;;  %v6342_v9 = vadd.s32 40, %v6267_v27  ;;  %v6345_v10 = vadd.s32 48, %v6267_v27 }
  0x11   : > { %1552 = vst [vmem:[%s6222_s20 + $0x24] sm:$0x8] %v6145_v13  ;;  %5086 = vst [vmem:[%s6222_s20 + $0x4c] sm:$0x8] %v6145_v13  ;;  %5555 = vmatpush3.bf16.msra.mxu1 %v5919_v11  ;;  %s6291_s11 = scalar_lea.vmem %s7882_s0, %s5872_s26  ;;  %v266_v54 = vmul.u32 10, %v265_v52  ;;  %v256_v57 = vsub.s32 %v6283_v32, %v255_v53  ;;  %v277_v59 = vmul.u32 10, %v276_v55 }
  0x12   : > { %5226 = vst [vmem:[%s6222_s20 + $0x74] sm:$0x8] %v6145_v13  ;;  %5366 = vst [vmem:[%s6222_s20 + $0x9c] sm:$0x8] %v6145_v13  ;;  %5556 = vmatprep.subr.bf16.mxu1 %v5922_v15  ;;  %v210_v38 = vld [vmem:[%s6291_s11] sm:$0xf] }
  0x13   : > { %5511 = vmatpush3.bf16.msra.mxu0 %v5921_v14  ;;  %v575_v45 = vsel %vm6312_vm1, 0, %v210_v38  ;;  %v267_v58 = vsub.s32 %v226_v34, %v266_v54  ;;  %vm381_vm3 = vcmp.ne.s32.totalorder %v256_v57, 0  ;;  %vm394_vm5 = vcmp.lt.s32.totalorder %v256_v57, 0  ;;  %v211_v11 = vld [vmem:[%s6291_s11 + $0x4] sm:$0xf]  ;;  %s4882_s13 = sshll.u32 %s7918_s16, 1 }
  0x14   : > { %5512 = vmatprep.subr.bf16.mxu0 %v5924_v17  ;;  %588 = vst [vmem:[#allocation2] sm:$0xf] %v575_v45  ;;  %vm407_vm7 = vmand %vm394_vm5, %vm381_vm3  ;;  %v420_v63 = vadd.s32 10, %v256_v57  ;;  %v278_v5 = vsub.s32 %v227_v37, %v277_v59  ;;  %v212_v12 = vld [vmem:[%s6291_s11 + $0x8] sm:$0xf] }
  0x15   : > { %5557 = vmatpush3.bf16.msra.mxu1 %v5923_v16  ;;  %vm382_vm4 = vcmp.ne.s32.totalorder %v267_v58, 0  ;;  %vm395_vm6 = vcmp.lt.s32.totalorder %v267_v58, 0  ;;  %v421_v0 = vadd.s32 10, %v267_v58 }
  0x16   : > { %5558 = vmatprep.subr.bf16.mxu1 %v5926_v19  ;;  %vm408_vm8 = vmand %vm395_vm6, %vm382_vm4  ;;  %v6337_v7 = vsel %vm407_vm7, %v420_v63, %v256_v57  ;;  %vm383_vm15 = vcmp.ne.s32.totalorder %v278_v5, 0  ;;  %vm396_vm3 = vcmp.lt.s32.totalorder %v278_v5, 0  ;;  %v422_v19 = vadd.s32 10, %v278_v5 }
  0x17   : > { %5513 = vmatpush3.bf16.msra.mxu0 %v5925_v18  ;;  %v6339_v8 = vsel %vm408_vm8, %v421_v0, %v267_v58  ;;  %vm446_vm9 = vcmp.eq.s32.totalorder %v6337_v7, 0  ;;  %vm459_vm11 = vcmp.eq.s32.totalorder %v6337_v7, 9  ;;  %v288_v18 = vmul.u32 10, %v287_v6 }
  0x18   : > { %5514 = vmatprep.subr.bf16.mxu0 %v5928_v21  ;;  %vm447_vm10 = vcmp.eq.s32.totalorder %v6339_v8, 0  ;;  %vm460_vm12 = vcmp.eq.s32.totalorder %v6339_v8, 9  ;;  %vm472_vm13 = vmor %vm446_vm9, %vm459_vm11  ;;  %vm642_vm11 = vsmask.f32 7440 }
  0x19   : > { %5559 = vmatpush3.bf16.msra.mxu1 %v5927_v20  ;;  %vm6353_vm14 = vmor %vm447_vm10, %vm460_vm12  ;;  %v6360_v20 = vmul.u32.u64.low 3435973837, %v6342_v9  ;;  %v6361_v21 = vmul.u32.u64.high 3435973837, %v6342_v9, %v6360_v20  ;;  %v289_v22 = vsub.s32 %v6303_v39, %v288_v18  ;;  %vm641_vm10 = vsmask.f32 3328 }
  0x1a   : > { %5560 = vmatprep.subr.bf16.mxu1 %v5930_v24  ;;  %vm498_vm0 = vmor %vm472_vm13, %vm485_vm2  ;;  %vm783_vm13 = vcmask 1042432   ;;  %v6388_v39 = vadd.s32 72, %v6267_v27 }
  0x1b   : > { %5515 = vmatpush3.bf16.msra.mxu0 %v5929_v23  ;;  %v611_v60 = vld [vmem:[#allocation2] sm:$0xf]  ;;  %vm563_vm4 = vmpackc.low %vm498_vm0, %vm498_vm0  ;;  %v6365_v23 = vmul.u32.u64.low 3435973837, %v6345_v10  ;;  %v6366_v24 = vmul.u32.u64.high 3435973837, %v6345_v10, %v6365_v23  ;;  %v298_v34 = vshrl.u32 %v6361_v21, 3  ;;  %vm384_vm8 = vcmp.ne.s32.totalorder %v289_v22, 0 }
  0x1c   : > { %5516 = vmatprep.subr.bf16.mxu0 %v5932_v26  ;;  %v631_v61 = vld [vmem:[#allocation2] sm:$0xf]  ;;  %621 = vst [vmem:[#allocation3] sm:$0xf] %v611_v60  ;;  %vm564_vm5 = vmpackc.low %vm6353_vm14, %vm6353_vm14  ;;  %vm397_vm9 = vcmp.lt.s32.totalorder %v289_v22, 0  ;;  %vm784_vm14 = vcmask 1046532  }
  0x1d   : > { %5561 = vmatpush3.bf16.msra.mxu1 %v5931_v25  ;;  %v1628_v62 = vld [vmem:[#allocation2] sm:$0xf]  ;;  %v645_v1 = vshrl.u32 %v631_v61, 16  ;;  %v648_v2 = vshll.u32 %v631_v61, 16  ;;  %v576_v25 = vsel %vm563_vm4, 0, %v211_v11  ;;  %v577_v26 = vsel %vm564_vm5, 0, %v212_v12  ;;  %vm409_vm2 = vmand %vm396_vm3, %vm383_vm15 }
  0x1e   : > { %5562 = vmatprep.subr.bf16.mxu1 %v5934_v29  ;;  %v1639_v3 = vshrl.u32 %v1628_v62, 16  ;;  %v1642_v4 = vshll.u32 %v1628_v62, 16  ;;  %589 = vst [vmem:[#allocation2 + $0x4] sm:$0xf] %v576_v25  ;;  %v6371_v29 = vld [vmem:[#allocation2] sm:$0xe]  ;;  %vm410_vm0 = vmand %vm397_vm9, %vm384_vm8 }
  0x1f   : > { %5517 = vmatpush3.bf16.msra.mxu0 %v5933_v28  ;;  %v647_v13 = vrot.slane %v645_v1, 4  ;;  %v650_v14 = vrot.slane %v648_v2, 5  ;;  %590 = vst [vmem:[#allocation2 + $0x8] sm:$0xf] %v577_v26  ;;  %v4947_v37 = vrot.slane %v6371_v29, 9  ;;  %v423_v38 = vadd.s32 10, %v289_v22  ;;  %vm6407_vm3 = vmor %vm641_vm10, %vm642_vm11 }
  0x20   : > { %5518 = vmatprep.subr.bf16.mxu0 %v5936_v31  ;;  %v1641_v16 = vrot.slane %v1639_v3, 4  ;;  %v1644_v17 = vrot.slane %v1642_v4, 5  ;;  %v6376_v31 = vadd.s32 56, %v6267_v27  ;;  %v299_v42 = vmul.u32 10, %v298_v34 }
  0x21   : > { %5563 = vmatpush3.bf16.msra.mxu1 %v5935_v30  ;;  %v651_v28 = vor.u32 %v650_v14, %v647_v13  ;;  %v213_v30 = vld [vmem:[%s6291_s11 + $0xc] sm:$0xf]  ;;  %v309_v43 = vshrl.u32 %v6366_v24, 3  ;;  %vm1983_vm8 = vcmask 1041408   ;;  %vm1984_vm9 = vcmask 1045508  }
  0x22   : > { %5564 = vmatprep.subr.bf16.mxu1 %v5938_v35  ;;  %v1645_v32 = vor.u32 %v1644_v17, %v1641_v16  ;;  %v6382_v35 = vadd.s32 64, %v6267_v27  ;;  %v6429_v26 = vsub.s32 %v6342_v9, %v299_v42 }
  0x23   : > { %5519 = vmatpush3.bf16.msra.mxu0 %v5937_v33  ;;  %v6378_v33 = vsel %vm409_vm2, %v422_v19, %v278_v5  ;;  %vm846_vm2 = vsmask.f32 2304  ;;  %v6421_v16 = vmul.u32 10, %v309_v43 }
  0x24   : > { %5596 = vmatprep.subr.bf16.mxu0 %v5944_v46  ;;  %vm448_vm6 = vcmp.eq.s32.totalorder %v6378_v33, 0  ;;  %vm461_vm7 = vcmp.eq.s32.totalorder %v6378_v33, 9  ;;  %v6390_v40 = vrot.slane %v1645_v32, 4 }
  0x25   : > { %5565 = vmatpush3.bf16.msra.mxu1 %v5939_v36  ;;  %vm474_vm12 = vmor %vm448_vm6, %vm461_vm7  ;;  %v652_v36 = vrot.slane %v651_v28, 4  ;;  %v6394_v45 = vmul.u32.u64.low 3435973837, %v6376_v31  ;;  %v6395_v46 = vmul.u32.u64.high 3435973837, %v6376_v31, %v6394_v45  ;;  %v612_v49 = vld [vmem:[#allocation2 + $0x4] sm:$0xf] }
  0x26   : > { %5642 = vmatprep.subr.bf16.mxu1 %v5946_v56  ;;  %vm565_vm15 = vmpackc.low %vm474_vm12, %vm474_vm12  ;;  %v6399_v47 = vmul.u32.u64.low 3435973837, %v6382_v35  ;;  %v6400_v48 = vmul.u32.u64.high 3435973837, %v6382_v35, %v6399_v47  ;;  %v632_v50 = vld [vmem:[#allocation2 + $0x4] sm:$0xf]  ;;  %622 = vst [vmem:[#allocation3 + $0x10] sm:$0xf] %v612_v49  ;;  %v6403_v56 = vsel %vm410_vm0, %v423_v38, %v289_v22 }
  0x27   : > { %v578_v41 = vsel %vm565_vm15, 0, %v213_v30  ;;  %v1629_v51 = vld [vmem:[#allocation2 + $0x4] sm:$0xf]  ;;  %v633_v52 = vld [vmem:[#allocation2 + $0x8] sm:$0xf]  ;;  %v654_v53 = vshll.u32 %v632_v50, 16  ;;  %vm6433_vm7 = vmor %vm783_vm13, %vm784_vm14 }
  0x28   : > { %591 = vst [vmem:[#allocation2 + $0xc] sm:$0xf] %v578_v41  ;;  %v658_v54 = vshrl.u32 %v632_v50, 16  ;;  %v1630_v55 = vld [vmem:[#allocation2 + $0x8] sm:$0xf]  ;;  %v664_v58 = vshll.u32 %v633_v52, 16  ;;  %vm6511_vm13 = vmor %vm1983_vm8, %vm1984_vm9 }
  0x29   : > { %v668_v59 = vshrl.u32 %v633_v52, 16  ;;  %v1648_v60 = vshll.u32 %v1629_v51, 16  ;;  %v1652_v61 = vshrl.u32 %v1629_v51, 16  ;;  %v656_v62 = vrot.slane %v654_v53, 5  ;;  %v1758_v2 = vld [vmem:[#allocation2 + $0x4] sm:$0xf] }
  0x2a   : > { %v660_v63 = vrot.slane %v658_v54, 4  ;;  %v1658_v0 = vshll.u32 %v1630_v55, 16  ;;  %v1662_v1 = vshrl.u32 %v1630_v55, 16  ;;  %v666_v3 = vrot.slane %v664_v58, 5  ;;  %v763_v11 = vld [vmem:[#allocation2 + $0x4] sm:$0xe] }
  0x2b   : > { %v670_v4 = vrot.slane %v668_v59, 4  ;;  %v6411_v5 = vrot.slane %v1648_v60, 5  ;;  %v1654_v6 = vrot.slane %v1652_v61, 4  ;;  %vm449_vm4 = vcmp.eq.s32.totalorder %v6403_v56, 0  ;;  %v6419_v15 = vld [vmem:[#allocation2 + $0x8] sm:$0xf] }
  0x2c   : > { %vm462_vm5 = vcmp.eq.s32.totalorder %v6403_v56, 9  ;;  %v657_v12 = vsel %vm6407_vm3, %v652_v36, %v656_v62  ;;  %v661_v13 = vor.u32 %v660_v63, %v656_v62  ;;  %v6417_v14 = vrot.slane %v1662_v1, 4  ;;  %v764_v21 = vld [vmem:[#allocation2 + $0x8] sm:$0xf]  ;;  %v835_v25 = vld [vmem:[#allocation2 + $0x4] sm:$0xe] }
  0x2d   : > { %vm847_vm6 = vsmask.f32 6416  ;;  %v671_v17 = vor.u32 %v670_v4, %v666_v3  ;;  %753 = vst [vmem:[#allocation3 + $0x4] sm:$0xf] %v657_v12  ;;  %v1655_v18 = vor.u32 %v1654_v6, %v6411_v5  ;;  %v6424_v19 = vrot.slane %v1658_v0, 5  ;;  %vm6475_vm10 = vmor %vm449_vm4, %vm462_vm5 }
  0x2e   : > { %v1779_v20 = vrot.slane %v1758_v2, 5  ;;  %v662_v22 = vrot.slane %v661_v13, 4  ;;  %v4883_v24 = vrot.slane %v763_v11, 9  ;;  %v1651_v30 = vsel %vm6407_vm3, %v6390_v40, %v6411_v5  ;;  %v836_v38 = vld [vmem:[#allocation2 + $0x8] sm:$0xf]  ;;  %vm6481_vm11 = vmor %vm846_vm2, %vm847_vm6 }
  0x2f   : > { %v6426_v23 = vld [vmem:[#allocation2 + $0xc] sm:$0xf]  ;;  %v6441_v32 = vrot.slane %v1655_v18, 4  ;;  %v1782_v36 = vrot.slane %v6419_v15, 5  ;;  %v6446_v41 = vrot.slane %v671_v17, 4  ;;  %v1665_v42 = vor.u32 %v6417_v14, %v6424_v19  ;;  %vm566_vm12 = vmpackc.low %vm6475_vm10, %vm6475_vm10  ;;  %v5945_v14 = vld [vmem:[%s7883_s1 + $0x100] sm:$0xff]  }
  0x30   : > { %v1781_v34 = vrot.slane %v1779_v20, 4  ;;  %v667_v9 = vsel %vm6407_vm3, %v662_v22, %v666_v3  ;;  %v788_v43 = vrot.slane %v764_v21, 5  ;;  %v837_v45 = vld [vmem:[#allocation2 + $0xc] sm:$0xf]  ;;  %v1780_v47 = vsel %vm6433_vm7, %v4947_v37, %v1779_v20  ;;  %v1826_v51 = vld [vmem:[#allocation2 + $0x4] sm:$0xe] }
  0x31   : > { %754 = vst [vmem:[#allocation3 + $0x14] sm:$0xf] %v667_v9  ;;  %v1661_v40 = vsel %vm6407_vm3, %v6441_v32, %v6424_v19  ;;  %v791_v49 = vrot.slane %v6426_v23, 5  ;;  %v850_v50 = vshrl.u32 %v835_v25, 16  ;;  %v853_v54 = vshll.u32 %v835_v25, 16 }
  0x32   : > { %v789_v52 = vsel %vm6433_vm7, %v4883_v24, %v788_v43  ;;  %v790_v53 = vrot.slane %v788_v43, 4  ;;  %v859_v55 = vshrl.u32 %v836_v38, 16  ;;  %v1827_v58 = vld [vmem:[#allocation2 + $0x8] sm:$0xf]  ;;  %v1783_v29 = vsel %vm6433_vm7, %v1781_v34, %v1782_v36  ;;  %v1828_v61 = vld [vmem:[#allocation2 + $0xc] sm:$0xf] }
  0x33   : > { %825 = vst [vmem:[#allocation3 + $0x8] sm:$0xf] %v789_v52  ;;  %v852_v37 = vrot.slane %v850_v50, 5  ;;  %v862_v59 = vshll.u32 %v836_v38, 16  ;;  %v869_v60 = vshrl.u32 %v837_v45, 16  ;;  %v855_v63 = vrot.slane %v853_v54, 6 }
  0x34   : > { %v792_v62 = vsel %vm6433_vm7, %v790_v53, %v791_v49  ;;  %v861_v0 = vrot.slane %v859_v55, 5  ;;  %v872_v1 = vshll.u32 %v837_v45, 16  ;;  %v613_v2 = vld [vmem:[#allocation2 + $0x8] sm:$0xf]  ;;  %v1838_v5 = vshrl.u32 %v1826_v51, 16  ;;  %v973_v45 = vld [vmem:[#allocation3] sm:$0xff] }
  0x35   : > { %826 = vst [vmem:[#allocation3 + $0x18] sm:$0xf] %v792_v62  ;;  %v864_v3 = vrot.slane %v862_v59, 6  ;;  %v871_v4 = vrot.slane %v869_v60, 5  ;;  %v1841_v6 = vshll.u32 %v1826_v51, 16  ;;  %v856_v13 = vor.u32 %v855_v63, %v852_v37 }
  0x36   : > { %v6469_v11 = vld [vmem:[#allocation2 + $0x4] sm:$0xc]  ;;  %v614_v12 = vld [vmem:[#allocation2 + $0xc] sm:$0xf]  ;;  %623 = vst [vmem:[#allocation3 + $0x20] sm:$0xf] %v613_v2 }
  0x37   : > { %v874_v17 = vrot.slane %v872_v1, 6  ;;  %v1847_v18 = vshrl.u32 %v1827_v58, 16  ;;  %v1850_v20 = vshll.u32 %v1827_v58, 16  ;;  %v1962_v21 = vld [vmem:[#allocation2 + $0x8] sm:$0xf]  ;;  %v865_v25 = vor.u32 %v864_v3, %v861_v0 }
  0x38   : > { %624 = vst [vmem:[#allocation3 + $0x30] sm:$0xf] %v614_v12  ;;  %v1840_v32 = vrot.slane %v1838_v5, 5  ;;  %v1843_v34 = vrot.slane %v1841_v6, 6  ;;  %v1857_v38 = vshrl.u32 %v1828_v61, 16  ;;  %v857_v51 = vrot.slane %v856_v13, 4 }
  0x39   : > { %v6485_v9 = vld [vmem:[#allocation2 + $0xc] sm:$0xf]  ;;  %v214_v43 = vld [vmem:[%s6291_s11 + $0x10] sm:$0xf]  ;;  %v5940_v50 = vld [vmem:[#allocation3 + $0x4] ss:$16 sps:$4 sm:$0xff]   ;;  %v6488_v52 = vor.u32 %v874_v17, %v871_v4 }
  0x3a   : > { %v1849_v53 = vrot.slane %v1847_v18, 5  ;;  %v1852_v54 = vrot.slane %v1850_v20, 6  ;;  %v975_v55 = vld [vmem:[#allocation3 + $0x10] sm:$0xff]  ;;  %1747 = vst [vmem:[#allocation3] sm:$0xf] %v1651_v30  ;;  %v867_v58 = vrot.slane %v865_v25, 4  ;;  %v1844_v37 = vor.u32 %v1843_v34, %v1840_v32  ;;  %1388 = vmatprep.mubr.bf16.mxu0 %v5940_v50 }
  0x3b   : > { %1748 = vst [vmem:[#allocation3 + $0x10] sm:$0xf] %v1661_v40  ;;  %1816 = vst [vmem:[#allocation3 + $0x4] sm:$0xf] %v1780_v47  ;;  %v1859_v59 = vrot.slane %v1857_v38, 5  ;;  %v1860_v60 = vshll.u32 %v1828_v61, 16  ;;  %v866_v30 = vsel %vm6481_vm11, %v857_v51, %v865_v25  ;;  %v4885_v5 = vcombine.low %v973_v45, %v975_v55 }
  0x3c   : > { %1817 = vst [vmem:[#allocation3 + $0x14] sm:$0xf] %v1783_v29  ;;  %v634_v62 = vld [vmem:[#allocation2 + $0xc] sm:$0xf]  ;;  %v6496_v0 = vrot.slane %v1665_v42, 4  ;;  %v1853_v40 = vor.u32 %v1852_v54, %v1849_v53  ;;  %v4948_v47 = vrot.slane %v6469_v11, 10  ;;  %v876_v29 = vsel %vm6481_vm11, %v867_v58, %v6488_v52 }
  0x3d   : > { %v1631_v63 = vld [vmem:[#allocation2 + $0xc] sm:$0xf]  ;;  %963 = vst [vmem:[#allocation3 + $0xc] sm:$0xf] %v866_v30  ;;  %v1845_v61 = vrot.slane %v1844_v37, 4  ;;  %v1862_v1 = vrot.slane %v1860_v60, 6  ;;  %v6532_v18 = vsub.s32 %v6345_v10, %v6421_v16  ;;  %1389 = vmatmul.mubr.bf16.vlgmr.msra.gmra.mrb[0].mxu0 %v4885_v5 }
  0x3e   : > { %v1988_v2 = vrot.slane %v1962_v21, 6  ;;  %v6507_v19 = vld [vmem:[#allocation2 + $0xc] sm:$0xf]  ;;  %964 = vst [vmem:[#allocation3 + $0x1c] sm:$0xf] %v876_v29  ;;  %v1855_v42 = vrot.slane %v1853_v40, 4  ;;  %5597 = vmatpush3.bf16.msra.mxu0 %v5945_v14 }
  0x3f   : > { %v1991_v4 = vrot.slane %v6485_v9, 6  ;;  %v5948_v6 = vld [vmem:[%s7883_s1 + $0x148] sm:$0xff]   ;;  %v579_v11 = vsel %vm566_vm12, 0, %v214_v43  ;;  %v6526_v12 = vrot.slane %v1782_v36, 4  ;;  %v6528_v13 = vor.u32 %v1862_v1, %v1859_v59  ;;  %v5956_v34 = vld [vmem:[%s7883_s1 + $0x150] sm:$0xff]   ;;  %v5947_v50 = vld [vmem:[%s7883_s1 + $0x180] sm:$0xff]  }
  0x40   : > { %v1990_v17 = vrot.slane %v1988_v2, 4  ;;  %592 = vst [vmem:[#allocation2 + $0x10] sm:$0xf] %v579_v11  ;;  %v1854_v20 = vsel %vm6481_vm11, %v1845_v61, %v1853_v40  ;;  %v5949_v21 = vld [vmem:[%s7883_s1 + $0x108] sm:$0xff]   ;;  %v674_v22 = vshll.u32 %v634_v62, 16  ;;  %v678_v15 = vshrl.u32 %v634_v62, 16  ;;  %5598 = vmatprep.subr.bf16.mxu0 %v5948_v6 }
  0x41   : > { %v1668_v36 = vshll.u32 %v1631_v63, 16  ;;  %v1864_v25 = vsel %vm6481_vm11, %v1855_v42, %v6528_v13  ;;  %v1989_v32 = vsel %vm6511_vm13, %v4948_v47, %v1988_v2  ;;  %v1672_v16 = vshrl.u32 %v1631_v63, 16  ;;  %v5957_v54 = vld [vmem:[%s7883_s1 + $0x110] sm:$0xff]   ;;  %v5950_v59 = vld [vmem:[%s7883_s1 + $0x1c8] sm:$0xff]   ;;  %v5965_v6 = vld [vmem:[%s7883_s1 + $0x118] sm:$0xff]  }
  0x42   : > { %v1992_v10 = vsel %vm6511_vm13, %v1990_v17, %v1991_v4  ;;  %v676_v38 = vrot.slane %v674_v22, 5  ;;  %v680_v9 = vrot.slane %v678_v15, 4  ;;  %v1785_v45 = vrot.slane %v6507_v19, 5  ;;  %5599 = vmatpush3.bf16.msra.mxu0 %v5949_v21  ;;  %v215_v14 = vld [vmem:[%s6291_s11 + $0x14] sm:$0xf]  ;;  %v5955_v5 = vld [vmem:[%s7883_s1 + $0x188] sm:$0xff]  }
  0x43   : > { %v6549_v43 = vrot.slane %v1668_v36, 5  ;;  %v1674_v51 = vrot.slane %v1672_v16, 4  ;;  %vm385_vm14 = vcmp.ne.s32.totalorder %v6429_v26, 0  ;;  %vm398_vm15 = vcmp.lt.s32.totalorder %v6429_v26, 0  ;;  %5600 = vmatprep.subr.bf16.mxu0 %v5956_v34  ;;  %v5958_v21 = vld [vmem:[%s7883_s1 + $0x1d0] sm:$0xff]   ;;  %v5968_v22 = vld [vmem:[%s7883_s1 + $0x160] sm:$0xff]  }
  0x44   : > { %v424_v53 = vadd.s32 10, %v6429_v26  ;;  %v6563_v55 = vrot.slane %v791_v49, 4  ;;  %v877_v58 = vrot.slane %v6488_v52, 4  ;;  %v974_v37 = vld [vmem:[#allocation3 + $0x8] sm:$0xff]  ;;  %v677_v60 = vsel %vm6407_vm3, %v6446_v41, %v676_v38  ;;  %vm411_vm0 = vmand %vm398_vm15, %vm385_vm14 }
  0x45   : > { %v681_v62 = vor.u32 %v680_v9, %v676_v38  ;;  %v976_v63 = vld [vmem:[#allocation3 + $0x18] sm:$0xff]  ;;  %v1865_v23 = vrot.slane %v6528_v13, 4  ;;  %v6573_v49 = vrot.slane %v1991_v4, 4  ;;  %755 = vst [vmem:[#allocation3 + $0x24] sm:$0xf] %v677_v60  ;;  %v1675_v40 = vor.u32 %v1674_v51, %v6549_v43  ;;  %v5960_v41 = vld [vmem:[%s7883_s1 + $0x158] sm:$0xff]  }
  0x46   : > { %v5942_v30 = vld [vmem:[#allocation3 + $0xc] ss:$16 sps:$4 sm:$0xff]   ;;  %v6577_v47 = vsel %vm411_vm0, %v424_v53, %v6429_v26  ;;  %1951 = vst [vmem:[#allocation3 + $0x8] sm:$0xf] %v1854_v20  ;;  %1952 = vst [vmem:[#allocation3 + $0x18] sm:$0xf] %v1864_v25  ;;  %v4887_v29 = vcombine.low %v974_v37, %v976_v63  ;;  %5601 = vmatpush3.bf16.msra.mxu0 %v5957_v54  ;;  %v1671_v34 = vsel %vm6407_vm3, %v6496_v0, %v6549_v43 }
  0x47   : > { %2027 = vst [vmem:[#allocation3 + $0xc] sm:$0xf] %v1989_v32  ;;  %2028 = vst [vmem:[#allocation3 + $0x1c] sm:$0xf] %v1992_v10  ;;  %v635_v61 = vld [vmem:[#allocation2 + $0x10] sm:$0xf]  ;;  %1461 = vmatprep.mubr.bf16.mxu1 %v5942_v30  ;;  %v6625_v38 = vsel %vm6433_vm7, %v6526_v12, %v1785_v45  ;;  %5602 = vmatprep.subr.bf16.mxu0 %v5960_v41 }
  0x48   : > { %v6582_v1 = vld [vmem:[#allocation2 + $0x10] sm:$0xf]  ;;  %v6584_v2 = vrot.slane %v1785_v45, 4  ;;  %vm450_vm4 = vcmp.eq.s32.totalorder %v6577_v47, 0  ;;  %v682_v26 = vrot.slane %v681_v62, 4  ;;  %v684_v19 = vshll.u32 %v635_v61, 16  ;;  %1462 = vmatmul.mubr.bf16.vlgmr.msra.gmra.mrb[0].mxu1 %v4887_v29 }
  0x49   : > { %v1678_v42 = vshll.u32 %v6582_v1, 16  ;;  %v6589_v4 = vld [vmem:[#allocation2 + $0x10] sm:$0xf]  ;;  %vm386_vm5 = vcmp.ne.s32.totalorder %v6532_v18, 0  ;;  %v688_v11 = vshrl.u32 %v635_v61, 16  ;;  %v6598_v17 = vrot.slane %v1675_v40, 4  ;;  %5643 = vmatpush3.bf16.msra.mxu1 %v5947_v50 }
  0x4a   : > { %vm463_vm2 = vcmp.eq.s32.totalorder %v6577_v47, 9  ;;  %v766_v20 = vld [vmem:[#allocation2 + $0x10] sm:$0xf]  ;;  %vm399_vm6 = vcmp.lt.s32.totalorder %v6532_v18, 0  ;;  %v6608_v15 = vrot.slane %v684_v19, 5  ;;  %v1788_v36 = vrot.slane %v6589_v4, 5  ;;  %5644 = vmatprep.subr.bf16.mxu1 %v5950_v59  ;;  %5603 = vmatpush3.bf16.msra.mxu0 %v5965_v6 }
  0x4b   : > { %vm6613_vm8 = vmor %vm450_vm4, %vm463_vm2  ;;  %v794_v32 = vrot.slane %v766_v20, 5  ;;  %v838_v10 = vld [vmem:[#allocation2 + $0x10] sm:$0xf]  ;;  %v425_v16 = vadd.s32 10, %v6532_v18  ;;  %v6635_v37 = vrot.slane %v1678_v42, 5  ;;  %v1682_v60 = vshrl.u32 %v6582_v1, 16  ;;  %5604 = vmatprep.subr.bf16.mxu0 %v5968_v22 }
  0x4c   : > { %vm567_vm9 = vmpackc.low %vm6613_vm8, %vm6613_vm8  ;;  %v879_v9 = vshrl.u32 %v838_v10, 16  ;;  %v882_v50 = vshll.u32 %v838_v10, 16  ;;  %v1829_v51 = vld [vmem:[#allocation2 + $0x10] sm:$0xf]  ;;  %v687_v54 = vsel %vm6407_vm3, %v682_v26, %v6608_v15  ;;  %v216_v40 = vld [vmem:[%s6291_s11 + $0x18] sm:$0xf]  ;;  %v1789_v6 = vsel %vm6433_vm7, %v6584_v2, %v1788_v36 }
  0x4d   : > { %v6630_v53 = vld [vmem:[#allocation2 + $0x10] sm:$0xf]  ;;  %v580_v59 = vsel %vm567_vm9, 0, %v215_v14  ;;  %v795_v12 = vsel %vm6433_vm7, %v6563_v55, %v794_v32  ;;  %vm412_vm10 = vmand %vm399_vm6, %vm386_vm5  ;;  %756 = vst [vmem:[#allocation3 + $0x34] sm:$0xf] %v687_v54  ;;  %v1867_v30 = vshrl.u32 %v1829_v51, 16  ;;  %5645 = vmatpush3.bf16.msra.mxu1 %v5955_v5  ;;  %v1681_v5 = vsel %vm6407_vm3, %v6598_v17, %v6635_v37 }
  0x4e   : > { %v615_v45 = vld [vmem:[#allocation2 + $0x10] sm:$0xf]  ;;  %593 = vst [vmem:[#allocation2 + $0x14] sm:$0xf] %v580_v59  ;;  %827 = vst [vmem:[#allocation3 + $0x28] sm:$0xf] %v795_v12  ;;  %v6651_v61 = vsel %vm412_vm10, %v425_v16, %v6532_v18  ;;  %5646 = vmatprep.subr.bf16.mxu1 %v5958_v21 }
  0x4f   : > { %v881_v62 = vrot.slane %v879_v9, 5  ;;  %v884_v63 = vrot.slane %v882_v50, 6  ;;  %625 = vst [vmem:[#allocation3 + $0x40] sm:$0xf] %v615_v45  ;;  %v1870_v41 = vshll.u32 %v1829_v51, 16  ;;  %v1994_v29 = vrot.slane %v6630_v53, 6 }
  0x50   : > { %v5959_v55 = vld [vmem:[%s7883_s1 + $0x190] sm:$0xff]   ;;  %v690_v14 = vrot.slane %v688_v11, 4  ;;  %v5966_v1 = vld [vmem:[%s7883_s1 + $0x1d8] sm:$0xff]   ;;  %v5969_v26 = vld [vmem:[%s7883_s1 + $0x120] sm:$0xff]   ;;  %v1869_v42 = vrot.slane %v1867_v30, 5  ;;  %vm451_vm12 = vcmp.eq.s32.totalorder %v6651_v61, 0 }
  0x51   : > { %v6659_v19 = vor.u32 %v884_v63, %v881_v62  ;;  %vm464_vm14 = vcmp.eq.s32.totalorder %v6651_v61, 9  ;;  %v5976_v18 = vld [vmem:[%s7883_s1 + $0x168] sm:$0xff]   ;;  %v1872_v11 = vrot.slane %v1870_v41, 6  ;;  %v5967_v22 = vld [vmem:[%s7883_s1 + $0x198] sm:$0xff]   ;;  %v796_v25 = vrot.slane %v794_v32, 4  ;;  %v5970_v10 = vld [vmem:[%s7883_s1 + $0x1e0] sm:$0xff]   ;;  %5647 = vmatpush3.bf16.msra.mxu1 %v5959_v55  ;;  %5605 = vmatpush3.bf16.msra.mxu0 %v5969_v26 }
  0x52   : > { %vm6675_vm15 = vmor %vm451_vm12, %vm464_vm14  ;;  %v691_v21 = vor.u32 %v690_v14, %v6608_v15  ;;  %v6690_v2 = vrot.slane %v1994_v29, 4  ;;  %v1684_v15 = vrot.slane %v1682_v60, 4  ;;  %v977_v32 = vld [vmem:[#allocation3 + $0x20] sm:$0xff]  ;;  %v6703_v9 = vrot.slane %v1788_v36, 4  ;;  %v5977_v50 = vld [vmem:[%s7883_s1 + $0x128] sm:$0xff]   ;;  %5648 = vmatprep.subr.bf16.mxu1 %v5966_v1  ;;  %5606 = vmatprep.subr.bf16.mxu0 %v5976_v18 }
  0x53   : > { %v886_v17 = vsel %vm6481_vm11, %v877_v58, %v6659_v19  ;;  %vm568_vm0 = vmpackc.low %vm6675_vm15, %vm6675_vm15  ;;  %v887_v16 = vrot.slane %v6659_v19, 4  ;;  %v6699_v52 = vor.u32 %v1872_v11, %v1869_v42  ;;  %v5980_v4 = vld [vmem:[%s7883_s1 + $0x170] sm:$0xff]   ;;  %v320_v62 = vshrl.u32 %v6395_v46, 3  ;;  %1749 = vst [vmem:[#allocation3 + $0x20] sm:$0xf] %v1671_v34  ;;  %v5978_v55 = vld [vmem:[%s7883_s1 + $0x1e8] sm:$0xff]  }
  0x54   : > { %965 = vst [vmem:[#allocation3 + $0x2c] sm:$0xf] %v886_v17  ;;  %v581_v58 = vsel %vm568_vm0, 0, %v216_v40  ;;  %v6708_v51 = vrot.slane %v691_v21, 4  ;;  %v1685_v54 = vor.u32 %v1684_v15, %v6635_v37  ;;  %v979_v36 = vld [vmem:[#allocation3 + $0x30] sm:$0xff]  ;;  %v331_v46 = vshrl.u32 %v6400_v48, 3 }
  0x55   : > { %594 = vst [vmem:[#allocation2 + $0x18] sm:$0xf] %v581_v58  ;;  %v6712_v59 = vmul.u32.u64.low 3435973837, %v6388_v39  ;;  %v6713_v12 = vmul.u32.u64.high 3435973837, %v6388_v39, %v6712_v59  ;;  %v5951_v45 = vld [vmem:[#allocation3 + $0x24] ss:$16 sps:$4 sm:$0xff]   ;;  %v4889_v41 = vcombine.low %v977_v32, %v979_v36  ;;  %5649 = vmatpush3.bf16.msra.mxu1 %v5967_v22  ;;  %5607 = vmatpush3.bf16.msra.mxu0 %v5977_v50  ;;  %v6764_v50 = vsel %vm6511_vm13, %v6573_v49, %v1994_v29 }
  0x56   : > { %v6719_v60 = vld [vmem:[#allocation2 + $0x14] sm:$0xf]  ;;  %v5971_v37 = vld [vmem:[%s7883_s1 + $0x1a0] sm:$0xff]   ;;  %1750 = vst [vmem:[#allocation3 + $0x30] sm:$0xf] %v1681_v5  ;;  %1396 = vmatprep.mubr.bf16.mxu0 %v5951_v45  ;;  %v1875_v42 = vrot.slane %v6699_v52, 4  ;;  %5650 = vmatprep.subr.bf16.mxu1 %v5970_v10 }
  0x57   : > { %1818 = vst [vmem:[#allocation3 + $0x24] sm:$0xf] %v6625_v38  ;;  %1819 = vst [vmem:[#allocation3 + $0x34] sm:$0xf] %v1789_v6  ;;  %v797_v63 = vrot.slane %v6719_v60, 5  ;;  %v5981_v38 = vld [vmem:[%s7883_s1 + $0x130] sm:$0xff]   ;;  %1397 = vmatmul.mubr.bf16.gmra.mrb[4].mxu0 %v4889_v41  ;;  %5608 = vmatprep.subr.bf16.mxu0 %v5980_v4 }
  0x58   : > { %v839_v30 = vld [vmem:[#allocation2 + $0x14] sm:$0xf]  ;;  %v6746_v6 = vrot.slane %v1685_v54, 4  ;;  %v5988_v11 = vld [vmem:[%s7883_s1 + $0x178] sm:$0xff]   ;;  %v321_v41 = vmul.u32 10, %v320_v62  ;;  %v6878_v48 = vadd.s32 80, %v6267_v27 }
  0x59   : > { %v1830_v40 = vld [vmem:[#allocation2 + $0x14] sm:$0xf]  ;;  %v889_v14 = vshrl.u32 %v839_v30, 16  ;;  %v892_v1 = vshll.u32 %v839_v30, 16  ;;  %v798_v26 = vsel %vm6433_vm7, %v796_v25, %v797_v63  ;;  %v5979_v25 = vld [vmem:[%s7883_s1 + $0x1a8] sm:$0xff]   ;;  %5651 = vmatpush3.bf16.msra.mxu1 %v5971_v37  ;;  %5609 = vmatpush3.bf16.msra.mxu0 %v5981_v38 }
  0x5a   : > { %v1877_v0 = vshrl.u32 %v1830_v40, 16  ;;  %v1880_v43 = vshll.u32 %v1830_v40, 16  ;;  %v6736_v34 = vld [vmem:[#allocation2 + $0x14] sm:$0xf]  ;;  %828 = vst [vmem:[#allocation3 + $0x38] sm:$0xf] %v798_v26  ;;  %5652 = vmatprep.subr.bf16.mxu1 %v5978_v55  ;;  %5610 = vmatprep.subr.bf16.mxu0 %v5988_v11 }
  0x5b   : > { %v616_v18 = vld [vmem:[#allocation2 + $0x14] sm:$0xf]  ;;  %v891_v20 = vrot.slane %v889_v14, 5  ;;  %v894_v21 = vrot.slane %v892_v1, 6  ;;  %v1997_v32 = vrot.slane %v6736_v34, 6  ;;  %v5989_v26 = vld [vmem:[%s7883_s1 + $0x138] sm:$0xff]  }
  0x5c   : > { %v636_v5 = vld [vmem:[#allocation2 + $0x14] sm:$0xf]  ;;  %v1879_v22 = vrot.slane %v1877_v0, 5  ;;  %v1882_v17 = vrot.slane %v1880_v43, 6  ;;  %626 = vst [vmem:[#allocation3 + $0x50] sm:$0xf] %v616_v18 }
  0x5d   : > { %v1633_v15 = vld [vmem:[#allocation2 + $0x14] sm:$0xf]  ;;  %v694_v58 = vshll.u32 %v636_v5, 16  ;;  %v698_v10 = vshrl.u32 %v636_v5, 16  ;;  %v6757_v36 = vor.u32 %v894_v21, %v891_v20  ;;  %v6766_v45 = vld [vmem:[#allocation2 + $0x18] sm:$0xf]  ;;  %5653 = vmatpush3.bf16.msra.mxu1 %v5979_v25  ;;  %5611 = vmatpush3.bf16.msra.mxu0 %v5989_v26 }
  0x5e   : > { %v1688_v54 = vshll.u32 %v1633_v15, 16  ;;  %v6755_v59 = vld [vmem:[#allocation2 + $0x14] sm:$0xf]  ;;  %v6768_v30 = vld [vmem:[#allocation2 + $0x18] sm:$0xf]  ;;  %v1692_v40 = vshrl.u32 %v1633_v15, 16  ;;  %v6780_v29 = vor.u32 %v1882_v17, %v1879_v22  ;;  %v1874_v22 = vsel %vm6481_vm11, %v1865_v23, %v6699_v52 }
  0x5f   : > { %v696_v14 = vrot.slane %v694_v58, 5  ;;  %v700_v1 = vrot.slane %v698_v10, 4  ;;  %v704_v4 = vshll.u32 %v6766_v45, 16  ;;  %v1791_v0 = vrot.slane %v6755_v59, 5  ;;  %v5986_v53 = vld [vmem:[%s7883_s1 + $0x1f0] sm:$0xff]   ;;  %v5990_v21 = vld [vmem:[%s7883_s1 + $0x1f8] sm:$0xff]  }
  0x60   : > { %v896_v49 = vsel %vm6481_vm11, %v887_v16, %v6757_v36  ;;  %v6782_v62 = vrot.slane %v1688_v54, 5  ;;  %v1694_v37 = vrot.slane %v1692_v40, 4  ;;  %v6784_v43 = vld [vmem:[#allocation2 + $0x18] sm:$0xf]  ;;  %v5987_v55 = vld [vmem:[%s7883_s1 + $0x1b0] sm:$0xff]   ;;  %v1698_v5 = vshll.u32 %v6768_v30, 16  ;;  %5654 = vmatprep.subr.bf16.mxu1 %v5986_v53 }
  0x61   : > { %966 = vst [vmem:[#allocation3 + $0x3c] sm:$0xf] %v896_v49  ;;  %v697_v19 = vsel %vm6407_vm3, %v6708_v51, %v696_v14  ;;  %v701_v16 = vor.u32 %v700_v1, %v696_v14  ;;  %v6795_v18 = vrot.slane %v704_v4, 5  ;;  %v6798_v20 = vld [vmem:[#allocation2 + $0x18] sm:$0xf]  ;;  %v1998_v51 = vsel %vm6511_vm13, %v6690_v2, %v1997_v32  ;;  %v978_v59 = vld [vmem:[#allocation3 + $0x28] sm:$0xff]  ;;  %5655 = vmatpush3.bf16.msra.mxu1 %v5987_v55 }
  0x62   : > { %v840_v38 = vld [vmem:[#allocation2 + $0x18] sm:$0xf]  ;;  %v708_v17 = vshrl.u32 %v6766_v45, 16  ;;  %757 = vst [vmem:[#allocation3 + $0x44] sm:$0xf] %v697_v19  ;;  %v1695_v11 = vor.u32 %v1694_v37, %v6782_v62  ;;  %v6815_v10 = vrot.slane %v1698_v5, 5  ;;  %v322_v14 = vsub.s32 %v6376_v31, %v321_v41  ;;  %5656 = vmatprep.subr.bf16.mxu1 %v5990_v21 }
  0x63   : > { %v617_v15 = vld [vmem:[#allocation2 + $0x18] sm:$0xf]  ;;  %v702_v58 = vrot.slane %v701_v16, 4  ;;  %v1702_v13 = vshrl.u32 %v6768_v30, 16  ;;  %v1793_v54 = vrot.slane %v1791_v0, 4  ;;  %v1794_v2 = vrot.slane %v6784_v43, 5 }
  0x64   : > { %v1831_v23 = vld [vmem:[#allocation2 + $0x18] sm:$0xf]  ;;  %627 = vst [vmem:[#allocation3 + $0x60] sm:$0xf] %v617_v15  ;;  %v6818_v40 = vrot.slane %v1695_v11, 4  ;;  %v799_v25 = vrot.slane %v797_v63, 4  ;;  %v1884_v1 = vsel %vm6481_vm11, %v1875_v42, %v6780_v29  ;;  %v1691_v60 = vsel %vm6407_vm3, %v6746_v6, %v6782_v62 }
  0x65   : > { %v5991_v30 = vld [vmem:[%s7883_s1 + $0x1b8] sm:$0xff]   ;;  %v707_v4 = vsel %vm6407_vm3, %v702_v58, %v6795_v18  ;;  %v800_v31 = vrot.slane %v6798_v20, 5  ;;  %v899_v41 = vshrl.u32 %v840_v38, 16  ;;  %vm387_vm4 = vcmp.ne.s32.totalorder %v322_v14, 0  ;;  %1953 = vst [vmem:[#allocation3 + $0x28] sm:$0xf] %v1874_v22 }
  0x66   : > { %758 = vst [vmem:[#allocation3 + $0x54] sm:$0xf] %v707_v4  ;;  %vm400_vm5 = vcmp.lt.s32.totalorder %v322_v14, 0  ;;  %v426_v63 = vadd.s32 10, %v322_v14  ;;  %v1792_v52 = vsel %vm6433_vm7, %v6703_v9, %v1791_v0  ;;  %v217_v42 = vld [vmem:[%s6291_s11 + $0x1c] sm:$0xf]  ;;  %5657 = vmatpush3.bf16.msra.mxu1 %v5991_v30 }
  0x67   : > { %vm413_vm2 = vmand %vm400_vm5, %vm387_vm4  ;;  %v801_v53 = vsel %vm6433_vm7, %v799_v25, %v800_v31  ;;  %v901_v49 = vrot.slane %v899_v41, 5  ;;  %v902_v37 = vshll.u32 %v840_v38, 16  ;;  %v897_v55 = vrot.slane %v6757_v36, 4  ;;  %v6854_v5 = vld [vmem:[#allocation2 + $0x18] sm:$0xf] }
  0x68   : > { %v980_v26 = vld [vmem:[#allocation3 + $0x38] sm:$0xff]  ;;  %v6848_v62 = vsel %vm413_vm2, %v426_v63, %v322_v14  ;;  %829 = vst [vmem:[#allocation3 + $0x48] sm:$0xf] %v801_v53  ;;  %v1887_v19 = vshrl.u32 %v1831_v23, 16  ;;  %v1890_v16 = vshll.u32 %v1831_v23, 16  ;;  %v1701_v36 = vsel %vm6407_vm3, %v6818_v40, %v6815_v10  ;;  %v5996_v23 = vld [vmem:[%s7883_s1 + $0x240] sm:$0xff]  }
  0x69   : > { %v5953_v6 = vld [vmem:[#allocation3 + $0x2c] ss:$16 sps:$4 sm:$0xff]   ;;  %1954 = vst [vmem:[#allocation3 + $0x38] sm:$0xf] %v1884_v1  ;;  %v4891_v9 = vcombine.low %v978_v59, %v980_v26  ;;  %vm452_vm6 = vcmp.eq.s32.totalorder %v6848_v62, 0  ;;  %vm465_vm8 = vcmp.eq.s32.totalorder %v6848_v62, 9  ;;  %5688 = vmatprep.subr.bf16.mxu0 %v5996_v23 }
  0x6a   : > { %2029 = vst [vmem:[#allocation3 + $0x2c] sm:$0xf] %v6764_v50  ;;  %2030 = vst [vmem:[#allocation3 + $0x3c] sm:$0xf] %v1998_v51  ;;  %v904_v0 = vrot.slane %v902_v37, 6  ;;  %1469 = vmatprep.mubr.bf16.mxu1 %v5953_v6  ;;  %v981_v38 = vld [vmem:[#allocation3 + $0x40] sm:$0xff]  ;;  %v1795_v50 = vsel %vm6433_vm7, %v1793_v54, %v1794_v2 }
  0x6b   : > { %vm478_vm9 = vmor %vm452_vm6, %vm465_vm8  ;;  %v1889_v21 = vrot.slane %v1887_v19, 5  ;;  %v1892_v22 = vrot.slane %v1890_v16, 6  ;;  %1470 = vmatmul.mubr.bf16.gmra.mrb[4].mxu1 %v4891_v9  ;;  %v332_v11 = vmul.u32 10, %v331_v46  ;;  %v710_v15 = vrot.slane %v708_v17, 4  ;;  %1751 = vst [vmem:[#allocation3 + $0x40] sm:$0xf] %v1691_v60 }
  0x6c   : > { %vm569_vm10 = vmpackc.low %vm478_vm9, %vm478_vm9  ;;  %v6864_v51 = vor.u32 %v904_v0, %v901_v49  ;;  %v1704_v58 = vrot.slane %v1702_v13, 4  ;;  %v2000_v45 = vrot.slane %v6854_v5, 6  ;;  %v802_v1 = vrot.slane %v800_v31, 4 }
  0x6d   : > { %v582_v54 = vsel %vm569_vm10, 0, %v217_v42  ;;  %v983_v59 = vld [vmem:[#allocation3 + $0x50] sm:$0xff]  ;;  %v333_v25 = vsub.s32 %v6382_v35, %v332_v11  ;;  %v6880_v46 = vor.u32 %v1892_v22, %v1889_v21  ;;  %v711_v13 = vor.u32 %v710_v15, %v6795_v18 }
  0x6e   : > { %v5961_v40 = vld [vmem:[#allocation3 + $0x44] ss:$16 sps:$4 sm:$0xff]   ;;  %595 = vst [vmem:[#allocation2 + $0x1c] sm:$0xf] %v582_v54  ;;  %v906_v14 = vsel %vm6481_vm11, %v897_v55, %v6864_v51  ;;  %1752 = vst [vmem:[#allocation3 + $0x50] sm:$0xf] %v1701_v36  ;;  %v4893_v17 = vcombine.low %v981_v38, %v983_v59  ;;  %v1705_v30 = vor.u32 %v1704_v58, %v6815_v10 }
  0x6f   : > { %1820 = vst [vmem:[#allocation3 + $0x44] sm:$0xf] %v1792_v52  ;;  %1821 = vst [vmem:[#allocation3 + $0x54] sm:$0xf] %v1795_v50  ;;  %1404 = vmatprep.mubr.bf16.mxu0 %v5961_v40  ;;  %vm388_vm12 = vcmp.ne.s32.totalorder %v333_v25, 0  ;;  %vm401_vm14 = vcmp.lt.s32.totalorder %v333_v25, 0 }
  0x70   : > { %967 = vst [vmem:[#allocation3 + $0x4c] sm:$0xf] %v906_v14  ;;  %v427_v35 = vadd.s32 10, %v333_v25  ;;  %1405 = vmatmul.mubr.bf16.gmra.mrb[8].mxu0 %v4893_v17  ;;  %vm414_vm15 = vmand %vm401_vm14, %vm388_vm12  ;;  %v342_v4 = vshrl.u32 %v6713_v12, 3  ;;  %v6889_v41 = vadd.s32 88, %v6267_v27  ;;  %v6000_v18 = vld [vmem:[%s7883_s1 + $0x2c0] sm:$0xff]  }
  0x71   : > { %v1885_v60 = vrot.slane %v6780_v29, 4  ;;  %v1999_v10 = vrot.slane %v1997_v32, 4  ;;  %v6901_v20 = vrot.slane %v2000_v45, 4  ;;  %5734 = vmatprep.subr.bf16.mxu1 %v6000_v18  ;;  %v907_v31 = vrot.slane %v6864_v51, 4  ;;  %v218_v29 = vld [vmem:[%s6291_s11 + $0x20] sm:$0xf] }
  0x72   : > { %v6897_v63 = vsel %vm414_vm15, %v427_v35, %v333_v25  ;;  %v343_v12 = vmul.u32 10, %v342_v4  ;;  %v1895_v52 = vrot.slane %v6880_v46, 4  ;;  %v712_v34 = vrot.slane %v711_v13, 4 }
  0x73   : > { %vm453_vm0 = vcmp.eq.s32.totalorder %v6897_v63, 0  ;;  %vm466_vm4 = vcmp.eq.s32.totalorder %v6897_v63, 9  ;;  %v6908_v32 = vrot.slane %v1705_v30, 4 }
  0x74   : > { %vm479_vm5 = vmor %vm453_vm0, %vm466_vm4  ;;  %v344_v37 = vsub.s32 %v6388_v39, %v343_v12  ;;  %v6912_v38 = vmul.u32.u64.low 3435973837, %v6878_v48  ;;  %v6913_v36 = vmul.u32.u64.high 3435973837, %v6878_v48, %v6912_v38  ;;  %vm521_vm0 = vcmp.ge.s32.totalorder %v6889_v41, 90 }
  0x75   : > { %v769_v42 = vld [vmem:[#allocation2 + $0x1c] sm:$0xf]  ;;  %vm570_vm2 = vmpackc.low %vm479_vm5, %vm479_vm5 }
  0x76   : > { %v841_v53 = vld [vmem:[#allocation2 + $0x1c] sm:$0xf]  ;;  %v803_v26 = vrot.slane %v769_v42, 5  ;;  %v583_v9 = vsel %vm570_vm2, 0, %v218_v29  ;;  %vm389_vm6 = vcmp.ne.s32.totalorder %v344_v37, 0  ;;  %vm402_vm8 = vcmp.lt.s32.totalorder %v344_v37, 0 }
  0x77   : > { %v1832_v49 = vld [vmem:[#allocation2 + $0x1c] sm:$0xf]  ;;  %v909_v6 = vshrl.u32 %v841_v53, 16  ;;  %v912_v55 = vshll.u32 %v841_v53, 16  ;;  %596 = vst [vmem:[#allocation2 + $0x20] sm:$0xf] %v583_v9  ;;  %vm6934_vm9 = vmand %vm402_vm8, %vm389_vm6 }
  0x78   : > { %v1897_v19 = vshrl.u32 %v1832_v49, 16  ;;  %v1900_v16 = vshll.u32 %v1832_v49, 16  ;;  %v618_v0 = vld [vmem:[#allocation2 + $0x1c] sm:$0xf]  ;;  %v804_v50 = vsel %vm6433_vm7, %v802_v1, %v803_v26  ;;  %v1894_v49 = vsel %vm6481_vm11, %v1885_v60, %v6880_v46  ;;  %v219_v60 = vld [vmem:[%s6291_s11 + $0x24] sm:$0xf] }
  0x79   : > { %v911_v21 = vrot.slane %v909_v6, 5  ;;  %v914_v22 = vrot.slane %v912_v55, 6  ;;  %v6918_v51 = vld [vmem:[#allocation2 + $0x1c] sm:$0xf]  ;;  %628 = vst [vmem:[#allocation3 + $0x70] sm:$0xf] %v618_v0 }
  0x7a   : > { %v638_v39 = vld [vmem:[#allocation2 + $0x1c] sm:$0xf]  ;;  %830 = vst [vmem:[#allocation3 + $0x58] sm:$0xf] %v804_v50  ;;  %v1899_v11 = vrot.slane %v1897_v19, 5  ;;  %v1902_v15 = vrot.slane %v1900_v16, 6 }
  0x7b   : > { %v714_v58 = vshll.u32 %v638_v39, 16  ;;  %v718_v23 = vshrl.u32 %v638_v39, 16  ;;  %v1635_v54 = vld [vmem:[#allocation2 + $0x1c] sm:$0xf]  ;;  %v6920_v59 = vor.u32 %v914_v22, %v911_v21  ;;  %v2003_v35 = vrot.slane %v6918_v51, 6 }
  0x7c   : > { %v1708_v40 = vshll.u32 %v1635_v54, 16  ;;  %v1712_v14 = vshrl.u32 %v1635_v54, 16  ;;  %v6928_v4 = vld [vmem:[#allocation2 + $0x1c] sm:$0xf]  ;;  %v6930_v18 = vor.u32 %v1902_v15, %v1899_v11  ;;  %v428_v16 = vadd.s32 10, %v344_v37 }
  0x7d   : > { %v716_v25 = vrot.slane %v714_v58, 5  ;;  %v720_v17 = vrot.slane %v718_v23, 4  ;;  %v916_v13 = vsel %vm6481_vm11, %v907_v31, %v6920_v59  ;;  %v1797_v19 = vrot.slane %v6928_v4, 5  ;;  %v982_v9 = vld [vmem:[#allocation3 + $0x48] sm:$0xff] }
  0x7e   : > { %v6926_v30 = vrot.slane %v1708_v40, 5  ;;  %v1714_v1 = vrot.slane %v1712_v14, 4  ;;  %968 = vst [vmem:[#allocation3 + $0x5c] sm:$0xf] %v916_v13  ;;  %v6939_v31 = vmul.u32.u64.low 3435973837, %v6889_v41  ;;  %v6940_v53 = vmul.u32.u64.high 3435973837, %v6889_v41, %v6939_v31 }
  0x7f   : > { %v717_v12 = vsel %vm6407_vm3, %v712_v34, %v716_v25  ;;  %v721_v29 = vor.u32 %v720_v17, %v716_v25  ;;  %v2001_v34 = vsel %vm6511_vm13, %v1999_v10, %v2000_v45  ;;  %v639_v6 = vld [vmem:[#allocation2 + $0x20] sm:$0xf]  ;;  %v1796_v21 = vrot.slane %v1794_v2, 4  ;;  %1955 = vst [vmem:[#allocation3 + $0x48] sm:$0xf] %v1894_v49 }
  0x80   : > { %759 = vst [vmem:[#allocation3 + $0x64] sm:$0xf] %v717_v12  ;;  %v6950_v55 = vld [vmem:[#allocation2 + $0x20] sm:$0xf]  ;;  %v724_v38 = vshll.u32 %v639_v6, 16  ;;  %v1715_v50 = vor.u32 %v1714_v1, %v6926_v30  ;;  %v1904_v5 = vsel %vm6481_vm11, %v1895_v52, %v6930_v18  ;;  %v2004_v45 = vsel %vm6511_vm13, %v6901_v20, %v2003_v35 }
  0x81   : > { %v722_v0 = vrot.slane %v721_v29, 4  ;;  %v6967_v10 = vld [vmem:[#allocation2 + $0x20] sm:$0xf]  ;;  %v6971_v22 = vsel %vm6934_vm9, %v428_v16, %v344_v37  ;;  %v805_v2 = vrot.slane %v803_v26, 4  ;;  %v1718_v46 = vshll.u32 %v6950_v55, 16 }
  0x82   : > { %v770_v43 = vld [vmem:[#allocation2 + $0x20] sm:$0xf]  ;;  %v6973_v39 = vrot.slane %v724_v38, 5  ;;  %vm454_vm10 = vcmp.eq.s32.totalorder %v6971_v22, 0  ;;  %vm467_vm12 = vcmp.eq.s32.totalorder %v6971_v22, 9  ;;  %v1799_v11 = vrot.slane %v1797_v19, 4 }
  0x83   : > { %v842_v52 = vld [vmem:[#allocation2 + $0x20] sm:$0xf]  ;;  %vm6978_vm14 = vmor %vm454_vm10, %vm467_vm12  ;;  %v806_v15 = vrot.slane %v770_v43, 5  ;;  %v728_v40 = vshrl.u32 %v639_v6, 16  ;;  %v1716_v14 = vrot.slane %v1715_v50, 4  ;;  %v1800_v13 = vrot.slane %v6967_v10, 5 }
  0x84   : > { %v919_v58 = vshrl.u32 %v842_v52, 16  ;;  %v1833_v37 = vld [vmem:[#allocation2 + $0x20] sm:$0xf]  ;;  %v727_v26 = vsel %vm6407_vm3, %v722_v0, %v6973_v39  ;;  %vm571_vm15 = vmpackc.low %vm6978_vm14, %vm6978_vm14  ;;  %v922_v25 = vshll.u32 %v842_v52, 16  ;;  %v6991_v12 = vrot.slane %v1718_v46, 5 }
  0x85   : > { %v984_v23 = vld [vmem:[#allocation3 + $0x58] sm:$0xff]  ;;  %760 = vst [vmem:[#allocation3 + $0x74] sm:$0xf] %v727_v26  ;;  %v584_v1 = vsel %vm571_vm15, 0, %v219_v60  ;;  %v807_v4 = vsel %vm6433_vm7, %v805_v2, %v806_v15  ;;  %v917_v29 = vrot.slane %v6920_v59, 4  ;;  %v1907_v6 = vshrl.u32 %v1833_v37, 16 }
  0x86   : > { %v5963_v54 = vld [vmem:[#allocation3 + $0x4c] ss:$16 sps:$4 sm:$0xff]   ;;  %1956 = vst [vmem:[#allocation3 + $0x58] sm:$0xf] %v1904_v5  ;;  %v4895_v17 = vcombine.low %v982_v9, %v984_v23  ;;  %597 = vst [vmem:[#allocation2 + $0x24] sm:$0xf] %v584_v1  ;;  %v1711_v59 = vsel %vm6407_vm3, %v6908_v32, %v6926_v30  ;;  %v1798_v5 = vsel %vm6433_vm7, %v1796_v21, %v1797_v19 }
  0x87   : > { %2031 = vst [vmem:[#allocation3 + $0x4c] sm:$0xf] %v2001_v34  ;;  %2032 = vst [vmem:[#allocation3 + $0x5c] sm:$0xf] %v2004_v45  ;;  %1477 = vmatprep.mubr.bf16.mxu1 %v5963_v54  ;;  %v921_v42 = vrot.slane %v919_v58, 5  ;;  %v924_v31 = vrot.slane %v922_v25, 6  ;;  %v1721_v10 = vsel %vm6407_vm3, %v1716_v14, %v6991_v12 }
  0x88   : > { %831 = vst [vmem:[#allocation3 + $0x68] sm:$0xf] %v807_v4  ;;  %v619_v49 = vld [vmem:[#allocation2 + $0x20] sm:$0xf]  ;;  %1478 = vmatmul.mubr.bf16.gmra.mrb[8].mxu1 %v4895_v17  ;;  %v1722_v34 = vshrl.u32 %v6950_v55, 16  ;;  %v1910_v16 = vshll.u32 %v1833_v37, 16  ;;  %v1801_v55 = vsel %vm6433_vm7, %v1799_v11, %v1800_v13 }
  0x89   : > { %629 = vst [vmem:[#allocation3 + $0x80] sm:$0xf] %v619_v49  ;;  %v6995_v9 = vor.u32 %v924_v31, %v921_v42  ;;  %v1905_v0 = vrot.slane %v6930_v18, 4  ;;  %v6998_v38 = vld [vmem:[#allocation2 + $0x20] sm:$0xf]  ;;  %v730_v50 = vrot.slane %v728_v40, 4 }
  0x8a   : > { %v985_v60 = vld [vmem:[#allocation3 + $0x60] sm:$0xff]  ;;  %v808_v45 = vrot.slane %v806_v15, 4  ;;  %v2005_v2 = vrot.slane %v2003_v35, 4  ;;  %v353_v32 = vshrl.u32 %v6913_v36, 3  ;;  %v1909_v30 = vrot.slane %v1907_v6, 5 }
  0x8b   : > { %v926_v43 = vsel %vm6481_vm11, %v917_v29, %v6995_v9  ;;  %v1912_v19 = vrot.slane %v1910_v16, 6  ;;  %v2006_v21 = vrot.slane %v6998_v38, 6  ;;  %v7018_v46 = vrot.slane %v1722_v34, 4  ;;  %1753 = vst [vmem:[#allocation3 + $0x60] sm:$0xf] %v1711_v59 }
  0x8c   : > { %969 = vst [vmem:[#allocation3 + $0x6c] sm:$0xf] %v926_v43  ;;  %v987_v52 = vld [vmem:[#allocation3 + $0x70] sm:$0xff]  ;;  %v927_v20 = vrot.slane %v6995_v9, 4  ;;  %v731_v15 = vor.u32 %v730_v50, %v6973_v39  ;;  %v7022_v58 = vrot.slane %v1800_v13, 4  ;;  %v354_v37 = vmul.u32 10, %v353_v32 }
  0x8d   : > { %v5972_v11 = vld [vmem:[#allocation3 + $0x64] ss:$16 sps:$4 sm:$0xff]   ;;  %1754 = vst [vmem:[#allocation3 + $0x70] sm:$0xf] %v1721_v10  ;;  %v7024_v36 = vld [vmem:[#allocation2 + $0x24] sm:$0xf]  ;;  %v4897_v23 = vcombine.low %v985_v60, %v987_v52  ;;  %v1913_v25 = vor.u32 %v1912_v19, %v1909_v30  ;;  %v2007_v19 = vsel %vm6511_vm13, %v2005_v2, %v2006_v21 }
  0x8e   : > { %1822 = vst [vmem:[#allocation3 + $0x64] sm:$0xf] %v1798_v5  ;;  %1823 = vst [vmem:[#allocation3 + $0x74] sm:$0xf] %v1801_v55  ;;  %v843_v51 = vld [vmem:[#allocation2 + $0x24] sm:$0xf]  ;;  %1412 = vmatprep.mubr.bf16.mxu0 %v5972_v11  ;;  %v355_v38 = vsub.s32 %v6878_v48, %v354_v37 }
  0x8f   : > { %v1834_v35 = vld [vmem:[#allocation2 + $0x24] sm:$0xf]  ;;  %v809_v54 = vrot.slane %v7024_v36, 5  ;;  %v929_v26 = vshrl.u32 %v843_v51, 16  ;;  %v932_v40 = vshll.u32 %v843_v51, 16  ;;  %1413 = vmatmul.mubr.bf16.gmra.mrb[12].mxu0 %v4897_v23  ;;  %v364_v1 = vshrl.u32 %v6940_v53, 3 }
  0x90   : > { %v1917_v14 = vshrl.u32 %v1834_v35, 16  ;;  %v1920_v39 = vshll.u32 %v1834_v35, 16  ;;  %v620_v17 = vld [vmem:[#allocation2 + $0x24] sm:$0x7]  ;;  %v732_v31 = vrot.slane %v731_v15, 4  ;;  %v2008_v32 = vrot.slane %v2006_v21, 4 }
  0x91   : > { %v640_v13 = vld [vmem:[#allocation2 + $0x24] sm:$0xf]  ;;  %v810_v4 = vsel %vm6433_vm7, %v808_v45, %v809_v54  ;;  %v931_v29 = vrot.slane %v929_v26, 5  ;;  %v934_v42 = vrot.slane %v932_v40, 6  ;;  %630 = vst [vmem:[#allocation3 + $0x90] sm:$0x7] %v620_v17  ;;  %v1725_v45 = vor.u32 %v7018_v46, %v6991_v12 }
  0x92   : > { %v1637_v49 = vld [vmem:[#allocation2 + $0x24] sm:$0xf]  ;;  %832 = vst [vmem:[#allocation3 + $0x78] sm:$0xf] %v810_v4  ;;  %v1919_v34 = vrot.slane %v1917_v14, 5  ;;  %v734_v16 = vshll.u32 %v640_v13, 16  ;;  %v1914_v2 = vsel %vm6481_vm11, %v1905_v0, %v1913_v25 }
  0x93   : > { %v7032_v6 = vld [vmem:[#allocation2 + $0x24] sm:$0xf]  ;;  %v738_v9 = vshrl.u32 %v640_v13, 16  ;;  %v7035_v50 = vor.u32 %v934_v42, %v931_v29  ;;  %v1922_v53 = vrot.slane %v1920_v39, 6  ;;  %v1728_v60 = vshll.u32 %v1637_v49, 16  ;;  %v986_v26 = vld [vmem:[#allocation3 + $0x68] sm:$0xff] }
  0x94   : > { %v1732_v59 = vshrl.u32 %v1637_v49, 16  ;;  %v736_v5 = vrot.slane %v734_v16, 5  ;;  %v365_v10 = vmul.u32 10, %v364_v1  ;;  %v2009_v48 = vrot.slane %v7032_v6, 6  ;;  %v1766_v46 = vld [vmem:[#allocation2 + $0x24] sm:$0xf] }
  0x95   : > { %v740_v55 = vrot.slane %v738_v9, 4  ;;  %v936_v43 = vsel %vm6481_vm11, %v927_v20, %v7035_v50  ;;  %v1730_v30 = vrot.slane %v1728_v60, 5  ;;  %v1915_v37 = vrot.slane %v1913_v25, 4  ;;  %v220_v0 = vld [vmem:[%s6291_s11 + $0x28] sm:$0xf]  ;;  %v6021_v6 = vld [vmem:[%s7883_s1 + $0x218] sm:$0xff]  }
  0x96   : > { %970 = vst [vmem:[#allocation3 + $0x7c] sm:$0xf] %v936_v43  ;;  %v737_v52 = vsel %vm6407_vm3, %v732_v31, %v736_v5  ;;  %v1734_v15 = vrot.slane %v1732_v59, 4  ;;  %v7048_v12 = vor.u32 %v1922_v53, %v1919_v34  ;;  %v366_v20 = vsub.s32 %v6889_v41, %v365_v10  ;;  %v221_v13 = vld [vmem:[%s6291_s11 + $0x2c] sm:$0xf] }
  0x97   : > { %v741_v11 = vor.u32 %v740_v55, %v736_v5  ;;  %761 = vst [vmem:[#allocation3 + $0x84] sm:$0xf] %v737_v52  ;;  %vm390_vm4 = vcmp.ne.s32.totalorder %v355_v38, 0  ;;  %v1726_v35 = vrot.slane %v1725_v45, 4  ;;  %vm403_vm5 = vcmp.lt.s32.totalorder %v355_v38, 0  ;;  %v5999_v55 = vld [vmem:[%s7883_s1 + $0x200] sm:$0xff]  }
  0x98   : > { %v429_v23 = vadd.s32 10, %v355_v38  ;;  %vm391_vm2 = vcmp.ne.s32.totalorder %v366_v20, 0  ;;  %vm404_vm6 = vcmp.lt.s32.totalorder %v366_v20, 0  ;;  %vm416_vm8 = vmand %vm403_vm5, %vm390_vm4  ;;  %v430_v21 = vadd.s32 10, %v366_v20  ;;  %1957 = vst [vmem:[#allocation3 + $0x68] sm:$0xf] %v1914_v2 }
  0x99   : > { %v742_v51 = vrot.slane %v741_v11, 4  ;;  %v2010_v40 = vsel %vm6511_vm13, %v2008_v32, %v2009_v48  ;;  %v1735_v14 = vor.u32 %v1734_v15, %v1730_v30  ;;  %v1803_v39 = vrot.slane %v1766_v46, 5  ;;  %vm417_vm9 = vmand %vm404_vm6, %vm391_vm2  ;;  %v5992_v53 = vld [vmem:[#allocation3 + $0x4] ss:$16 sps:$4 sm:$0xff]  }
  0x9a   : > { %v442_v17 = vsel %vm416_vm8, %v429_v23, %v355_v38  ;;  %v1924_v18 = vsel %vm6481_vm11, %v1915_v37, %v7048_v12  ;;  %v443_v25 = vsel %vm417_vm9, %v430_v21, %v366_v20  ;;  %v1731_v16 = vsel %vm6407_vm3, %v1726_v35, %v1730_v30  ;;  %v6005_v45 = vld [vmem:[#allocation3 + $0x24] ss:$16 sps:$4 sm:$0xff]  }
  0x9b   : > { %762 = vst [vmem:[#allocation3 + $0x94] sm:$0x7] %v742_v51  ;;  %vm455_vm10 = vcmp.eq.s32.totalorder %v442_v17, 0  ;;  %vm468_vm12 = vcmp.eq.s32.totalorder %v442_v17, 9  ;;  %vm456_vm14 = vcmp.eq.s32.totalorder %v443_v25, 0  ;;  %vm469_vm15 = vcmp.eq.s32.totalorder %v443_v25, 9 }
  0x9c   : > { %vm7064_vm4 = vmor %vm455_vm10, %vm468_vm12  ;;  %v1736_v49 = vrot.slane %v1735_v14, 4  ;;  %v1805_v34 = vrot.slane %v1803_v39, 4  ;;  %v1804_v9 = vsel %vm6433_vm7, %v7022_v58, %v1803_v39  ;;  %v5997_v58 = vld [vmem:[#allocation3] ss:$16 sps:$4 sm:$0xff]   ;;  %v811_v5 = vrot.slane %v809_v54, 4  ;;  %v6002_v36 = vld [vmem:[%s7883_s1 + $0x248] sm:$0xff]  }
  0x9d   : > { %v988_v4 = vld [vmem:[#allocation3 + $0x78] sm:$0xff]  ;;  %vm482_vm5 = vmor %vm456_vm14, %vm469_vm15  ;;  %v937_v37 = vrot.slane %v7035_v50, 4  ;;  %vm2961_vm3 = vsmask.f32 1280  ;;  %vm4097_vm9 = vcmask 1040384   ;;  %vm4098_vm10 = vcmask 1044484  }
  0x9e   : > { %v5974_v29 = vld [vmem:[#allocation3 + $0x6c] ss:$16 sps:$4 sm:$0xff]   ;;  %1958 = vst [vmem:[#allocation3 + $0x78] sm:$0xf] %v1924_v18  ;;  %v4899_v42 = vcombine.low %v986_v26, %v988_v4  ;;  %v989_v31 = vld [vmem:[#allocation3 + $0x80] sm:$0xff]  ;;  %vm534_vm2 = vmor %vm482_vm5, %vm521_vm0  ;;  %vm604_vm5 = vcmp.lt.s32.totalorder %v6378_v33, 8 }
  0x9f   : > { %2033 = vst [vmem:[#allocation3 + $0x6c] sm:$0xf] %v2007_v19  ;;  %2034 = vst [vmem:[#allocation3 + $0x7c] sm:$0xf] %v2010_v40  ;;  %1485 = vmatprep.mubr.bf16.mxu1 %v5974_v29  ;;  %v6003_v50 = vld [vmem:[%s7883_s1 + $0x208] sm:$0xff]  }
  0xa0   : > { %vm572_vm6 = vmpackc.low %vm7064_vm4, %vm7064_vm4  ;;  %1486 = vmatmul.mubr.bf16.gmra.mrb[12].mxu1 %v4899_v42  ;;  %1755 = vst [vmem:[#allocation3 + $0x80] sm:$0xf] %v1731_v16  ;;  %v6010_v29 = vld [vmem:[#allocation3 + $0x20] ss:$16 sps:$4 sm:$0xff]   ;;  %vm2962_vm0 = vsmask.f32 5392 }
  0xa1   : > { %vm573_vm8 = vmpackc.low %vm534_vm2, %vm534_vm2  ;;  %v585_v38 = vsel %vm572_vm6, 0, %v220_v0  ;;  %v6012_v0 = vld [vmem:[%s7883_s1 + $0x250] sm:$0xff]   ;;  %vm605_vm2 = vcmp.lt.s32.totalorder %v6403_v56, 8  ;;  %vm606_vm6 = vcmp.lt.s32.totalorder %v6577_v47, 8 }
  0xa2   : > { %v991_v60 = vld [vmem:[#allocation3 + $0x90] sm:$0x77]  ;;  %v586_v41 = vsel %vm573_vm8, 0, %v221_v13  ;;  %598 = vst [vmem:[#allocation2 + $0x28] sm:$0xf] %v585_v38  ;;  %v6013_v42 = vld [vmem:[%s7883_s1 + $0x210] sm:$0xff]   ;;  %vm7231_vm12 = vmor %vm2961_vm3, %vm2962_vm0 }
  0xa3   : > { %v5982_v59 = vld [vmem:[#allocation3 + $0x84] ss:$16 sps:$4 sm:$0x7f]   ;;  %1756 = vst [vmem:[#allocation3 + $0x90] sm:$0x7] %v1736_v49  ;;  %v4901_v57 = vcombine.low %v989_v31, %v991_v60  ;;  %v1925_v31 = vrot.slane %v7048_v12, 4  ;;  %vm7259_vm14 = vmor %vm4097_vm9, %vm4098_vm10 }
  0xa4   : > { %1824 = vst [vmem:[#allocation3 + $0x84] sm:$0xf] %v1804_v9  ;;  %1825 = vst [vmem:[#allocation3 + $0x94] sm:$0x7] %v1805_v34  ;;  %1420 = vmatprep.mubr.bf16.mxu0 %v5982_v59  ;;  %v2011_v34 = vrot.slane %v2009_v48, 4  ;;  %v6016_v9 = vld [vmem:[%s7883_s1 + $0x258] sm:$0xff]  }
  0xa5   : > { %599 = vst [vmem:[#allocation2 + $0x2c] sm:$0xf] %v586_v41  ;;  %1421 = vmatmul.mubr.bf16.gmra.mrb[16].mxu0 %v4901_v57  ;;  %v6017_v38 = vld [vmem:[#allocation3 + $0x44] ss:$16 sps:$4 sm:$0xff]   ;;  %v6026_v48 = vld [vmem:[%s7883_s1 + $0x260] sm:$0xff]   ;;  %vm607_vm8 = vcmp.lt.s32.totalorder %v6651_v61, 8 }
  0xa6   : > { %2453 = vmatprep.mubr.bf16.mxu0 %v5992_v53  ;;  %vm608_vm3 = vcmp.lt.s32.totalorder %v6848_v62, 8  ;;  %vm609_vm0 = vcmp.lt.s32.totalorder %v6897_v63, 8  ;;  %vm610_vm9 = vcmp.lt.s32.totalorder %v6971_v22, 8  ;;  %vm1591_vm10 = vcmask 1045504  }
  0xa9   : > { %v772_v10 = vld [vmem:[#allocation2 + $0x28] sm:$0xf] }
  0xaa   : > { %v844_v43 = vld [vmem:[#allocation2 + $0x28] sm:$0xf]  ;;  %v812_v30 = vrot.slane %v772_v10, 5  ;;  %v6027_v10 = vld [vmem:[%s7883_s1 + $0x220] sm:$0xff]  }
  0xab   : > { %v1835_v32 = vld [vmem:[#allocation2 + $0x28] sm:$0xf]  ;;  %v939_v52 = vshrl.u32 %v844_v43, 16  ;;  %v942_v11 = vshll.u32 %v844_v43, 16 }
  0xac   : > { %v845_v19 = vld [vmem:[#allocation2 + $0x2c] sm:$0x1]  ;;  %v1927_v15 = vshrl.u32 %v1835_v32, 16  ;;  %v1930_v51 = vshll.u32 %v1835_v32, 16  ;;  %v813_v54 = vsel %vm6433_vm7, %v811_v5, %v812_v30  ;;  %v814_v35 = vrot.slane %v812_v30, 4 }
  0xad   : > { %v949_v46 = vshll.u32 %v845_v19, 16  ;;  %v1836_v20 = vld [vmem:[#allocation2 + $0x2c] sm:$0x1]  ;;  %v941_v23 = vrot.slane %v939_v52, 5  ;;  %v944_v2 = vrot.slane %v942_v11, 6  ;;  %2454 = vmatmul.mubr.bf16.vlgmr.msra.gmra.mrb[20].mxu0 %v5997_v58 }
  0xae   : > { %v1970_v21 = vld [vmem:[#allocation2 + $0x28] sm:$0xf]  ;;  %833 = vst [vmem:[#allocation3 + $0x88] sm:$0xf] %v813_v54  ;;  %v1929_v26 = vrot.slane %v1927_v15, 5  ;;  %v1932_v40 = vrot.slane %v1930_v51, 6  ;;  %5689 = vmatpush3.bf16.msra.mxu0 %v5999_v55  ;;  %2461 = vmatprep.mubr.bf16.mxu0 %v6005_v45 }
  0xaf   : > { %v1937_v14 = vshll.u32 %v1836_v20, 16  ;;  %834 = vst [vmem:[#allocation3 + $0x98] sm:$0x7] %v814_v35  ;;  %v945_v39 = vor.u32 %v944_v2, %v941_v23  ;;  %v951_v17 = vrot.slane %v949_v46, 6  ;;  %v1971_v18 = vld [vmem:[#allocation2 + $0x2c] sm:$0x1]  ;;  %5690 = vmatprep.subr.bf16.mxu0 %v6002_v36 }
  0xb0   : > { %v1933_v1 = vor.u32 %v1932_v40, %v1929_v26  ;;  %v2012_v4 = vrot.slane %v1970_v21, 6  ;;  %v2015_v16 = vrot.slane %v1971_v18, 6  ;;  %v5994_v55 = vld [vmem:[#allocation3 + $0xc] ss:$16 sps:$4 sm:$0xff]   ;;  %v6022_v45 = vld [vmem:[#allocation3 + $0x40] ss:$16 sps:$4 sm:$0xff]  }
  0xb1   : > { %v946_v25 = vsel %vm6481_vm11, %v937_v37, %v945_v39  ;;  %v947_v13 = vrot.slane %v945_v39, 4  ;;  %v1939_v49 = vrot.slane %v1937_v14, 6  ;;  %v6030_v43 = vld [vmem:[#allocation3 + $0x64] ss:$16 sps:$4 sm:$0xff]   ;;  %v5998_v15 = vld [vmem:[#allocation3 + $0x8] ss:$16 sps:$4 sm:$0xff]  }
  0xb2   : > { %971 = vst [vmem:[#allocation3 + $0x8c] sm:$0xf] %v946_v25  ;;  %5691 = vmatpush3.bf16.msra.mxu0 %v6003_v50  ;;  %v1935_v60 = vrot.slane %v1933_v1, 4  ;;  %v2014_v59 = vrot.slane %v2012_v4, 4  ;;  %v1934_v41 = vsel %vm6481_vm11, %v1925_v31, %v1933_v1  ;;  %v2013_v58 = vsel %vm6511_vm13, %v2011_v34, %v2012_v4  ;;  %v6036_v19 = vld [vmem:[%s7883_s1 + $0x268] sm:$0xff]   ;;  %v6040_v46 = vld [vmem:[%s7883_s1 + $0x270] sm:$0xff]  }
  0xb3   : > { %v952_v53 = vsel %vm6481_vm11, %v947_v13, %v951_v17  ;;  %5692 = vmatprep.subr.bf16.mxu0 %v6012_v0  ;;  %v6037_v11 = vld [vmem:[%s7883_s1 + $0x228] sm:$0xff]   ;;  %v6034_v37 = vld [vmem:[#allocation3 + $0x60] ss:$16 sps:$4 sm:$0xff]   ;;  %v6007_v36 = vld [vmem:[#allocation3 + $0x2c] ss:$16 sps:$4 sm:$0xff]  }
  0xb4   : > { %972 = vst [vmem:[#allocation3 + $0x9c] sm:$0x7] %v952_v53  ;;  %v1940_v57 = vsel %vm6481_vm11, %v1935_v60, %v1939_v49  ;;  %v2016_v5 = vsel %vm6511_vm13, %v2014_v59, %v2015_v16  ;;  %v2673_v20 = vld [vmem:[#allocation2 + $0x4] sm:$0xe]  ;;  %v2674_v54 = vld [vmem:[#allocation2 + $0x8] sm:$0xf] }
  0xb5   : > { %2462 = vmatmul.mubr.bf16.gmra.mrb[24].mxu0 %v6010_v29  ;;  %v6001_v51 = vld [vmem:[%s7883_s1 + $0x280] sm:$0xff]   ;;  %v7137_v35 = vld [vmem:[#allocation2 + $0xc] sm:$0xf]  ;;  %v5087_v23 = vrot.slane %v2673_v20, 9  ;;  %v2695_v21 = vrot.slane %v2674_v54, 5  ;;  %v6041_v39 = vld [vmem:[%s7883_s1 + $0x230] sm:$0xff]  }
  0xb6   : > { %5693 = vmatpush3.bf16.msra.mxu0 %v6013_v42  ;;  %2469 = vmatprep.mubr.bf16.mxu0 %v6017_v38  ;;  %v6004_v2 = vld [vmem:[%s7883_s1 + $0x2c8] sm:$0xff]   ;;  %v2698_v26 = vrot.slane %v7137_v35, 5  ;;  %v2742_v40 = vld [vmem:[#allocation2 + $0x4] sm:$0xe]  ;;  %v6050_v17 = vld [vmem:[%s7883_s1 + $0x278] sm:$0xff]  }
  0xb7   : > { %5694 = vmatprep.subr.bf16.mxu0 %v6016_v9  ;;  %v2743_v14 = vld [vmem:[#allocation2 + $0x8] sm:$0xf]  ;;  %v2696_v18 = vsel %vm6433_vm7, %v5087_v23, %v2695_v21  ;;  %v2697_v0 = vrot.slane %v2695_v21, 4  ;;  %v2744_v25 = vld [vmem:[#allocation2 + $0xc] sm:$0xf]  ;;  %v2754_v13 = vshrl.u32 %v2742_v40, 16 }
  0xb8   : > { %v6042_v50 = vld [vmem:[#allocation3 + $0x84] ss:$16 sps:$4 sm:$0x7f]   ;;  %2732 = vst [vmem:[#allocation3] sm:$0xf] %v2696_v18  ;;  %v2757_v1 = vshll.u32 %v2742_v40, 16 }
  0xb9   : > { %v990_v12 = vld [vmem:[#allocation3 + $0x88] sm:$0xff]  ;;  %v2763_v4 = vshrl.u32 %v2743_v14, 16  ;;  %v2766_v29 = vshll.u32 %v2743_v14, 16  ;;  %v3728_v42 = vld [vmem:[#allocation2 + $0x4] sm:$0xe]  ;;  %v6009_v31 = vld [vmem:[%s7883_s1 + $0x288] sm:$0xff]   ;;  %v2699_v34 = vsel %vm6433_vm7, %v2697_v0, %v2698_v26 }
  0xba   : > { %5695 = vmatpush3.bf16.msra.mxu0 %v6021_v6  ;;  %1959 = vst [vmem:[#allocation3 + $0x88] sm:$0xf] %v1934_v41  ;;  %v6014_v49 = vld [vmem:[%s7883_s1 + $0x2d0] sm:$0xff]   ;;  %v2773_v16 = vshrl.u32 %v2744_v25, 16  ;;  %v2776_v9 = vshll.u32 %v2744_v25, 16  ;;  %v2756_v53 = vrot.slane %v2754_v13, 5 }
  0xbb   : > { %v992_v32 = vld [vmem:[#allocation3 + $0x98] sm:$0x77]  ;;  %5696 = vmatprep.subr.bf16.mxu0 %v6026_v48  ;;  %v3729_v38 = vld [vmem:[#allocation2 + $0x8] sm:$0xf]  ;;  %2733 = vst [vmem:[#allocation3 + $0x10] sm:$0xf] %v2699_v34 }
  0xbc   : > { %v5984_v30 = vld [vmem:[#allocation3 + $0x8c] ss:$16 sps:$4 sm:$0x7f]   ;;  %1960 = vst [vmem:[#allocation3 + $0x98] sm:$0x7] %v1940_v57  ;;  %v4903_v52 = vcombine.low %v990_v12, %v992_v32  ;;  %v2759_v60 = vrot.slane %v2757_v1, 6 }
  0xbd   : > { %2035 = vst [vmem:[#allocation3 + $0x8c] sm:$0xf] %v2013_v58  ;;  %2036 = vst [vmem:[#allocation3 + $0x9c] sm:$0x7] %v2016_v5  ;;  %1493 = vmatprep.mubr.bf16.mxu1 %v5984_v30  ;;  %2470 = vmatmul.mubr.bf16.gmra.mrb[28].mxu0 %v6022_v45  ;;  %v2765_v59 = vrot.slane %v2763_v4, 5  ;;  %v2768_v6 = vrot.slane %v2766_v29, 6 }
  0xbe   : > { %1494 = vmatmul.mubr.bf16.gmra.mrb[16].mxu1 %v4903_v52  ;;  %5697 = vmatpush3.bf16.msra.mxu0 %v6027_v10  ;;  %v3730_v48 = vld [vmem:[#allocation2 + $0xc] sm:$0xf]  ;;  %v6047_v41 = vld [vmem:[#allocation3 + $0x80] ss:$16 sps:$4 sm:$0x7f]   ;;  %v6051_v57 = vld [vmem:[%s7883_s1 + $0x238] sm:$0xff]   ;;  %v2760_v32 = vor.u32 %v2759_v60, %v2756_v53 }
  0xbf   : > { %2526 = vmatprep.mubr.bf16.mxu1 %v5994_v55  ;;  %2477 = vmatprep.mubr.bf16.mxu0 %v6030_v43  ;;  %v6011_v12 = vld [vmem:[#allocation3 + $0x28] ss:$16 sps:$4 sm:$0xff]   ;;  %v2775_v58 = vrot.slane %v2773_v16, 5  ;;  %v2778_v5 = vrot.slane %v2776_v9, 6  ;;  %v3740_v55 = vshrl.u32 %v3728_v42, 16  ;;  %v3743_v45 = vshll.u32 %v3728_v42, 16 }
  0xc0   : > { %5698 = vmatprep.subr.bf16.mxu0 %v6036_v19  ;;  %v6058_v10 = vld [vmem:[%s7883_s1 + $0x340] sm:$0xff]   ;;  %v2769_v30 = vor.u32 %v2768_v6, %v2765_v59  ;;  %v3749_v19 = vshrl.u32 %v3729_v38, 16  ;;  %v3752_v52 = vshll.u32 %v3729_v38, 16  ;;  %v7172_v54 = vld [vmem:[#allocation2 + $0xc] sm:$0xf]  ;;  %v2761_v23 = vrot.slane %v2760_v32, 4 }
  0xc1   : > { %v6019_v43 = vld [vmem:[#allocation3 + $0x4c] ss:$16 sps:$4 sm:$0xff]   ;;  %v3742_v20 = vrot.slane %v3740_v55, 5  ;;  %v2877_v14 = vld [vmem:[#allocation2 + $0x8] sm:$0xc]  ;;  %v3762_v18 = vshll.u32 %v3730_v48, 16 }
  0xc2   : > { %5699 = vmatpush3.bf16.msra.mxu0 %v6037_v11  ;;  %v3863_v11 = vld [vmem:[#allocation2 + $0x4] sm:$0xc]  ;;  %v3751_v21 = vrot.slane %v3749_v19, 5  ;;  %v3754_v40 = vrot.slane %v3752_v52, 6  ;;  %v2878_v25 = vld [vmem:[#allocation2 + $0xc] sm:$0xf]  ;;  %v2770_v13 = vsel %vm6481_vm11, %v2761_v23, %v2769_v30 }
  0xc3   : > { %5700 = vmatprep.subr.bf16.mxu0 %v6040_v46  ;;  %v7170_v46 = vor.u32 %v2778_v5, %v2775_v58  ;;  %v5227_v0 = vrot.slane %v3863_v11, 10  ;;  %v7184_v42 = vld [vmem:[#allocation2 + $0x10] sm:$0xf]  ;;  %2867 = vst [vmem:[#allocation3 + $0x4] sm:$0xf] %v2770_v13  ;;  %v3764_v34 = vrot.slane %v3762_v18, 6 }
  0xc4   : > { %v7182_v4 = vor.u32 %v3754_v40, %v3751_v21  ;;  %v3890_v16 = vrot.slane %v7172_v54, 6  ;;  %v5088_v9 = vrot.slane %v2877_v14, 10  ;;  %v6025_v38 = vld [vmem:[%s7883_s1 + $0x298] sm:$0xff]   ;;  %v2901_v6 = vrot.slane %v2878_v25, 6  ;;  %v2952_v55 = vld [vmem:[#allocation2 + $0x10] sm:$0xf] }
  0xc5   : > { %2478 = vmatmul.mubr.bf16.gmra.mrb[32].mxu0 %v6034_v37  ;;  %v6015_v37 = vld [vmem:[%s7883_s1 + $0x290] sm:$0xff]   ;;  %v2904_v5 = vrot.slane %v7184_v42, 6  ;;  %v3936_v52 = vld [vmem:[#allocation2 + $0x8] sm:$0xc]  ;;  %v3937_v11 = vld [vmem:[#allocation2 + $0xc] sm:$0xf] }
  0xc6   : > { %2527 = vmatmul.mubr.bf16.vlgmr.msra.gmra.mrb[20].mxu1 %v5998_v15  ;;  %5701 = vmatpush3.bf16.msra.mxu0 %v6041_v39  ;;  %v3864_v15 = vld [vmem:[#allocation2 + $0x8] sm:$0xf]  ;;  %v3757_v53 = vrot.slane %v7182_v4, 4  ;;  %v2902_v32 = vsel %vm6511_vm13, %v5088_v9, %v2901_v6  ;;  %v3938_v23 = vld [vmem:[#allocation2 + $0x10] sm:$0xf]  ;;  %v2984_v14 = vshrl.u32 %v2952_v55, 16 }
  0xc7   : > { %5735 = vmatpush3.bf16.msra.mxu1 %v6001_v51  ;;  %2534 = vmatprep.mubr.bf16.mxu1 %v6007_v36  ;;  %v3745_v51 = vrot.slane %v3743_v45, 6  ;;  %v3759_v36 = vshrl.u32 %v3730_v48, 16  ;;  %v3887_v29 = vrot.slane %v3864_v15, 6  ;;  %v2951_v48 = vld [vmem:[#allocation2 + $0xc] sm:$0xf]  ;;  %v6029_v15 = vld [vmem:[%s7883_s1 + $0x2a0] sm:$0xff]  }
  0xc8   : > { %5736 = vmatprep.subr.bf16.mxu1 %v6004_v2  ;;  %2485 = vmatprep.mubr.bf16.mxu0 %v6042_v50  ;;  %v2771_v2 = vrot.slane %v2769_v30, 4  ;;  %v6024_v50 = vld [vmem:[%s7883_s1 + $0x2d8] sm:$0xff]   ;;  %v2903_v30 = vrot.slane %v2901_v6, 4  ;;  %2940 = vst [vmem:[#allocation3 + $0x8] sm:$0xf] %v2902_v32  ;;  %v3948_v18 = vshrl.u32 %v3936_v52, 16 }
  0xc9   : > { %5702 = vmatprep.subr.bf16.mxu0 %v6050_v17  ;;  %v3746_v39 = vor.u32 %v3745_v51, %v3742_v20  ;;  %v3761_v17 = vrot.slane %v3759_v36, 5  ;;  %v3888_v60 = vsel %vm6511_vm13, %v5227_v0, %v3887_v29  ;;  %v3889_v59 = vrot.slane %v3887_v29, 4  ;;  %v7221_v25 = vld [vmem:[#allocation2 + $0x8] sm:$0x8] }
  0xca   : > { %5703 = vmatpush3.bf16.msra.mxu0 %v6051_v57  ;;  %v2780_v1 = vsel %vm6481_vm11, %v2771_v2, %v7170_v46  ;;  %v2974_v51 = vshrl.u32 %v2951_v48, 16  ;;  %v2977_v36 = vshll.u32 %v2951_v48, 16  ;;  %v6038_v2 = vld [vmem:[%s7883_s1 + $0x2e8] sm:$0xff]   ;;  %v2905_v21 = vsel %vm6511_vm13, %v2903_v30, %v2904_v5  ;;  %v7235_v48 = vld [vmem:[#allocation2 + $0x10] sm:$0xf] }
  0xcb   : > { %5737 = vmatpush3.bf16.msra.mxu1 %v6009_v31  ;;  %v2950_v31 = vld [vmem:[#allocation2 + $0x8] sm:$0xc]  ;;  %5780 = vmatprep.subr.bf16.mxu0 %v6058_v10  ;;  %2868 = vst [vmem:[#allocation3 + $0x14] sm:$0xf] %v2780_v1  ;;  %v7199_v58 = vor.u32 %v3764_v34, %v3761_v17  ;;  %v6032_v10 = vld [vmem:[#allocation3 + $0x6c] ss:$16 sps:$4 sm:$0xff]  }
  0xcc   : > { %5738 = vmatprep.subr.bf16.mxu1 %v6014_v49  ;;  %v3747_v49 = vrot.slane %v3746_v39, 4  ;;  %v2965_v45 = vshrl.u32 %v2950_v31, 16  ;;  %v2968_v19 = vshll.u32 %v2950_v31, 16  ;;  %2941 = vst [vmem:[#allocation3 + $0x18] sm:$0xf] %v2905_v21  ;;  %v2976_v39 = vrot.slane %v2974_v51, 6 }
  0xcd   : > { %2486 = vmatmul.mubr.bf16.gmra.mrb[36].mxu0 %v6047_v41  ;;  %v6028_v41 = vld [vmem:[%s7883_s1 + $0x2e0] sm:$0xff]   ;;  %v2979_v17 = vrot.slane %v2977_v36, 7  ;;  %v3951_v0 = vshll.u32 %v3936_v52, 16  ;;  %v6039_v13 = vld [vmem:[%s7883_s1 + $0x2a8] sm:$0xff]   ;;  %v2986_v29 = vrot.slane %v2984_v14, 6  ;;  %v6046_v34 = vld [vmem:[%s7883_s1 + $0x2f0] sm:$0xff]  }
  0xce   : > { %2535 = vmatmul.mubr.bf16.gmra.mrb[24].mxu1 %v6011_v12  ;;  %v6023_v12 = vld [vmem:[#allocation3 + $0x48] ss:$16 sps:$4 sm:$0xff]   ;;  %v3756_v57 = vsel %vm6481_vm11, %v3747_v49, %v7182_v4  ;;  %v2967_v20 = vrot.slane %v2965_v45, 6  ;;  %v2970_v40 = vrot.slane %v2968_v19, 7  ;;  %v3957_v6 = vshrl.u32 %v3937_v11, 16  ;;  %v6059_v36 = vld [vmem:[%s7883_s1 + $0x300] sm:$0xff]  }
  0xcf   : > { %5739 = vmatpush3.bf16.msra.mxu1 %v6015_v37  ;;  %2542 = vmatprep.mubr.bf16.mxu1 %v6019_v43  ;;  %v3891_v43 = vsel %vm6511_vm13, %v3889_v59, %v3890_v16  ;;  %v3766_v37 = vsel %vm6481_vm11, %v3757_v53, %v7199_v58  ;;  %v4076_v49 = vld [vmem:[#allocation2 + $0xc] sm:$0xf]  ;;  %3853 = vst [vmem:[#allocation3] sm:$0xf] %v3756_v57  ;;  %v3950_v53 = vrot.slane %v3948_v18, 6  ;;  %v3953_v59 = vrot.slane %v3951_v0, 7 }
  0xd0   : > { %5740 = vmatprep.subr.bf16.mxu1 %v6024_v50  ;;  %v2987_v50 = vshll.u32 %v2952_v55, 16  ;;  %v2971_v4 = vor.u32 %v2970_v40, %v2967_v20  ;;  %3854 = vst [vmem:[#allocation3 + $0x10] sm:$0xf] %v3766_v37  ;;  %v3967_v55 = vshrl.u32 %v3938_v23, 16  ;;  %v6035_v45 = vld [vmem:[#allocation3 + $0x68] ss:$16 sps:$4 sm:$0xff]  }
  0xd1   : > { %v3954_v30 = vor.u32 %v3953_v59, %v3950_v53  ;;  %v3959_v19 = vrot.slane %v3957_v6, 6  ;;  %v3970_v52 = vshll.u32 %v3938_v23, 16  ;;  %v6044_v37 = vld [vmem:[#allocation3 + $0x8c] ss:$16 sps:$4 sm:$0x7f]   ;;  %v6052_v23 = vld [vmem:[%s7883_s1 + $0x2f8] sm:$0xff]  }
  0xd2   : > { %v6054_v1 = vld [vmem:[#allocation3 + $0x4] ss:$16 sps:$4 sm:$0xff]   ;;  %v2989_v31 = vrot.slane %v2987_v50, 7  ;;  %v3969_v51 = vrot.slane %v3967_v55, 6  ;;  %v4102_v14 = vrot.slane %v4076_v49, 7  ;;  %v4105_v18 = vrot.slane %v7235_v48, 7 }
  0xd3   : > { %5741 = vmatpush3.bf16.msra.mxu1 %v6025_v38  ;;  %3926 = vst [vmem:[#allocation3 + $0x4] sm:$0xf] %v3888_v60  ;;  %3927 = vst [vmem:[#allocation3 + $0x14] sm:$0xf] %v3891_v43  ;;  %v2980_v38 = vor.u32 %v2979_v17, %v2976_v39  ;;  %v3960_v60 = vshll.u32 %v3937_v11, 16  ;;  %3508 = vmatprep.mubr.bf16.mxu0 %v6054_v1  ;;  %v5228_v11 = vrot.slane %v7221_v25, 11 }
  0xd4   : > { %5742 = vmatprep.subr.bf16.mxu1 %v6028_v41  ;;  %v2972_v41 = vrot.slane %v2971_v4, 4  ;;  %v7237_v57 = vor.u32 %v2989_v31, %v2986_v29  ;;  %v3955_v21 = vrot.slane %v3954_v30, 4  ;;  %v3972_v40 = vrot.slane %v3970_v52, 7  ;;  %v6062_v50 = vld [vmem:[%s7883_s1 + $0x348] sm:$0xff]   ;;  %v6053_v31 = vld [vmem:[%s7883_s1 + $0x2b8] sm:$0xff]   ;;  %v6060_v53 = vld [vmem:[%s7883_s1 + $0x3c0] sm:$0xff]  }
  0xd5   : > { %v2982_v32 = vrot.slane %v2980_v38, 4  ;;  %v3962_v20 = vrot.slane %v3960_v60, 7  ;;  %v2700_v25 = vrot.slane %v2698_v26, 4  ;;  %v4104_v4 = vrot.slane %v4102_v14, 4  ;;  %v2676_v59 = vld [vmem:[#allocation2 + $0x10] sm:$0xf] }
  0xd6   : > { %2543 = vmatmul.mubr.bf16.gmra.mrb[28].mxu1 %v6023_v12  ;;  %v7266_v1 = vor.u32 %v3972_v40, %v3969_v51  ;;  %v2781_v29 = vrot.slane %v7170_v46, 4  ;;  %v4103_v26 = vsel %vm7259_vm14, %v5228_v11, %v4102_v14  ;;  %v7287_v6 = vld [vmem:[#allocation2 + $0x14] sm:$0xf]  ;;  %v2701_v60 = vrot.slane %v2676_v59, 5  ;;  %v6074_v40 = vld [vmem:[%s7883_s1 + $0x358] sm:$0xff]  }
  0xd7   : > { %5743 = vmatpush3.bf16.msra.mxu1 %v6029_v15  ;;  %2550 = vmatprep.mubr.bf16.mxu1 %v6032_v10  ;;  %v6049_v15 = vld [vmem:[%s7883_s1 + $0x2b0] sm:$0xff]   ;;  %v2981_v10 = vsel %vm7231_vm12, %v2972_v41, %v2980_v38  ;;  %v3963_v39 = vor.u32 %v3962_v20, %v3959_v19  ;;  %v3767_v38 = vrot.slane %v7199_v58, 4  ;;  %v2704_v55 = vrot.slane %v7287_v6, 5  ;;  %v6048_v30 = vld [vmem:[#allocation3 + $0x88] ss:$16 sps:$4 sm:$0x7f]  }
  0xd8   : > { %5744 = vmatprep.subr.bf16.mxu1 %v6038_v2  ;;  %v2991_v2 = vsel %vm7231_vm12, %v2982_v32, %v7237_v57  ;;  %3082 = vst [vmem:[#allocation3 + $0xc] sm:$0xf] %v2981_v10  ;;  %v6070_v32 = vld [vmem:[%s7883_s1 + $0x350] sm:$0xff]   ;;  %v3892_v10 = vrot.slane %v3890_v16, 4  ;;  %v2702_v11 = vsel %vm6433_vm7, %v2700_v25, %v2701_v60  ;;  %v6064_v58 = vld [vmem:[%s7883_s1 + $0x3c8] sm:$0xff]  }
  0xd9   : > { %3083 = vst [vmem:[#allocation3 + $0x1c] sm:$0xf] %v2991_v2  ;;  %v3965_v49 = vrot.slane %v3963_v39, 4  ;;  %v3964_v35 = vsel %vm7231_vm12, %v3955_v21, %v3963_v39  ;;  %v6071_v20 = vld [vmem:[%s7883_s1 + $0x310] sm:$0xff]   ;;  %2734 = vst [vmem:[#allocation3 + $0x20] sm:$0xf] %v2702_v11 }
  0xda   : > { %v3092_v12 = vld [vmem:[#allocation3] sm:$0xff]  ;;  %v3094_v43 = vld [vmem:[#allocation3 + $0x10] sm:$0xff] }
  0xdb   : > { %5745 = vmatpush3.bf16.msra.mxu1 %v6039_v13  ;;  %v5154_v0 = vcombine.low %v3092_v12, %v3094_v43  ;;  %v6063_v13 = vld [vmem:[%s7883_s1 + $0x308] sm:$0xff]   ;;  %v2745_v12 = vld [vmem:[#allocation2 + $0x10] sm:$0xf]  ;;  %v3974_v41 = vsel %vm7231_vm12, %v3965_v49, %v7266_v1  ;;  %v7316_v59 = vld [vmem:[#allocation2 + $0x14] sm:$0xf] }
  0xdc   : > { %5746 = vmatprep.subr.bf16.mxu1 %v6046_v34  ;;  %v4106_v34 = vsel %vm7259_vm14, %v4104_v4, %v4105_v18  ;;  %v2783_v43 = vshrl.u32 %v2745_v12, 16  ;;  %v2786_v19 = vshll.u32 %v2745_v12, 16  ;;  %v2880_v12 = vld [vmem:[#allocation2 + $0x14] sm:$0xf]  ;;  %v6108_v3 = vld [vmem:[#allocation3 + $0x4] ss:$16 sps:$4 sm:$0xff]  }
  0xdd   : > { %3509 = vmatmul.mubr.bf16.vlgmr.msra.gmra.mrb[40].mxu0 %v5154_v0  ;;  %v2907_v46 = vrot.slane %v2880_v12, 6 }
  0xde   : > { %2551 = vmatmul.mubr.bf16.gmra.mrb[32].mxu1 %v6035_v45  ;;  %5781 = vmatpush3.bf16.msra.mxu0 %v6059_v36  ;;  %v2746_v45 = vld [vmem:[#allocation2 + $0x14] sm:$0xf]  ;;  %v2703_v36 = vrot.slane %v2701_v60, 4  ;;  %v2785_v2 = vrot.slane %v2783_v43, 5  ;;  %v2788_v16 = vrot.slane %v2786_v19, 6  ;;  %v2906_v19 = vrot.slane %v2904_v5, 4 }
  0xdf   : > { %2558 = vmatprep.mubr.bf16.mxu1 %v6044_v37  ;;  %5747 = vmatpush3.bf16.msra.mxu1 %v6049_v15  ;;  %v2793_v52 = vshrl.u32 %v2746_v45, 16  ;;  %v2796_v37 = vshll.u32 %v2746_v45, 16  ;;  %v3731_v15 = vld [vmem:[#allocation2 + $0x10] sm:$0xf]  ;;  %v7301_v51 = vld [vmem:[#allocation3 + $0x8] sm:$0xff]  ;;  %v3896_v45 = vrot.slane %v7316_v59, 6 }
  0xe0   : > { %5748 = vmatprep.subr.bf16.mxu1 %v6052_v23  ;;  %5782 = vmatprep.subr.bf16.mxu0 %v6062_v50  ;;  %v3732_v23 = vld [vmem:[#allocation2 + $0x14] sm:$0xf]  ;;  %v3769_v21 = vshrl.u32 %v3731_v15, 16  ;;  %v7308_v14 = vld [vmem:[#allocation3 + $0x18] sm:$0xff]  ;;  %4065 = vst [vmem:[#allocation3 + $0x8] sm:$0xf] %v3964_v35  ;;  %v2705_v25 = vsel %vm6433_vm7, %v2703_v36, %v2704_v55 }
  0xe1   : > { %v6056_v54 = vld [vmem:[#allocation3 + $0xc] ss:$16 sps:$4 sm:$0xff]   ;;  %v2795_v50 = vrot.slane %v2793_v52, 5  ;;  %v2798_v39 = vrot.slane %v2796_v37, 6  ;;  %4066 = vst [vmem:[#allocation3 + $0x18] sm:$0xf] %v3974_v41  ;;  %v5156_v0 = vcombine.low %v7301_v51, %v7308_v14 }
  0xe2   : > { %5783 = vmatpush3.bf16.msra.mxu0 %v6063_v13  ;;  %4141 = vst [vmem:[#allocation3 + $0xc] sm:$0xf] %v4103_v26  ;;  %4142 = vst [vmem:[#allocation3 + $0x1c] sm:$0xf] %v4106_v34  ;;  %v3771_v4 = vrot.slane %v3769_v21, 5  ;;  %v3772_v49 = vshll.u32 %v3731_v15, 16 }
  0xe3   : > { %5749 = vmatpush3.bf16.msra.mxu1 %v6053_v31  ;;  %v3866_v13 = vld [vmem:[#allocation2 + $0x10] sm:$0xf]  ;;  %5784 = vmatprep.subr.bf16.mxu0 %v6070_v32  ;;  %2735 = vst [vmem:[#allocation3 + $0x30] sm:$0xf] %v2705_v25  ;;  %v2789_v31 = vor.u32 %v2788_v16, %v2785_v2  ;;  %v7318_v35 = vor.u32 %v2798_v39, %v2795_v50  ;;  %v3779_v26 = vshrl.u32 %v3732_v23, 16  ;;  %v3782_v34 = vshll.u32 %v3732_v23, 16 }
  0xe4   : > { %5826 = vmatprep.subr.bf16.mxu1 %v6060_v53  ;;  %v3774_v41 = vrot.slane %v3772_v49, 6  ;;  %v3893_v60 = vrot.slane %v3866_v13, 6  ;;  %v7321_v43 = vld [vmem:[#allocation2 + $0x18] sm:$0xf]  ;;  %v2992_v23 = vrot.slane %v7237_v57, 4  ;;  %v2908_v57 = vsel %vm6511_vm13, %v2906_v19, %v2907_v46  ;;  %v6083_v51 = vld [vmem:[%s7883_s1 + $0x320] sm:$0xff]  }
  0xe5   : > { %v2790_v53 = vsel %vm6481_vm11, %v2781_v29, %v2789_v31  ;;  %v2791_v32 = vrot.slane %v2789_v31, 4  ;;  %v3781_v52 = vrot.slane %v3779_v26, 5  ;;  %v3784_v37 = vrot.slane %v3782_v34, 6  ;;  %v6079_v15 = vld [vmem:[%s7883_s1 + $0x318] sm:$0xff]   ;;  %v3939_v21 = vld [vmem:[#allocation2 + $0x14] sm:$0xf] }
  0xe6   : > { %2559 = vmatmul.mubr.bf16.gmra.mrb[36].mxu1 %v6048_v30  ;;  %5785 = vmatpush3.bf16.msra.mxu0 %v6071_v20  ;;  %2869 = vst [vmem:[#allocation3 + $0x24] sm:$0xf] %v2790_v53  ;;  %v3775_v11 = vor.u32 %v3774_v41, %v3771_v4  ;;  %v7334_v42 = vsel %vm6511_vm13, %v3892_v10, %v3893_v60  ;;  %v3895_v5 = vrot.slane %v3893_v60, 4  ;;  %v2953_v30 = vld [vmem:[#allocation2 + $0x14] sm:$0xf]  ;;  %v2910_v2 = vrot.slane %v7321_v43, 6 }
  0xe7   : > { %3581 = vmatprep.mubr.bf16.mxu1 %v6056_v54  ;;  %v2954_v36 = vld [vmem:[#allocation2 + $0x18] sm:$0xf]  ;;  %5786 = vmatprep.subr.bf16.mxu0 %v6074_v40  ;;  %v2800_v29 = vsel %vm6481_vm11, %v2791_v32, %v7318_v35  ;;  %v7339_v20 = vor.u32 %v3784_v37, %v3781_v52  ;;  %v6061_v10 = vld [vmem:[%s7883_s1 + $0x380] sm:$0xff]   ;;  %v4078_v39 = vld [vmem:[#allocation2 + $0x14] sm:$0xf]  ;;  %v2909_v25 = vrot.slane %v2907_v46, 4 }
  0xe8   : > { %v3940_v54 = vld [vmem:[#allocation2 + $0x18] sm:$0xf]  ;;  %2870 = vst [vmem:[#allocation3 + $0x34] sm:$0xf] %v2800_v29  ;;  %v3776_v40 = vsel %vm6481_vm11, %v3767_v38, %v3775_v11  ;;  %v3777_v16 = vrot.slane %v3775_v11, 4  ;;  %v3897_v50 = vsel %vm6511_vm13, %v3895_v5, %v3896_v45  ;;  %v2994_v4 = vshrl.u32 %v2953_v30, 16 }
  0xe9   : > { %2942 = vst [vmem:[#allocation3 + $0x28] sm:$0xf] %v2908_v57  ;;  %v2997_v49 = vshll.u32 %v2953_v30, 16  ;;  %v3004_v13 = vshrl.u32 %v2954_v36, 16  ;;  %v7356_v31 = vld [vmem:[#allocation2 + $0x18] sm:$0xf]  ;;  %v2911_v41 = vsel %vm6511_vm13, %v2909_v25, %v2910_v2 }
  0xea   : > { %5787 = vmatpush3.bf16.msra.mxu0 %v6079_v15  ;;  %v3786_v38 = vsel %vm6481_vm11, %v3777_v16, %v7339_v20  ;;  %v3007_v26 = vshll.u32 %v2954_v36, 16  ;;  %v3975_v34 = vrot.slane %v7266_v1, 4  ;;  %v3977_v12 = vshrl.u32 %v3939_v21, 16  ;;  %v6082_v32 = vld [vmem:[%s7883_s1 + $0x360] sm:$0xff]   ;;  %2943 = vst [vmem:[#allocation3 + $0x38] sm:$0xf] %v2911_v41 }
  0xeb   : > { %v2996_v60 = vrot.slane %v2994_v4, 6  ;;  %v2999_v19 = vrot.slane %v2997_v49, 7  ;;  %v3006_v53 = vrot.slane %v3004_v13, 6  ;;  %v3980_v15 = vshll.u32 %v3939_v21, 16  ;;  %v6069_v1 = vld [vmem:[%s7883_s1 + $0x388] sm:$0xff]   ;;  %5788 = vmatprep.subr.bf16.mxu0 %v6082_v32  ;;  %v6073_v13 = vld [vmem:[%s7883_s1 + $0x390] sm:$0xff]  }
  0xec   : > { %v3009_v52 = vrot.slane %v3007_v26, 7  ;;  %v3979_v37 = vrot.slane %v3977_v12, 6  ;;  %v3987_v11 = vshrl.u32 %v3940_v54, 16  ;;  %v3990_v30 = vshll.u32 %v3940_v54, 16  ;;  %v7413_v12 = vld [vmem:[#allocation2 + $0x1c] sm:$0xf] }
  0xed   : > { %v3096_v5 = vld [vmem:[#allocation3 + $0x20] sm:$0xff]  ;;  %v3000_v46 = vor.u32 %v2999_v19, %v2996_v60  ;;  %v4107_v36 = vrot.slane %v4105_v18, 4  ;;  %v4108_v29 = vrot.slane %v4078_v39, 7  ;;  %v3982_v21 = vrot.slane %v3980_v15, 7  ;;  %v6090_v59 = vld [vmem:[%s7883_s1 + $0x368] sm:$0xff]  }
  0xee   : > { %3582 = vmatmul.mubr.bf16.vlgmr.msra.gmra.mrb[40].mxu1 %v5156_v0  ;;  %v7380_v16 = vor.u32 %v3009_v52, %v3006_v53  ;;  %v3989_v57 = vrot.slane %v3987_v11, 6  ;;  %v4111_v25 = vrot.slane %v7356_v31, 7  ;;  %v3992_v54 = vrot.slane %v3990_v30, 7  ;;  %3855 = vst [vmem:[#allocation3 + $0x20] sm:$0xf] %v3776_v40  ;;  %5789 = vmatpush3.bf16.msra.mxu0 %v6083_v51 }
  0xef   : > { %5827 = vmatpush3.bf16.msra.mxu1 %v6061_v10  ;;  %v3098_v14 = vld [vmem:[#allocation3 + $0x30] sm:$0xff]  ;;  %v3001_v48 = vsel %vm7231_vm12, %v2992_v23, %v3000_v46  ;;  %v3002_v18 = vrot.slane %v3000_v46, 4  ;;  %v6072_v10 = vld [vmem:[%s7883_s1 + $0x3d0] sm:$0xff]   ;;  %v3983_v39 = vor.u32 %v3982_v21, %v3979_v37  ;;  %v4110_v4 = vrot.slane %v4108_v29, 4  ;;  %v2747_v60 = vld [vmem:[#allocation2 + $0x18] sm:$0xf]  ;;  %5790 = vmatprep.subr.bf16.mxu0 %v6090_v59 }
  0xf0   : > { %5828 = vmatprep.subr.bf16.mxu1 %v6064_v58  ;;  %v6065_v0 = vld [vmem:[#allocation3 + $0x24] ss:$16 sps:$4 sm:$0xff]   ;;  %3856 = vst [vmem:[#allocation3 + $0x30] sm:$0xf] %v3786_v38  ;;  %3084 = vst [vmem:[#allocation3 + $0x2c] sm:$0xf] %v3001_v48  ;;  %v5158_v49 = vcombine.low %v3096_v5, %v3098_v14  ;;  %v7400_v58 = vor.u32 %v3992_v54, %v3989_v57 }
  0xf1   : > { %3928 = vst [vmem:[#allocation3 + $0x24] sm:$0xf] %v7334_v42  ;;  %3929 = vst [vmem:[#allocation3 + $0x34] sm:$0xf] %v3897_v50  ;;  %v2706_v23 = vrot.slane %v2704_v55, 4  ;;  %3516 = vmatprep.mubr.bf16.mxu0 %v6065_v0  ;;  %v3011_v40 = vsel %vm7231_vm12, %v3002_v18, %v7380_v16  ;;  %v4109_v42 = vsel %vm7259_vm14, %v4107_v36, %v4108_v29  ;;  %v6080_v38 = vld [vmem:[%s7883_s1 + $0x3d8] sm:$0xff]  }
  0xf2   : > { %v2678_v50 = vld [vmem:[#allocation2 + $0x18] sm:$0xf]  ;;  %3085 = vst [vmem:[#allocation3 + $0x3c] sm:$0xf] %v3011_v40  ;;  %v3984_v6 = vsel %vm7231_vm12, %v3975_v34, %v3983_v39  ;;  %v3985_v55 = vrot.slane %v3983_v39, 4  ;;  %v4112_v26 = vsel %vm7259_vm14, %v4110_v4, %v4111_v25  ;;  %3517 = vmatmul.mubr.bf16.gmra.mrb[44].mxu0 %v5158_v49  ;;  %v2710_v19 = vrot.slane %v7413_v12, 5 }
  0xf3   : > { %5829 = vmatpush3.bf16.msra.mxu1 %v6069_v1  ;;  %v2707_v41 = vrot.slane %v2678_v50, 5  ;;  %v2748_v53 = vld [vmem:[#allocation2 + $0x1c] sm:$0xf]  ;;  %v2801_v32 = vrot.slane %v7318_v35, 4  ;;  %v2803_v52 = vshrl.u32 %v2747_v60, 16  ;;  %v2806_v34 = vshll.u32 %v2747_v60, 16 }
  0xf4   : > { %5830 = vmatprep.subr.bf16.mxu1 %v6072_v10  ;;  %v3994_v37 = vsel %vm7231_vm12, %v3985_v55, %v7400_v58  ;;  %v2813_v1 = vshrl.u32 %v2748_v53, 16  ;;  %v3733_v5 = vld [vmem:[#allocation2 + $0x18] sm:$0xf]  ;;  %v3734_v46 = vld [vmem:[#allocation2 + $0x1c] sm:$0xf]  ;;  %v2816_v29 = vshll.u32 %v2748_v53, 16 }
  0xf5   : > { %v2708_v15 = vsel %vm6433_vm7, %v2706_v23, %v2707_v41  ;;  %v2709_v11 = vrot.slane %v2707_v41, 4  ;;  %v2805_v30 = vrot.slane %v2803_v52, 5  ;;  %v2808_v36 = vrot.slane %v2806_v34, 6  ;;  %v3868_v35 = vld [vmem:[#allocation2 + $0x18] sm:$0xf]  ;;  %v6084_v18 = vld [vmem:[%s7883_s1 + $0x3e0] sm:$0xff]  }
  0xf6   : > { %2736 = vst [vmem:[#allocation3 + $0x40] sm:$0xf] %v2708_v15  ;;  %v3787_v21 = vrot.slane %v7339_v20, 4  ;;  %v2815_v51 = vrot.slane %v2813_v1, 5  ;;  %v3789_v14 = vshrl.u32 %v3733_v5, 16  ;;  %v3792_v0 = vshll.u32 %v3733_v5, 16 }
  0xf7   : > { %5831 = vmatpush3.bf16.msra.mxu1 %v6073_v13  ;;  %v2711_v57 = vsel %vm6433_vm7, %v2709_v11, %v2710_v19  ;;  %v6081_v48 = vld [vmem:[%s7883_s1 + $0x398] sm:$0xff]   ;;  %v2809_v20 = vor.u32 %v2808_v36, %v2805_v30  ;;  %v2818_v10 = vrot.slane %v2816_v29, 6  ;;  %v3799_v39 = vshrl.u32 %v3734_v46, 16  ;;  %v6085_v41 = vld [vmem:[%s7883_s1 + $0x3a0] sm:$0xff]   ;;  %v6091_v30 = vld [vmem:[%s7883_s1 + $0x328] sm:$0xff]  }
  0xf8   : > { %v3097_v54 = vld [vmem:[#allocation3 + $0x28] sm:$0xff]  ;;  %2737 = vst [vmem:[#allocation3 + $0x50] sm:$0xf] %v2711_v57  ;;  %v3802_v4 = vshll.u32 %v3734_v46, 16  ;;  %5832 = vmatprep.subr.bf16.mxu1 %v6080_v38  ;;  %v3791_v13 = vrot.slane %v3789_v14, 5  ;;  %v3794_v23 = vrot.slane %v3792_v0, 6  ;;  %5791 = vmatpush3.bf16.msra.mxu0 %v6091_v30 }
  0xf9   : > { %v7433_v49 = vld [vmem:[#allocation2 + $0x1c] sm:$0xf]  ;;  %v3898_v40 = vrot.slane %v3896_v45, 4  ;;  %v3899_v50 = vrot.slane %v3868_v35, 6  ;;  %v3099_v60 = vld [vmem:[#allocation3 + $0x38] sm:$0xff]  ;;  %v2810_v52 = vsel %vm6481_vm11, %v2801_v32, %v2809_v20  ;;  %v2811_v34 = vrot.slane %v2809_v20, 4 }
  0xfa   : > { %v2882_v55 = vld [vmem:[#allocation2 + $0x1c] sm:$0xf]  ;;  %v6067_v53 = vld [vmem:[#allocation3 + $0x2c] ss:$16 sps:$4 sm:$0xff]   ;;  %v7442_v15 = vor.u32 %v2818_v10, %v2815_v51  ;;  %v3801_v38 = vrot.slane %v3799_v39, 5  ;;  %v5160_v45 = vcombine.low %v3097_v54, %v3099_v60  ;;  %v3795_v11 = vor.u32 %v3794_v23, %v3791_v13  ;;  %v6092_v36 = vld [vmem:[%s7883_s1 + $0x3e8] sm:$0xff]  }
  0xfb   : > { %4067 = vst [vmem:[#allocation3 + $0x28] sm:$0xf] %v3984_v6  ;;  %4068 = vst [vmem:[#allocation3 + $0x38] sm:$0xf] %v3994_v37  ;;  %v3804_v1 = vrot.slane %v3802_v4, 6  ;;  %v7449_v5 = vsel %vm6511_vm13, %v3898_v40, %v3899_v50  ;;  %5833 = vmatpush3.bf16.msra.mxu1 %v6081_v48  ;;  %3589 = vmatprep.mubr.bf16.mxu1 %v6067_v53  ;;  %v3901_v6 = vrot.slane %v3899_v50, 4 }
  0xfc   : > { %4143 = vst [vmem:[#allocation3 + $0x2c] sm:$0xf] %v4109_v42  ;;  %4144 = vst [vmem:[#allocation3 + $0x3c] sm:$0xf] %v4112_v26  ;;  %v7451_v32 = vld [vmem:[#allocation2 + $0x20] sm:$0xf]  ;;  %v2820_v42 = vsel %vm6481_vm11, %v2811_v34, %v7442_v15  ;;  %5834 = vmatprep.subr.bf16.mxu1 %v6084_v18  ;;  %3590 = vmatmul.mubr.bf16.gmra.mrb[44].mxu1 %v5160_v45  ;;  %v3796_v29 = vsel %vm6481_vm11, %v3787_v21, %v3795_v11 }
  0xfd   : > { %2871 = vst [vmem:[#allocation3 + $0x44] sm:$0xf] %v2810_v52  ;;  %v2955_v46 = vld [vmem:[#allocation2 + $0x1c] sm:$0xf]  ;;  %v3902_v26 = vrot.slane %v7433_v49, 6  ;;  %v2912_v37 = vrot.slane %v2910_v2, 4  ;;  %v7467_v57 = vor.u32 %v3804_v1, %v3801_v38 }
  0xfe   : > { %2872 = vst [vmem:[#allocation3 + $0x54] sm:$0xf] %v2820_v42  ;;  %v3797_v35 = vrot.slane %v3795_v11, 4  ;;  %v2913_v51 = vrot.slane %v2882_v55, 6  ;;  %v2956_v14 = vld [vmem:[#allocation2 + $0x20] sm:$0xf] }
  0xff   : > { %v3941_v0 = vld [vmem:[#allocation2 + $0x1c] sm:$0xf]  ;;  %v3903_v43 = vsel %vm6511_vm13, %v3901_v6, %v3902_v26  ;;  %v2916_v2 = vrot.slane %v7451_v32, 6  ;;  %v3012_v48 = vrot.slane %v7380_v16, 4  ;;  %v3014_v18 = vshrl.u32 %v2955_v46, 16  ;;  %v6093_v21 = vld [vmem:[%s7883_s1 + $0x3a8] sm:$0xff]   ;;  %5835 = vmatpush3.bf16.msra.mxu1 %v6085_v41 }
 0x100   : > { %v3942_v54 = vld [vmem:[#allocation2 + $0x20] sm:$0xf]  ;;  %v3806_v20 = vsel %vm6481_vm11, %v3797_v35, %v7467_v57  ;;  %v2914_v10 = vsel %vm6511_vm13, %v2912_v37, %v2913_v51  ;;  %v2915_v39 = vrot.slane %v2913_v51, 4  ;;  %v3017_v4 = vshll.u32 %v2955_v46, 16  ;;  %v4080_v13 = vld [vmem:[#allocation2 + $0x1c] sm:$0xf]  ;;  %5836 = vmatprep.subr.bf16.mxu1 %v6092_v36 }
 0x101   : > { %2944 = vst [vmem:[#allocation3 + $0x48] sm:$0xf] %v2914_v10  ;;  %v3016_v16 = vrot.slane %v3014_v18, 6  ;;  %v3024_v23 = vshrl.u32 %v2956_v14, 16  ;;  %v3027_v40 = vshll.u32 %v2956_v14, 16  ;;  %v3995_v50 = vrot.slane %v7400_v58, 4 }
 0x102   : > { %v7484_v55 = vld [vmem:[#allocation2 + $0x20] sm:$0xf]  ;;  %v2917_v60 = vsel %vm6511_vm13, %v2915_v39, %v2916_v2  ;;  %v3019_v53 = vrot.slane %v3017_v4, 7  ;;  %v3997_v52 = vshrl.u32 %v3941_v0, 16  ;;  %v4000_v34 = vshll.u32 %v3941_v0, 16  ;;  %v6094_v41 = vld [vmem:[%s7883_s1 + $0x370] sm:$0xff]  }
 0x103   : > { %2945 = vst [vmem:[#allocation3 + $0x58] sm:$0xf] %v2917_v60  ;;  %v3026_v59 = vrot.slane %v3024_v23, 6  ;;  %v3029_v45 = vrot.slane %v3027_v40, 7  ;;  %v4007_v58 = vshrl.u32 %v3942_v54, 16  ;;  %v4010_v11 = vshll.u32 %v3942_v54, 16  ;;  %5837 = vmatpush3.bf16.msra.mxu1 %v6093_v21  ;;  %5792 = vmatprep.subr.bf16.mxu0 %v6094_v41 }
 0x104   : > { %v3100_v38 = vld [vmem:[#allocation3 + $0x40] sm:$0xff]  ;;  %v3020_v46 = vor.u32 %v3019_v53, %v3016_v16  ;;  %v3999_v30 = vrot.slane %v3997_v52, 6  ;;  %v4002_v42 = vrot.slane %v4000_v34, 7  ;;  %v4113_v6 = vrot.slane %v4111_v25, 4  ;;  %v2680_v12 = vld [vmem:[#allocation2 + $0x20] sm:$0xf] }
 0x105   : > { %v6095_v1 = vld [vmem:[%s7883_s1 + $0x330] sm:$0xff]   ;;  %v3102_v36 = vld [vmem:[#allocation3 + $0x50] sm:$0xff]  ;;  %v7501_v51 = vor.u32 %v3029_v45, %v3026_v59  ;;  %v4009_v14 = vrot.slane %v4007_v58, 6  ;;  %v4012_v0 = vrot.slane %v4010_v11, 7  ;;  %v4114_v18 = vrot.slane %v4080_v13, 7 }
 0x106   : > { %v6100_v37 = vld [vmem:[%s7883_s1 + $0x3f0] sm:$0xff]   ;;  %v6075_v35 = vld [vmem:[#allocation3 + $0x44] ss:$16 sps:$4 sm:$0xff]   ;;  %5793 = vmatpush3.bf16.msra.mxu0 %v6095_v1  ;;  %3857 = vst [vmem:[#allocation3 + $0x40] sm:$0xf] %v3796_v29  ;;  %v3021_v31 = vsel %vm7231_vm12, %v3012_v48, %v3020_v46  ;;  %v3022_v25 = vrot.slane %v3020_v46, 4  ;;  %v4003_v54 = vor.u32 %v4002_v42, %v3999_v30  ;;  %v5162_v4 = vcombine.low %v3100_v38, %v3102_v36 }
 0x107   : > { %3858 = vst [vmem:[#allocation3 + $0x50] sm:$0xf] %v3806_v20  ;;  %3930 = vst [vmem:[#allocation3 + $0x44] sm:$0xf] %v7449_v5  ;;  %v4117_v21 = vrot.slane %v7484_v55, 7  ;;  %5838 = vmatprep.subr.bf16.mxu1 %v6100_v37  ;;  %3524 = vmatprep.mubr.bf16.mxu0 %v6075_v35  ;;  %v7507_v10 = vor.u32 %v4012_v0, %v4009_v14  ;;  %v4116_v39 = vrot.slane %v4114_v18, 4 }
 0x108   : > { %3931 = vst [vmem:[#allocation3 + $0x54] sm:$0xf] %v3903_v43  ;;  %3086 = vst [vmem:[#allocation3 + $0x4c] sm:$0xf] %v3021_v31  ;;  %v6101_v29 = vld [vmem:[%s7883_s1 + $0x3b0] sm:$0xff]   ;;  %v3031_v5 = vsel %vm7231_vm12, %v3022_v25, %v7501_v51  ;;  %v4005_v43 = vrot.slane %v4003_v54, 4  ;;  %3525 = vmatmul.mubr.bf16.gmra.mrb[48].mxu0 %v5162_v4  ;;  %v4004_v20 = vsel %vm7231_vm12, %v3995_v50, %v4003_v54 }
 0x109   : > { %v2712_v48 = vrot.slane %v2710_v19, 4  ;;  %3087 = vst [vmem:[#allocation3 + $0x5c] sm:$0xf] %v3031_v5  ;;  %5839 = vmatpush3.bf16.msra.mxu1 %v6101_v29  ;;  %v4115_v16 = vsel %vm7259_vm14, %v4113_v6, %v4114_v18  ;;  %v4118_v23 = vsel %vm7259_vm14, %v4116_v39, %v4117_v21  ;;  %v7528_v19 = vld [vmem:[#allocation2 + $0x24] sm:$0xf]  ;;  %v2713_v60 = vrot.slane %v2680_v12, 5 }
 0x10a   : > { %v4014_v13 = vsel %vm7231_vm12, %v4005_v43, %v7507_v10  ;;  %v2749_v40 = vld [vmem:[#allocation2 + $0x20] sm:$0xf]  ;;  %v2716_v53 = vrot.slane %v7528_v19, 5  ;;  %v2750_v50 = vld [vmem:[#allocation2 + $0x24] sm:$0xf]  ;;  %v2821_v52 = vrot.slane %v7442_v15, 4 }
 0x10b   : > { %v2823_v34 = vshrl.u32 %v2749_v40, 16  ;;  %v2826_v41 = vshll.u32 %v2749_v40, 16  ;;  %v2833_v38 = vshrl.u32 %v2750_v50, 16  ;;  %v2836_v59 = vshll.u32 %v2750_v50, 16  ;;  %v3735_v45 = vld [vmem:[#allocation2 + $0x20] sm:$0xf] }
 0x10c   : > { %v3807_v58 = vrot.slane %v7467_v57, 4  ;;  %v2714_v11 = vsel %vm6433_vm7, %v2712_v48, %v2713_v60  ;;  %v2715_v1 = vrot.slane %v2713_v60, 4  ;;  %v3736_v30 = vld [vmem:[#allocation2 + $0x24] sm:$0xf]  ;;  %v3809_v42 = vshrl.u32 %v3735_v45, 16  ;;  %v6102_v6 = vld [vmem:[%s7883_s1 + $0x378] sm:$0xff]  }
 0x10d   : > { %v2825_v46 = vrot.slane %v2823_v34, 5  ;;  %2738 = vst [vmem:[#allocation3 + $0x60] sm:$0xf] %v2714_v11  ;;  %v2828_v15 = vrot.slane %v2826_v41, 6  ;;  %v2835_v36 = vrot.slane %v2833_v38, 5  ;;  %v2838_v35 = vrot.slane %v2836_v59, 6  ;;  %5794 = vmatprep.subr.bf16.mxu0 %v6102_v6 }
 0x10e   : > { %v3812_v14 = vshll.u32 %v3735_v45, 16  ;;  %v6103_v57 = vld [vmem:[%s7883_s1 + $0x338] sm:$0xff]   ;;  %v2717_v0 = vsel %vm6433_vm7, %v2715_v1, %v2716_v53  ;;  %v3811_v18 = vrot.slane %v3809_v42, 5  ;;  %v3819_v31 = vshrl.u32 %v3736_v30, 16  ;;  %v3870_v54 = vld [vmem:[#allocation2 + $0x20] sm:$0xf] }
 0x10f   : > { %v3101_v37 = vld [vmem:[#allocation3 + $0x48] sm:$0xff]  ;;  %v3822_v25 = vshll.u32 %v3736_v30, 16  ;;  %2739 = vst [vmem:[#allocation3 + $0x70] sm:$0xf] %v2717_v0  ;;  %v2829_v5 = vor.u32 %v2828_v15, %v2825_v46  ;;  %v7548_v43 = vor.u32 %v2838_v35, %v2835_v36  ;;  %v7550_v12 = vld [vmem:[#allocation2 + $0x24] sm:$0xf]  ;;  %5795 = vmatpush3.bf16.msra.mxu0 %v6103_v57 }
 0x110   : > { %v6104_v39 = vld [vmem:[%s7883_s1 + $0x3f8] sm:$0xff]   ;;  %v3103_v4 = vld [vmem:[#allocation3 + $0x58] sm:$0xff]  ;;  %v3814_v48 = vrot.slane %v3812_v14, 6  ;;  %4069 = vst [vmem:[#allocation3 + $0x48] sm:$0xf] %v4004_v20  ;;  %v3821_v60 = vrot.slane %v3819_v31, 5 }
 0x111   : > { %v6077_v29 = vld [vmem:[#allocation3 + $0x4c] ss:$16 sps:$4 sm:$0xff]   ;;  %4070 = vst [vmem:[#allocation3 + $0x58] sm:$0xf] %v4014_v13  ;;  %v5164_v40 = vcombine.low %v3101_v37, %v3103_v4  ;;  %v3824_v50 = vrot.slane %v3822_v25, 6  ;;  %v3904_v34 = vrot.slane %v3902_v26, 4  ;;  %5840 = vmatprep.subr.bf16.mxu1 %v6104_v39  ;;  %v2830_v59 = vsel %vm6481_vm11, %v2821_v52, %v2829_v5 }
 0x112   : > { %4145 = vst [vmem:[#allocation3 + $0x4c] sm:$0xf] %v4115_v16  ;;  %4146 = vst [vmem:[#allocation3 + $0x5c] sm:$0xf] %v4118_v23  ;;  %v2884_v41 = vld [vmem:[#allocation2 + $0x24] sm:$0xf]  ;;  %3597 = vmatprep.mubr.bf16.mxu1 %v6077_v29  ;;  %v3815_v13 = vor.u32 %v3814_v48, %v3811_v18 }
 0x113   : > { %v6105_v38 = vld [vmem:[%s7883_s1 + $0x3b8] sm:$0xff]   ;;  %v2831_v20 = vrot.slane %v2829_v5, 4  ;;  %v3905_v16 = vrot.slane %v3870_v54, 6  ;;  %v7559_v23 = vld [vmem:[#allocation2 + $0x28] sm:$0xf]  ;;  %3598 = vmatmul.mubr.bf16.gmra.mrb[48].mxu1 %v5164_v40  ;;  %v7561_v45 = vor.u32 %v3824_v50, %v3821_v60  ;;  %v3908_v49 = vrot.slane %v7550_v12, 6 }
 0x114   : > { %2873 = vst [vmem:[#allocation3 + $0x64] sm:$0xf] %v2830_v59  ;;  %v2918_v26 = vrot.slane %v2916_v2, 4  ;;  %v2919_v11 = vrot.slane %v2884_v41, 6  ;;  %v2957_v1 = vld [vmem:[#allocation2 + $0x24] sm:$0xf]  ;;  %v3816_v46 = vsel %vm6481_vm11, %v3807_v58, %v3815_v13  ;;  %5841 = vmatpush3.bf16.msra.mxu1 %v6105_v38 }
 0x115   : > { %v2840_v52 = vsel %vm6481_vm11, %v2831_v20, %v7548_v43  ;;  %v3817_v30 = vrot.slane %v3815_v13, 4  ;;  %v2958_v42 = vld [vmem:[#allocation2 + $0x28] sm:$0xf]  ;;  %v3943_v6 = vld [vmem:[#allocation2 + $0x24] sm:$0xf]  ;;  %v3907_v37 = vrot.slane %v3905_v16, 4  ;;  %v3906_v35 = vsel %vm6511_vm13, %v3904_v34, %v3905_v16 }
 0x116   : > { %2874 = vst [vmem:[#allocation3 + $0x74] sm:$0xf] %v2840_v52  ;;  %v2920_v15 = vsel %vm6511_vm13, %v2918_v26, %v2919_v11  ;;  %v2921_v32 = vrot.slane %v2919_v11, 4  ;;  %v2922_v2 = vrot.slane %v7559_v23, 6  ;;  %v3944_v36 = vld [vmem:[#allocation2 + $0x28] sm:$0xf] }
 0x117   : > { %2946 = vst [vmem:[#allocation3 + $0x68] sm:$0xf] %v2920_v15  ;;  %v3032_v14 = vrot.slane %v7501_v51, 4  ;;  %v3034_v58 = vshrl.u32 %v2957_v1, 16  ;;  %v3037_v57 = vshll.u32 %v2957_v1, 16  ;;  %v3826_v18 = vsel %vm6481_vm11, %v3817_v30, %v7561_v45 }
 0x118   : > { %v4082_v0 = vld [vmem:[#allocation2 + $0x24] sm:$0xf]  ;;  %v2923_v31 = vsel %vm6511_vm13, %v2921_v32, %v2922_v2  ;;  %v3044_v25 = vshrl.u32 %v2958_v42, 16  ;;  %v3047_v54 = vshll.u32 %v2958_v42, 16  ;;  %v3909_v39 = vsel %vm6511_vm13, %v3907_v37, %v3908_v49  ;;  %v7588_v5 = vld [vmem:[#allocation2 + $0x28] sm:$0xf] }
 0x119   : > { %2947 = vst [vmem:[#allocation3 + $0x78] sm:$0xf] %v2923_v31  ;;  %v3036_v51 = vrot.slane %v3034_v58, 6  ;;  %v3039_v4 = vrot.slane %v3037_v57, 7  ;;  %v4017_v29 = vshrl.u32 %v3943_v6, 16  ;;  %v4020_v60 = vshll.u32 %v3943_v6, 16 }
 0x11a   : > { %v3046_v48 = vrot.slane %v3044_v25, 6  ;;  %v3049_v40 = vrot.slane %v3047_v54, 7  ;;  %v4027_v50 = vshrl.u32 %v3944_v36, 16  ;;  %v4015_v38 = vrot.slane %v7507_v10, 4  ;;  %v2751_v57 = vld [vmem:[#allocation2 + $0x28] sm:$0xf] }
 0x11b   : > { %v3104_v34 = vld [vmem:[#allocation3 + $0x60] sm:$0xff]  ;;  %v3040_v41 = vor.u32 %v3039_v4, %v3036_v51  ;;  %v4019_v59 = vrot.slane %v4017_v29, 6  ;;  %v4030_v20 = vshll.u32 %v3944_v36, 16  ;;  %v4022_v16 = vrot.slane %v4020_v60, 7  ;;  %v2682_v36 = vld [vmem:[#allocation2 + $0x28] sm:$0xf] }
 0x11c   : > { %v7591_v13 = vor.u32 %v3049_v40, %v3046_v48  ;;  %v4119_v26 = vrot.slane %v4117_v21, 4  ;;  %v4120_v11 = vrot.slane %v4082_v0, 7  ;;  %v4029_v6 = vrot.slane %v4027_v50, 6  ;;  %3859 = vst [vmem:[#allocation3 + $0x60] sm:$0xf] %v3816_v46 }
 0x11d   : > { %v3106_v1 = vld [vmem:[#allocation3 + $0x70] sm:$0xff]  ;;  %v3041_v30 = vsel %vm7231_vm12, %v3032_v14, %v3040_v41  ;;  %v3042_v42 = vrot.slane %v3040_v41, 4  ;;  %v4032_v37 = vrot.slane %v4030_v20, 7  ;;  %v4023_v10 = vor.u32 %v4022_v16, %v4019_v59  ;;  %v2752_v0 = vld [vmem:[#allocation2 + $0x2c] sm:$0x1] }
 0x11e   : > { %v6086_v52 = vld [vmem:[#allocation3 + $0x64] ss:$16 sps:$4 sm:$0xff]   ;;  %3860 = vst [vmem:[#allocation3 + $0x70] sm:$0xf] %v3826_v18  ;;  %3088 = vst [vmem:[#allocation3 + $0x6c] sm:$0xf] %v3041_v30  ;;  %v5166_v32 = vcombine.low %v3104_v34, %v3106_v1  ;;  %v4121_v18 = vsel %vm7259_vm14, %v4119_v26, %v4120_v11 }
 0x11f   : > { %3932 = vst [vmem:[#allocation3 + $0x64] sm:$0xf] %v3906_v35  ;;  %3933 = vst [vmem:[#allocation3 + $0x74] sm:$0xf] %v3909_v39  ;;  %v4123_v15 = vrot.slane %v7588_v5, 7  ;;  %3532 = vmatprep.mubr.bf16.mxu0 %v6086_v52  ;;  %v3051_v55 = vsel %vm7231_vm12, %v3042_v42, %v7591_v13  ;;  %v4122_v21 = vrot.slane %v4120_v11, 4  ;;  %v7603_v35 = vor.u32 %v4032_v37, %v4029_v6 }
 0x120   : > { %3089 = vst [vmem:[#allocation3 + $0x7c] sm:$0xf] %v3051_v55  ;;  %3533 = vmatmul.mubr.bf16.gmra.mrb[52].mxu0 %v5166_v32  ;;  %v2718_v46 = vrot.slane %v2716_v53, 4  ;;  %v4025_v14 = vrot.slane %v4023_v10, 4  ;;  %v2719_v58 = vrot.slane %v2682_v36, 5  ;;  %v2843_v31 = vshrl.u32 %v2751_v57, 16 }
 0x121   : > { %v2846_v25 = vshll.u32 %v2751_v57, 16  ;;  %v2853_v54 = vshll.u32 %v2752_v0, 16  ;;  %v3737_v39 = vld [vmem:[#allocation2 + $0x28] sm:$0xf]  ;;  %v4024_v51 = vsel %vm7231_vm12, %v4015_v38, %v4023_v10  ;;  %v3738_v4 = vld [vmem:[#allocation2 + $0x2c] sm:$0x1]  ;;  %v4124_v28 = vsel %vm7259_vm14, %v4122_v21, %v4123_v15 }
 0x122   : > { %v2720_v19 = vsel %vm6433_vm7, %v2718_v46, %v2719_v58  ;;  %v2721_v53 = vrot.slane %v2719_v58, 4  ;;  %v3829_v29 = vshrl.u32 %v3737_v39, 16  ;;  %v2841_v48 = vrot.slane %v7548_v43, 4  ;;  %v3872_v34 = vld [vmem:[#allocation2 + $0x28] sm:$0xf] }
 0x123   : > { %2740 = vst [vmem:[#allocation3 + $0x80] sm:$0xf] %v2720_v19  ;;  %v2845_v40 = vrot.slane %v2843_v31, 5  ;;  %v2848_v60 = vrot.slane %v2846_v25, 6  ;;  %v3832_v50 = vshll.u32 %v3737_v39, 16  ;;  %v4034_v59 = vsel %vm7231_vm12, %v4025_v14, %v7603_v35 }
 0x124   : > { %2741 = vst [vmem:[#allocation3 + $0x90] sm:$0x7] %v2721_v53  ;;  %v2855_v38 = vrot.slane %v2853_v54, 6  ;;  %v3831_v20 = vrot.slane %v3829_v29, 5  ;;  %v3873_v16 = vld [vmem:[#allocation2 + $0x2c] sm:$0x1] }
 0x125   : > { %v3105_v41 = vld [vmem:[#allocation3 + $0x68] sm:$0xff]  ;;  %v2849_v43 = vor.u32 %v2848_v60, %v2845_v40  ;;  %v3834_v26 = vrot.slane %v3832_v50, 6  ;;  %v3839_v11 = vshll.u32 %v3738_v4, 16  ;;  %v3911_v1 = vrot.slane %v3872_v34, 6  ;;  %v222_v52 = vld [vmem:[%s6291_s11 + $0x30] sm:$0x3] }
 0x126   : > { %v3827_v6 = vrot.slane %v7561_v45, 4  ;;  %v587_v37 = vsel %vm6312_vm1, 0, %v222_v52  ;;  %v2924_v10 = vrot.slane %v2922_v2, 4  ;;  %4071 = vst [vmem:[#allocation3 + $0x68] sm:$0xf] %v4024_v51  ;;  %v3910_v44 = vrot.slane %v3908_v49, 4 }
 0x127   : > { %v3107_v30 = vld [vmem:[#allocation3 + $0x78] sm:$0xff]  ;;  %v2850_v55 = vsel %vm6481_vm11, %v2841_v48, %v2849_v43  ;;  %v2851_v21 = vrot.slane %v2849_v43, 4  ;;  %v3835_v36 = vor.u32 %v3834_v26, %v3831_v20  ;;  %600 = vst [vmem:[#allocation2 + $0x30] sm:$0x3] %v587_v37  ;;  %v3914_v23 = vrot.slane %v3873_v16, 6 }
 0x128   : > { %v6088_v42 = vld [vmem:[#allocation3 + $0x6c] ss:$16 sps:$4 sm:$0xff]   ;;  %4072 = vst [vmem:[#allocation3 + $0x78] sm:$0xf] %v4034_v59  ;;  %v5168_v32 = vcombine.low %v3105_v41, %v3107_v30  ;;  %v2886_v46 = vld [vmem:[#allocation2 + $0x2c] sm:$0xf]  ;;  %v3912_v53 = vsel %vm6511_vm13, %v3910_v44, %v3911_v1 }
 0x129   : > { %4147 = vst [vmem:[#allocation3 + $0x6c] sm:$0xf] %v4121_v18  ;;  %4148 = vst [vmem:[#allocation3 + $0x7c] sm:$0xf] %v4124_v28  ;;  %v2959_v14 = vld [vmem:[#allocation2 + $0x2c] sm:$0xf]  ;;  %3605 = vmatprep.mubr.bf16.mxu1 %v6088_v42  ;;  %v2856_v58 = vsel %vm6481_vm11, %v2851_v21, %v2855_v38  ;;  %v3836_v29 = vsel %vm6481_vm11, %v3827_v6, %v3835_v36 }
 0x12a   : > { %2875 = vst [vmem:[#allocation3 + $0x84] sm:$0xf] %v2850_v55  ;;  %v2925_v45 = vrot.slane %v2886_v46, 6  ;;  %v3945_v2 = vld [vmem:[#allocation2 + $0x2c] sm:$0xf]  ;;  %3606 = vmatmul.mubr.bf16.gmra.mrb[52].mxu1 %v5168_v32  ;;  %v3841_v57 = vrot.slane %v3839_v11, 6 }
 0x12b   : > { %v3913_v0 = vrot.slane %v3911_v1, 4  ;;  %v3054_v18 = vshrl.u32 %v2959_v14, 16  ;;  %2876 = vst [vmem:[#allocation3 + $0x94] sm:$0x7] %v2856_v58  ;;  %v3837_v31 = vrot.slane %v3835_v36, 4  ;;  %v3057_v54 = vshll.u32 %v2959_v14, 16 }
 0x12c   : > { %v2926_v25 = vsel %vm6511_vm13, %v2924_v10, %v2925_v45  ;;  %v4037_v12 = vshrl.u32 %v3945_v2, 16  ;;  %v3052_v49 = vrot.slane %v7591_v13, 4  ;;  %v4040_v19 = vshll.u32 %v3945_v2, 16  ;;  %v4084_v13 = vld [vmem:[#allocation2 + $0x2c] sm:$0xf] }
 0x12d   : > { %2948 = vst [vmem:[#allocation3 + $0x88] sm:$0xf] %v2926_v25  ;;  %v3056_v39 = vrot.slane %v3054_v18, 6  ;;  %v3059_v51 = vrot.slane %v3057_v54, 7  ;;  %v2927_v4 = vrot.slane %v2925_v45, 4  ;;  %v3842_v48 = vsel %vm6481_vm11, %v3837_v31, %v3841_v57  ;;  %v5520_v18 = vpop.f32.mrb[0].mxu0 }
 0x12e   : > { %v3915_v40 = vsel %vm6511_vm13, %v3913_v0, %v3914_v23  ;;  %v2887_v60 = vld [vmem:[#allocation2 + $0x30] sm:$0x1]  ;;  %v4039_v20 = vrot.slane %v4037_v12, 6  ;;  %v4042_v26 = vrot.slane %v4040_v19, 7  ;;  %v4126_v10 = vrot.slane %v4084_v13, 7  ;;  %v5566_v25 = vpop.f32.mrb[0].mxu1 }
 0x12f   : > { %v2960_v50 = vld [vmem:[#allocation2 + $0x30] sm:$0x3]  ;;  %v3060_v34 = vor.u32 %v3059_v51, %v3056_v39  ;;  %v2928_v59 = vrot.slane %v2887_v60, 6  ;;  %v4035_v23 = vrot.slane %v7603_v35, 4  ;;  %v4125_v45 = vrot.slane %v4123_v15, 4  ;;  %v5521_v39 = vpop.f32.mrb[1].mxu0 }
 0x130   : > { %v3946_v41 = vld [vmem:[#allocation2 + $0x30] sm:$0x3]  ;;  %v3064_v28 = vshrl.u32 %v2960_v50, 16  ;;  %v3067_v38 = vshll.u32 %v2960_v50, 16  ;;  %v4043_v21 = vor.u32 %v4042_v26, %v4039_v20  ;;  %v4128_v57 = vrot.slane %v4126_v10, 4  ;;  %v5567_v51 = vpop.f32.mrb[1].mxu1 }
 0x131   : > { %v3108_v16 = vld [vmem:[#allocation3 + $0x80] sm:$0xff]  ;;  %v3061_v43 = vsel %vm7231_vm12, %v3052_v49, %v3060_v34  ;;  %v4047_v11 = vshrl.u32 %v3946_v41, 16  ;;  %v4050_v24 = vshll.u32 %v3946_v41, 16  ;;  %v2929_v30 = vsel %vm6511_vm13, %v2927_v4, %v2928_v59  ;;  %v4085_v14 = vld [vmem:[#allocation2 + $0x30] sm:$0x3]  ;;  %v5569_v9 = vpop.f32.mrb[2].mxu1 }
 0x132   : > { %v3110_v1 = vld [vmem:[#allocation3 + $0x90] sm:$0x77]  ;;  %v3066_v42 = vrot.slane %v3064_v28, 6  ;;  %3090 = vst [vmem:[#allocation3 + $0x8c] sm:$0xf] %v3061_v43  ;;  %v3062_v6 = vrot.slane %v3060_v34, 4  ;;  %v4127_v12 = vsel %vm7259_vm14, %v4125_v45, %v4126_v10  ;;  %v5522_v49 = vadd.f32 %v5521_v39, %v5520_v18 }
 0x133   : > { %v6096_v52 = vld [vmem:[#allocation3 + $0x84] ss:$16 sps:$4 sm:$0x7f]   ;;  %3861 = vst [vmem:[#allocation3 + $0x80] sm:$0xf] %v3836_v29  ;;  %v3069_v37 = vrot.slane %v3067_v38, 7  ;;  %v5170_v32 = vcombine.low %v3108_v16, %v3110_v1  ;;  %v4044_v5 = vsel %vm7231_vm12, %v4035_v23, %v4043_v21  ;;  %v5568_v4 = vadd.f32 %v5567_v51, %v5566_v25 }
 0x134   : > { %3862 = vst [vmem:[#allocation3 + $0x90] sm:$0x7] %v3842_v48  ;;  %3934 = vst [vmem:[#allocation3 + $0x84] sm:$0xf] %v3912_v53  ;;  %3540 = vmatprep.mubr.bf16.mxu0 %v6096_v52  ;;  %v4049_v36 = vrot.slane %v4047_v11, 6  ;;  %v4052_v46 = vrot.slane %v4050_v24, 7 }
 0x135   : > { %3935 = vst [vmem:[#allocation3 + $0x94] sm:$0x7] %v3915_v40  ;;  %2949 = vst [vmem:[#allocation3 + $0x98] sm:$0x7] %v2929_v30  ;;  %v3070_v55 = vor.u32 %v3069_v37, %v3066_v42  ;;  %3541 = vmatmul.mubr.bf16.gmra.mrb[56].mxu0 %v5170_v32  ;;  %v4045_v2 = vrot.slane %v4043_v21, 4  ;;  %v4129_v0 = vrot.slane %v4085_v14, 7 }
 0x136   : > { %4567 = vmatprep.mubr.bf16.mxu0 %v6108_v3  ;;  %v4053_v58 = vor.u32 %v4052_v46, %v4049_v36  ;;  %v6106_v31 = vld [vmem:[#allocation3] ss:$16 sps:$4 sm:$0xff]   ;;  %v6112_v54 = vld [vmem:[#allocation3 + $0x24] ss:$16 sps:$4 sm:$0xff]   ;;  %v7662_v53 = vld [vmem:[%s7884_s2] ss:$0 sm:$0xff] }
 0x137   : > { %v3071_v44 = vsel %vm7231_vm12, %v3062_v6, %v3070_v55  ;;  %v4130_v35 = vsel %vm7259_vm14, %v4128_v57, %v4129_v0  ;;  %v5523_v29 = vpop.f32.mrb[2].mxu0  ;;  %v6111_v48 = vld [vmem:[#allocation3 + $0xc] ss:$16 sps:$4 sm:$0xff]   ;;  %v1391_v40 = vadd.f32 %v5522_v49, %v7662_v53  ;;  %v5570_v59 = vpop.f32.mrb[3].mxu1  ;;  %v6116_v11 = vld [vmem:[#allocation3 + $0x20] ss:$16 sps:$4 sm:$0xff]  }
 0x138   : > { %3091 = vst [vmem:[#allocation3 + $0x9c] sm:$0x7] %v3071_v44  ;;  %v4054_v15 = vsel %vm7231_vm12, %v4045_v2, %v4053_v58  ;;  %v7666_v60 = vmul.u32.u64.low 3435973837, %v6267_v27  ;;  %v7667_v50 = vmul.u32.u64.high 3435973837, %v6267_v27, %v7666_v60  ;;  %v5524_v34 = vpop.f32.mrb[3].mxu0  ;;  %v5571_v20 = vadd.f32 %v5570_v59, %v5569_v9 }
 0x139   : > { %v3109_v19 = vld [vmem:[#allocation3 + $0x88] sm:$0xff]  ;;  %v5525_v13 = vadd.f32 %v5524_v34, %v5523_v29  ;;  %v1464_v38 = vadd.f32 %v5568_v4, %v1391_v40  ;;  %v5526_v16 = vpop.f32.mrb[4].mxu0  ;;  %v6118_v30 = vld [vmem:[#allocation3 + $0x44] ss:$16 sps:$4 sm:$0xff]   ;;  %vm602_vm1 = vcmp.lt.s32.totalorder %v6337_v7, 8  ;;  %vm603_vm7 = vcmp.lt.s32.totalorder %v6339_v8, 8 }
 0x13a   : > { %4073 = vst [vmem:[#allocation3 + $0x88] sm:$0xf] %v4044_v5  ;;  %v5527_v26 = vpop.f32.mrb[5].mxu0  ;;  %v243_v24 = vshrl.u32 %v7667_v50, 3  ;;  %v6109_v46 = vld [vmem:[#allocation3 + $0x8] ss:$16 sps:$4 sm:$0xff]  }
 0x13b   : > { %v1394_v43 = vadd.f32 %v5525_v13, %v7662_v53  ;;  %v5528_v1 = vadd.f32 %v5527_v26, %v5526_v16  ;;  %v5529_v52 = vpop.f32.mrb[6].mxu0  ;;  %v6114_v14 = vld [vmem:[#allocation3 + $0x2c] ss:$16 sps:$4 sm:$0xff]   ;;  %v6117_v50 = vld [vmem:[#allocation3 + $0x28] ss:$16 sps:$4 sm:$0xff]  }
 0x13c   : > { %v5530_v6 = vpop.f32.mrb[7].mxu0  ;;  %v244_v37 = vmul.u32 10, %v243_v24  ;;  %v6130_v16 = vld [vmem:[#allocation3 + $0x84] ss:$16 sps:$4 sm:$0x7f]  }
 0x13d   : > { %4568 = vmatmul.mubr.bf16.vlgmr.msra.gmra.mrb[60].mxu0 %v6106_v31  ;;  %v1467_v42 = vadd.f32 %v5571_v20, %v1394_v43  ;;  %v1399_v32 = vadd.f32 %v5528_v1, %v7662_v53  ;;  %v5531_v55 = vadd.f32 %v5530_v6, %v5529_v52  ;;  %v6128_v20 = vld [vmem:[#allocation3 + $0x60] ss:$16 sps:$4 sm:$0xff]   ;;  %v6123_v26 = vld [vmem:[#allocation3 + $0x48] ss:$16 sps:$4 sm:$0xff]  }
 0x13e   : > { %4575 = vmatprep.mubr.bf16.mxu0 %v6112_v54  ;;  %v5572_v10 = vpop.f32.mrb[4].mxu1  ;;  %v245_v3 = vsub.s32 %v6267_v27, %v244_v37  ;;  %v6122_v27 = vld [vmem:[#allocation3 + $0x40] ss:$16 sps:$4 sm:$0xff]   ;;  %v6129_v1 = vld [vmem:[#allocation3 + $0x68] ss:$16 sps:$4 sm:$0xff]  }
 0x13f   : > { %v3111_v41 = vld [vmem:[#allocation3 + $0x98] sm:$0x77]  ;;  %v5412_v21 = vpack.c.bf16 %v1467_v42, %v1464_v38  ;;  %v5573_v36 = vpop.f32.mrb[5].mxu1  ;;  %v1574_v45 = vsel %vm602_vm1, %v1467_v42, 0.0  ;;  %v1402_v2 = vadd.f32 %v5531_v55, %v7662_v53 }
 0x140   : > { %v6098_v17 = vld [vmem:[#allocation3 + $0x8c] ss:$16 sps:$4 sm:$0x7f]   ;;  %4074 = vst [vmem:[#allocation3 + $0x98] sm:$0x7] %v4054_v15  ;;  %v5172_v28 = vcombine.low %v3109_v19, %v3111_v41  ;;  %v5574_v44 = vadd.f32 %v5573_v36, %v5572_v10  ;;  %v5575_v23 = vpop.f32.mrb[6].mxu1  ;;  %v1602_v51 = vmul.f32 %v1574_v45, %v1574_v45 }
 0x141   : > { %4149 = vst [vmem:[#allocation3 + $0x8c] sm:$0xf] %v4127_v12  ;;  %4150 = vst [vmem:[#allocation3 + $0x9c] sm:$0x7] %v4130_v35  ;;  %3613 = vmatprep.mubr.bf16.mxu1 %v6098_v17  ;;  %vm380_vm11 = vcmp.ne.s32.totalorder %v245_v3, 0  ;;  %vm393_vm13 = vcmp.lt.s32.totalorder %v245_v3, 0 }
 0x142   : > { %3614 = vmatmul.mubr.bf16.gmra.mrb[56].mxu1 %v5172_v28  ;;  %5413 = vst [vmem:[%s6222_s20] sm:$0xff] %v5412_v21   ;;  %v419_v58 = vadd.s32 10, %v245_v3  ;;  %v1472_v57 = vadd.f32 %v5574_v44, %v1399_v32  ;;  %vm406_vm15 = vmand %vm393_vm13, %vm380_vm11  ;;  %v5576_v0 = vpop.f32.mrb[7].mxu1  ;;  %v6124_v12 = vld [vmem:[#allocation3 + $0x64] ss:$16 sps:$4 sm:$0xff]   ;;  %v6120_v41 = vld [vmem:[#allocation3 + $0x4c] ss:$16 sps:$4 sm:$0xff]  }
 0x143   : > { %4640 = vmatprep.mubr.bf16.mxu1 %v6111_v48  ;;  %v5532_v18 = vpop.f32.mrb[8].mxu0  ;;  %v5577_v54 = vadd.f32 %v5576_v0, %v5575_v23  ;;  %v6134_v24 = vld [vmem:[#allocation3 + $0x80] ss:$16 sps:$4 sm:$0x7f]  }
 0x144   : > { %v432_v31 = vsel %vm406_vm15, %v419_v58, %v245_v3  ;;  %v1575_v25 = vsel %vm603_vm7, %v1472_v57, 0.0  ;;  %v5533_v39 = vpop.f32.mrb[9].mxu0 }
 0x145   : > { %4576 = vmatmul.mubr.bf16.gmra.mrb[64].mxu0 %v6116_v11  ;;  %vm7681_vm4 = vcmp.lt.s32.totalorder %v432_v31, 8  ;;  %v5534_v19 = vadd.f32 %v5533_v39, %v5532_v18  ;;  %v5535_v5 = vpop.f32.mrb[10].mxu0  ;;  %v1475_v35 = vadd.f32 %v5577_v54, %v1402_v2  ;;  %v1603_v40 = vmul.f32 %v1575_v25, %v1575_v25  ;;  %v6126_v11 = vld [vmem:[#allocation3 + $0x6c] ss:$16 sps:$4 sm:$0xff]  }
 0x146   : > { %4583 = vmatprep.mubr.bf16.mxu0 %v6118_v30  ;;  %v1573_v15 = vsel %vm7681_vm4, %v1464_v38, 0.0  ;;  %v5536_v4 = vpop.f32.mrb[11].mxu0 }
 0x147   : > { %v1601_v29 = vmul.f32 %v1573_v15, %v1573_v15  ;;  %v1583_v48 = vadd.f32 %v1574_v45, %v1573_v15  ;;  %v5537_v60 = vadd.f32 %v5536_v4, %v5535_v5  ;;  %v5417_v9 = vpack.c.bf16 %v1475_v35, %v1472_v57  ;;  %v6135_v3 = vld [vmem:[#allocation3 + $0x88] ss:$16 sps:$4 sm:$0x7f]  }
 0x148   : > { %v1576_v34 = vsel %vm604_vm5, %v1475_v35, 0.0  ;;  %v6132_v52 = vld [vmem:[#allocation3 + $0x8c] ss:$16 sps:$4 sm:$0x7f]   ;;  %v1407_v42 = vadd.f32 %v5534_v19, %v7662_v53 }
 0x149   : > { %v1611_v17 = vadd.f32 %v1602_v51, %v1601_v29  ;;  %v1584_v13 = vadd.f32 %v1583_v48, %v1575_v25  ;;  %v1604_v59 = vmul.f32 %v1576_v34, %v1576_v34  ;;  %5489 = vst [vmem:[%s6222_s20 + $0x8] sm:$0xff] %v5417_v9   ;;  %v1410_v32 = vadd.f32 %v5537_v60, %v7662_v53 }
 0x14a   : > { %4641 = vmatmul.mubr.bf16.vlgmr.msra.gmra.mrb[60].mxu1 %v6109_v46 }
 0x14b   : > { %4648 = vmatprep.mubr.bf16.mxu1 %v6114_v14  ;;  %v1612_v28 = vadd.f32 %v1611_v17, %v1603_v40  ;;  %v1585_v38 = vadd.f32 %v1584_v13, %v1576_v34 }
 0x14d   : > { %4584 = vmatmul.mubr.bf16.gmra.mrb[68].mxu0 %v6122_v27  ;;  %v1613_v43 = vadd.f32 %v1612_v28, %v1604_v59 }
 0x14e   : > { %4591 = vmatprep.mubr.bf16.mxu0 %v6124_v12 }
 0x152   : > { %4649 = vmatmul.mubr.bf16.gmra.mrb[64].mxu1 %v6117_v50 }
 0x153   : > { %4656 = vmatprep.mubr.bf16.mxu1 %v6120_v41 }
 0x155   : > { %4592 = vmatmul.mubr.bf16.gmra.mrb[72].mxu0 %v6128_v20 }
 0x156   : > { %4599 = vmatprep.mubr.bf16.mxu0 %v6130_v16 }
 0x15a   : > { %4657 = vmatmul.mubr.bf16.gmra.mrb[68].mxu1 %v6123_v26 }
 0x15b   : > { %4664 = vmatprep.mubr.bf16.mxu1 %v6126_v11  ;;  %v5578_v30 = vpop.f32.mrb[8].mxu1 }
 0x15c   : > { %v5579_v6 = vpop.f32.mrb[9].mxu1 }
 0x15d   : > { %4600 = vmatmul.mubr.bf16.gmra.mrb[76].mxu0 %v6134_v24  ;;  %v5580_v37 = vadd.f32 %v5579_v6, %v5578_v30  ;;  %v5581_v10 = vpop.f32.mrb[10].mxu1 }
 0x15e   : > { %v5582_v55 = vpop.f32.mrb[11].mxu1 }
 0x15f   : > { %v1480_v21 = vadd.f32 %v5580_v37, %v1407_v42  ;;  %v5583_v36 = vadd.f32 %v5582_v55, %v5581_v10 }
 0x161   : > { %v1577_v46 = vsel %vm605_vm2, %v1480_v21, 0.0  ;;  %v1483_v14 = vadd.f32 %v5583_v36, %v1410_v32 }
 0x162   : > { %4665 = vmatmul.mubr.bf16.gmra.mrb[72].mxu1 %v6129_v1  ;;  %v1586_v44 = vadd.f32 %v1585_v38, %v1577_v46  ;;  %v1605_v23 = vmul.f32 %v1577_v46, %v1577_v46  ;;  %v5538_v58 = vpop.f32.mrb[12].mxu0 }
 0x163   : > { %4672 = vmatprep.mubr.bf16.mxu1 %v6132_v52  ;;  %v5422_v45 = vpack.c.bf16 %v1483_v14, %v1480_v21  ;;  %v1578_v2 = vsel %vm606_vm6, %v1483_v14, 0.0  ;;  %v5539_v27 = vpop.f32.mrb[13].mxu0 }
 0x164   : > { %v1614_v57 = vadd.f32 %v1613_v43, %v1605_v23  ;;  %v1587_v0 = vadd.f32 %v1586_v44, %v1578_v2  ;;  %v1606_v18 = vmul.f32 %v1578_v2, %v1578_v2  ;;  %v5540_v31 = vadd.f32 %v5539_v27, %v5538_v58  ;;  %v5541_v25 = vpop.f32.mrb[14].mxu0 }
 0x165   : > { %5490 = vst [vmem:[%s6222_s20 + $0x10] sm:$0xff] %v5422_v45   ;;  %v5542_v39 = vpop.f32.mrb[15].mxu0 }
 0x166   : > { %v1615_v54 = vadd.f32 %v1614_v57, %v1606_v18  ;;  %v5543_v12 = vadd.f32 %v5542_v39, %v5541_v25  ;;  %v1415_v19 = vadd.f32 %v5540_v31, %v7662_v53 }
 0x168   : > { %v1418_v4 = vadd.f32 %v5543_v12, %v7662_v53 }
 0x16a   : > { %4673 = vmatmul.mubr.bf16.gmra.mrb[76].mxu1 %v6135_v3 }
 0x173   : > { %v5584_v51 = vpop.f32.mrb[12].mxu1 }
 0x174   : > { %v5585_v5 = vpop.f32.mrb[13].mxu1 }
 0x175   : > { %v5586_v15 = vadd.f32 %v5585_v5, %v5584_v51  ;;  %v5587_v35 = vpop.f32.mrb[14].mxu1 }
 0x176   : > { %v5588_v29 = vpop.f32.mrb[15].mxu1 }
 0x177   : > { %v1488_v48 = vadd.f32 %v5586_v15, %v1415_v19  ;;  %v5589_v40 = vadd.f32 %v5588_v29, %v5587_v35 }
 0x178   : > { %v5544_v60 = vpop.f32.mrb[16].mxu0 }
 0x179   : > { %v5545_v50 = vpop.f32.mrb[17].mxu0  ;;  %v1579_v9 = vsel %vm607_vm8, %v1488_v48, 0.0  ;;  %v1491_v34 = vadd.f32 %v5589_v40, %v1418_v4 }
 0x17a   : > { %v5546_v41 = vadd.f32 %v5545_v50, %v5544_v60  ;;  %v5547_v17 = vpop.f32.mrb[18].mxu0  ;;  %v1588_v13 = vadd.f32 %v1587_v0, %v1579_v9  ;;  %v1607_v59 = vmul.f32 %v1579_v9, %v1579_v9 }
 0x17b   : > { %v5548_v28 = vpop.f32.mrb[19].mxu0  ;;  %v5427_v38 = vpack.c.bf16 %v1491_v34, %v1488_v48  ;;  %v1580_v20 = vsel %vm608_vm3, %v1491_v34, 0.0 }
 0x17c   : > { %v5549_v16 = vadd.f32 %v5548_v28, %v5547_v17  ;;  %v1616_v43 = vadd.f32 %v1615_v54, %v1607_v59  ;;  %v1589_v26 = vadd.f32 %v1588_v13, %v1580_v20  ;;  %v1608_v11 = vmul.f32 %v1580_v20, %v1580_v20 }
 0x17d   : > { %5491 = vst [vmem:[%s6222_s20 + $0x18] sm:$0xff] %v5427_v38   ;;  %v1423_v3 = vadd.f32 %v5546_v41, %v7662_v53 }
 0x17e   : > { %v1617_v24 = vadd.f32 %v1616_v43, %v1608_v11  ;;  %v1426_v57 = vadd.f32 %v5549_v16, %v7662_v53 }
 0x180   : > { %v5612_v1 = vpop.f32.mrb[20].mxu0 }
 0x181   : > { %v5613_v52 = vpop.f32.mrb[21].mxu0 }
 0x182   : > { %v5614_v30 = vadd.f32 %v5613_v52, %v5612_v1  ;;  %v5615_v42 = vpop.f32.mrb[22].mxu0 }
 0x183   : > { %v5616_v6 = vpop.f32.mrb[23].mxu0 }
 0x184   : > { %v5617_v37 = vadd.f32 %v5616_v6, %v5615_v42  ;;  %v2456_v48 = vadd.f32 %v5614_v30, %v7662_v53 }
 0x186   : > { %v2459_v28 = vadd.f32 %v5617_v37, %v7662_v53 }
 0x188   : > { %v5618_v10 = vpop.f32.mrb[24].mxu0 }
 0x189   : > { %v5619_v32 = vpop.f32.mrb[25].mxu0 }
 0x18a   : > { %v5620_v55 = vadd.f32 %v5619_v32, %v5618_v10  ;;  %v5621_v21 = vpop.f32.mrb[26].mxu0 }
 0x18b   : > { %v5622_v36 = vpop.f32.mrb[27].mxu0 }
 0x18c   : > { %v7709_v46 = vadd.f32 %v5622_v36, %v5621_v21  ;;  %v2464_v32 = vadd.f32 %v5620_v55, %v7662_v53 }
 0x190   : > { %v5624_v44 = vpop.f32.mrb[28].mxu0 }
 0x191   : > { %v5590_v14 = vpop.f32.mrb[16].mxu1  ;;  %v5625_v45 = vpop.f32.mrb[29].mxu0 }
 0x192   : > { %v5591_v23 = vpop.f32.mrb[17].mxu1  ;;  %v7713_v0 = vadd.f32 %v5625_v45, %v5624_v44  ;;  %v5627_v18 = vpop.f32.mrb[30].mxu0 }
 0x193   : > { %v5592_v2 = vadd.f32 %v5591_v23, %v5590_v14  ;;  %v5593_v58 = vpop.f32.mrb[18].mxu1  ;;  %v5628_v31 = vpop.f32.mrb[31].mxu0 }
 0x194   : > { %v5594_v27 = vpop.f32.mrb[19].mxu1  ;;  %v7716_v39 = vadd.f32 %v5628_v31, %v5627_v18 }
 0x195   : > { %v1496_v25 = vadd.f32 %v5592_v2, %v1423_v3  ;;  %v5595_v54 = vadd.f32 %v5594_v27, %v5593_v58  ;;  %v2467_v58 = vadd.f32 %v7709_v46, %v7662_v53 }
 0x197   : > { %v5377_v12 = vpack.c.bf16 %v1496_v25, %v1496_v25  ;;  %v1581_v51 = vsel %vm609_vm0, %v1496_v25, 0.0  ;;  %v1499_v19 = vadd.f32 %v5595_v54, %v1426_v57 }
 0x198   : > { %v1590_v5 = vadd.f32 %v1589_v26, %v1581_v51  ;;  %v1609_v15 = vmul.f32 %v1581_v51, %v1581_v51  ;;  %v5630_v40 = vpop.f32.mrb[32].mxu0 }
 0x199   : > { %1550 = vst [vmem:[%s6222_s20 + $0x20] sm:$0xf] %v5377_v12  ;;  %v5378_v35 = vpack.c.bf16 %v1499_v19, %v1499_v19  ;;  %v1582_v4 = vsel %vm610_vm9, %v1499_v19, 0.0  ;;  %v5658_v29 = vpop.f32.mrb[20].mxu1  ;;  %v5631_v41 = vpop.f32.mrb[33].mxu0 }
 0x19a   : > { %v1618_v60 = vadd.f32 %v1617_v24, %v1609_v15  ;;  %v1592_v50 = vsel %vm1591_vm10, %v1582_v4, 0.0  ;;  %v1610_v9 = vmul.f32 %v1582_v4, %v1582_v4  ;;  %v5659_v34 = vpop.f32.mrb[21].mxu1  ;;  %v5632_v38 = vadd.f32 %v5631_v41, %v5630_v40  ;;  %v5633_v20 = vpop.f32.mrb[34].mxu0 }
 0x19b   : > { %1551 = vst [vmem:[%s6222_s20 + $0x24] sm:$0x7] %v5378_v35  ;;  %v7727_v17 = vadd.f32 %v1592_v50, %v1590_v5  ;;  %v5660_v13 = vadd.f32 %v5659_v34, %v5658_v29  ;;  %v5661_v59 = vpop.f32.mrb[22].mxu1  ;;  %v5634_v26 = vpop.f32.mrb[35].mxu0  ;;  %v2472_v29 = vadd.f32 %v7713_v0, %v7662_v53  ;;  %v2475_v41 = vadd.f32 %v7716_v39, %v7662_v53 }
 0x19c   : > { %v1619_v16 = vsel %vm1591_vm10, %v1610_v9, 0.0  ;;  %v5662_v43 = vpop.f32.mrb[23].mxu1  ;;  %v7733_v52 = vadd.f32 %v5634_v26, %v5633_v20 }
 0x19d   : > { %v7731_v11 = vadd.f32 %v1619_v16, %v1618_v60  ;;  %v2529_v24 = vadd.f32 %v5660_v13, %v2456_v48  ;;  %v5663_v1 = vadd.f32 %v5662_v43, %v5661_v59 }
 0x19f   : > { %v2619_v30 = vsel %vm7681_vm4, %v2529_v24, 0.0  ;;  %v2532_v42 = vadd.f32 %v5663_v1, %v2459_v28 }
 0x1a0   : > { %v5636_v21 = vpop.f32.mrb[36].mxu0  ;;  %v2646_v36 = vmul.f32 %v2619_v30, %v2619_v30 }
 0x1a1   : > { %v5432_v6 = vpack.c.bf16 %v2532_v42, %v2529_v24  ;;  %v2620_v37 = vsel %vm602_vm1, %v2532_v42, 0.0  ;;  %v5664_v10 = vpop.f32.mrb[24].mxu1  ;;  %v5637_v23 = vpop.f32.mrb[37].mxu0 }
 0x1a2   : > { %v2629_v14 = vadd.f32 %v2620_v37, %v2619_v30  ;;  %v2647_v3 = vmul.f32 %v2620_v37, %v2620_v37  ;;  %v5665_v44 = vpop.f32.mrb[25].mxu1  ;;  %v5638_v57 = vadd.f32 %v5637_v23, %v5636_v21  ;;  %v5639_v18 = vpop.f32.mrb[38].mxu0  ;;  %v2483_v23 = vadd.f32 %v7733_v52, %v7662_v53 }
 0x1a3   : > { %5492 = vst [vmem:[%s6222_s20 + $0x28] sm:$0xff] %v5432_v6   ;;  %v5666_v45 = vadd.f32 %v5665_v44, %v5664_v10  ;;  %v5667_v2 = vpop.f32.mrb[26].mxu1  ;;  %v5640_v25 = vpop.f32.mrb[39].mxu0  ;;  %v2480_v6 = vadd.f32 %v5632_v38, %v7662_v53 }
 0x1a4   : > { %v2656_v27 = vadd.f32 %v2647_v3, %v2646_v36  ;;  %v5668_v31 = vpop.f32.mrb[27].mxu1  ;;  %v7743_v12 = vadd.f32 %v5640_v25, %v5639_v18  ;;  %v2488_v52 = vadd.f32 %v5638_v57, %v7662_v53 }
 0x1a5   : > { %v2537_v54 = vadd.f32 %v5666_v45, %v2464_v32  ;;  %v5669_v55 = vadd.f32 %v5668_v31, %v5667_v2 }
 0x1a7   : > { %v2621_v51 = vsel %vm603_vm7, %v2537_v54, 0.0  ;;  %v2540_v19 = vadd.f32 %v5669_v55, %v2467_v58 }
 0x1a8   : > { %v2630_v5 = vadd.f32 %v2629_v14, %v2621_v51  ;;  %v2648_v15 = vmul.f32 %v2621_v51, %v2621_v51 }
 0x1a9   : > { %v5437_v35 = vpack.c.bf16 %v2540_v19, %v2537_v54  ;;  %v2622_v46 = vsel %vm604_vm5, %v2540_v19, 0.0  ;;  %v5670_v4 = vpop.f32.mrb[28].mxu1 }
 0x1aa   : > { %v2657_v48 = vadd.f32 %v2656_v27, %v2648_v15  ;;  %v2631_v40 = vadd.f32 %v2630_v5, %v2622_v46  ;;  %v2649_v60 = vmul.f32 %v2622_v46, %v2622_v46  ;;  %v5671_v50 = vpop.f32.mrb[29].mxu1  ;;  %v1594_v15 = vrot.slane %v7727_v17, 4 }
 0x1ab   : > { %5493 = vst [vmem:[%s6222_s20 + $0x30] sm:$0xff] %v5437_v35   ;;  %v5672_v9 = vadd.f32 %v5671_v50, %v5670_v4  ;;  %v5673_v34 = vpop.f32.mrb[30].mxu1  ;;  %v1621_v50 = vrot.slane %v7731_v11, 4 }
 0x1ac   : > { %v2658_v13 = vadd.f32 %v2657_v48, %v2649_v60  ;;  %v5674_v59 = vpop.f32.mrb[31].mxu1  ;;  %v2491_v60 = vadd.f32 %v7743_v12, %v7662_v53  ;;  %v1595_v57 = vadd.f32 %v1594_v15, %v7727_v17 }
 0x1ad   : > { %v2545_v28 = vadd.f32 %v5672_v9, %v2472_v29  ;;  %v5675_v20 = vadd.f32 %v5674_v59, %v5673_v34 }
 0x1af   : > { %v2623_v16 = vsel %vm605_vm2, %v2545_v28, 0.0  ;;  %v2548_v43 = vadd.f32 %v5675_v20, %v2475_v41 }
 0x1b0   : > { %v2632_v0 = vadd.f32 %v2631_v40, %v2623_v16  ;;  %v2650_v26 = vmul.f32 %v2623_v16, %v2623_v16  ;;  %v5704_v24 = vpop.f32.mrb[40].mxu0  ;;  %v1622_v16 = vadd.f32 %v1621_v50, %v7731_v11 }
 0x1b1   : > { %v5442_v1 = vpack.c.bf16 %v2548_v43, %v2545_v28  ;;  %v2624_v30 = vsel %vm606_vm6, %v2548_v43, 0.0  ;;  %v5676_v42 = vpop.f32.mrb[32].mxu1  ;;  %v5705_v39 = vpop.f32.mrb[41].mxu0 }
 0x1b2   : > { %v2659_v37 = vadd.f32 %v2658_v13, %v2650_v26  ;;  %v2633_v10 = vadd.f32 %v2632_v0, %v2624_v30  ;;  %v2651_v32 = vmul.f32 %v2624_v30, %v2624_v30  ;;  %v5677_v21 = vpop.f32.mrb[33].mxu1  ;;  %v5706_v36 = vadd.f32 %v5705_v39, %v5704_v24  ;;  %v5707_v14 = vpop.f32.mrb[42].mxu0 }
 0x1b3   : > { %5494 = vst [vmem:[%s6222_s20 + $0x38] sm:$0xff] %v5442_v1   ;;  %v5678_v3 = vadd.f32 %v5677_v21, %v5676_v42  ;;  %v5679_v44 = vpop.f32.mrb[34].mxu1  ;;  %v5708_v45 = vpop.f32.mrb[43].mxu0  ;;  %v1596_v30 = vrot.slane %v1595_v57, 2  ;;  %v1623_v21 = vrot.slane %v1622_v16, 2 }
 0x1b4   : > { %v2660_v2 = vadd.f32 %v2659_v37, %v2651_v32  ;;  %v5680_v58 = vpop.f32.mrb[35].mxu1  ;;  %v5709_v18 = vadd.f32 %v5708_v45, %v5707_v14  ;;  %v3511_v1 = vadd.f32 %v5706_v36, %v7662_v53 }
 0x1b5   : > { %v2553_v27 = vadd.f32 %v5678_v3, %v2480_v6  ;;  %v5681_v38 = vadd.f32 %v5680_v58, %v5679_v44 }
 0x1b6   : > { %v3514_v32 = vadd.f32 %v5709_v18, %v7662_v53 }
 0x1b7   : > { %v2625_v31 = vsel %vm607_vm8, %v2553_v27, 0.0  ;;  %v2556_v25 = vadd.f32 %v5681_v38, %v2483_v23 }
 0x1b8   : > { %v2634_v54 = vadd.f32 %v2633_v10, %v2625_v31  ;;  %v2652_v55 = vmul.f32 %v2625_v31, %v2625_v31 }
 0x1b9   : > { %v5447_v51 = vpack.c.bf16 %v2556_v25, %v2553_v27  ;;  %v2626_v19 = vsel %vm608_vm3, %v2556_v25, 0.0  ;;  %v5682_v5 = vpop.f32.mrb[36].mxu1 }
 0x1ba   : > { %v2661_v35 = vadd.f32 %v2660_v2, %v2652_v55  ;;  %v2635_v46 = vadd.f32 %v2634_v54, %v2626_v19  ;;  %v2653_v4 = vmul.f32 %v2626_v19, %v2626_v19  ;;  %v5683_v29 = vpop.f32.mrb[37].mxu1  ;;  %v1597_v2 = vadd.f32 %v1596_v30, %v1595_v57 }
 0x1bb   : > { %5495 = vst [vmem:[%s6222_s20 + $0x40] sm:$0xff] %v5447_v51   ;;  %v5684_v48 = vadd.f32 %v5683_v29, %v5682_v5  ;;  %v5685_v40 = vpop.f32.mrb[38].mxu1  ;;  %v1624_v55 = vadd.f32 %v1623_v21, %v1622_v16 }
 0x1bc   : > { %v2662_v9 = vadd.f32 %v2661_v35, %v2653_v4  ;;  %v5686_v34 = vpop.f32.mrb[39].mxu1 }
 0x1bd   : > { %v2561_v41 = vadd.f32 %v5684_v48, %v2488_v52  ;;  %v5687_v13 = vadd.f32 %v5686_v34, %v5685_v40  ;;  %v1598_v40 = vrot.slane %v1597_v2, 1  ;;  %v1625_v34 = vrot.slane %v1624_v55, 1 }
 0x1bf   : > { %v5387_v59 = vpack.c.bf16 %v2561_v41, %v2561_v41  ;;  %v2627_v28 = vsel %vm609_vm0, %v2561_v41, 0.0  ;;  %v2564_v20 = vadd.f32 %v5687_v13, %v2491_v60  ;;  %v1599_v57 = vadd.f32 %v1598_v40, %v1597_v2 }
 0x1c0   : > { %v2636_v43 = vadd.f32 %v2635_v46, %v2627_v28  ;;  %v2654_v0 = vmul.f32 %v2627_v28, %v2627_v28 }
 0x1c1   : > { %5084 = vst [vmem:[%s6222_s20 + $0x48] sm:$0xf] %v5387_v59  ;;  %v5388_v12 = vpack.c.bf16 %v2564_v20, %v2564_v20  ;;  %v2628_v26 = vsel %vm610_vm9, %v2564_v20, 0.0  ;;  %v5750_v24 = vpop.f32.mrb[40].mxu1 }
 0x1c2   : > { %v2663_v17 = vadd.f32 %v2662_v9, %v2654_v0  ;;  %v2637_v42 = vsel %vm1591_vm10, %v2628_v26, 0.0  ;;  %v2655_v6 = vmul.f32 %v2628_v26, %v2628_v26  ;;  %v5751_v39 = vpop.f32.mrb[41].mxu1 }
 0x1c3   : > { %5085 = vst [vmem:[%s6222_s20 + $0x4c] sm:$0x7] %v5388_v12  ;;  %v2638_v37 = vadd.f32 %v2637_v42, %v2636_v43  ;;  %v5752_v10 = vadd.f32 %v5751_v39, %v5750_v24  ;;  %v5753_v11 = vpop.f32.mrb[42].mxu1  ;;  %v1626_v43 = vadd.f32 %v1625_v34, %v1624_v55 }
 0x1c4   : > { %v2664_v14 = vsel %vm1591_vm10, %v2655_v6, 0.0  ;;  %v5754_v3 = vpop.f32.mrb[43].mxu1 }
 0x1c5   : > { %v2639_v44 = vrot.slane %v2638_v37, 4  ;;  %v2665_v23 = vadd.f32 %v2664_v14, %v2663_v17  ;;  %v3584_v45 = vadd.f32 %v5752_v10, %v3511_v1  ;;  %v5755_v36 = vadd.f32 %v5754_v3, %v5753_v11  ;;  %v5710_v58 = vpop.f32.mrb[44].mxu0 }
 0x1c6   : > { %v5711_v54 = vpop.f32.mrb[45].mxu0 }
 0x1c7   : > { %v2640_v27 = vadd.f32 %v2639_v44, %v2638_v37  ;;  %v2666_v38 = vrot.slane %v2665_v23, 4  ;;  %v3674_v31 = vsel %vm7681_vm4, %v3584_v45, 0.0  ;;  %v3587_v25 = vadd.f32 %v5755_v36, %v3514_v32  ;;  %v5713_v51 = vpop.f32.mrb[46].mxu0 }
 0x1c8   : > { %v5712_v18 = vadd.f32 %v5711_v54, %v5710_v58  ;;  %v5714_v35 = vpop.f32.mrb[47].mxu0  ;;  %v3701_v46 = vmul.f32 %v3674_v31, %v3674_v31 }
 0x1c9   : > { %v2641_v19 = vrot.slane %v2640_v27, 2  ;;  %v2667_v5 = vadd.f32 %v2666_v38, %v2665_v23  ;;  %v5452_v52 = vpack.c.bf16 %v3587_v25, %v3584_v45  ;;  %v3675_v15 = vsel %vm602_vm1, %v3587_v25, 0.0 }
 0x1ca   : > { %v3684_v4 = vadd.f32 %v3675_v15, %v3674_v31  ;;  %v3702_v29 = vmul.f32 %v3675_v15, %v3675_v15  ;;  %v5715_v48 = vadd.f32 %v5714_v35, %v5713_v51  ;;  %v3519_v16 = vadd.f32 %v5712_v18, %v7662_v53 }
 0x1cb   : > { %v2642_v60 = vadd.f32 %v2641_v19, %v2640_v27  ;;  %v2668_v50 = vrot.slane %v2667_v5, 2  ;;  %5496 = vst [vmem:[%s6222_s20 + $0x50] sm:$0xff] %v5452_v52  }
 0x1cc   : > { %v3711_v9 = vadd.f32 %v3702_v29, %v3701_v46  ;;  %v3522_v30 = vadd.f32 %v5715_v48, %v7662_v53 }
 0x1cd   : > { %v2643_v41 = vrot.slane %v2642_v60, 1  ;;  %v2669_v13 = vadd.f32 %v2668_v50, %v2667_v5 }
 0x1cf   : > { %v2644_v59 = vadd.f32 %v2643_v41, %v2642_v60  ;;  %v2670_v28 = vrot.slane %v2669_v13, 1  ;;  %v5756_v20 = vpop.f32.mrb[44].mxu1 }
 0x1d0   : > { %v5757_v26 = vpop.f32.mrb[45].mxu1 }
 0x1d1   : > { %v7790_v0 = vadd.f32 %v2644_v59, %v1599_v57  ;;  %v2671_v12 = vadd.f32 %v2670_v28, %v2669_v13  ;;  %v5758_v24 = vadd.f32 %v5757_v26, %v5756_v20  ;;  %v5759_v1 = vpop.f32.mrb[46].mxu1 }
 0x1d2   : > { %v5760_v42 = vpop.f32.mrb[47].mxu1 }
 0x1d3   : > { %v7793_v17 = vadd.f32 %v2671_v12, %v1626_v43  ;;  %v3592_v6 = vadd.f32 %v5758_v24, %v3519_v16  ;;  %v5761_v39 = vadd.f32 %v5760_v42, %v5759_v1 }
 0x1d5   : > { %v3676_v37 = vsel %vm603_vm7, %v3592_v6, 0.0  ;;  %v3595_v10 = vadd.f32 %v5761_v39, %v3522_v30 }
 0x1d6   : > { %v3685_v11 = vadd.f32 %v3684_v4, %v3676_v37  ;;  %v3703_v32 = vmul.f32 %v3676_v37, %v3676_v37 }
 0x1d7   : > { %v5457_v21 = vpack.c.bf16 %v3595_v10, %v3592_v6  ;;  %v3677_v14 = vsel %vm604_vm5, %v3595_v10, 0.0 }
 0x1d8   : > { %v3712_v3 = vadd.f32 %v3711_v9, %v3703_v32  ;;  %v3686_v44 = vadd.f32 %v3685_v11, %v3677_v14  ;;  %v3704_v23 = vmul.f32 %v3677_v14, %v3677_v14 }
 0x1d9   : > { %5497 = vst [vmem:[%s6222_s20 + $0x58] sm:$0xff] %v5457_v21  }
 0x1da   : > { %v3713_v45 = vadd.f32 %v3712_v3, %v3704_v23 }
 0x1db   : > { %v5716_v36 = vpop.f32.mrb[48].mxu0 }
 0x1dc   : > { %v5717_v2 = vpop.f32.mrb[49].mxu0 }
 0x1dd   : > { %v5718_v58 = vadd.f32 %v5717_v2, %v5716_v36  ;;  %v5719_v27 = vpop.f32.mrb[50].mxu0 }
 0x1de   : > { %v5720_v38 = vpop.f32.mrb[51].mxu0 }
 0x1df   : > { %v5721_v31 = vadd.f32 %v5720_v38, %v5719_v27  ;;  %v3527_v54 = vadd.f32 %v5718_v58, %v7662_v53 }
 0x1e1   : > { %v3530_v19 = vadd.f32 %v5721_v31, %v7662_v53 }
 0x1e6   : > { %v5762_v25 = vpop.f32.mrb[48].mxu1 }
 0x1e7   : > { %v5763_v55 = vpop.f32.mrb[49].mxu1 }
 0x1e8   : > { %v5764_v18 = vadd.f32 %v5763_v55, %v5762_v25  ;;  %v5765_v51 = vpop.f32.mrb[50].mxu1 }
 0x1e9   : > { %v5766_v5 = vpop.f32.mrb[51].mxu1 }
 0x1ea   : > { %v3600_v52 = vadd.f32 %v5764_v18, %v3527_v54  ;;  %v5767_v15 = vadd.f32 %v5766_v5, %v5765_v51 }
 0x1ec   : > { %v3678_v35 = vsel %vm605_vm2, %v3600_v52, 0.0  ;;  %v3603_v46 = vadd.f32 %v5767_v15, %v3530_v19 }
 0x1ed   : > { %v3687_v4 = vadd.f32 %v3686_v44, %v3678_v35  ;;  %v3705_v29 = vmul.f32 %v3678_v35, %v3678_v35 }
 0x1ee   : > { %v5462_v48 = vpack.c.bf16 %v3603_v46, %v3600_v52  ;;  %v3679_v40 = vsel %vm606_vm6, %v3603_v46, 0.0 }
 0x1ef   : > { %v3714_v60 = vadd.f32 %v3713_v45, %v3705_v29  ;;  %v3688_v50 = vadd.f32 %v3687_v4, %v3679_v40  ;;  %v3706_v9 = vmul.f32 %v3679_v40, %v3679_v40 }
 0x1f0   : > { %5498 = vst [vmem:[%s6222_s20 + $0x60] sm:$0xff] %v5462_v48  }
 0x1f1   : > { %v3715_v34 = vadd.f32 %v3714_v60, %v3706_v9 }
 0x1f3   : > { %v5722_v41 = vpop.f32.mrb[52].mxu0 }
 0x1f4   : > { %v5723_v13 = vpop.f32.mrb[53].mxu0 }
 0x1f5   : > { %v5724_v57 = vadd.f32 %v5723_v13, %v5722_v41  ;;  %v5725_v59 = vpop.f32.mrb[54].mxu0 }
 0x1f6   : > { %v5726_v28 = vpop.f32.mrb[55].mxu0 }
 0x1f7   : > { %v5727_v20 = vadd.f32 %v5726_v28, %v5725_v59  ;;  %v3535_v43 = vadd.f32 %v5724_v57, %v7662_v53 }
 0x1f9   : > { %v3538_v1 = vadd.f32 %v5727_v20, %v7662_v53 }
 0x1fd   : > { %v5768_v16 = vpop.f32.mrb[52].mxu1 }
 0x1fe   : > { %v5769_v12 = vpop.f32.mrb[53].mxu1 }
 0x1ff   : > { %v5770_v26 = vadd.f32 %v5769_v12, %v5768_v16  ;;  %v5771_v24 = vpop.f32.mrb[54].mxu1 }
 0x200   : > { %v5772_v30 = vpop.f32.mrb[55].mxu1 }
 0x201   : > { %v3608_v42 = vadd.f32 %v5770_v26, %v3535_v43  ;;  %v5773_v6 = vadd.f32 %v5772_v30, %v5771_v24 }
 0x203   : > { %v3680_v39 = vsel %vm607_vm8, %v3608_v42, 0.0  ;;  %v3611_v37 = vadd.f32 %v5773_v6, %v3538_v1 }
 0x204   : > { %v3689_v10 = vadd.f32 %v3688_v50, %v3680_v39  ;;  %v3707_v11 = vmul.f32 %v3680_v39, %v3680_v39 }
 0x205   : > { %v5467_v32 = vpack.c.bf16 %v3611_v37, %v3608_v42  ;;  %v3681_v21 = vsel %vm608_vm3, %v3611_v37, 0.0 }
 0x206   : > { %v3716_v14 = vadd.f32 %v3715_v34, %v3707_v11  ;;  %v3690_v3 = vadd.f32 %v3689_v10, %v3681_v21  ;;  %v3708_v44 = vmul.f32 %v3681_v21, %v3681_v21 }
 0x207   : > { %5499 = vst [vmem:[%s6222_s20 + $0x68] sm:$0xff] %v5467_v32  }
 0x208   : > { %v3717_v23 = vadd.f32 %v3716_v14, %v3708_v44  ;;  %v5728_v45 = vpop.f32.mrb[56].mxu0 }
 0x209   : > { %v5729_v36 = vpop.f32.mrb[57].mxu0 }
 0x20a   : > { %v5730_v2 = vadd.f32 %v5729_v36, %v5728_v45  ;;  %v5731_v58 = vpop.f32.mrb[58].mxu0 }
 0x20b   : > { %v5732_v27 = vpop.f32.mrb[59].mxu0 }
 0x20c   : > { %v5733_v38 = vadd.f32 %v5732_v27, %v5731_v58  ;;  %v3543_v19 = vadd.f32 %v5730_v2, %v7662_v53 }
 0x20e   : > { %v3546_v46 = vadd.f32 %v5733_v38, %v7662_v53 }
 0x210   : > { %v5796_v31 = vpop.f32.mrb[60].mxu0 }
 0x211   : > { %v5797_v25 = vpop.f32.mrb[61].mxu0 }
 0x212   : > { %v5798_v54 = vadd.f32 %v5797_v25, %v5796_v31  ;;  %v5799_v55 = vpop.f32.mrb[62].mxu0 }
 0x213   : > { %v5800_v18 = vpop.f32.mrb[63].mxu0 }
 0x214   : > { %v5801_v5 = vadd.f32 %v5800_v18, %v5799_v55  ;;  %v4570_v12 = vadd.f32 %v5798_v54, %v7662_v53 }
 0x215   : > { %v5774_v51 = vpop.f32.mrb[56].mxu1 }
 0x216   : > { %v5775_v52 = vpop.f32.mrb[57].mxu1  ;;  %v4573_v10 = vadd.f32 %v5801_v5, %v7662_v53  ;;  %v7831_v53 = vld [vmem:[%s7884_s2] ss:$0 sm:$0xff] }
 0x217   : > { %v5776_v15 = vadd.f32 %v5775_v52, %v5774_v51  ;;  %v5777_v35 = vpop.f32.mrb[58].mxu1 }
 0x218   : > { %v5778_v4 = vpop.f32.mrb[59].mxu1  ;;  %v5802_v40 = vpop.f32.mrb[64].mxu0 }
 0x219   : > { %v3616_v29 = vadd.f32 %v5776_v15, %v3543_v19  ;;  %v5779_v48 = vadd.f32 %v5778_v4, %v5777_v35  ;;  %v5803_v60 = vpop.f32.mrb[65].mxu0 }
 0x21a   : > { %v5804_v41 = vadd.f32 %v5803_v60, %v5802_v40  ;;  %v5805_v13 = vpop.f32.mrb[66].mxu0 }
 0x21b   : > { %v5397_v50 = vpack.c.bf16 %v3616_v29, %v3616_v29  ;;  %v3682_v9 = vsel %vm609_vm0, %v3616_v29, 0.0  ;;  %v3619_v34 = vadd.f32 %v5779_v48, %v3546_v46  ;;  %v5806_v28 = vpop.f32.mrb[67].mxu0 }
 0x21c   : > { %v3691_v57 = vadd.f32 %v3690_v3, %v3682_v9  ;;  %v3709_v59 = vmul.f32 %v3682_v9, %v3682_v9  ;;  %v5807_v26 = vadd.f32 %v5806_v28, %v5805_v13  ;;  %v4578_v31 = vadd.f32 %v7831_v53, %v5804_v41 }
 0x21d   : > { %5224 = vst [vmem:[%s6222_s20 + $0x70] sm:$0xf] %v5397_v50  ;;  %v5398_v20 = vpack.c.bf16 %v3619_v34, %v3619_v34  ;;  %v3683_v16 = vsel %vm610_vm9, %v3619_v34, 0.0  ;;  %v5842_v43 = vpop.f32.mrb[60].mxu1 }
 0x21e   : > { %v3718_v24 = vadd.f32 %v3717_v23, %v3709_v59  ;;  %v3692_v1 = vsel %vm1591_vm10, %v3683_v16, 0.0  ;;  %v3710_v30 = vmul.f32 %v3683_v16, %v3683_v16  ;;  %v5843_v42 = vpop.f32.mrb[61].mxu1  ;;  %v4581_v60 = vadd.f32 %v7831_v53, %v5807_v26 }
 0x21f   : > { %5225 = vst [vmem:[%s6222_s20 + $0x74] sm:$0x7] %v5398_v20  ;;  %v3693_v6 = vadd.f32 %v3692_v1, %v3691_v57  ;;  %v5844_v39 = vadd.f32 %v5843_v42, %v5842_v43  ;;  %v5845_v37 = vpop.f32.mrb[62].mxu1 }
 0x220   : > { %v3719_v11 = vsel %vm1591_vm10, %v3710_v30, 0.0  ;;  %v5846_v32 = vpop.f32.mrb[63].mxu1  ;;  %v5808_v45 = vpop.f32.mrb[68].mxu0 }
 0x221   : > { %v3694_v21 = vrot.slane %v3693_v6, 4  ;;  %v3720_v14 = vadd.f32 %v3719_v11, %v3718_v24  ;;  %v4643_v3 = vadd.f32 %v5844_v39, %v4570_v12  ;;  %v5847_v44 = vadd.f32 %v5846_v32, %v5845_v37  ;;  %v5809_v36 = vpop.f32.mrb[69].mxu0 }
 0x222   : > { %v5811_v38 = vpop.f32.mrb[70].mxu0  ;;  %v5810_v25 = vadd.f32 %v5809_v36, %v5808_v45 }
 0x223   : > { %v3695_v23 = vadd.f32 %v3694_v21, %v3693_v6  ;;  %v3721_v2 = vrot.slane %v3720_v14, 4  ;;  %v4733_v58 = vsel %vm7681_vm4, %v4643_v3, 0.0  ;;  %v4646_v27 = vadd.f32 %v5847_v44, %v4573_v10  ;;  %v5812_v54 = vpop.f32.mrb[71].mxu0 }
 0x224   : > { %v4760_v5 = vmul.f32 %v4733_v58, %v4733_v58  ;;  %v5813_v46 = vadd.f32 %v5812_v54, %v5811_v38  ;;  %v4586_v26 = vadd.f32 %v7831_v53, %v5810_v25 }
 0x225   : > { %v3696_v55 = vrot.slane %v3695_v23, 2  ;;  %v3722_v18 = vadd.f32 %v3721_v2, %v3720_v14  ;;  %v5472_v51 = vpack.c.bf16 %v4646_v27, %v4643_v3  ;;  %v4734_v19 = vsel %vm602_vm1, %v4646_v27, 0.0  ;;  %v5848_v49 = vpop.f32.mrb[64].mxu1 }
 0x226   : > { %v4743_v52 = vadd.f32 %v4734_v19, %v4733_v58  ;;  %v4761_v15 = vmul.f32 %v4734_v19, %v4734_v19  ;;  %v5849_v35 = vpop.f32.mrb[65].mxu1  ;;  %v4589_v36 = vadd.f32 %v7831_v53, %v5813_v46 }
 0x227   : > { %v3697_v4 = vadd.f32 %v3696_v55, %v3695_v23  ;;  %v3723_v29 = vrot.slane %v3722_v18, 2  ;;  %5500 = vst [vmem:[%s6222_s20 + $0x78] sm:$0xff] %v5472_v51   ;;  %v5850_v48 = vadd.f32 %v5849_v35, %v5848_v49  ;;  %v5851_v40 = vpop.f32.mrb[66].mxu1 }
 0x228   : > { %v4770_v50 = vadd.f32 %v4761_v15, %v4760_v5  ;;  %v5852_v9 = vpop.f32.mrb[67].mxu1  ;;  %v5814_v57 = vpop.f32.mrb[72].mxu0 }
 0x229   : > { %v3698_v34 = vrot.slane %v3697_v4, 1  ;;  %v3724_v41 = vadd.f32 %v3723_v29, %v3722_v18  ;;  %v4651_v13 = vadd.f32 %v5850_v48, %v4578_v31  ;;  %v5853_v7 = vadd.f32 %v5852_v9, %v5851_v40  ;;  %v5815_v59 = vpop.f32.mrb[73].mxu0 }
 0x22a   : > { %v5817_v12 = vpop.f32.mrb[74].mxu0  ;;  %v5816_v30 = vadd.f32 %v5815_v59, %v5814_v57 }
 0x22b   : > { %v3699_v28 = vadd.f32 %v3698_v34, %v3697_v4  ;;  %v3725_v20 = vrot.slane %v3724_v41, 1  ;;  %v4735_v16 = vsel %vm603_vm7, %v4651_v13, 0.0  ;;  %v4654_v43 = vadd.f32 %v5853_v7, %v4581_v60  ;;  %v5818_v42 = vpop.f32.mrb[75].mxu0 }
 0x22c   : > { %v4744_v24 = vadd.f32 %v4743_v52, %v4735_v16  ;;  %v4762_v1 = vmul.f32 %v4735_v16, %v4735_v16  ;;  %v4594_v52 = vadd.f32 %v7831_v53, %v5816_v30 }
 0x22d   : > { %v7842_v6 = vadd.f32 %v3699_v28, %v7790_v0  ;;  %v3726_v39 = vadd.f32 %v3725_v20, %v3724_v41  ;;  %v5477_v37 = vpack.c.bf16 %v4654_v43, %v4651_v13  ;;  %v4736_v10 = vsel %vm604_vm5, %v4654_v43, 0.0  ;;  %v5854_v11 = vpop.f32.mrb[68].mxu1 }
 0x22e   : > { %v4771_v8 = vadd.f32 %v4770_v50, %v4762_v1  ;;  %v4745_v32 = vadd.f32 %v4744_v24, %v4736_v10  ;;  %v4763_v21 = vmul.f32 %v4736_v10, %v4736_v10  ;;  %v5855_v14 = vpop.f32.mrb[69].mxu1  ;;  %v5819_v0 = vadd.f32 %v5818_v42, %v5817_v12 }
 0x22f   : > { %v7847_v3 = vadd.f32 %v3726_v39, %v7793_v17  ;;  %5501 = vst [vmem:[%s6222_s20 + $0x80] sm:$0xff] %v5477_v37   ;;  %v5856_v44 = vadd.f32 %v5855_v14, %v5854_v11  ;;  %v5857_v45 = vpop.f32.mrb[70].mxu1 }
 0x230   : > { %v4772_v23 = vadd.f32 %v4771_v8, %v4763_v21  ;;  %v5858_v2 = vpop.f32.mrb[71].mxu1  ;;  %v5820_v33 = vpop.f32.mrb[76].mxu0  ;;  %v4597_v40 = vadd.f32 %v7831_v53, %v5819_v0 }
 0x231   : > { %v4659_v58 = vadd.f32 %v5856_v44, %v4586_v26  ;;  %v5859_v27 = vadd.f32 %v5858_v2, %v5857_v45  ;;  %v5821_v38 = vpop.f32.mrb[77].mxu0 }
 0x232   : > { %v5822_v54 = vadd.f32 %v5821_v38, %v5820_v33  ;;  %v5823_v17 = vpop.f32.mrb[78].mxu0 }
 0x233   : > { %v4737_v31 = vsel %vm605_vm2, %v4659_v58, 0.0  ;;  %v4662_v25 = vadd.f32 %v5859_v27, %v4589_v36  ;;  %v5824_v51 = vpop.f32.mrb[79].mxu0 }
 0x234   : > { %v4746_v55 = vadd.f32 %v4745_v32, %v4737_v31  ;;  %v4764_v18 = vmul.f32 %v4737_v31, %v4737_v31  ;;  %v5825_v15 = vadd.f32 %v5824_v51, %v5823_v17  ;;  %v4602_v20 = vadd.f32 %v7831_v53, %v5822_v54 }
 0x235   : > { %v5482_v19 = vpack.c.bf16 %v4662_v25, %v4659_v58  ;;  %v4738_v49 = vsel %vm606_vm6, %v4662_v25, 0.0  ;;  %v5860_v5 = vpop.f32.mrb[72].mxu1 }
 0x236   : > { %v4773_v35 = vadd.f32 %v4772_v23, %v4764_v18  ;;  %v4747_v46 = vadd.f32 %v4746_v55, %v4738_v49  ;;  %v4765_v4 = vmul.f32 %v4738_v49, %v4738_v49  ;;  %v5861_v56 = vpop.f32.mrb[73].mxu1  ;;  %v4605_v61 = vadd.f32 %v7831_v53, %v5825_v15 }
 0x237   : > { %5502 = vst [vmem:[%s6222_s20 + $0x88] sm:$0xff] %v5482_v19   ;;  %v5862_v29 = vadd.f32 %v5861_v56, %v5860_v5  ;;  %v5863_v48 = vpop.f32.mrb[74].mxu1 }
 0x238   : > { %v4774_v60 = vadd.f32 %v4773_v35, %v4765_v4  ;;  %v5864_v50 = vpop.f32.mrb[75].mxu1 }
 0x239   : > { %v4667_v9 = vadd.f32 %v5862_v29, %v4594_v52  ;;  %v5865_v34 = vadd.f32 %v5864_v50, %v5863_v48 }
 0x23b   : > { %v4739_v47 = vsel %vm607_vm8, %v4667_v9, 0.0  ;;  %v4670_v41 = vadd.f32 %v5865_v34, %v4597_v40 }
 0x23c   : > { %v4748_v13 = vadd.f32 %v4747_v46, %v4739_v47  ;;  %v4766_v7 = vmul.f32 %v4739_v47, %v4739_v47 }
 0x23d   : > { %v5487_v57 = vpack.c.bf16 %v4670_v41, %v4667_v9  ;;  %v4740_v59 = vsel %vm608_vm3, %v4670_v41, 0.0  ;;  %v5866_v28 = vpop.f32.mrb[76].mxu1 }
 0x23e   : > { %v4775_v16 = vadd.f32 %v4774_v60, %v4766_v7  ;;  %v4749_v43 = vadd.f32 %v4748_v13, %v4740_v59  ;;  %v4767_v12 = vmul.f32 %v4740_v59, %v4740_v59  ;;  %v5867_v24 = vpop.f32.mrb[77].mxu1 }
 0x23f   : > { %5503 = vst [vmem:[%s6222_s20 + $0x90] sm:$0xff] %v5487_v57   ;;  %v5868_v1 = vadd.f32 %v5867_v24, %v5866_v28  ;;  %v5869_v26 = vpop.f32.mrb[78].mxu1 }
 0x240   : > { %v4776_v30 = vadd.f32 %v4775_v16, %v4767_v12  ;;  %v5870_v42 = vpop.f32.mrb[79].mxu1 }
 0x241   : > { %v4675_v39 = vadd.f32 %v5868_v1, %v4602_v20  ;;  %v5871_v37 = vadd.f32 %v5870_v42, %v5869_v26 }
 0x243   : > { %v5407_v62 = vpack.c.bf16 %v4675_v39, %v4675_v39  ;;  %v4741_v10 = vsel %vm609_vm0, %v4675_v39, 0.0  ;;  %v4678_v11 = vadd.f32 %v5871_v37, %v4605_v61 }
 0x244   : > { %v4750_v8 = vadd.f32 %v4749_v43, %v4741_v10  ;;  %v4768_v32 = vmul.f32 %v4741_v10, %v4741_v10 }
 0x245   : > { %5364 = vst [vmem:[%s6222_s20 + $0x98] sm:$0xf] %v5407_v62  ;;  %v5408_v21 = vpack.c.bf16 %v4678_v11, %v4678_v11  ;;  %v4742_v14 = vsel %vm610_vm9, %v4678_v11, 0.0 }
 0x246   : > { %v4777_v44 = vadd.f32 %v4776_v30, %v4768_v32  ;;  %v4751_v53 = vsel %vm1591_vm10, %v4742_v14, 0.0  ;;  %v4769_v45 = vmul.f32 %v4742_v14, %v4742_v14 }
 0x247   : > { %5365 = vst [vmem:[%s6222_s20 + $0x9c] sm:$0x7] %v5408_v21  ;;  %v4752_v36 = vadd.f32 %v4751_v53, %v4750_v8  ;;  %s208_s20 = scalar_lea.vmem %s7886_s4, %s4882_s13 }
 0x248   : > { %v4778_v0 = vsel %vm1591_vm10, %v4769_v45, 0.0 }
 0x249   : > { %v4753_v23 = vrot.slane %v4752_v36, 4  ;;  %v4779_v63 = vadd.f32 %v4778_v0, %v4777_v44 }
 0x24b   : > { %v4754_v2 = vadd.f32 %v4753_v23, %v4752_v36  ;;  %v4780_v58 = vrot.slane %v4779_v63, 4 }
 0x24d   : > { %v4755_v27 = vrot.slane %v4754_v2, 2  ;;  %v4781_v33 = vadd.f32 %v4780_v58, %v4779_v63 }
 0x24f   : > { %v4756_v38 = vadd.f32 %v4755_v27, %v4754_v2  ;;  %v4782_v31 = vrot.slane %v4781_v33, 2 }
 0x251   : > { %v4757_v22 = vrot.slane %v4756_v38, 1  ;;  %v4783_v25 = vadd.f32 %v4782_v31, %v4781_v33 }
 0x253   : > { %v4758_v54 = vadd.f32 %v4757_v22, %v4756_v38  ;;  %v4784_v17 = vrot.slane %v4783_v25, 1 }
 0x255   : > { %v4759_v55 = vadd.f32 %v4758_v54, %v7842_v6  ;;  %v4785_v18 = vadd.f32 %v4784_v17, %v4783_v25 }
 0x257   : > { %v4786_v51 = vadd.f32 %v4785_v18, %v7847_v3  ;;  %4787 = vst [vmem:[%s208_s20] sm:$0x1] %v4759_v55 }
 0x259   : > { %4788 = vst [vmem:[%s208_s20 + $0x1] sm:$0x1] %v4786_v51 }
 0x25a PF: > { %s15_s15 = sadd.s32 1, %s6143_s15  }
 0x25b   : > { %p12_p4 = scmp.ge.s32.totalorder %s15_s15, 4  }
 0x25d   :  { %14 = sbr.rel (!%p12_p4) target bundleno = 1 (0x1), region = 80 }

</bundles_post_ra>
